<compile_context>
chip_gen: v7x
topology: tpu7x:2x2x1
jax: 0.10.0
libtpu: 0.0.40
codegen_flags: <defaults>
</compile_context>

<pallas_src>
import functools
import math

import jax
import jax.numpy as jnp
from jax.experimental import pallas as pl
from jax.experimental.pallas import tpu as pltpu

EMBED_DIM = 128      # embed_dim
NUM_HEADS = 8        # num_heads_each_layer (head_dim = 16)
NUM_LAYERS = 2       # num_layers (small for the demo)
EPS = 1e-5           # nn.LayerNorm default eps
MXU_DTYPE = jnp.bfloat16   # MXU operand dtype (f32 accumulate); jnp.float32 for exact f32


def _layer_norm_f32(z, g, b):
    # LayerNorm over the last dim, f32 VPU math.
    mean = jnp.mean(z, axis=-1, keepdims=True)
    zc = z - mean
    var = jnp.mean(zc * zc, axis=-1, keepdims=True)
    inv = jax.lax.rsqrt(var + EPS)
    return zc * inv * g + b


def _fused_forward_kernel(
    tx_ref, sx_ref,
    wq_ref, bq_ref, wkv_ref, bkv_ref, wo_ref, bo_ref,
    g1_ref, b1_ref, wm1_ref, bm1_ref, wm2_ref, bm2_ref, g2_ref, b2_ref,
    gl_ref, bl_ref,
    o_ref,
    *, S, E, H, num_layers):
  """One grid step = one batch element pushed through the whole module."""
  Dh = E // H
  f32 = jnp.float32

  def mm(x, w):  # MXU matmul: bf16 operands, f32 accumulation
    return jnp.dot(x.astype(MXU_DTYPE), w, preferred_element_type=f32)

  def cross_attention_layer(x_kv, x_q, l):
    # In-projections. q from the query stream; fused K|V from the key==value stream.
    q = mm(x_q, wq_ref[l]) + bq_ref[l]        # (S, E); 1/sqrt(Dh) pre-folded
    kv = mm(x_kv, wkv_ref[l]) + bkv_ref[l]    # (S, 2E) lane-dense: [K | V]

    # Per-head attention, statically unrolled; heads are column slices (lane slices)
    # of the q / kv slabs.  Output reassembled as a lane-dense (S, E) slab.
    head_outs = []
    for h in range(H):
      c0 = h * Dh
      qh = q[:, c0:c0 + Dh]                   # (S, Dh)
      kh = kv[:, c0:c0 + Dh]                  # (S, Dh)
      vh = kv[:, E + c0:E + c0 + Dh]          # (S, Dh)
      s = jnp.dot(qh.astype(MXU_DTYPE), kh.T.astype(MXU_DTYPE),
                  preferred_element_type=f32)             # (S, S)
      s = s - jnp.max(s, axis=-1, keepdims=True)
      p = jnp.exp(s)
      inv = pl.reciprocal(jnp.sum(p, axis=-1, keepdims=True), approx=True)
      attn = p * inv
      head_outs.append(jnp.dot(attn.astype(MXU_DTYPE), vh.astype(MXU_DTYPE),
                               preferred_element_type=f32))
    attn_out = jnp.concatenate(head_outs, axis=-1)         # (S, E)

    attn_out = mm(attn_out, wo_ref[l]) + bo_ref[l]         # out_proj
    out1 = _layer_norm_f32(attn_out + x_q, g1_ref[l], b1_ref[l])   # norm1(attn + query)

    # MLP [E, 2E, E]: Linear+ReLU, Linear+ReLU (dropout omitted, eval mode).
    h1 = jnp.maximum(mm(out1, wm1_ref[l]) + bm1_ref[l], 0.0)
    h2 = jnp.maximum(mm(h1, wm2_ref[l]) + bm2_ref[l], 0.0)
    return _layer_norm_f32(h2 + out1, g2_ref[l], b2_ref[l])        # norm2(mlp + out1)

  time_x = tx_ref[...].astype(f32)        # (S, E)
  spatial_x = sx_ref[...].astype(f32)     # (S, E)
  for i in range(num_layers):
    # time_x = time_attention(key=time_x, value=time_x, query=spatial_x)
    time_x = cross_attention_layer(time_x, spatial_x, 2 * i)
    # spatial_x = spatial_attention(key=spatial_x, value=spatial_x, query=time_x)
    spatial_x = cross_attention_layer(spatial_x, time_x, 2 * i + 1)

  out = _layer_norm_f32(time_x + spatial_x, gl_ref[...], bl_ref[...])
  o_ref[...] = jnp.maximum(out, 0.0).astype(o_ref.dtype)   # ReLU(last_norm(...))


def _replicated_spec(shape):
  # Whole-array block, same block for every grid step (weights fetched once).
  if len(shape) == 2:
    return pl.BlockSpec(shape, lambda b: (0, 0))
  return pl.BlockSpec(shape, lambda b: (0, 0, 0))


def pcross_attention_forward(time_x, spatial_x, fp, num_heads):
  B, S, E = time_x.shape
  M = B * S
  num_layers = fp["wq"].shape[0] // 2

  act_spec = pl.BlockSpec((S, E), lambda b: (b, 0))
  weight_args = [fp["wq"], fp["bq"], fp["wkv"], fp["bkv"], fp["wo"], fp["bo"],
                 fp["g1"], fp["b1"], fp["wm1"], fp["bm1"], fp["wm2"], fp["bm2"],
                 fp["g2"], fp["b2"], fp["g_last"], fp["b_last"]]

  out = pl.pallas_call(
      functools.partial(_fused_forward_kernel, S=S, E=E, H=num_heads,
                        num_layers=num_layers),
      out_shape=jax.ShapeDtypeStruct((M, E), jnp.float32),
      grid=(B,),
      in_specs=[act_spec, act_spec] + [_replicated_spec(w.shape) for w in weight_args],
      out_specs=pl.BlockSpec((S, E), lambda b: (b, 0)),
      compiler_params=pltpu.CompilerParams(
          dimension_semantics=("parallel",)),   # batch elems independent -> v7x 2-TC split
  )(time_x.reshape(M, E), spatial_x.reshape(M, E), *weight_args)
  return out.reshape(B, S, E)


# -------------------- deterministic parameter init & packing --------------------

def init_layer_params(key, E):
  ks = jax.random.split(key, 6)

  def w(k, shape):
    return jax.random.normal(k, shape, jnp.float32) * 0.02

  return dict(
      wq=w(ks[0], (E, E)), bq=jnp.zeros((E,), jnp.float32),
      wk=w(ks[1], (E, E)), bk=jnp.zeros((E,), jnp.float32),
      wv=w(ks[2], (E, E)), bv=jnp.zeros((E,), jnp.float32),
      wo=w(ks[3], (E, E)), bo=jnp.zeros((E,), jnp.float32),
      g1=jnp.ones((E,), jnp.float32), b1=jnp.zeros((E,), jnp.float32),
      g2=jnp.ones((E,), jnp.float32), b2=jnp.zeros((E,), jnp.float32),
      w_mlp1=w(ks[4], (E, 2 * E)), b_mlp1=jnp.zeros((2 * E,), jnp.float32),
      w_mlp2=w(ks[5], (2 * E, E)), b_mlp2=jnp.zeros((E,), jnp.float32),
  )


def prepare_fused_params(time_layers, spatial_layers, g_last, b_last, E, num_heads):
  """Stack per-layer params in execution order [time0, spatial0, time1, spatial1, ...],
  fuse K/V weights, fold the attention scale into wq/bq, cast MXU weights to bf16."""
  layers = []
  for lt, ls in zip(time_layers, spatial_layers):
    layers += [lt, ls]
  scale = 1.0 / math.sqrt(E // num_heads)
  wdt = MXU_DTYPE

  def stack(fn):
    return jnp.stack([fn(l) for l in layers], axis=0)

  return dict(
      wq=stack(lambda l: l["wq"] * scale).astype(wdt),
      bq=stack(lambda l: (l["bq"] * scale).reshape(1, E)),
      wkv=stack(lambda l: jnp.concatenate([l["wk"], l["wv"]], axis=1)).astype(wdt),
      bkv=stack(lambda l: jnp.concatenate([l["bk"], l["bv"]]).reshape(1, 2 * E)),
      wo=stack(lambda l: l["wo"]).astype(wdt),
      bo=stack(lambda l: l["bo"].reshape(1, E)),
      g1=stack(lambda l: l["g1"].reshape(1, E)),
      b1=stack(lambda l: l["b1"].reshape(1, E)),
      wm1=stack(lambda l: l["w_mlp1"]).astype(wdt),
      bm1=stack(lambda l: l["b_mlp1"].reshape(1, 2 * E)),
      wm2=stack(lambda l: l["w_mlp2"]).astype(wdt),
      bm2=stack(lambda l: l["b_mlp2"].reshape(1, E)),
      g2=stack(lambda l: l["g2"].reshape(1, E)),
      b2=stack(lambda l: l["b2"].reshape(1, E)),
      g_last=g_last.reshape(1, E),
      b_last=b_last.reshape(1, E),
  )


if __name__ == "__main__":
  B, S, E = 2, 8, EMBED_DIM

  root = jax.random.PRNGKey(0)
  k_in, k_p = jax.random.split(root)
  k_time, k_spat = jax.random.split(k_in)
  time_x = jax.random.normal(k_time, (B, S, E), jnp.float32)
  spatial_x = jax.random.normal(k_spat, (B, S, E), jnp.float32)

  lkeys = jax.random.split(k_p, 2 * NUM_LAYERS)
  time_layers = [init_layer_params(lkeys[i], E) for i in range(NUM_LAYERS)]
  spatial_layers = [init_layer_params(lkeys[NUM_LAYERS + i], E)
                    for i in range(NUM_LAYERS)]
  g_last = jnp.ones((E,), jnp.float32)
  b_last = jnp.zeros((E,), jnp.float32)

  fused_params = prepare_fused_params(time_layers, spatial_layers,
                                      g_last, b_last, E, NUM_HEADS)

  out = pcross_attention_forward(time_x, spatial_x, fused_params, NUM_HEADS)
  jax.block_until_ready(out)
  assert out.shape == (B, S, E) and out.dtype == jnp.float32
  print("KERNEL_OK")
</pallas_src>

<mosaic_0001>
module attributes {stable_mosaic.version = 11 : i64} {
  func.func @_fused_forward_kernel(%arg0: i32, %arg1: memref<8x128xf32, #tpu.memory_space<vmem>>, %arg2: memref<8x128xf32, #tpu.memory_space<vmem>>, %arg3: memref<4x128x128xbf16, #tpu.memory_space<vmem>>, %arg4: memref<4x1x128xf32, #tpu.memory_space<vmem>>, %arg5: memref<4x128x256xbf16, #tpu.memory_space<vmem>>, %arg6: memref<4x1x256xf32, #tpu.memory_space<vmem>>, %arg7: memref<4x128x128xbf16, #tpu.memory_space<vmem>>, %arg8: memref<4x1x128xf32, #tpu.memory_space<vmem>>, %arg9: memref<4x1x128xf32, #tpu.memory_space<vmem>>, %arg10: memref<4x1x128xf32, #tpu.memory_space<vmem>>, %arg11: memref<4x128x256xbf16, #tpu.memory_space<vmem>>, %arg12: memref<4x1x256xf32, #tpu.memory_space<vmem>>, %arg13: memref<4x256x128xbf16, #tpu.memory_space<vmem>>, %arg14: memref<4x1x128xf32, #tpu.memory_space<vmem>>, %arg15: memref<4x1x128xf32, #tpu.memory_space<vmem>>, %arg16: memref<4x1x128xf32, #tpu.memory_space<vmem>>, %arg17: memref<1x128xf32, #tpu.memory_space<vmem>>, %arg18: memref<1x128xf32, #tpu.memory_space<vmem>>, %arg19: memref<8x128xf32, #tpu.memory_space<vmem>>) attributes {dimension_semantics = [#tpu.dimension_semantics<parallel>], iteration_bounds = array<i64: 2>, scalar_prefetch = 0 : i64, scratch_operands = 0 : i64, tpu.core_type = #tpu.core_type<tc>, window_params = [{transform_indices = @transform_0, window_bounds = array<i64: 8, 128>}, {transform_indices = @transform_1, window_bounds = array<i64: 8, 128>}, {pipeline_mode = #tpu.pipeline_mode<synchronous>, transform_indices = @transform_2, window_bounds = array<i64: 4, 128, 128>}, {pipeline_mode = #tpu.pipeline_mode<synchronous>, transform_indices = @transform_3, window_bounds = array<i64: 4, 1, 128>}, {pipeline_mode = #tpu.pipeline_mode<synchronous>, transform_indices = @transform_4, window_bounds = array<i64: 4, 128, 256>}, {pipeline_mode = #tpu.pipeline_mode<synchronous>, transform_indices = @transform_5, window_bounds = array<i64: 4, 1, 256>}, {pipeline_mode = #tpu.pipeline_mode<synchronous>, transform_indices = @transform_6, window_bounds = array<i64: 4, 128, 128>}, {pipeline_mode = #tpu.pipeline_mode<synchronous>, transform_indices = @transform_7, window_bounds = array<i64: 4, 1, 128>}, {pipeline_mode = #tpu.pipeline_mode<synchronous>, transform_indices = @transform_8, window_bounds = array<i64: 4, 1, 128>}, {pipeline_mode = #tpu.pipeline_mode<synchronous>, transform_indices = @transform_9, window_bounds = array<i64: 4, 1, 128>}, {pipeline_mode = #tpu.pipeline_mode<synchronous>, transform_indices = @transform_10, window_bounds = array<i64: 4, 128, 256>}, {pipeline_mode = #tpu.pipeline_mode<synchronous>, transform_indices = @transform_11, window_bounds = array<i64: 4, 1, 256>}, {pipeline_mode = #tpu.pipeline_mode<synchronous>, transform_indices = @transform_12, window_bounds = array<i64: 4, 256, 128>}, {pipeline_mode = #tpu.pipeline_mode<synchronous>, transform_indices = @transform_13, window_bounds = array<i64: 4, 1, 128>}, {pipeline_mode = #tpu.pipeline_mode<synchronous>, transform_indices = @transform_14, window_bounds = array<i64: 4, 1, 128>}, {pipeline_mode = #tpu.pipeline_mode<synchronous>, transform_indices = @transform_15, window_bounds = array<i64: 4, 1, 128>}, {pipeline_mode = #tpu.pipeline_mode<synchronous>, transform_indices = @transform_16, window_bounds = array<i64: 1, 128>}, {pipeline_mode = #tpu.pipeline_mode<synchronous>, transform_indices = @transform_17, window_bounds = array<i64: 1, 128>}, {transform_indices = @transform_18, window_bounds = array<i64: 8, 128>}]} {
    %c0 = arith.constant 0 : index
    %c0_0 = arith.constant 0 : index
    %0 = vector.load %arg1[%c0, %c0_0] : memref<8x128xf32, #tpu.memory_space<vmem>>, vector<8x128xf32>
    %c0_1 = arith.constant 0 : index
    %c0_2 = arith.constant 0 : index
    %1 = vector.load %arg2[%c0_1, %c0_2] : memref<8x128xf32, #tpu.memory_space<vmem>>, vector<8x128xf32>
    %c0_3 = arith.constant 0 : index
    %c0_4 = arith.constant 0 : index
    %c0_5 = arith.constant 0 : index
    %2 = vector.load %arg3[%c0_3, %c0_4, %c0_5] : memref<4x128x128xbf16, #tpu.memory_space<vmem>>, vector<1x128x128xbf16>
    %3 = vector.shape_cast %2 : vector<1x128x128xbf16> to vector<128x128xbf16>
    %4 = arith.truncf %1 : vector<8x128xf32> to vector<8x128xbf16>
    %cst = arith.constant dense<0.000000e+00> : vector<8x128xf32>
    %5 = tpu.matmul %4, %3, %cst {dimension_numbers = #tpu.dot_dimension_numbers<[1], [0], [0], [1], [0, 0, 1, 1], [], []>} : vector<8x128xbf16>, vector<128x128xbf16>, vector<8x128xf32> -> vector<8x128xf32>
    %c0_6 = arith.constant 0 : index
    %c0_7 = arith.constant 0 : index
    %c0_8 = arith.constant 0 : index
    %6 = vector.load %arg4[%c0_6, %c0_7, %c0_8] : memref<4x1x128xf32, #tpu.memory_space<vmem>>, vector<1x1x128xf32>
    %7 = vector.shape_cast %6 : vector<1x1x128xf32> to vector<1x128xf32>
    %8 = vector.broadcast %7 : vector<1x128xf32> to vector<8x128xf32>
    %9 = arith.addf %5, %8 : vector<8x128xf32>
    %c0_9 = arith.constant 0 : index
    %c0_10 = arith.constant 0 : index
    %c0_11 = arith.constant 0 : index
    %10 = vector.load %arg5[%c0_9, %c0_10, %c0_11] : memref<4x128x256xbf16, #tpu.memory_space<vmem>>, vector<1x128x256xbf16>
    %11 = vector.shape_cast %10 : vector<1x128x256xbf16> to vector<128x256xbf16>
    %12 = arith.truncf %0 : vector<8x128xf32> to vector<8x128xbf16>
    %cst_12 = arith.constant dense<0.000000e+00> : vector<8x256xf32>
    %13 = tpu.matmul %12, %11, %cst_12 {dimension_numbers = #tpu.dot_dimension_numbers<[1], [0], [0], [1], [0, 0, 1, 1], [], []>} : vector<8x128xbf16>, vector<128x256xbf16>, vector<8x256xf32> -> vector<8x256xf32>
    %c0_13 = arith.constant 0 : index
    %c0_14 = arith.constant 0 : index
    %c0_15 = arith.constant 0 : index
    %14 = vector.load %arg6[%c0_13, %c0_14, %c0_15] : memref<4x1x256xf32, #tpu.memory_space<vmem>>, vector<1x1x256xf32>
    %15 = vector.shape_cast %14 : vector<1x1x256xf32> to vector<1x256xf32>
    %16 = vector.broadcast %15 : vector<1x256xf32> to vector<8x256xf32>
    %17 = arith.addf %13, %16 : vector<8x256xf32>
    %18 = vector.extract_strided_slice %9 {offsets = [0, 0], sizes = [8, 16], strides = [1, 1]} : vector<8x128xf32> to vector<8x16xf32>
    %19 = vector.extract_strided_slice %17 {offsets = [0, 0], sizes = [8, 16], strides = [1, 1]} : vector<8x256xf32> to vector<8x16xf32>
    %20 = vector.extract_strided_slice %17 {offsets = [0, 128], sizes = [8, 16], strides = [1, 1]} : vector<8x256xf32> to vector<8x16xf32>
    %21 = arith.truncf %18 : vector<8x16xf32> to vector<8x16xbf16>
    %22 = tpu.transpose %19, [1, 0] : vector<8x16xf32> -> vector<16x8xf32>
    %23 = arith.truncf %22 : vector<16x8xf32> to vector<16x8xbf16>
    %cst_16 = arith.constant dense<0.000000e+00> : vector<8x8xf32>
    %24 = tpu.matmul %21, %23, %cst_16 {dimension_numbers = #tpu.dot_dimension_numbers<[1], [0], [0], [1], [0, 0, 1, 1], [], []>} : vector<8x16xbf16>, vector<16x8xbf16>, vector<8x8xf32> -> vector<8x8xf32>
    %cst_17 = arith.constant dense<0xFF800000> : vector<8xf32>
    %25 = vector.multi_reduction <maximumf>, %24, %cst_17 [1] : vector<8x8xf32> to vector<8xf32>
    %26 = vector.shape_cast %25 : vector<8xf32> to vector<8x1xf32>
    %27 = vector.broadcast %26 : vector<8x1xf32> to vector<8x8xf32>
    %28 = arith.subf %24, %27 : vector<8x8xf32>
    %29 = math.exp %28 : vector<8x8xf32>
    %cst_18 = arith.constant dense<0.000000e+00> : vector<8xf32>
    %30 = vector.multi_reduction <add>, %29, %cst_18 [1] : vector<8x8xf32> to vector<8xf32>
    %31 = vector.shape_cast %30 : vector<8xf32> to vector<8x1xf32>
    %32 = tpu.reciprocal %31 {approx = true} : vector<8x1xf32> -> vector<8x1xf32>
    %33 = vector.broadcast %32 : vector<8x1xf32> to vector<8x8xf32>
    %34 = arith.mulf %29, %33 : vector<8x8xf32>
    %35 = arith.truncf %34 : vector<8x8xf32> to vector<8x8xbf16>
    %36 = arith.truncf %20 : vector<8x16xf32> to vector<8x16xbf16>
    %cst_19 = arith.constant dense<0.000000e+00> : vector<8x16xf32>
    %37 = tpu.matmul %35, %36, %cst_19 {dimension_numbers = #tpu.dot_dimension_numbers<[1], [0], [0], [1], [0, 0, 1, 1], [], []>} : vector<8x8xbf16>, vector<8x16xbf16>, vector<8x16xf32> -> vector<8x16xf32>
    %38 = vector.extract_strided_slice %9 {offsets = [0, 16], sizes = [8, 16], strides = [1, 1]} : vector<8x128xf32> to vector<8x16xf32>
    %39 = vector.extract_strided_slice %17 {offsets = [0, 16], sizes = [8, 16], strides = [1, 1]} : vector<8x256xf32> to vector<8x16xf32>
    %40 = vector.extract_strided_slice %17 {offsets = [0, 144], sizes = [8, 16], strides = [1, 1]} : vector<8x256xf32> to vector<8x16xf32>
    %41 = arith.truncf %38 : vector<8x16xf32> to vector<8x16xbf16>
    %42 = tpu.transpose %39, [1, 0] : vector<8x16xf32> -> vector<16x8xf32>
    %43 = arith.truncf %42 : vector<16x8xf32> to vector<16x8xbf16>
    %cst_20 = arith.constant dense<0.000000e+00> : vector<8x8xf32>
    %44 = tpu.matmul %41, %43, %cst_20 {dimension_numbers = #tpu.dot_dimension_numbers<[1], [0], [0], [1], [0, 0, 1, 1], [], []>} : vector<8x16xbf16>, vector<16x8xbf16>, vector<8x8xf32> -> vector<8x8xf32>
    %cst_21 = arith.constant dense<0xFF800000> : vector<8xf32>
    %45 = vector.multi_reduction <maximumf>, %44, %cst_21 [1] : vector<8x8xf32> to vector<8xf32>
    %46 = vector.shape_cast %45 : vector<8xf32> to vector<8x1xf32>
    %47 = vector.broadcast %46 : vector<8x1xf32> to vector<8x8xf32>
    %48 = arith.subf %44, %47 : vector<8x8xf32>
    %49 = math.exp %48 : vector<8x8xf32>
    %cst_22 = arith.constant dense<0.000000e+00> : vector<8xf32>
    %50 = vector.multi_reduction <add>, %49, %cst_22 [1] : vector<8x8xf32> to vector<8xf32>
    %51 = vector.shape_cast %50 : vector<8xf32> to vector<8x1xf32>
    %52 = tpu.reciprocal %51 {approx = true} : vector<8x1xf32> -> vector<8x1xf32>
    %53 = vector.broadcast %52 : vector<8x1xf32> to vector<8x8xf32>
    %54 = arith.mulf %49, %53 : vector<8x8xf32>
    %55 = arith.truncf %54 : vector<8x8xf32> to vector<8x8xbf16>
    %56 = arith.truncf %40 : vector<8x16xf32> to vector<8x16xbf16>
    %cst_23 = arith.constant dense<0.000000e+00> : vector<8x16xf32>
    %57 = tpu.matmul %55, %56, %cst_23 {dimension_numbers = #tpu.dot_dimension_numbers<[1], [0], [0], [1], [0, 0, 1, 1], [], []>} : vector<8x8xbf16>, vector<8x16xbf16>, vector<8x16xf32> -> vector<8x16xf32>
    %58 = vector.extract_strided_slice %9 {offsets = [0, 32], sizes = [8, 16], strides = [1, 1]} : vector<8x128xf32> to vector<8x16xf32>
    %59 = vector.extract_strided_slice %17 {offsets = [0, 32], sizes = [8, 16], strides = [1, 1]} : vector<8x256xf32> to vector<8x16xf32>
    %60 = vector.extract_strided_slice %17 {offsets = [0, 160], sizes = [8, 16], strides = [1, 1]} : vector<8x256xf32> to vector<8x16xf32>
    %61 = arith.truncf %58 : vector<8x16xf32> to vector<8x16xbf16>
    %62 = tpu.transpose %59, [1, 0] : vector<8x16xf32> -> vector<16x8xf32>
    %63 = arith.truncf %62 : vector<16x8xf32> to vector<16x8xbf16>
    %cst_24 = arith.constant dense<0.000000e+00> : vector<8x8xf32>
    %64 = tpu.matmul %61, %63, %cst_24 {dimension_numbers = #tpu.dot_dimension_numbers<[1], [0], [0], [1], [0, 0, 1, 1], [], []>} : vector<8x16xbf16>, vector<16x8xbf16>, vector<8x8xf32> -> vector<8x8xf32>
    %cst_25 = arith.constant dense<0xFF800000> : vector<8xf32>
    %65 = vector.multi_reduction <maximumf>, %64, %cst_25 [1] : vector<8x8xf32> to vector<8xf32>
    %66 = vector.shape_cast %65 : vector<8xf32> to vector<8x1xf32>
    %67 = vector.broadcast %66 : vector<8x1xf32> to vector<8x8xf32>
    %68 = arith.subf %64, %67 : vector<8x8xf32>
    %69 = math.exp %68 : vector<8x8xf32>
    %cst_26 = arith.constant dense<0.000000e+00> : vector<8xf32>
    %70 = vector.multi_reduction <add>, %69, %cst_26 [1] : vector<8x8xf32> to vector<8xf32>
    %71 = vector.shape_cast %70 : vector<8xf32> to vector<8x1xf32>
    %72 = tpu.reciprocal %71 {approx = true} : vector<8x1xf32> -> vector<8x1xf32>
    %73 = vector.broadcast %72 : vector<8x1xf32> to vector<8x8xf32>
    %74 = arith.mulf %69, %73 : vector<8x8xf32>
    %75 = arith.truncf %74 : vector<8x8xf32> to vector<8x8xbf16>
    %76 = arith.truncf %60 : vector<8x16xf32> to vector<8x16xbf16>
    %cst_27 = arith.constant dense<0.000000e+00> : vector<8x16xf32>
    %77 = tpu.matmul %75, %76, %cst_27 {dimension_numbers = #tpu.dot_dimension_numbers<[1], [0], [0], [1], [0, 0, 1, 1], [], []>} : vector<8x8xbf16>, vector<8x16xbf16>, vector<8x16xf32> -> vector<8x16xf32>
    %78 = vector.extract_strided_slice %9 {offsets = [0, 48], sizes = [8, 16], strides = [1, 1]} : vector<8x128xf32> to vector<8x16xf32>
    %79 = vector.extract_strided_slice %17 {offsets = [0, 48], sizes = [8, 16], strides = [1, 1]} : vector<8x256xf32> to vector<8x16xf32>
    %80 = vector.extract_strided_slice %17 {offsets = [0, 176], sizes = [8, 16], strides = [1, 1]} : vector<8x256xf32> to vector<8x16xf32>
    %81 = arith.truncf %78 : vector<8x16xf32> to vector<8x16xbf16>
    %82 = tpu.transpose %79, [1, 0] : vector<8x16xf32> -> vector<16x8xf32>
    %83 = arith.truncf %82 : vector<16x8xf32> to vector<16x8xbf16>
    %cst_28 = arith.constant dense<0.000000e+00> : vector<8x8xf32>
    %84 = tpu.matmul %81, %83, %cst_28 {dimension_numbers = #tpu.dot_dimension_numbers<[1], [0], [0], [1], [0, 0, 1, 1], [], []>} : vector<8x16xbf16>, vector<16x8xbf16>, vector<8x8xf32> -> vector<8x8xf32>
    %cst_29 = arith.constant dense<0xFF800000> : vector<8xf32>
    %85 = vector.multi_reduction <maximumf>, %84, %cst_29 [1] : vector<8x8xf32> to vector<8xf32>
    %86 = vector.shape_cast %85 : vector<8xf32> to vector<8x1xf32>
    %87 = vector.broadcast %86 : vector<8x1xf32> to vector<8x8xf32>
    %88 = arith.subf %84, %87 : vector<8x8xf32>
    %89 = math.exp %88 : vector<8x8xf32>
    %cst_30 = arith.constant dense<0.000000e+00> : vector<8xf32>
    %90 = vector.multi_reduction <add>, %89, %cst_30 [1] : vector<8x8xf32> to vector<8xf32>
    %91 = vector.shape_cast %90 : vector<8xf32> to vector<8x1xf32>
    %92 = tpu.reciprocal %91 {approx = true} : vector<8x1xf32> -> vector<8x1xf32>
    %93 = vector.broadcast %92 : vector<8x1xf32> to vector<8x8xf32>
    %94 = arith.mulf %89, %93 : vector<8x8xf32>
    %95 = arith.truncf %94 : vector<8x8xf32> to vector<8x8xbf16>
    %96 = arith.truncf %80 : vector<8x16xf32> to vector<8x16xbf16>
    %cst_31 = arith.constant dense<0.000000e+00> : vector<8x16xf32>
    %97 = tpu.matmul %95, %96, %cst_31 {dimension_numbers = #tpu.dot_dimension_numbers<[1], [0], [0], [1], [0, 0, 1, 1], [], []>} : vector<8x8xbf16>, vector<8x16xbf16>, vector<8x16xf32> -> vector<8x16xf32>
    %98 = vector.extract_strided_slice %9 {offsets = [0, 64], sizes = [8, 16], strides = [1, 1]} : vector<8x128xf32> to vector<8x16xf32>
    %99 = vector.extract_strided_slice %17 {offsets = [0, 64], sizes = [8, 16], strides = [1, 1]} : vector<8x256xf32> to vector<8x16xf32>
    %100 = vector.extract_strided_slice %17 {offsets = [0, 192], sizes = [8, 16], strides = [1, 1]} : vector<8x256xf32> to vector<8x16xf32>
    %101 = arith.truncf %98 : vector<8x16xf32> to vector<8x16xbf16>
    %102 = tpu.transpose %99, [1, 0] : vector<8x16xf32> -> vector<16x8xf32>
    %103 = arith.truncf %102 : vector<16x8xf32> to vector<16x8xbf16>
    %cst_32 = arith.constant dense<0.000000e+00> : vector<8x8xf32>
    %104 = tpu.matmul %101, %103, %cst_32 {dimension_numbers = #tpu.dot_dimension_numbers<[1], [0], [0], [1], [0, 0, 1, 1], [], []>} : vector<8x16xbf16>, vector<16x8xbf16>, vector<8x8xf32> -> vector<8x8xf32>
    %cst_33 = arith.constant dense<0xFF800000> : vector<8xf32>
    %105 = vector.multi_reduction <maximumf>, %104, %cst_33 [1] : vector<8x8xf32> to vector<8xf32>
    %106 = vector.shape_cast %105 : vector<8xf32> to vector<8x1xf32>
    %107 = vector.broadcast %106 : vector<8x1xf32> to vector<8x8xf32>
    %108 = arith.subf %104, %107 : vector<8x8xf32>
    %109 = math.exp %108 : vector<8x8xf32>
    %cst_34 = arith.constant dense<0.000000e+00> : vector<8xf32>
    %110 = vector.multi_reduction <add>, %109, %cst_34 [1] : vector<8x8xf32> to vector<8xf32>
    %111 = vector.shape_cast %110 : vector<8xf32> to vector<8x1xf32>
    %112 = tpu.reciprocal %111 {approx = true} : vector<8x1xf32> -> vector<8x1xf32>
    %113 = vector.broadcast %112 : vector<8x1xf32> to vector<8x8xf32>
    %114 = arith.mulf %109, %113 : vector<8x8xf32>
    %115 = arith.truncf %114 : vector<8x8xf32> to vector<8x8xbf16>
    %116 = arith.truncf %100 : vector<8x16xf32> to vector<8x16xbf16>
    %cst_35 = arith.constant dense<0.000000e+00> : vector<8x16xf32>
    %117 = tpu.matmul %115, %116, %cst_35 {dimension_numbers = #tpu.dot_dimension_numbers<[1], [0], [0], [1], [0, 0, 1, 1], [], []>} : vector<8x8xbf16>, vector<8x16xbf16>, vector<8x16xf32> -> vector<8x16xf32>
    %118 = vector.extract_strided_slice %9 {offsets = [0, 80], sizes = [8, 16], strides = [1, 1]} : vector<8x128xf32> to vector<8x16xf32>
    %119 = vector.extract_strided_slice %17 {offsets = [0, 80], sizes = [8, 16], strides = [1, 1]} : vector<8x256xf32> to vector<8x16xf32>
    %120 = vector.extract_strided_slice %17 {offsets = [0, 208], sizes = [8, 16], strides = [1, 1]} : vector<8x256xf32> to vector<8x16xf32>
    %121 = arith.truncf %118 : vector<8x16xf32> to vector<8x16xbf16>
    %122 = tpu.transpose %119, [1, 0] : vector<8x16xf32> -> vector<16x8xf32>
    %123 = arith.truncf %122 : vector<16x8xf32> to vector<16x8xbf16>
    %cst_36 = arith.constant dense<0.000000e+00> : vector<8x8xf32>
    %124 = tpu.matmul %121, %123, %cst_36 {dimension_numbers = #tpu.dot_dimension_numbers<[1], [0], [0], [1], [0, 0, 1, 1], [], []>} : vector<8x16xbf16>, vector<16x8xbf16>, vector<8x8xf32> -> vector<8x8xf32>
    %cst_37 = arith.constant dense<0xFF800000> : vector<8xf32>
    %125 = vector.multi_reduction <maximumf>, %124, %cst_37 [1] : vector<8x8xf32> to vector<8xf32>
    %126 = vector.shape_cast %125 : vector<8xf32> to vector<8x1xf32>
    %127 = vector.broadcast %126 : vector<8x1xf32> to vector<8x8xf32>
    %128 = arith.subf %124, %127 : vector<8x8xf32>
    %129 = math.exp %128 : vector<8x8xf32>
    %cst_38 = arith.constant dense<0.000000e+00> : vector<8xf32>
    %130 = vector.multi_reduction <add>, %129, %cst_38 [1] : vector<8x8xf32> to vector<8xf32>
    %131 = vector.shape_cast %130 : vector<8xf32> to vector<8x1xf32>
    %132 = tpu.reciprocal %131 {approx = true} : vector<8x1xf32> -> vector<8x1xf32>
    %133 = vector.broadcast %132 : vector<8x1xf32> to vector<8x8xf32>
    %134 = arith.mulf %129, %133 : vector<8x8xf32>
    %135 = arith.truncf %134 : vector<8x8xf32> to vector<8x8xbf16>
    %136 = arith.truncf %120 : vector<8x16xf32> to vector<8x16xbf16>
    %cst_39 = arith.constant dense<0.000000e+00> : vector<8x16xf32>
    %137 = tpu.matmul %135, %136, %cst_39 {dimension_numbers = #tpu.dot_dimension_numbers<[1], [0], [0], [1], [0, 0, 1, 1], [], []>} : vector<8x8xbf16>, vector<8x16xbf16>, vector<8x16xf32> -> vector<8x16xf32>
    %138 = vector.extract_strided_slice %9 {offsets = [0, 96], sizes = [8, 16], strides = [1, 1]} : vector<8x128xf32> to vector<8x16xf32>
    %139 = vector.extract_strided_slice %17 {offsets = [0, 96], sizes = [8, 16], strides = [1, 1]} : vector<8x256xf32> to vector<8x16xf32>
    %140 = vector.extract_strided_slice %17 {offsets = [0, 224], sizes = [8, 16], strides = [1, 1]} : vector<8x256xf32> to vector<8x16xf32>
    %141 = arith.truncf %138 : vector<8x16xf32> to vector<8x16xbf16>
    %142 = tpu.transpose %139, [1, 0] : vector<8x16xf32> -> vector<16x8xf32>
    %143 = arith.truncf %142 : vector<16x8xf32> to vector<16x8xbf16>
    %cst_40 = arith.constant dense<0.000000e+00> : vector<8x8xf32>
    %144 = tpu.matmul %141, %143, %cst_40 {dimension_numbers = #tpu.dot_dimension_numbers<[1], [0], [0], [1], [0, 0, 1, 1], [], []>} : vector<8x16xbf16>, vector<16x8xbf16>, vector<8x8xf32> -> vector<8x8xf32>
    %cst_41 = arith.constant dense<0xFF800000> : vector<8xf32>
    %145 = vector.multi_reduction <maximumf>, %144, %cst_41 [1] : vector<8x8xf32> to vector<8xf32>
    %146 = vector.shape_cast %145 : vector<8xf32> to vector<8x1xf32>
    %147 = vector.broadcast %146 : vector<8x1xf32> to vector<8x8xf32>
    %148 = arith.subf %144, %147 : vector<8x8xf32>
    %149 = math.exp %148 : vector<8x8xf32>
    %cst_42 = arith.constant dense<0.000000e+00> : vector<8xf32>
    %150 = vector.multi_reduction <add>, %149, %cst_42 [1] : vector<8x8xf32> to vector<8xf32>
    %151 = vector.shape_cast %150 : vector<8xf32> to vector<8x1xf32>
    %152 = tpu.reciprocal %151 {approx = true} : vector<8x1xf32> -> vector<8x1xf32>
    %153 = vector.broadcast %152 : vector<8x1xf32> to vector<8x8xf32>
    %154 = arith.mulf %149, %153 : vector<8x8xf32>
    %155 = arith.truncf %154 : vector<8x8xf32> to vector<8x8xbf16>
    %156 = arith.truncf %140 : vector<8x16xf32> to vector<8x16xbf16>
    %cst_43 = arith.constant dense<0.000000e+00> : vector<8x16xf32>
    %157 = tpu.matmul %155, %156, %cst_43 {dimension_numbers = #tpu.dot_dimension_numbers<[1], [0], [0], [1], [0, 0, 1, 1], [], []>} : vector<8x8xbf16>, vector<8x16xbf16>, vector<8x16xf32> -> vector<8x16xf32>
    %158 = vector.extract_strided_slice %9 {offsets = [0, 112], sizes = [8, 16], strides = [1, 1]} : vector<8x128xf32> to vector<8x16xf32>
    %159 = vector.extract_strided_slice %17 {offsets = [0, 112], sizes = [8, 16], strides = [1, 1]} : vector<8x256xf32> to vector<8x16xf32>
    %160 = vector.extract_strided_slice %17 {offsets = [0, 240], sizes = [8, 16], strides = [1, 1]} : vector<8x256xf32> to vector<8x16xf32>
    %161 = arith.truncf %158 : vector<8x16xf32> to vector<8x16xbf16>
    %162 = tpu.transpose %159, [1, 0] : vector<8x16xf32> -> vector<16x8xf32>
    %163 = arith.truncf %162 : vector<16x8xf32> to vector<16x8xbf16>
    %cst_44 = arith.constant dense<0.000000e+00> : vector<8x8xf32>
    %164 = tpu.matmul %161, %163, %cst_44 {dimension_numbers = #tpu.dot_dimension_numbers<[1], [0], [0], [1], [0, 0, 1, 1], [], []>} : vector<8x16xbf16>, vector<16x8xbf16>, vector<8x8xf32> -> vector<8x8xf32>
    %cst_45 = arith.constant dense<0xFF800000> : vector<8xf32>
    %165 = vector.multi_reduction <maximumf>, %164, %cst_45 [1] : vector<8x8xf32> to vector<8xf32>
    %166 = vector.shape_cast %165 : vector<8xf32> to vector<8x1xf32>
    %167 = vector.broadcast %166 : vector<8x1xf32> to vector<8x8xf32>
    %168 = arith.subf %164, %167 : vector<8x8xf32>
    %169 = math.exp %168 : vector<8x8xf32>
    %cst_46 = arith.constant dense<0.000000e+00> : vector<8xf32>
    %170 = vector.multi_reduction <add>, %169, %cst_46 [1] : vector<8x8xf32> to vector<8xf32>
    %171 = vector.shape_cast %170 : vector<8xf32> to vector<8x1xf32>
    %172 = tpu.reciprocal %171 {approx = true} : vector<8x1xf32> -> vector<8x1xf32>
    %173 = vector.broadcast %172 : vector<8x1xf32> to vector<8x8xf32>
    %174 = arith.mulf %169, %173 : vector<8x8xf32>
    %175 = arith.truncf %174 : vector<8x8xf32> to vector<8x8xbf16>
    %176 = arith.truncf %160 : vector<8x16xf32> to vector<8x16xbf16>
    %cst_47 = arith.constant dense<0.000000e+00> : vector<8x16xf32>
    %177 = tpu.matmul %175, %176, %cst_47 {dimension_numbers = #tpu.dot_dimension_numbers<[1], [0], [0], [1], [0, 0, 1, 1], [], []>} : vector<8x8xbf16>, vector<8x16xbf16>, vector<8x16xf32> -> vector<8x16xf32>
    %178 = tpu.concatenate %37, %57, %77, %97, %117, %137, %157, %177 in 1 : vector<8x16xf32>, vector<8x16xf32>, vector<8x16xf32>, vector<8x16xf32>, vector<8x16xf32>, vector<8x16xf32>, vector<8x16xf32>, vector<8x16xf32> -> vector<8x128xf32>
    %c0_48 = arith.constant 0 : index
    %c0_49 = arith.constant 0 : index
    %c0_50 = arith.constant 0 : index
    %179 = vector.load %arg7[%c0_48, %c0_49, %c0_50] : memref<4x128x128xbf16, #tpu.memory_space<vmem>>, vector<1x128x128xbf16>
    %180 = vector.shape_cast %179 : vector<1x128x128xbf16> to vector<128x128xbf16>
    %181 = arith.truncf %178 : vector<8x128xf32> to vector<8x128xbf16>
    %cst_51 = arith.constant dense<0.000000e+00> : vector<8x128xf32>
    %182 = tpu.matmul %181, %180, %cst_51 {dimension_numbers = #tpu.dot_dimension_numbers<[1], [0], [0], [1], [0, 0, 1, 1], [], []>} : vector<8x128xbf16>, vector<128x128xbf16>, vector<8x128xf32> -> vector<8x128xf32>
    %c0_52 = arith.constant 0 : index
    %c0_53 = arith.constant 0 : index
    %c0_54 = arith.constant 0 : index
    %183 = vector.load %arg8[%c0_52, %c0_53, %c0_54] : memref<4x1x128xf32, #tpu.memory_space<vmem>>, vector<1x1x128xf32>
    %184 = vector.shape_cast %183 : vector<1x1x128xf32> to vector<1x128xf32>
    %185 = vector.broadcast %184 : vector<1x128xf32> to vector<8x128xf32>
    %186 = arith.addf %182, %185 : vector<8x128xf32>
    %187 = arith.addf %186, %1 : vector<8x128xf32>
    %c0_55 = arith.constant 0 : index
    %c0_56 = arith.constant 0 : index
    %c0_57 = arith.constant 0 : index
    %188 = vector.load %arg9[%c0_55, %c0_56, %c0_57] : memref<4x1x128xf32, #tpu.memory_space<vmem>>, vector<1x1x128xf32>
    %189 = vector.shape_cast %188 : vector<1x1x128xf32> to vector<1x128xf32>
    %c0_58 = arith.constant 0 : index
    %c0_59 = arith.constant 0 : index
    %c0_60 = arith.constant 0 : index
    %190 = vector.load %arg10[%c0_58, %c0_59, %c0_60] : memref<4x1x128xf32, #tpu.memory_space<vmem>>, vector<1x1x128xf32>
    %191 = vector.shape_cast %190 : vector<1x1x128xf32> to vector<1x128xf32>
    %cst_61 = arith.constant dense<0.000000e+00> : vector<8xf32>
    %192 = vector.multi_reduction <add>, %187, %cst_61 [1] : vector<8x128xf32> to vector<8xf32>
    %193 = vector.shape_cast %192 : vector<8xf32> to vector<8x1xf32>
    %cst_62 = arith.constant 1.280000e+02 : f32
    %194 = vector.broadcast %cst_62 : f32 to vector<8x1xf32>
    %195 = arith.divf %193, %194 : vector<8x1xf32>
    %196 = vector.broadcast %195 : vector<8x1xf32> to vector<8x128xf32>
    %197 = arith.subf %187, %196 : vector<8x128xf32>
    %198 = arith.mulf %197, %197 : vector<8x128xf32>
    %cst_63 = arith.constant dense<0.000000e+00> : vector<8xf32>
    %199 = vector.multi_reduction <add>, %198, %cst_63 [1] : vector<8x128xf32> to vector<8xf32>
    %200 = vector.shape_cast %199 : vector<8xf32> to vector<8x1xf32>
    %cst_64 = arith.constant 1.280000e+02 : f32
    %201 = vector.broadcast %cst_64 : f32 to vector<8x1xf32>
    %202 = arith.divf %200, %201 : vector<8x1xf32>
    %cst_65 = arith.constant 9.99999974E-6 : f32
    %203 = vector.broadcast %cst_65 : f32 to vector<8x1xf32>
    %204 = arith.addf %202, %203 : vector<8x1xf32>
    %205 = math.rsqrt %204 : vector<8x1xf32>
    %206 = vector.broadcast %205 : vector<8x1xf32> to vector<8x128xf32>
    %207 = arith.mulf %197, %206 : vector<8x128xf32>
    %208 = vector.broadcast %189 : vector<1x128xf32> to vector<8x128xf32>
    %209 = arith.mulf %207, %208 : vector<8x128xf32>
    %210 = vector.broadcast %191 : vector<1x128xf32> to vector<8x128xf32>
    %211 = arith.addf %209, %210 : vector<8x128xf32>
    %c0_66 = arith.constant 0 : index
    %c0_67 = arith.constant 0 : index
    %c0_68 = arith.constant 0 : index
    %212 = vector.load %arg11[%c0_66, %c0_67, %c0_68] : memref<4x128x256xbf16, #tpu.memory_space<vmem>>, vector<1x128x256xbf16>
    %213 = vector.shape_cast %212 : vector<1x128x256xbf16> to vector<128x256xbf16>
    %214 = arith.truncf %211 : vector<8x128xf32> to vector<8x128xbf16>
    %cst_69 = arith.constant dense<0.000000e+00> : vector<8x256xf32>
    %215 = tpu.matmul %214, %213, %cst_69 {dimension_numbers = #tpu.dot_dimension_numbers<[1], [0], [0], [1], [0, 0, 1, 1], [], []>} : vector<8x128xbf16>, vector<128x256xbf16>, vector<8x256xf32> -> vector<8x256xf32>
    %c0_70 = arith.constant 0 : index
    %c0_71 = arith.constant 0 : index
    %c0_72 = arith.constant 0 : index
    %216 = vector.load %arg12[%c0_70, %c0_71, %c0_72] : memref<4x1x256xf32, #tpu.memory_space<vmem>>, vector<1x1x256xf32>
    %217 = vector.shape_cast %216 : vector<1x1x256xf32> to vector<1x256xf32>
    %218 = vector.broadcast %217 : vector<1x256xf32> to vector<8x256xf32>
    %219 = arith.addf %215, %218 : vector<8x256xf32>
    %cst_73 = arith.constant 0.000000e+00 : f32
    %220 = vector.broadcast %cst_73 : f32 to vector<8x256xf32>
    %221 = arith.maximumf %219, %220 : vector<8x256xf32>
    %c0_74 = arith.constant 0 : index
    %c0_75 = arith.constant 0 : index
    %c0_76 = arith.constant 0 : index
    %222 = vector.load %arg13[%c0_74, %c0_75, %c0_76] : memref<4x256x128xbf16, #tpu.memory_space<vmem>>, vector<1x256x128xbf16>
    %223 = vector.shape_cast %222 : vector<1x256x128xbf16> to vector<256x128xbf16>
    %224 = arith.truncf %221 : vector<8x256xf32> to vector<8x256xbf16>
    %cst_77 = arith.constant dense<0.000000e+00> : vector<8x128xf32>
    %225 = tpu.matmul %224, %223, %cst_77 {dimension_numbers = #tpu.dot_dimension_numbers<[1], [0], [0], [1], [0, 0, 1, 1], [], []>} : vector<8x256xbf16>, vector<256x128xbf16>, vector<8x128xf32> -> vector<8x128xf32>
    %c0_78 = arith.constant 0 : index
    %c0_79 = arith.constant 0 : index
    %c0_80 = arith.constant 0 : index
    %226 = vector.load %arg14[%c0_78, %c0_79, %c0_80] : memref<4x1x128xf32, #tpu.memory_space<vmem>>, vector<1x1x128xf32>
    %227 = vector.shape_cast %226 : vector<1x1x128xf32> to vector<1x128xf32>
    %228 = vector.broadcast %227 : vector<1x128xf32> to vector<8x128xf32>
    %229 = arith.addf %225, %228 : vector<8x128xf32>
    %cst_81 = arith.constant 0.000000e+00 : f32
    %230 = vector.broadcast %cst_81 : f32 to vector<8x128xf32>
    %231 = arith.maximumf %229, %230 : vector<8x128xf32>
    %232 = arith.addf %231, %211 : vector<8x128xf32>
    %c0_82 = arith.constant 0 : index
    %c0_83 = arith.constant 0 : index
    %c0_84 = arith.constant 0 : index
    %233 = vector.load %arg15[%c0_82, %c0_83, %c0_84] : memref<4x1x128xf32, #tpu.memory_space<vmem>>, vector<1x1x128xf32>
    %234 = vector.shape_cast %233 : vector<1x1x128xf32> to vector<1x128xf32>
    %c0_85 = arith.constant 0 : index
    %c0_86 = arith.constant 0 : index
    %c0_87 = arith.constant 0 : index
    %235 = vector.load %arg16[%c0_85, %c0_86, %c0_87] : memref<4x1x128xf32, #tpu.memory_space<vmem>>, vector<1x1x128xf32>
    %236 = vector.shape_cast %235 : vector<1x1x128xf32> to vector<1x128xf32>
    %cst_88 = arith.constant dense<0.000000e+00> : vector<8xf32>
    %237 = vector.multi_reduction <add>, %232, %cst_88 [1] : vector<8x128xf32> to vector<8xf32>
    %238 = vector.shape_cast %237 : vector<8xf32> to vector<8x1xf32>
    %cst_89 = arith.constant 1.280000e+02 : f32
    %239 = vector.broadcast %cst_89 : f32 to vector<8x1xf32>
    %240 = arith.divf %238, %239 : vector<8x1xf32>
    %241 = vector.broadcast %240 : vector<8x1xf32> to vector<8x128xf32>
    %242 = arith.subf %232, %241 : vector<8x128xf32>
    %243 = arith.mulf %242, %242 : vector<8x128xf32>
    %cst_90 = arith.constant dense<0.000000e+00> : vector<8xf32>
    %244 = vector.multi_reduction <add>, %243, %cst_90 [1] : vector<8x128xf32> to vector<8xf32>
    %245 = vector.shape_cast %244 : vector<8xf32> to vector<8x1xf32>
    %cst_91 = arith.constant 1.280000e+02 : f32
    %246 = vector.broadcast %cst_91 : f32 to vector<8x1xf32>
    %247 = arith.divf %245, %246 : vector<8x1xf32>
    %cst_92 = arith.constant 9.99999974E-6 : f32
    %248 = vector.broadcast %cst_92 : f32 to vector<8x1xf32>
    %249 = arith.addf %247, %248 : vector<8x1xf32>
    %250 = math.rsqrt %249 : vector<8x1xf32>
    %251 = vector.broadcast %250 : vector<8x1xf32> to vector<8x128xf32>
    %252 = arith.mulf %242, %251 : vector<8x128xf32>
    %253 = vector.broadcast %234 : vector<1x128xf32> to vector<8x128xf32>
    %254 = arith.mulf %252, %253 : vector<8x128xf32>
    %255 = vector.broadcast %236 : vector<1x128xf32> to vector<8x128xf32>
    %256 = arith.addf %254, %255 : vector<8x128xf32>
    %c1 = arith.constant 1 : index
    %c0_93 = arith.constant 0 : index
    %c0_94 = arith.constant 0 : index
    %257 = vector.load %arg3[%c1, %c0_93, %c0_94] : memref<4x128x128xbf16, #tpu.memory_space<vmem>>, vector<1x128x128xbf16>
    %258 = vector.shape_cast %257 : vector<1x128x128xbf16> to vector<128x128xbf16>
    %259 = arith.truncf %256 : vector<8x128xf32> to vector<8x128xbf16>
    %cst_95 = arith.constant dense<0.000000e+00> : vector<8x128xf32>
    %260 = tpu.matmul %259, %258, %cst_95 {dimension_numbers = #tpu.dot_dimension_numbers<[1], [0], [0], [1], [0, 0, 1, 1], [], []>} : vector<8x128xbf16>, vector<128x128xbf16>, vector<8x128xf32> -> vector<8x128xf32>
    %c1_96 = arith.constant 1 : index
    %c0_97 = arith.constant 0 : index
    %c0_98 = arith.constant 0 : index
    %261 = vector.load %arg4[%c1_96, %c0_97, %c0_98] : memref<4x1x128xf32, #tpu.memory_space<vmem>>, vector<1x1x128xf32>
    %262 = vector.shape_cast %261 : vector<1x1x128xf32> to vector<1x128xf32>
    %263 = vector.broadcast %262 : vector<1x128xf32> to vector<8x128xf32>
    %264 = arith.addf %260, %263 : vector<8x128xf32>
    %c1_99 = arith.constant 1 : index
    %c0_100 = arith.constant 0 : index
    %c0_101 = arith.constant 0 : index
    %265 = vector.load %arg5[%c1_99, %c0_100, %c0_101] : memref<4x128x256xbf16, #tpu.memory_space<vmem>>, vector<1x128x256xbf16>
    %266 = vector.shape_cast %265 : vector<1x128x256xbf16> to vector<128x256xbf16>
    %267 = arith.truncf %1 : vector<8x128xf32> to vector<8x128xbf16>
    %cst_102 = arith.constant dense<0.000000e+00> : vector<8x256xf32>
    %268 = tpu.matmul %267, %266, %cst_102 {dimension_numbers = #tpu.dot_dimension_numbers<[1], [0], [0], [1], [0, 0, 1, 1], [], []>} : vector<8x128xbf16>, vector<128x256xbf16>, vector<8x256xf32> -> vector<8x256xf32>
    %c1_103 = arith.constant 1 : index
    %c0_104 = arith.constant 0 : index
    %c0_105 = arith.constant 0 : index
    %269 = vector.load %arg6[%c1_103, %c0_104, %c0_105] : memref<4x1x256xf32, #tpu.memory_space<vmem>>, vector<1x1x256xf32>
    %270 = vector.shape_cast %269 : vector<1x1x256xf32> to vector<1x256xf32>
    %271 = vector.broadcast %270 : vector<1x256xf32> to vector<8x256xf32>
    %272 = arith.addf %268, %271 : vector<8x256xf32>
    %273 = vector.extract_strided_slice %264 {offsets = [0, 0], sizes = [8, 16], strides = [1, 1]} : vector<8x128xf32> to vector<8x16xf32>
    %274 = vector.extract_strided_slice %272 {offsets = [0, 0], sizes = [8, 16], strides = [1, 1]} : vector<8x256xf32> to vector<8x16xf32>
    %275 = vector.extract_strided_slice %272 {offsets = [0, 128], sizes = [8, 16], strides = [1, 1]} : vector<8x256xf32> to vector<8x16xf32>
    %276 = arith.truncf %273 : vector<8x16xf32> to vector<8x16xbf16>
    %277 = tpu.transpose %274, [1, 0] : vector<8x16xf32> -> vector<16x8xf32>
    %278 = arith.truncf %277 : vector<16x8xf32> to vector<16x8xbf16>
    %cst_106 = arith.constant dense<0.000000e+00> : vector<8x8xf32>
    %279 = tpu.matmul %276, %278, %cst_106 {dimension_numbers = #tpu.dot_dimension_numbers<[1], [0], [0], [1], [0, 0, 1, 1], [], []>} : vector<8x16xbf16>, vector<16x8xbf16>, vector<8x8xf32> -> vector<8x8xf32>
    %cst_107 = arith.constant dense<0xFF800000> : vector<8xf32>
    %280 = vector.multi_reduction <maximumf>, %279, %cst_107 [1] : vector<8x8xf32> to vector<8xf32>
    %281 = vector.shape_cast %280 : vector<8xf32> to vector<8x1xf32>
    %282 = vector.broadcast %281 : vector<8x1xf32> to vector<8x8xf32>
    %283 = arith.subf %279, %282 : vector<8x8xf32>
    %284 = math.exp %283 : vector<8x8xf32>
    %cst_108 = arith.constant dense<0.000000e+00> : vector<8xf32>
    %285 = vector.multi_reduction <add>, %284, %cst_108 [1] : vector<8x8xf32> to vector<8xf32>
    %286 = vector.shape_cast %285 : vector<8xf32> to vector<8x1xf32>
    %287 = tpu.reciprocal %286 {approx = true} : vector<8x1xf32> -> vector<8x1xf32>
    %288 = vector.broadcast %287 : vector<8x1xf32> to vector<8x8xf32>
    %289 = arith.mulf %284, %288 : vector<8x8xf32>
    %290 = arith.truncf %289 : vector<8x8xf32> to vector<8x8xbf16>
    %291 = arith.truncf %275 : vector<8x16xf32> to vector<8x16xbf16>
    %cst_109 = arith.constant dense<0.000000e+00> : vector<8x16xf32>
    %292 = tpu.matmul %290, %291, %cst_109 {dimension_numbers = #tpu.dot_dimension_numbers<[1], [0], [0], [1], [0, 0, 1, 1], [], []>} : vector<8x8xbf16>, vector<8x16xbf16>, vector<8x16xf32> -> vector<8x16xf32>
    %293 = vector.extract_strided_slice %264 {offsets = [0, 16], sizes = [8, 16], strides = [1, 1]} : vector<8x128xf32> to vector<8x16xf32>
    %294 = vector.extract_strided_slice %272 {offsets = [0, 16], sizes = [8, 16], strides = [1, 1]} : vector<8x256xf32> to vector<8x16xf32>
    %295 = vector.extract_strided_slice %272 {offsets = [0, 144], sizes = [8, 16], strides = [1, 1]} : vector<8x256xf32> to vector<8x16xf32>
    %296 = arith.truncf %293 : vector<8x16xf32> to vector<8x16xbf16>
    %297 = tpu.transpose %294, [1, 0] : vector<8x16xf32> -> vector<16x8xf32>
    %298 = arith.truncf %297 : vector<16x8xf32> to vector<16x8xbf16>
    %cst_110 = arith.constant dense<0.000000e+00> : vector<8x8xf32>
    %299 = tpu.matmul %296, %298, %cst_110 {dimension_numbers = #tpu.dot_dimension_numbers<[1], [0], [0], [1], [0, 0, 1, 1], [], []>} : vector<8x16xbf16>, vector<16x8xbf16>, vector<8x8xf32> -> vector<8x8xf32>
    %cst_111 = arith.constant dense<0xFF800000> : vector<8xf32>
    %300 = vector.multi_reduction <maximumf>, %299, %cst_111 [1] : vector<8x8xf32> to vector<8xf32>
    %301 = vector.shape_cast %300 : vector<8xf32> to vector<8x1xf32>
    %302 = vector.broadcast %301 : vector<8x1xf32> to vector<8x8xf32>
    %303 = arith.subf %299, %302 : vector<8x8xf32>
    %304 = math.exp %303 : vector<8x8xf32>
    %cst_112 = arith.constant dense<0.000000e+00> : vector<8xf32>
    %305 = vector.multi_reduction <add>, %304, %cst_112 [1] : vector<8x8xf32> to vector<8xf32>
    %306 = vector.shape_cast %305 : vector<8xf32> to vector<8x1xf32>
    %307 = tpu.reciprocal %306 {approx = true} : vector<8x1xf32> -> vector<8x1xf32>
    %308 = vector.broadcast %307 : vector<8x1xf32> to vector<8x8xf32>
    %309 = arith.mulf %304, %308 : vector<8x8xf32>
    %310 = arith.truncf %309 : vector<8x8xf32> to vector<8x8xbf16>
    %311 = arith.truncf %295 : vector<8x16xf32> to vector<8x16xbf16>
    %cst_113 = arith.constant dense<0.000000e+00> : vector<8x16xf32>
    %312 = tpu.matmul %310, %311, %cst_113 {dimension_numbers = #tpu.dot_dimension_numbers<[1], [0], [0], [1], [0, 0, 1, 1], [], []>} : vector<8x8xbf16>, vector<8x16xbf16>, vector<8x16xf32> -> vector<8x16xf32>
    %313 = vector.extract_strided_slice %264 {offsets = [0, 32], sizes = [8, 16], strides = [1, 1]} : vector<8x128xf32> to vector<8x16xf32>
    %314 = vector.extract_strided_slice %272 {offsets = [0, 32], sizes = [8, 16], strides = [1, 1]} : vector<8x256xf32> to vector<8x16xf32>
    %315 = vector.extract_strided_slice %272 {offsets = [0, 160], sizes = [8, 16], strides = [1, 1]} : vector<8x256xf32> to vector<8x16xf32>
    %316 = arith.truncf %313 : vector<8x16xf32> to vector<8x16xbf16>
    %317 = tpu.transpose %314, [1, 0] : vector<8x16xf32> -> vector<16x8xf32>
    %318 = arith.truncf %317 : vector<16x8xf32> to vector<16x8xbf16>
    %cst_114 = arith.constant dense<0.000000e+00> : vector<8x8xf32>
    %319 = tpu.matmul %316, %318, %cst_114 {dimension_numbers = #tpu.dot_dimension_numbers<[1], [0], [0], [1], [0, 0, 1, 1], [], []>} : vector<8x16xbf16>, vector<16x8xbf16>, vector<8x8xf32> -> vector<8x8xf32>
    %cst_115 = arith.constant dense<0xFF800000> : vector<8xf32>
    %320 = vector.multi_reduction <maximumf>, %319, %cst_115 [1] : vector<8x8xf32> to vector<8xf32>
    %321 = vector.shape_cast %320 : vector<8xf32> to vector<8x1xf32>
    %322 = vector.broadcast %321 : vector<8x1xf32> to vector<8x8xf32>
    %323 = arith.subf %319, %322 : vector<8x8xf32>
    %324 = math.exp %323 : vector<8x8xf32>
    %cst_116 = arith.constant dense<0.000000e+00> : vector<8xf32>
    %325 = vector.multi_reduction <add>, %324, %cst_116 [1] : vector<8x8xf32> to vector<8xf32>
    %326 = vector.shape_cast %325 : vector<8xf32> to vector<8x1xf32>
    %327 = tpu.reciprocal %326 {approx = true} : vector<8x1xf32> -> vector<8x1xf32>
    %328 = vector.broadcast %327 : vector<8x1xf32> to vector<8x8xf32>
    %329 = arith.mulf %324, %328 : vector<8x8xf32>
    %330 = arith.truncf %329 : vector<8x8xf32> to vector<8x8xbf16>
    %331 = arith.truncf %315 : vector<8x16xf32> to vector<8x16xbf16>
    %cst_117 = arith.constant dense<0.000000e+00> : vector<8x16xf32>
    %332 = tpu.matmul %330, %331, %cst_117 {dimension_numbers = #tpu.dot_dimension_numbers<[1], [0], [0], [1], [0, 0, 1, 1], [], []>} : vector<8x8xbf16>, vector<8x16xbf16>, vector<8x16xf32> -> vector<8x16xf32>
    %333 = vector.extract_strided_slice %264 {offsets = [0, 48], sizes = [8, 16], strides = [1, 1]} : vector<8x128xf32> to vector<8x16xf32>
    %334 = vector.extract_strided_slice %272 {offsets = [0, 48], sizes = [8, 16], strides = [1, 1]} : vector<8x256xf32> to vector<8x16xf32>
    %335 = vector.extract_strided_slice %272 {offsets = [0, 176], sizes = [8, 16], strides = [1, 1]} : vector<8x256xf32> to vector<8x16xf32>
    %336 = arith.truncf %333 : vector<8x16xf32> to vector<8x16xbf16>
    %337 = tpu.transpose %334, [1, 0] : vector<8x16xf32> -> vector<16x8xf32>
    %338 = arith.truncf %337 : vector<16x8xf32> to vector<16x8xbf16>
    %cst_118 = arith.constant dense<0.000000e+00> : vector<8x8xf32>
    %339 = tpu.matmul %336, %338, %cst_118 {dimension_numbers = #tpu.dot_dimension_numbers<[1], [0], [0], [1], [0, 0, 1, 1], [], []>} : vector<8x16xbf16>, vector<16x8xbf16>, vector<8x8xf32> -> vector<8x8xf32>
    %cst_119 = arith.constant dense<0xFF800000> : vector<8xf32>
    %340 = vector.multi_reduction <maximumf>, %339, %cst_119 [1] : vector<8x8xf32> to vector<8xf32>
    %341 = vector.shape_cast %340 : vector<8xf32> to vector<8x1xf32>
    %342 = vector.broadcast %341 : vector<8x1xf32> to vector<8x8xf32>
    %343 = arith.subf %339, %342 : vector<8x8xf32>
    %344 = math.exp %343 : vector<8x8xf32>
    %cst_120 = arith.constant dense<0.000000e+00> : vector<8xf32>
    %345 = vector.multi_reduction <add>, %344, %cst_120 [1] : vector<8x8xf32> to vector<8xf32>
    %346 = vector.shape_cast %345 : vector<8xf32> to vector<8x1xf32>
    %347 = tpu.reciprocal %346 {approx = true} : vector<8x1xf32> -> vector<8x1xf32>
    %348 = vector.broadcast %347 : vector<8x1xf32> to vector<8x8xf32>
    %349 = arith.mulf %344, %348 : vector<8x8xf32>
    %350 = arith.truncf %349 : vector<8x8xf32> to vector<8x8xbf16>
    %351 = arith.truncf %335 : vector<8x16xf32> to vector<8x16xbf16>
    %cst_121 = arith.constant dense<0.000000e+00> : vector<8x16xf32>
    %352 = tpu.matmul %350, %351, %cst_121 {dimension_numbers = #tpu.dot_dimension_numbers<[1], [0], [0], [1], [0, 0, 1, 1], [], []>} : vector<8x8xbf16>, vector<8x16xbf16>, vector<8x16xf32> -> vector<8x16xf32>
    %353 = vector.extract_strided_slice %264 {offsets = [0, 64], sizes = [8, 16], strides = [1, 1]} : vector<8x128xf32> to vector<8x16xf32>
    %354 = vector.extract_strided_slice %272 {offsets = [0, 64], sizes = [8, 16], strides = [1, 1]} : vector<8x256xf32> to vector<8x16xf32>
    %355 = vector.extract_strided_slice %272 {offsets = [0, 192], sizes = [8, 16], strides = [1, 1]} : vector<8x256xf32> to vector<8x16xf32>
    %356 = arith.truncf %353 : vector<8x16xf32> to vector<8x16xbf16>
    %357 = tpu.transpose %354, [1, 0] : vector<8x16xf32> -> vector<16x8xf32>
    %358 = arith.truncf %357 : vector<16x8xf32> to vector<16x8xbf16>
    %cst_122 = arith.constant dense<0.000000e+00> : vector<8x8xf32>
    %359 = tpu.matmul %356, %358, %cst_122 {dimension_numbers = #tpu.dot_dimension_numbers<[1], [0], [0], [1], [0, 0, 1, 1], [], []>} : vector<8x16xbf16>, vector<16x8xbf16>, vector<8x8xf32> -> vector<8x8xf32>
    %cst_123 = arith.constant dense<0xFF800000> : vector<8xf32>
    %360 = vector.multi_reduction <maximumf>, %359, %cst_123 [1] : vector<8x8xf32> to vector<8xf32>
    %361 = vector.shape_cast %360 : vector<8xf32> to vector<8x1xf32>
    %362 = vector.broadcast %361 : vector<8x1xf32> to vector<8x8xf32>
    %363 = arith.subf %359, %362 : vector<8x8xf32>
    %364 = math.exp %363 : vector<8x8xf32>
    %cst_124 = arith.constant dense<0.000000e+00> : vector<8xf32>
    %365 = vector.multi_reduction <add>, %364, %cst_124 [1] : vector<8x8xf32> to vector<8xf32>
    %366 = vector.shape_cast %365 : vector<8xf32> to vector<8x1xf32>
    %367 = tpu.reciprocal %366 {approx = true} : vector<8x1xf32> -> vector<8x1xf32>
    %368 = vector.broadcast %367 : vector<8x1xf32> to vector<8x8xf32>
    %369 = arith.mulf %364, %368 : vector<8x8xf32>
    %370 = arith.truncf %369 : vector<8x8xf32> to vector<8x8xbf16>
    %371 = arith.truncf %355 : vector<8x16xf32> to vector<8x16xbf16>
    %cst_125 = arith.constant dense<0.000000e+00> : vector<8x16xf32>
    %372 = tpu.matmul %370, %371, %cst_125 {dimension_numbers = #tpu.dot_dimension_numbers<[1], [0], [0], [1], [0, 0, 1, 1], [], []>} : vector<8x8xbf16>, vector<8x16xbf16>, vector<8x16xf32> -> vector<8x16xf32>
    %373 = vector.extract_strided_slice %264 {offsets = [0, 80], sizes = [8, 16], strides = [1, 1]} : vector<8x128xf32> to vector<8x16xf32>
    %374 = vector.extract_strided_slice %272 {offsets = [0, 80], sizes = [8, 16], strides = [1, 1]} : vector<8x256xf32> to vector<8x16xf32>
    %375 = vector.extract_strided_slice %272 {offsets = [0, 208], sizes = [8, 16], strides = [1, 1]} : vector<8x256xf32> to vector<8x16xf32>
    %376 = arith.truncf %373 : vector<8x16xf32> to vector<8x16xbf16>
    %377 = tpu.transpose %374, [1, 0] : vector<8x16xf32> -> vector<16x8xf32>
    %378 = arith.truncf %377 : vector<16x8xf32> to vector<16x8xbf16>
    %cst_126 = arith.constant dense<0.000000e+00> : vector<8x8xf32>
    %379 = tpu.matmul %376, %378, %cst_126 {dimension_numbers = #tpu.dot_dimension_numbers<[1], [0], [0], [1], [0, 0, 1, 1], [], []>} : vector<8x16xbf16>, vector<16x8xbf16>, vector<8x8xf32> -> vector<8x8xf32>
    %cst_127 = arith.constant dense<0xFF800000> : vector<8xf32>
    %380 = vector.multi_reduction <maximumf>, %379, %cst_127 [1] : vector<8x8xf32> to vector<8xf32>
    %381 = vector.shape_cast %380 : vector<8xf32> to vector<8x1xf32>
    %382 = vector.broadcast %381 : vector<8x1xf32> to vector<8x8xf32>
    %383 = arith.subf %379, %382 : vector<8x8xf32>
    %384 = math.exp %383 : vector<8x8xf32>
    %cst_128 = arith.constant dense<0.000000e+00> : vector<8xf32>
    %385 = vector.multi_reduction <add>, %384, %cst_128 [1] : vector<8x8xf32> to vector<8xf32>
    %386 = vector.shape_cast %385 : vector<8xf32> to vector<8x1xf32>
    %387 = tpu.reciprocal %386 {approx = true} : vector<8x1xf32> -> vector<8x1xf32>
    %388 = vector.broadcast %387 : vector<8x1xf32> to vector<8x8xf32>
    %389 = arith.mulf %384, %388 : vector<8x8xf32>
    %390 = arith.truncf %389 : vector<8x8xf32> to vector<8x8xbf16>
    %391 = arith.truncf %375 : vector<8x16xf32> to vector<8x16xbf16>
    %cst_129 = arith.constant dense<0.000000e+00> : vector<8x16xf32>
    %392 = tpu.matmul %390, %391, %cst_129 {dimension_numbers = #tpu.dot_dimension_numbers<[1], [0], [0], [1], [0, 0, 1, 1], [], []>} : vector<8x8xbf16>, vector<8x16xbf16>, vector<8x16xf32> -> vector<8x16xf32>
    %393 = vector.extract_strided_slice %264 {offsets = [0, 96], sizes = [8, 16], strides = [1, 1]} : vector<8x128xf32> to vector<8x16xf32>
    %394 = vector.extract_strided_slice %272 {offsets = [0, 96], sizes = [8, 16], strides = [1, 1]} : vector<8x256xf32> to vector<8x16xf32>
    %395 = vector.extract_strided_slice %272 {offsets = [0, 224], sizes = [8, 16], strides = [1, 1]} : vector<8x256xf32> to vector<8x16xf32>
    %396 = arith.truncf %393 : vector<8x16xf32> to vector<8x16xbf16>
    %397 = tpu.transpose %394, [1, 0] : vector<8x16xf32> -> vector<16x8xf32>
    %398 = arith.truncf %397 : vector<16x8xf32> to vector<16x8xbf16>
    %cst_130 = arith.constant dense<0.000000e+00> : vector<8x8xf32>
    %399 = tpu.matmul %396, %398, %cst_130 {dimension_numbers = #tpu.dot_dimension_numbers<[1], [0], [0], [1], [0, 0, 1, 1], [], []>} : vector<8x16xbf16>, vector<16x8xbf16>, vector<8x8xf32> -> vector<8x8xf32>
    %cst_131 = arith.constant dense<0xFF800000> : vector<8xf32>
    %400 = vector.multi_reduction <maximumf>, %399, %cst_131 [1] : vector<8x8xf32> to vector<8xf32>
    %401 = vector.shape_cast %400 : vector<8xf32> to vector<8x1xf32>
    %402 = vector.broadcast %401 : vector<8x1xf32> to vector<8x8xf32>
    %403 = arith.subf %399, %402 : vector<8x8xf32>
    %404 = math.exp %403 : vector<8x8xf32>
    %cst_132 = arith.constant dense<0.000000e+00> : vector<8xf32>
    %405 = vector.multi_reduction <add>, %404, %cst_132 [1] : vector<8x8xf32> to vector<8xf32>
    %406 = vector.shape_cast %405 : vector<8xf32> to vector<8x1xf32>
    %407 = tpu.reciprocal %406 {approx = true} : vector<8x1xf32> -> vector<8x1xf32>
    %408 = vector.broadcast %407 : vector<8x1xf32> to vector<8x8xf32>
    %409 = arith.mulf %404, %408 : vector<8x8xf32>
    %410 = arith.truncf %409 : vector<8x8xf32> to vector<8x8xbf16>
    %411 = arith.truncf %395 : vector<8x16xf32> to vector<8x16xbf16>
    %cst_133 = arith.constant dense<0.000000e+00> : vector<8x16xf32>
    %412 = tpu.matmul %410, %411, %cst_133 {dimension_numbers = #tpu.dot_dimension_numbers<[1], [0], [0], [1], [0, 0, 1, 1], [], []>} : vector<8x8xbf16>, vector<8x16xbf16>, vector<8x16xf32> -> vector<8x16xf32>
    %413 = vector.extract_strided_slice %264 {offsets = [0, 112], sizes = [8, 16], strides = [1, 1]} : vector<8x128xf32> to vector<8x16xf32>
    %414 = vector.extract_strided_slice %272 {offsets = [0, 112], sizes = [8, 16], strides = [1, 1]} : vector<8x256xf32> to vector<8x16xf32>
    %415 = vector.extract_strided_slice %272 {offsets = [0, 240], sizes = [8, 16], strides = [1, 1]} : vector<8x256xf32> to vector<8x16xf32>
    %416 = arith.truncf %413 : vector<8x16xf32> to vector<8x16xbf16>
    %417 = tpu.transpose %414, [1, 0] : vector<8x16xf32> -> vector<16x8xf32>
    %418 = arith.truncf %417 : vector<16x8xf32> to vector<16x8xbf16>
    %cst_134 = arith.constant dense<0.000000e+00> : vector<8x8xf32>
    %419 = tpu.matmul %416, %418, %cst_134 {dimension_numbers = #tpu.dot_dimension_numbers<[1], [0], [0], [1], [0, 0, 1, 1], [], []>} : vector<8x16xbf16>, vector<16x8xbf16>, vector<8x8xf32> -> vector<8x8xf32>
    %cst_135 = arith.constant dense<0xFF800000> : vector<8xf32>
    %420 = vector.multi_reduction <maximumf>, %419, %cst_135 [1] : vector<8x8xf32> to vector<8xf32>
    %421 = vector.shape_cast %420 : vector<8xf32> to vector<8x1xf32>
    %422 = vector.broadcast %421 : vector<8x1xf32> to vector<8x8xf32>
    %423 = arith.subf %419, %422 : vector<8x8xf32>
    %424 = math.exp %423 : vector<8x8xf32>
    %cst_136 = arith.constant dense<0.000000e+00> : vector<8xf32>
    %425 = vector.multi_reduction <add>, %424, %cst_136 [1] : vector<8x8xf32> to vector<8xf32>
    %426 = vector.shape_cast %425 : vector<8xf32> to vector<8x1xf32>
    %427 = tpu.reciprocal %426 {approx = true} : vector<8x1xf32> -> vector<8x1xf32>
    %428 = vector.broadcast %427 : vector<8x1xf32> to vector<8x8xf32>
    %429 = arith.mulf %424, %428 : vector<8x8xf32>
    %430 = arith.truncf %429 : vector<8x8xf32> to vector<8x8xbf16>
    %431 = arith.truncf %415 : vector<8x16xf32> to vector<8x16xbf16>
    %cst_137 = arith.constant dense<0.000000e+00> : vector<8x16xf32>
    %432 = tpu.matmul %430, %431, %cst_137 {dimension_numbers = #tpu.dot_dimension_numbers<[1], [0], [0], [1], [0, 0, 1, 1], [], []>} : vector<8x8xbf16>, vector<8x16xbf16>, vector<8x16xf32> -> vector<8x16xf32>
    %433 = tpu.concatenate %292, %312, %332, %352, %372, %392, %412, %432 in 1 : vector<8x16xf32>, vector<8x16xf32>, vector<8x16xf32>, vector<8x16xf32>, vector<8x16xf32>, vector<8x16xf32>, vector<8x16xf32>, vector<8x16xf32> -> vector<8x128xf32>
    %c1_138 = arith.constant 1 : index
    %c0_139 = arith.constant 0 : index
    %c0_140 = arith.constant 0 : index
    %434 = vector.load %arg7[%c1_138, %c0_139, %c0_140] : memref<4x128x128xbf16, #tpu.memory_space<vmem>>, vector<1x128x128xbf16>
    %435 = vector.shape_cast %434 : vector<1x128x128xbf16> to vector<128x128xbf16>
    %436 = arith.truncf %433 : vector<8x128xf32> to vector<8x128xbf16>
    %cst_141 = arith.constant dense<0.000000e+00> : vector<8x128xf32>
    %437 = tpu.matmul %436, %435, %cst_141 {dimension_numbers = #tpu.dot_dimension_numbers<[1], [0], [0], [1], [0, 0, 1, 1], [], []>} : vector<8x128xbf16>, vector<128x128xbf16>, vector<8x128xf32> -> vector<8x128xf32>
    %c1_142 = arith.constant 1 : index
    %c0_143 = arith.constant 0 : index
    %c0_144 = arith.constant 0 : index
    %438 = vector.load %arg8[%c1_142, %c0_143, %c0_144] : memref<4x1x128xf32, #tpu.memory_space<vmem>>, vector<1x1x128xf32>
    %439 = vector.shape_cast %438 : vector<1x1x128xf32> to vector<1x128xf32>
    %440 = vector.broadcast %439 : vector<1x128xf32> to vector<8x128xf32>
    %441 = arith.addf %437, %440 : vector<8x128xf32>
    %442 = arith.addf %441, %256 : vector<8x128xf32>
    %c1_145 = arith.constant 1 : index
    %c0_146 = arith.constant 0 : index
    %c0_147 = arith.constant 0 : index
    %443 = vector.load %arg9[%c1_145, %c0_146, %c0_147] : memref<4x1x128xf32, #tpu.memory_space<vmem>>, vector<1x1x128xf32>
    %444 = vector.shape_cast %443 : vector<1x1x128xf32> to vector<1x128xf32>
    %c1_148 = arith.constant 1 : index
    %c0_149 = arith.constant 0 : index
    %c0_150 = arith.constant 0 : index
    %445 = vector.load %arg10[%c1_148, %c0_149, %c0_150] : memref<4x1x128xf32, #tpu.memory_space<vmem>>, vector<1x1x128xf32>
    %446 = vector.shape_cast %445 : vector<1x1x128xf32> to vector<1x128xf32>
    %cst_151 = arith.constant dense<0.000000e+00> : vector<8xf32>
    %447 = vector.multi_reduction <add>, %442, %cst_151 [1] : vector<8x128xf32> to vector<8xf32>
    %448 = vector.shape_cast %447 : vector<8xf32> to vector<8x1xf32>
    %cst_152 = arith.constant 1.280000e+02 : f32
    %449 = vector.broadcast %cst_152 : f32 to vector<8x1xf32>
    %450 = arith.divf %448, %449 : vector<8x1xf32>
    %451 = vector.broadcast %450 : vector<8x1xf32> to vector<8x128xf32>
    %452 = arith.subf %442, %451 : vector<8x128xf32>
    %453 = arith.mulf %452, %452 : vector<8x128xf32>
    %cst_153 = arith.constant dense<0.000000e+00> : vector<8xf32>
    %454 = vector.multi_reduction <add>, %453, %cst_153 [1] : vector<8x128xf32> to vector<8xf32>
    %455 = vector.shape_cast %454 : vector<8xf32> to vector<8x1xf32>
    %cst_154 = arith.constant 1.280000e+02 : f32
    %456 = vector.broadcast %cst_154 : f32 to vector<8x1xf32>
    %457 = arith.divf %455, %456 : vector<8x1xf32>
    %cst_155 = arith.constant 9.99999974E-6 : f32
    %458 = vector.broadcast %cst_155 : f32 to vector<8x1xf32>
    %459 = arith.addf %457, %458 : vector<8x1xf32>
    %460 = math.rsqrt %459 : vector<8x1xf32>
    %461 = vector.broadcast %460 : vector<8x1xf32> to vector<8x128xf32>
    %462 = arith.mulf %452, %461 : vector<8x128xf32>
    %463 = vector.broadcast %444 : vector<1x128xf32> to vector<8x128xf32>
    %464 = arith.mulf %462, %463 : vector<8x128xf32>
    %465 = vector.broadcast %446 : vector<1x128xf32> to vector<8x128xf32>
    %466 = arith.addf %464, %465 : vector<8x128xf32>
    %c1_156 = arith.constant 1 : index
    %c0_157 = arith.constant 0 : index
    %c0_158 = arith.constant 0 : index
    %467 = vector.load %arg11[%c1_156, %c0_157, %c0_158] : memref<4x128x256xbf16, #tpu.memory_space<vmem>>, vector<1x128x256xbf16>
    %468 = vector.shape_cast %467 : vector<1x128x256xbf16> to vector<128x256xbf16>
    %469 = arith.truncf %466 : vector<8x128xf32> to vector<8x128xbf16>
    %cst_159 = arith.constant dense<0.000000e+00> : vector<8x256xf32>
    %470 = tpu.matmul %469, %468, %cst_159 {dimension_numbers = #tpu.dot_dimension_numbers<[1], [0], [0], [1], [0, 0, 1, 1], [], []>} : vector<8x128xbf16>, vector<128x256xbf16>, vector<8x256xf32> -> vector<8x256xf32>
    %c1_160 = arith.constant 1 : index
    %c0_161 = arith.constant 0 : index
    %c0_162 = arith.constant 0 : index
    %471 = vector.load %arg12[%c1_160, %c0_161, %c0_162] : memref<4x1x256xf32, #tpu.memory_space<vmem>>, vector<1x1x256xf32>
    %472 = vector.shape_cast %471 : vector<1x1x256xf32> to vector<1x256xf32>
    %473 = vector.broadcast %472 : vector<1x256xf32> to vector<8x256xf32>
    %474 = arith.addf %470, %473 : vector<8x256xf32>
    %cst_163 = arith.constant 0.000000e+00 : f32
    %475 = vector.broadcast %cst_163 : f32 to vector<8x256xf32>
    %476 = arith.maximumf %474, %475 : vector<8x256xf32>
    %c1_164 = arith.constant 1 : index
    %c0_165 = arith.constant 0 : index
    %c0_166 = arith.constant 0 : index
    %477 = vector.load %arg13[%c1_164, %c0_165, %c0_166] : memref<4x256x128xbf16, #tpu.memory_space<vmem>>, vector<1x256x128xbf16>
    %478 = vector.shape_cast %477 : vector<1x256x128xbf16> to vector<256x128xbf16>
    %479 = arith.truncf %476 : vector<8x256xf32> to vector<8x256xbf16>
    %cst_167 = arith.constant dense<0.000000e+00> : vector<8x128xf32>
    %480 = tpu.matmul %479, %478, %cst_167 {dimension_numbers = #tpu.dot_dimension_numbers<[1], [0], [0], [1], [0, 0, 1, 1], [], []>} : vector<8x256xbf16>, vector<256x128xbf16>, vector<8x128xf32> -> vector<8x128xf32>
    %c1_168 = arith.constant 1 : index
    %c0_169 = arith.constant 0 : index
    %c0_170 = arith.constant 0 : index
    %481 = vector.load %arg14[%c1_168, %c0_169, %c0_170] : memref<4x1x128xf32, #tpu.memory_space<vmem>>, vector<1x1x128xf32>
    %482 = vector.shape_cast %481 : vector<1x1x128xf32> to vector<1x128xf32>
    %483 = vector.broadcast %482 : vector<1x128xf32> to vector<8x128xf32>
    %484 = arith.addf %480, %483 : vector<8x128xf32>
    %cst_171 = arith.constant 0.000000e+00 : f32
    %485 = vector.broadcast %cst_171 : f32 to vector<8x128xf32>
    %486 = arith.maximumf %484, %485 : vector<8x128xf32>
    %487 = arith.addf %486, %466 : vector<8x128xf32>
    %c1_172 = arith.constant 1 : index
    %c0_173 = arith.constant 0 : index
    %c0_174 = arith.constant 0 : index
    %488 = vector.load %arg15[%c1_172, %c0_173, %c0_174] : memref<4x1x128xf32, #tpu.memory_space<vmem>>, vector<1x1x128xf32>
    %489 = vector.shape_cast %488 : vector<1x1x128xf32> to vector<1x128xf32>
    %c1_175 = arith.constant 1 : index
    %c0_176 = arith.constant 0 : index
    %c0_177 = arith.constant 0 : index
    %490 = vector.load %arg16[%c1_175, %c0_176, %c0_177] : memref<4x1x128xf32, #tpu.memory_space<vmem>>, vector<1x1x128xf32>
    %491 = vector.shape_cast %490 : vector<1x1x128xf32> to vector<1x128xf32>
    %cst_178 = arith.constant dense<0.000000e+00> : vector<8xf32>
    %492 = vector.multi_reduction <add>, %487, %cst_178 [1] : vector<8x128xf32> to vector<8xf32>
    %493 = vector.shape_cast %492 : vector<8xf32> to vector<8x1xf32>
    %cst_179 = arith.constant 1.280000e+02 : f32
    %494 = vector.broadcast %cst_179 : f32 to vector<8x1xf32>
    %495 = arith.divf %493, %494 : vector<8x1xf32>
    %496 = vector.broadcast %495 : vector<8x1xf32> to vector<8x128xf32>
    %497 = arith.subf %487, %496 : vector<8x128xf32>
    %498 = arith.mulf %497, %497 : vector<8x128xf32>
    %cst_180 = arith.constant dense<0.000000e+00> : vector<8xf32>
    %499 = vector.multi_reduction <add>, %498, %cst_180 [1] : vector<8x128xf32> to vector<8xf32>
    %500 = vector.shape_cast %499 : vector<8xf32> to vector<8x1xf32>
    %cst_181 = arith.constant 1.280000e+02 : f32
    %501 = vector.broadcast %cst_181 : f32 to vector<8x1xf32>
    %502 = arith.divf %500, %501 : vector<8x1xf32>
    %cst_182 = arith.constant 9.99999974E-6 : f32
    %503 = vector.broadcast %cst_182 : f32 to vector<8x1xf32>
    %504 = arith.addf %502, %503 : vector<8x1xf32>
    %505 = math.rsqrt %504 : vector<8x1xf32>
    %506 = vector.broadcast %505 : vector<8x1xf32> to vector<8x128xf32>
    %507 = arith.mulf %497, %506 : vector<8x128xf32>
    %508 = vector.broadcast %489 : vector<1x128xf32> to vector<8x128xf32>
    %509 = arith.mulf %507, %508 : vector<8x128xf32>
    %510 = vector.broadcast %491 : vector<1x128xf32> to vector<8x128xf32>
    %511 = arith.addf %509, %510 : vector<8x128xf32>
    %c2 = arith.constant 2 : index
    %c0_183 = arith.constant 0 : index
    %c0_184 = arith.constant 0 : index
    %512 = vector.load %arg3[%c2, %c0_183, %c0_184] : memref<4x128x128xbf16, #tpu.memory_space<vmem>>, vector<1x128x128xbf16>
    %513 = vector.shape_cast %512 : vector<1x128x128xbf16> to vector<128x128xbf16>
    %514 = arith.truncf %511 : vector<8x128xf32> to vector<8x128xbf16>
    %cst_185 = arith.constant dense<0.000000e+00> : vector<8x128xf32>
    %515 = tpu.matmul %514, %513, %cst_185 {dimension_numbers = #tpu.dot_dimension_numbers<[1], [0], [0], [1], [0, 0, 1, 1], [], []>} : vector<8x128xbf16>, vector<128x128xbf16>, vector<8x128xf32> -> vector<8x128xf32>
    %c2_186 = arith.constant 2 : index
    %c0_187 = arith.constant 0 : index
    %c0_188 = arith.constant 0 : index
    %516 = vector.load %arg4[%c2_186, %c0_187, %c0_188] : memref<4x1x128xf32, #tpu.memory_space<vmem>>, vector<1x1x128xf32>
    %517 = vector.shape_cast %516 : vector<1x1x128xf32> to vector<1x128xf32>
    %518 = vector.broadcast %517 : vector<1x128xf32> to vector<8x128xf32>
    %519 = arith.addf %515, %518 : vector<8x128xf32>
    %c2_189 = arith.constant 2 : index
    %c0_190 = arith.constant 0 : index
    %c0_191 = arith.constant 0 : index
    %520 = vector.load %arg5[%c2_189, %c0_190, %c0_191] : memref<4x128x256xbf16, #tpu.memory_space<vmem>>, vector<1x128x256xbf16>
    %521 = vector.shape_cast %520 : vector<1x128x256xbf16> to vector<128x256xbf16>
    %522 = arith.truncf %256 : vector<8x128xf32> to vector<8x128xbf16>
    %cst_192 = arith.constant dense<0.000000e+00> : vector<8x256xf32>
    %523 = tpu.matmul %522, %521, %cst_192 {dimension_numbers = #tpu.dot_dimension_numbers<[1], [0], [0], [1], [0, 0, 1, 1], [], []>} : vector<8x128xbf16>, vector<128x256xbf16>, vector<8x256xf32> -> vector<8x256xf32>
    %c2_193 = arith.constant 2 : index
    %c0_194 = arith.constant 0 : index
    %c0_195 = arith.constant 0 : index
    %524 = vector.load %arg6[%c2_193, %c0_194, %c0_195] : memref<4x1x256xf32, #tpu.memory_space<vmem>>, vector<1x1x256xf32>
    %525 = vector.shape_cast %524 : vector<1x1x256xf32> to vector<1x256xf32>
    %526 = vector.broadcast %525 : vector<1x256xf32> to vector<8x256xf32>
    %527 = arith.addf %523, %526 : vector<8x256xf32>
    %528 = vector.extract_strided_slice %519 {offsets = [0, 0], sizes = [8, 16], strides = [1, 1]} : vector<8x128xf32> to vector<8x16xf32>
    %529 = vector.extract_strided_slice %527 {offsets = [0, 0], sizes = [8, 16], strides = [1, 1]} : vector<8x256xf32> to vector<8x16xf32>
    %530 = vector.extract_strided_slice %527 {offsets = [0, 128], sizes = [8, 16], strides = [1, 1]} : vector<8x256xf32> to vector<8x16xf32>
    %531 = arith.truncf %528 : vector<8x16xf32> to vector<8x16xbf16>
    %532 = tpu.transpose %529, [1, 0] : vector<8x16xf32> -> vector<16x8xf32>
    %533 = arith.truncf %532 : vector<16x8xf32> to vector<16x8xbf16>
    %cst_196 = arith.constant dense<0.000000e+00> : vector<8x8xf32>
    %534 = tpu.matmul %531, %533, %cst_196 {dimension_numbers = #tpu.dot_dimension_numbers<[1], [0], [0], [1], [0, 0, 1, 1], [], []>} : vector<8x16xbf16>, vector<16x8xbf16>, vector<8x8xf32> -> vector<8x8xf32>
    %cst_197 = arith.constant dense<0xFF800000> : vector<8xf32>
    %535 = vector.multi_reduction <maximumf>, %534, %cst_197 [1] : vector<8x8xf32> to vector<8xf32>
    %536 = vector.shape_cast %535 : vector<8xf32> to vector<8x1xf32>
    %537 = vector.broadcast %536 : vector<8x1xf32> to vector<8x8xf32>
    %538 = arith.subf %534, %537 : vector<8x8xf32>
    %539 = math.exp %538 : vector<8x8xf32>
    %cst_198 = arith.constant dense<0.000000e+00> : vector<8xf32>
    %540 = vector.multi_reduction <add>, %539, %cst_198 [1] : vector<8x8xf32> to vector<8xf32>
    %541 = vector.shape_cast %540 : vector<8xf32> to vector<8x1xf32>
    %542 = tpu.reciprocal %541 {approx = true} : vector<8x1xf32> -> vector<8x1xf32>
    %543 = vector.broadcast %542 : vector<8x1xf32> to vector<8x8xf32>
    %544 = arith.mulf %539, %543 : vector<8x8xf32>
    %545 = arith.truncf %544 : vector<8x8xf32> to vector<8x8xbf16>
    %546 = arith.truncf %530 : vector<8x16xf32> to vector<8x16xbf16>
    %cst_199 = arith.constant dense<0.000000e+00> : vector<8x16xf32>
    %547 = tpu.matmul %545, %546, %cst_199 {dimension_numbers = #tpu.dot_dimension_numbers<[1], [0], [0], [1], [0, 0, 1, 1], [], []>} : vector<8x8xbf16>, vector<8x16xbf16>, vector<8x16xf32> -> vector<8x16xf32>
    %548 = vector.extract_strided_slice %519 {offsets = [0, 16], sizes = [8, 16], strides = [1, 1]} : vector<8x128xf32> to vector<8x16xf32>
    %549 = vector.extract_strided_slice %527 {offsets = [0, 16], sizes = [8, 16], strides = [1, 1]} : vector<8x256xf32> to vector<8x16xf32>
    %550 = vector.extract_strided_slice %527 {offsets = [0, 144], sizes = [8, 16], strides = [1, 1]} : vector<8x256xf32> to vector<8x16xf32>
    %551 = arith.truncf %548 : vector<8x16xf32> to vector<8x16xbf16>
    %552 = tpu.transpose %549, [1, 0] : vector<8x16xf32> -> vector<16x8xf32>
    %553 = arith.truncf %552 : vector<16x8xf32> to vector<16x8xbf16>
    %cst_200 = arith.constant dense<0.000000e+00> : vector<8x8xf32>
    %554 = tpu.matmul %551, %553, %cst_200 {dimension_numbers = #tpu.dot_dimension_numbers<[1], [0], [0], [1], [0, 0, 1, 1], [], []>} : vector<8x16xbf16>, vector<16x8xbf16>, vector<8x8xf32> -> vector<8x8xf32>
    %cst_201 = arith.constant dense<0xFF800000> : vector<8xf32>
    %555 = vector.multi_reduction <maximumf>, %554, %cst_201 [1] : vector<8x8xf32> to vector<8xf32>
    %556 = vector.shape_cast %555 : vector<8xf32> to vector<8x1xf32>
    %557 = vector.broadcast %556 : vector<8x1xf32> to vector<8x8xf32>
    %558 = arith.subf %554, %557 : vector<8x8xf32>
    %559 = math.exp %558 : vector<8x8xf32>
    %cst_202 = arith.constant dense<0.000000e+00> : vector<8xf32>
    %560 = vector.multi_reduction <add>, %559, %cst_202 [1] : vector<8x8xf32> to vector<8xf32>
    %561 = vector.shape_cast %560 : vector<8xf32> to vector<8x1xf32>
    %562 = tpu.reciprocal %561 {approx = true} : vector<8x1xf32> -> vector<8x1xf32>
    %563 = vector.broadcast %562 : vector<8x1xf32> to vector<8x8xf32>
    %564 = arith.mulf %559, %563 : vector<8x8xf32>
    %565 = arith.truncf %564 : vector<8x8xf32> to vector<8x8xbf16>
    %566 = arith.truncf %550 : vector<8x16xf32> to vector<8x16xbf16>
    %cst_203 = arith.constant dense<0.000000e+00> : vector<8x16xf32>
    %567 = tpu.matmul %565, %566, %cst_203 {dimension_numbers = #tpu.dot_dimension_numbers<[1], [0], [0], [1], [0, 0, 1, 1], [], []>} : vector<8x8xbf16>, vector<8x16xbf16>, vector<8x16xf32> -> vector<8x16xf32>
    %568 = vector.extract_strided_slice %519 {offsets = [0, 32], sizes = [8, 16], strides = [1, 1]} : vector<8x128xf32> to vector<8x16xf32>
    %569 = vector.extract_strided_slice %527 {offsets = [0, 32], sizes = [8, 16], strides = [1, 1]} : vector<8x256xf32> to vector<8x16xf32>
    %570 = vector.extract_strided_slice %527 {offsets = [0, 160], sizes = [8, 16], strides = [1, 1]} : vector<8x256xf32> to vector<8x16xf32>
    %571 = arith.truncf %568 : vector<8x16xf32> to vector<8x16xbf16>
    %572 = tpu.transpose %569, [1, 0] : vector<8x16xf32> -> vector<16x8xf32>
    %573 = arith.truncf %572 : vector<16x8xf32> to vector<16x8xbf16>
    %cst_204 = arith.constant dense<0.000000e+00> : vector<8x8xf32>
    %574 = tpu.matmul %571, %573, %cst_204 {dimension_numbers = #tpu.dot_dimension_numbers<[1], [0], [0], [1], [0, 0, 1, 1], [], []>} : vector<8x16xbf16>, vector<16x8xbf16>, vector<8x8xf32> -> vector<8x8xf32>
    %cst_205 = arith.constant dense<0xFF800000> : vector<8xf32>
    %575 = vector.multi_reduction <maximumf>, %574, %cst_205 [1] : vector<8x8xf32> to vector<8xf32>
    %576 = vector.shape_cast %575 : vector<8xf32> to vector<8x1xf32>
    %577 = vector.broadcast %576 : vector<8x1xf32> to vector<8x8xf32>
    %578 = arith.subf %574, %577 : vector<8x8xf32>
    %579 = math.exp %578 : vector<8x8xf32>
    %cst_206 = arith.constant dense<0.000000e+00> : vector<8xf32>
    %580 = vector.multi_reduction <add>, %579, %cst_206 [1] : vector<8x8xf32> to vector<8xf32>
    %581 = vector.shape_cast %580 : vector<8xf32> to vector<8x1xf32>
    %582 = tpu.reciprocal %581 {approx = true} : vector<8x1xf32> -> vector<8x1xf32>
    %583 = vector.broadcast %582 : vector<8x1xf32> to vector<8x8xf32>
    %584 = arith.mulf %579, %583 : vector<8x8xf32>
    %585 = arith.truncf %584 : vector<8x8xf32> to vector<8x8xbf16>
    %586 = arith.truncf %570 : vector<8x16xf32> to vector<8x16xbf16>
    %cst_207 = arith.constant dense<0.000000e+00> : vector<8x16xf32>
    %587 = tpu.matmul %585, %586, %cst_207 {dimension_numbers = #tpu.dot_dimension_numbers<[1], [0], [0], [1], [0, 0, 1, 1], [], []>} : vector<8x8xbf16>, vector<8x16xbf16>, vector<8x16xf32> -> vector<8x16xf32>
    %588 = vector.extract_strided_slice %519 {offsets = [0, 48], sizes = [8, 16], strides = [1, 1]} : vector<8x128xf32> to vector<8x16xf32>
    %589 = vector.extract_strided_slice %527 {offsets = [0, 48], sizes = [8, 16], strides = [1, 1]} : vector<8x256xf32> to vector<8x16xf32>
    %590 = vector.extract_strided_slice %527 {offsets = [0, 176], sizes = [8, 16], strides = [1, 1]} : vector<8x256xf32> to vector<8x16xf32>
    %591 = arith.truncf %588 : vector<8x16xf32> to vector<8x16xbf16>
    %592 = tpu.transpose %589, [1, 0] : vector<8x16xf32> -> vector<16x8xf32>
    %593 = arith.truncf %592 : vector<16x8xf32> to vector<16x8xbf16>
    %cst_208 = arith.constant dense<0.000000e+00> : vector<8x8xf32>
    %594 = tpu.matmul %591, %593, %cst_208 {dimension_numbers = #tpu.dot_dimension_numbers<[1], [0], [0], [1], [0, 0, 1, 1], [], []>} : vector<8x16xbf16>, vector<16x8xbf16>, vector<8x8xf32> -> vector<8x8xf32>
    %cst_209 = arith.constant dense<0xFF800000> : vector<8xf32>
    %595 = vector.multi_reduction <maximumf>, %594, %cst_209 [1] : vector<8x8xf32> to vector<8xf32>
    %596 = vector.shape_cast %595 : vector<8xf32> to vector<8x1xf32>
    %597 = vector.broadcast %596 : vector<8x1xf32> to vector<8x8xf32>
    %598 = arith.subf %594, %597 : vector<8x8xf32>
    %599 = math.exp %598 : vector<8x8xf32>
    %cst_210 = arith.constant dense<0.000000e+00> : vector<8xf32>
    %600 = vector.multi_reduction <add>, %599, %cst_210 [1] : vector<8x8xf32> to vector<8xf32>
    %601 = vector.shape_cast %600 : vector<8xf32> to vector<8x1xf32>
    %602 = tpu.reciprocal %601 {approx = true} : vector<8x1xf32> -> vector<8x1xf32>
    %603 = vector.broadcast %602 : vector<8x1xf32> to vector<8x8xf32>
    %604 = arith.mulf %599, %603 : vector<8x8xf32>
    %605 = arith.truncf %604 : vector<8x8xf32> to vector<8x8xbf16>
    %606 = arith.truncf %590 : vector<8x16xf32> to vector<8x16xbf16>
    %cst_211 = arith.constant dense<0.000000e+00> : vector<8x16xf32>
    %607 = tpu.matmul %605, %606, %cst_211 {dimension_numbers = #tpu.dot_dimension_numbers<[1], [0], [0], [1], [0, 0, 1, 1], [], []>} : vector<8x8xbf16>, vector<8x16xbf16>, vector<8x16xf32> -> vector<8x16xf32>
    %608 = vector.extract_strided_slice %519 {offsets = [0, 64], sizes = [8, 16], strides = [1, 1]} : vector<8x128xf32> to vector<8x16xf32>
    %609 = vector.extract_strided_slice %527 {offsets = [0, 64], sizes = [8, 16], strides = [1, 1]} : vector<8x256xf32> to vector<8x16xf32>
    %610 = vector.extract_strided_slice %527 {offsets = [0, 192], sizes = [8, 16], strides = [1, 1]} : vector<8x256xf32> to vector<8x16xf32>
    %611 = arith.truncf %608 : vector<8x16xf32> to vector<8x16xbf16>
    %612 = tpu.transpose %609, [1, 0] : vector<8x16xf32> -> vector<16x8xf32>
    %613 = arith.truncf %612 : vector<16x8xf32> to vector<16x8xbf16>
    %cst_212 = arith.constant dense<0.000000e+00> : vector<8x8xf32>
    %614 = tpu.matmul %611, %613, %cst_212 {dimension_numbers = #tpu.dot_dimension_numbers<[1], [0], [0], [1], [0, 0, 1, 1], [], []>} : vector<8x16xbf16>, vector<16x8xbf16>, vector<8x8xf32> -> vector<8x8xf32>
    %cst_213 = arith.constant dense<0xFF800000> : vector<8xf32>
    %615 = vector.multi_reduction <maximumf>, %614, %cst_213 [1] : vector<8x8xf32> to vector<8xf32>
    %616 = vector.shape_cast %615 : vector<8xf32> to vector<8x1xf32>
    %617 = vector.broadcast %616 : vector<8x1xf32> to vector<8x8xf32>
    %618 = arith.subf %614, %617 : vector<8x8xf32>
    %619 = math.exp %618 : vector<8x8xf32>
    %cst_214 = arith.constant dense<0.000000e+00> : vector<8xf32>
    %620 = vector.multi_reduction <add>, %619, %cst_214 [1] : vector<8x8xf32> to vector<8xf32>
    %621 = vector.shape_cast %620 : vector<8xf32> to vector<8x1xf32>
    %622 = tpu.reciprocal %621 {approx = true} : vector<8x1xf32> -> vector<8x1xf32>
    %623 = vector.broadcast %622 : vector<8x1xf32> to vector<8x8xf32>
    %624 = arith.mulf %619, %623 : vector<8x8xf32>
    %625 = arith.truncf %624 : vector<8x8xf32> to vector<8x8xbf16>
    %626 = arith.truncf %610 : vector<8x16xf32> to vector<8x16xbf16>
    %cst_215 = arith.constant dense<0.000000e+00> : vector<8x16xf32>
    %627 = tpu.matmul %625, %626, %cst_215 {dimension_numbers = #tpu.dot_dimension_numbers<[1], [0], [0], [1], [0, 0, 1, 1], [], []>} : vector<8x8xbf16>, vector<8x16xbf16>, vector<8x16xf32> -> vector<8x16xf32>
    %628 = vector.extract_strided_slice %519 {offsets = [0, 80], sizes = [8, 16], strides = [1, 1]} : vector<8x128xf32> to vector<8x16xf32>
    %629 = vector.extract_strided_slice %527 {offsets = [0, 80], sizes = [8, 16], strides = [1, 1]} : vector<8x256xf32> to vector<8x16xf32>
    %630 = vector.extract_strided_slice %527 {offsets = [0, 208], sizes = [8, 16], strides = [1, 1]} : vector<8x256xf32> to vector<8x16xf32>
    %631 = arith.truncf %628 : vector<8x16xf32> to vector<8x16xbf16>
    %632 = tpu.transpose %629, [1, 0] : vector<8x16xf32> -> vector<16x8xf32>
    %633 = arith.truncf %632 : vector<16x8xf32> to vector<16x8xbf16>
    %cst_216 = arith.constant dense<0.000000e+00> : vector<8x8xf32>
    %634 = tpu.matmul %631, %633, %cst_216 {dimension_numbers = #tpu.dot_dimension_numbers<[1], [0], [0], [1], [0, 0, 1, 1], [], []>} : vector<8x16xbf16>, vector<16x8xbf16>, vector<8x8xf32> -> vector<8x8xf32>
    %cst_217 = arith.constant dense<0xFF800000> : vector<8xf32>
    %635 = vector.multi_reduction <maximumf>, %634, %cst_217 [1] : vector<8x8xf32> to vector<8xf32>
    %636 = vector.shape_cast %635 : vector<8xf32> to vector<8x1xf32>
    %637 = vector.broadcast %636 : vector<8x1xf32> to vector<8x8xf32>
    %638 = arith.subf %634, %637 : vector<8x8xf32>
    %639 = math.exp %638 : vector<8x8xf32>
    %cst_218 = arith.constant dense<0.000000e+00> : vector<8xf32>
    %640 = vector.multi_reduction <add>, %639, %cst_218 [1] : vector<8x8xf32> to vector<8xf32>
    %641 = vector.shape_cast %640 : vector<8xf32> to vector<8x1xf32>
    %642 = tpu.reciprocal %641 {approx = true} : vector<8x1xf32> -> vector<8x1xf32>
    %643 = vector.broadcast %642 : vector<8x1xf32> to vector<8x8xf32>
    %644 = arith.mulf %639, %643 : vector<8x8xf32>
    %645 = arith.truncf %644 : vector<8x8xf32> to vector<8x8xbf16>
    %646 = arith.truncf %630 : vector<8x16xf32> to vector<8x16xbf16>
    %cst_219 = arith.constant dense<0.000000e+00> : vector<8x16xf32>
    %647 = tpu.matmul %645, %646, %cst_219 {dimension_numbers = #tpu.dot_dimension_numbers<[1], [0], [0], [1], [0, 0, 1, 1], [], []>} : vector<8x8xbf16>, vector<8x16xbf16>, vector<8x16xf32> -> vector<8x16xf32>
    %648 = vector.extract_strided_slice %519 {offsets = [0, 96], sizes = [8, 16], strides = [1, 1]} : vector<8x128xf32> to vector<8x16xf32>
    %649 = vector.extract_strided_slice %527 {offsets = [0, 96], sizes = [8, 16], strides = [1, 1]} : vector<8x256xf32> to vector<8x16xf32>
    %650 = vector.extract_strided_slice %527 {offsets = [0, 224], sizes = [8, 16], strides = [1, 1]} : vector<8x256xf32> to vector<8x16xf32>
    %651 = arith.truncf %648 : vector<8x16xf32> to vector<8x16xbf16>
    %652 = tpu.transpose %649, [1, 0] : vector<8x16xf32> -> vector<16x8xf32>
    %653 = arith.truncf %652 : vector<16x8xf32> to vector<16x8xbf16>
    %cst_220 = arith.constant dense<0.000000e+00> : vector<8x8xf32>
    %654 = tpu.matmul %651, %653, %cst_220 {dimension_numbers = #tpu.dot_dimension_numbers<[1], [0], [0], [1], [0, 0, 1, 1], [], []>} : vector<8x16xbf16>, vector<16x8xbf16>, vector<8x8xf32> -> vector<8x8xf32>
    %cst_221 = arith.constant dense<0xFF800000> : vector<8xf32>
    %655 = vector.multi_reduction <maximumf>, %654, %cst_221 [1] : vector<8x8xf32> to vector<8xf32>
    %656 = vector.shape_cast %655 : vector<8xf32> to vector<8x1xf32>
    %657 = vector.broadcast %656 : vector<8x1xf32> to vector<8x8xf32>
    %658 = arith.subf %654, %657 : vector<8x8xf32>
    %659 = math.exp %658 : vector<8x8xf32>
    %cst_222 = arith.constant dense<0.000000e+00> : vector<8xf32>
    %660 = vector.multi_reduction <add>, %659, %cst_222 [1] : vector<8x8xf32> to vector<8xf32>
    %661 = vector.shape_cast %660 : vector<8xf32> to vector<8x1xf32>
    %662 = tpu.reciprocal %661 {approx = true} : vector<8x1xf32> -> vector<8x1xf32>
    %663 = vector.broadcast %662 : vector<8x1xf32> to vector<8x8xf32>
    %664 = arith.mulf %659, %663 : vector<8x8xf32>
    %665 = arith.truncf %664 : vector<8x8xf32> to vector<8x8xbf16>
    %666 = arith.truncf %650 : vector<8x16xf32> to vector<8x16xbf16>
    %cst_223 = arith.constant dense<0.000000e+00> : vector<8x16xf32>
    %667 = tpu.matmul %665, %666, %cst_223 {dimension_numbers = #tpu.dot_dimension_numbers<[1], [0], [0], [1], [0, 0, 1, 1], [], []>} : vector<8x8xbf16>, vector<8x16xbf16>, vector<8x16xf32> -> vector<8x16xf32>
    %668 = vector.extract_strided_slice %519 {offsets = [0, 112], sizes = [8, 16], strides = [1, 1]} : vector<8x128xf32> to vector<8x16xf32>
    %669 = vector.extract_strided_slice %527 {offsets = [0, 112], sizes = [8, 16], strides = [1, 1]} : vector<8x256xf32> to vector<8x16xf32>
    %670 = vector.extract_strided_slice %527 {offsets = [0, 240], sizes = [8, 16], strides = [1, 1]} : vector<8x256xf32> to vector<8x16xf32>
    %671 = arith.truncf %668 : vector<8x16xf32> to vector<8x16xbf16>
    %672 = tpu.transpose %669, [1, 0] : vector<8x16xf32> -> vector<16x8xf32>
    %673 = arith.truncf %672 : vector<16x8xf32> to vector<16x8xbf16>
    %cst_224 = arith.constant dense<0.000000e+00> : vector<8x8xf32>
    %674 = tpu.matmul %671, %673, %cst_224 {dimension_numbers = #tpu.dot_dimension_numbers<[1], [0], [0], [1], [0, 0, 1, 1], [], []>} : vector<8x16xbf16>, vector<16x8xbf16>, vector<8x8xf32> -> vector<8x8xf32>
    %cst_225 = arith.constant dense<0xFF800000> : vector<8xf32>
    %675 = vector.multi_reduction <maximumf>, %674, %cst_225 [1] : vector<8x8xf32> to vector<8xf32>
    %676 = vector.shape_cast %675 : vector<8xf32> to vector<8x1xf32>
    %677 = vector.broadcast %676 : vector<8x1xf32> to vector<8x8xf32>
    %678 = arith.subf %674, %677 : vector<8x8xf32>
    %679 = math.exp %678 : vector<8x8xf32>
    %cst_226 = arith.constant dense<0.000000e+00> : vector<8xf32>
    %680 = vector.multi_reduction <add>, %679, %cst_226 [1] : vector<8x8xf32> to vector<8xf32>
    %681 = vector.shape_cast %680 : vector<8xf32> to vector<8x1xf32>
    %682 = tpu.reciprocal %681 {approx = true} : vector<8x1xf32> -> vector<8x1xf32>
    %683 = vector.broadcast %682 : vector<8x1xf32> to vector<8x8xf32>
    %684 = arith.mulf %679, %683 : vector<8x8xf32>
    %685 = arith.truncf %684 : vector<8x8xf32> to vector<8x8xbf16>
    %686 = arith.truncf %670 : vector<8x16xf32> to vector<8x16xbf16>
    %cst_227 = arith.constant dense<0.000000e+00> : vector<8x16xf32>
    %687 = tpu.matmul %685, %686, %cst_227 {dimension_numbers = #tpu.dot_dimension_numbers<[1], [0], [0], [1], [0, 0, 1, 1], [], []>} : vector<8x8xbf16>, vector<8x16xbf16>, vector<8x16xf32> -> vector<8x16xf32>
    %688 = tpu.concatenate %547, %567, %587, %607, %627, %647, %667, %687 in 1 : vector<8x16xf32>, vector<8x16xf32>, vector<8x16xf32>, vector<8x16xf32>, vector<8x16xf32>, vector<8x16xf32>, vector<8x16xf32>, vector<8x16xf32> -> vector<8x128xf32>
    %c2_228 = arith.constant 2 : index
    %c0_229 = arith.constant 0 : index
    %c0_230 = arith.constant 0 : index
    %689 = vector.load %arg7[%c2_228, %c0_229, %c0_230] : memref<4x128x128xbf16, #tpu.memory_space<vmem>>, vector<1x128x128xbf16>
    %690 = vector.shape_cast %689 : vector<1x128x128xbf16> to vector<128x128xbf16>
    %691 = arith.truncf %688 : vector<8x128xf32> to vector<8x128xbf16>
    %cst_231 = arith.constant dense<0.000000e+00> : vector<8x128xf32>
    %692 = tpu.matmul %691, %690, %cst_231 {dimension_numbers = #tpu.dot_dimension_numbers<[1], [0], [0], [1], [0, 0, 1, 1], [], []>} : vector<8x128xbf16>, vector<128x128xbf16>, vector<8x128xf32> -> vector<8x128xf32>
    %c2_232 = arith.constant 2 : index
    %c0_233 = arith.constant 0 : index
    %c0_234 = arith.constant 0 : index
    %693 = vector.load %arg8[%c2_232, %c0_233, %c0_234] : memref<4x1x128xf32, #tpu.memory_space<vmem>>, vector<1x1x128xf32>
    %694 = vector.shape_cast %693 : vector<1x1x128xf32> to vector<1x128xf32>
    %695 = vector.broadcast %694 : vector<1x128xf32> to vector<8x128xf32>
    %696 = arith.addf %692, %695 : vector<8x128xf32>
    %697 = arith.addf %696, %511 : vector<8x128xf32>
    %c2_235 = arith.constant 2 : index
    %c0_236 = arith.constant 0 : index
    %c0_237 = arith.constant 0 : index
    %698 = vector.load %arg9[%c2_235, %c0_236, %c0_237] : memref<4x1x128xf32, #tpu.memory_space<vmem>>, vector<1x1x128xf32>
    %699 = vector.shape_cast %698 : vector<1x1x128xf32> to vector<1x128xf32>
    %c2_238 = arith.constant 2 : index
    %c0_239 = arith.constant 0 : index
    %c0_240 = arith.constant 0 : index
    %700 = vector.load %arg10[%c2_238, %c0_239, %c0_240] : memref<4x1x128xf32, #tpu.memory_space<vmem>>, vector<1x1x128xf32>
    %701 = vector.shape_cast %700 : vector<1x1x128xf32> to vector<1x128xf32>
    %cst_241 = arith.constant dense<0.000000e+00> : vector<8xf32>
    %702 = vector.multi_reduction <add>, %697, %cst_241 [1] : vector<8x128xf32> to vector<8xf32>
    %703 = vector.shape_cast %702 : vector<8xf32> to vector<8x1xf32>
    %cst_242 = arith.constant 1.280000e+02 : f32
    %704 = vector.broadcast %cst_242 : f32 to vector<8x1xf32>
    %705 = arith.divf %703, %704 : vector<8x1xf32>
    %706 = vector.broadcast %705 : vector<8x1xf32> to vector<8x128xf32>
    %707 = arith.subf %697, %706 : vector<8x128xf32>
    %708 = arith.mulf %707, %707 : vector<8x128xf32>
    %cst_243 = arith.constant dense<0.000000e+00> : vector<8xf32>
    %709 = vector.multi_reduction <add>, %708, %cst_243 [1] : vector<8x128xf32> to vector<8xf32>
    %710 = vector.shape_cast %709 : vector<8xf32> to vector<8x1xf32>
    %cst_244 = arith.constant 1.280000e+02 : f32
    %711 = vector.broadcast %cst_244 : f32 to vector<8x1xf32>
    %712 = arith.divf %710, %711 : vector<8x1xf32>
    %cst_245 = arith.constant 9.99999974E-6 : f32
    %713 = vector.broadcast %cst_245 : f32 to vector<8x1xf32>
    %714 = arith.addf %712, %713 : vector<8x1xf32>
    %715 = math.rsqrt %714 : vector<8x1xf32>
    %716 = vector.broadcast %715 : vector<8x1xf32> to vector<8x128xf32>
    %717 = arith.mulf %707, %716 : vector<8x128xf32>
    %718 = vector.broadcast %699 : vector<1x128xf32> to vector<8x128xf32>
    %719 = arith.mulf %717, %718 : vector<8x128xf32>
    %720 = vector.broadcast %701 : vector<1x128xf32> to vector<8x128xf32>
    %721 = arith.addf %719, %720 : vector<8x128xf32>
    %c2_246 = arith.constant 2 : index
    %c0_247 = arith.constant 0 : index
    %c0_248 = arith.constant 0 : index
    %722 = vector.load %arg11[%c2_246, %c0_247, %c0_248] : memref<4x128x256xbf16, #tpu.memory_space<vmem>>, vector<1x128x256xbf16>
    %723 = vector.shape_cast %722 : vector<1x128x256xbf16> to vector<128x256xbf16>
    %724 = arith.truncf %721 : vector<8x128xf32> to vector<8x128xbf16>
    %cst_249 = arith.constant dense<0.000000e+00> : vector<8x256xf32>
    %725 = tpu.matmul %724, %723, %cst_249 {dimension_numbers = #tpu.dot_dimension_numbers<[1], [0], [0], [1], [0, 0, 1, 1], [], []>} : vector<8x128xbf16>, vector<128x256xbf16>, vector<8x256xf32> -> vector<8x256xf32>
    %c2_250 = arith.constant 2 : index
    %c0_251 = arith.constant 0 : index
    %c0_252 = arith.constant 0 : index
    %726 = vector.load %arg12[%c2_250, %c0_251, %c0_252] : memref<4x1x256xf32, #tpu.memory_space<vmem>>, vector<1x1x256xf32>
    %727 = vector.shape_cast %726 : vector<1x1x256xf32> to vector<1x256xf32>
    %728 = vector.broadcast %727 : vector<1x256xf32> to vector<8x256xf32>
    %729 = arith.addf %725, %728 : vector<8x256xf32>
    %cst_253 = arith.constant 0.000000e+00 : f32
    %730 = vector.broadcast %cst_253 : f32 to vector<8x256xf32>
    %731 = arith.maximumf %729, %730 : vector<8x256xf32>
    %c2_254 = arith.constant 2 : index
    %c0_255 = arith.constant 0 : index
    %c0_256 = arith.constant 0 : index
    %732 = vector.load %arg13[%c2_254, %c0_255, %c0_256] : memref<4x256x128xbf16, #tpu.memory_space<vmem>>, vector<1x256x128xbf16>
    %733 = vector.shape_cast %732 : vector<1x256x128xbf16> to vector<256x128xbf16>
    %734 = arith.truncf %731 : vector<8x256xf32> to vector<8x256xbf16>
    %cst_257 = arith.constant dense<0.000000e+00> : vector<8x128xf32>
    %735 = tpu.matmul %734, %733, %cst_257 {dimension_numbers = #tpu.dot_dimension_numbers<[1], [0], [0], [1], [0, 0, 1, 1], [], []>} : vector<8x256xbf16>, vector<256x128xbf16>, vector<8x128xf32> -> vector<8x128xf32>
    %c2_258 = arith.constant 2 : index
    %c0_259 = arith.constant 0 : index
    %c0_260 = arith.constant 0 : index
    %736 = vector.load %arg14[%c2_258, %c0_259, %c0_260] : memref<4x1x128xf32, #tpu.memory_space<vmem>>, vector<1x1x128xf32>
    %737 = vector.shape_cast %736 : vector<1x1x128xf32> to vector<1x128xf32>
    %738 = vector.broadcast %737 : vector<1x128xf32> to vector<8x128xf32>
    %739 = arith.addf %735, %738 : vector<8x128xf32>
    %cst_261 = arith.constant 0.000000e+00 : f32
    %740 = vector.broadcast %cst_261 : f32 to vector<8x128xf32>
    %741 = arith.maximumf %739, %740 : vector<8x128xf32>
    %742 = arith.addf %741, %721 : vector<8x128xf32>
    %c2_262 = arith.constant 2 : index
    %c0_263 = arith.constant 0 : index
    %c0_264 = arith.constant 0 : index
    %743 = vector.load %arg15[%c2_262, %c0_263, %c0_264] : memref<4x1x128xf32, #tpu.memory_space<vmem>>, vector<1x1x128xf32>
    %744 = vector.shape_cast %743 : vector<1x1x128xf32> to vector<1x128xf32>
    %c2_265 = arith.constant 2 : index
    %c0_266 = arith.constant 0 : index
    %c0_267 = arith.constant 0 : index
    %745 = vector.load %arg16[%c2_265, %c0_266, %c0_267] : memref<4x1x128xf32, #tpu.memory_space<vmem>>, vector<1x1x128xf32>
    %746 = vector.shape_cast %745 : vector<1x1x128xf32> to vector<1x128xf32>
    %cst_268 = arith.constant dense<0.000000e+00> : vector<8xf32>
    %747 = vector.multi_reduction <add>, %742, %cst_268 [1] : vector<8x128xf32> to vector<8xf32>
    %748 = vector.shape_cast %747 : vector<8xf32> to vector<8x1xf32>
    %cst_269 = arith.constant 1.280000e+02 : f32
    %749 = vector.broadcast %cst_269 : f32 to vector<8x1xf32>
    %750 = arith.divf %748, %749 : vector<8x1xf32>
    %751 = vector.broadcast %750 : vector<8x1xf32> to vector<8x128xf32>
    %752 = arith.subf %742, %751 : vector<8x128xf32>
    %753 = arith.mulf %752, %752 : vector<8x128xf32>
    %cst_270 = arith.constant dense<0.000000e+00> : vector<8xf32>
    %754 = vector.multi_reduction <add>, %753, %cst_270 [1] : vector<8x128xf32> to vector<8xf32>
    %755 = vector.shape_cast %754 : vector<8xf32> to vector<8x1xf32>
    %cst_271 = arith.constant 1.280000e+02 : f32
    %756 = vector.broadcast %cst_271 : f32 to vector<8x1xf32>
    %757 = arith.divf %755, %756 : vector<8x1xf32>
    %cst_272 = arith.constant 9.99999974E-6 : f32
    %758 = vector.broadcast %cst_272 : f32 to vector<8x1xf32>
    %759 = arith.addf %757, %758 : vector<8x1xf32>
    %760 = math.rsqrt %759 : vector<8x1xf32>
    %761 = vector.broadcast %760 : vector<8x1xf32> to vector<8x128xf32>
    %762 = arith.mulf %752, %761 : vector<8x128xf32>
    %763 = vector.broadcast %744 : vector<1x128xf32> to vector<8x128xf32>
    %764 = arith.mulf %762, %763 : vector<8x128xf32>
    %765 = vector.broadcast %746 : vector<1x128xf32> to vector<8x128xf32>
    %766 = arith.addf %764, %765 : vector<8x128xf32>
    %c3 = arith.constant 3 : index
    %c0_273 = arith.constant 0 : index
    %c0_274 = arith.constant 0 : index
    %767 = vector.load %arg3[%c3, %c0_273, %c0_274] : memref<4x128x128xbf16, #tpu.memory_space<vmem>>, vector<1x128x128xbf16>
    %768 = vector.shape_cast %767 : vector<1x128x128xbf16> to vector<128x128xbf16>
    %769 = arith.truncf %766 : vector<8x128xf32> to vector<8x128xbf16>
    %cst_275 = arith.constant dense<0.000000e+00> : vector<8x128xf32>
    %770 = tpu.matmul %769, %768, %cst_275 {dimension_numbers = #tpu.dot_dimension_numbers<[1], [0], [0], [1], [0, 0, 1, 1], [], []>} : vector<8x128xbf16>, vector<128x128xbf16>, vector<8x128xf32> -> vector<8x128xf32>
    %c3_276 = arith.constant 3 : index
    %c0_277 = arith.constant 0 : index
    %c0_278 = arith.constant 0 : index
    %771 = vector.load %arg4[%c3_276, %c0_277, %c0_278] : memref<4x1x128xf32, #tpu.memory_space<vmem>>, vector<1x1x128xf32>
    %772 = vector.shape_cast %771 : vector<1x1x128xf32> to vector<1x128xf32>
    %773 = vector.broadcast %772 : vector<1x128xf32> to vector<8x128xf32>
    %774 = arith.addf %770, %773 : vector<8x128xf32>
    %c3_279 = arith.constant 3 : index
    %c0_280 = arith.constant 0 : index
    %c0_281 = arith.constant 0 : index
    %775 = vector.load %arg5[%c3_279, %c0_280, %c0_281] : memref<4x128x256xbf16, #tpu.memory_space<vmem>>, vector<1x128x256xbf16>
    %776 = vector.shape_cast %775 : vector<1x128x256xbf16> to vector<128x256xbf16>
    %777 = arith.truncf %511 : vector<8x128xf32> to vector<8x128xbf16>
    %cst_282 = arith.constant dense<0.000000e+00> : vector<8x256xf32>
    %778 = tpu.matmul %777, %776, %cst_282 {dimension_numbers = #tpu.dot_dimension_numbers<[1], [0], [0], [1], [0, 0, 1, 1], [], []>} : vector<8x128xbf16>, vector<128x256xbf16>, vector<8x256xf32> -> vector<8x256xf32>
    %c3_283 = arith.constant 3 : index
    %c0_284 = arith.constant 0 : index
    %c0_285 = arith.constant 0 : index
    %779 = vector.load %arg6[%c3_283, %c0_284, %c0_285] : memref<4x1x256xf32, #tpu.memory_space<vmem>>, vector<1x1x256xf32>
    %780 = vector.shape_cast %779 : vector<1x1x256xf32> to vector<1x256xf32>
    %781 = vector.broadcast %780 : vector<1x256xf32> to vector<8x256xf32>
    %782 = arith.addf %778, %781 : vector<8x256xf32>
    %783 = vector.extract_strided_slice %774 {offsets = [0, 0], sizes = [8, 16], strides = [1, 1]} : vector<8x128xf32> to vector<8x16xf32>
    %784 = vector.extract_strided_slice %782 {offsets = [0, 0], sizes = [8, 16], strides = [1, 1]} : vector<8x256xf32> to vector<8x16xf32>
    %785 = vector.extract_strided_slice %782 {offsets = [0, 128], sizes = [8, 16], strides = [1, 1]} : vector<8x256xf32> to vector<8x16xf32>
    %786 = arith.truncf %783 : vector<8x16xf32> to vector<8x16xbf16>
    %787 = tpu.transpose %784, [1, 0] : vector<8x16xf32> -> vector<16x8xf32>
    %788 = arith.truncf %787 : vector<16x8xf32> to vector<16x8xbf16>
    %cst_286 = arith.constant dense<0.000000e+00> : vector<8x8xf32>
    %789 = tpu.matmul %786, %788, %cst_286 {dimension_numbers = #tpu.dot_dimension_numbers<[1], [0], [0], [1], [0, 0, 1, 1], [], []>} : vector<8x16xbf16>, vector<16x8xbf16>, vector<8x8xf32> -> vector<8x8xf32>
    %cst_287 = arith.constant dense<0xFF800000> : vector<8xf32>
    %790 = vector.multi_reduction <maximumf>, %789, %cst_287 [1] : vector<8x8xf32> to vector<8xf32>
    %791 = vector.shape_cast %790 : vector<8xf32> to vector<8x1xf32>
    %792 = vector.broadcast %791 : vector<8x1xf32> to vector<8x8xf32>
    %793 = arith.subf %789, %792 : vector<8x8xf32>
    %794 = math.exp %793 : vector<8x8xf32>
    %cst_288 = arith.constant dense<0.000000e+00> : vector<8xf32>
    %795 = vector.multi_reduction <add>, %794, %cst_288 [1] : vector<8x8xf32> to vector<8xf32>
    %796 = vector.shape_cast %795 : vector<8xf32> to vector<8x1xf32>
    %797 = tpu.reciprocal %796 {approx = true} : vector<8x1xf32> -> vector<8x1xf32>
    %798 = vector.broadcast %797 : vector<8x1xf32> to vector<8x8xf32>
    %799 = arith.mulf %794, %798 : vector<8x8xf32>
    %800 = arith.truncf %799 : vector<8x8xf32> to vector<8x8xbf16>
    %801 = arith.truncf %785 : vector<8x16xf32> to vector<8x16xbf16>
    %cst_289 = arith.constant dense<0.000000e+00> : vector<8x16xf32>
    %802 = tpu.matmul %800, %801, %cst_289 {dimension_numbers = #tpu.dot_dimension_numbers<[1], [0], [0], [1], [0, 0, 1, 1], [], []>} : vector<8x8xbf16>, vector<8x16xbf16>, vector<8x16xf32> -> vector<8x16xf32>
    %803 = vector.extract_strided_slice %774 {offsets = [0, 16], sizes = [8, 16], strides = [1, 1]} : vector<8x128xf32> to vector<8x16xf32>
    %804 = vector.extract_strided_slice %782 {offsets = [0, 16], sizes = [8, 16], strides = [1, 1]} : vector<8x256xf32> to vector<8x16xf32>
    %805 = vector.extract_strided_slice %782 {offsets = [0, 144], sizes = [8, 16], strides = [1, 1]} : vector<8x256xf32> to vector<8x16xf32>
    %806 = arith.truncf %803 : vector<8x16xf32> to vector<8x16xbf16>
    %807 = tpu.transpose %804, [1, 0] : vector<8x16xf32> -> vector<16x8xf32>
    %808 = arith.truncf %807 : vector<16x8xf32> to vector<16x8xbf16>
    %cst_290 = arith.constant dense<0.000000e+00> : vector<8x8xf32>
    %809 = tpu.matmul %806, %808, %cst_290 {dimension_numbers = #tpu.dot_dimension_numbers<[1], [0], [0], [1], [0, 0, 1, 1], [], []>} : vector<8x16xbf16>, vector<16x8xbf16>, vector<8x8xf32> -> vector<8x8xf32>
    %cst_291 = arith.constant dense<0xFF800000> : vector<8xf32>
    %810 = vector.multi_reduction <maximumf>, %809, %cst_291 [1] : vector<8x8xf32> to vector<8xf32>
    %811 = vector.shape_cast %810 : vector<8xf32> to vector<8x1xf32>
    %812 = vector.broadcast %811 : vector<8x1xf32> to vector<8x8xf32>
    %813 = arith.subf %809, %812 : vector<8x8xf32>
    %814 = math.exp %813 : vector<8x8xf32>
    %cst_292 = arith.constant dense<0.000000e+00> : vector<8xf32>
    %815 = vector.multi_reduction <add>, %814, %cst_292 [1] : vector<8x8xf32> to vector<8xf32>
    %816 = vector.shape_cast %815 : vector<8xf32> to vector<8x1xf32>
    %817 = tpu.reciprocal %816 {approx = true} : vector<8x1xf32> -> vector<8x1xf32>
    %818 = vector.broadcast %817 : vector<8x1xf32> to vector<8x8xf32>
    %819 = arith.mulf %814, %818 : vector<8x8xf32>
    %820 = arith.truncf %819 : vector<8x8xf32> to vector<8x8xbf16>
    %821 = arith.truncf %805 : vector<8x16xf32> to vector<8x16xbf16>
    %cst_293 = arith.constant dense<0.000000e+00> : vector<8x16xf32>
    %822 = tpu.matmul %820, %821, %cst_293 {dimension_numbers = #tpu.dot_dimension_numbers<[1], [0], [0], [1], [0, 0, 1, 1], [], []>} : vector<8x8xbf16>, vector<8x16xbf16>, vector<8x16xf32> -> vector<8x16xf32>
    %823 = vector.extract_strided_slice %774 {offsets = [0, 32], sizes = [8, 16], strides = [1, 1]} : vector<8x128xf32> to vector<8x16xf32>
    %824 = vector.extract_strided_slice %782 {offsets = [0, 32], sizes = [8, 16], strides = [1, 1]} : vector<8x256xf32> to vector<8x16xf32>
    %825 = vector.extract_strided_slice %782 {offsets = [0, 160], sizes = [8, 16], strides = [1, 1]} : vector<8x256xf32> to vector<8x16xf32>
    %826 = arith.truncf %823 : vector<8x16xf32> to vector<8x16xbf16>
    %827 = tpu.transpose %824, [1, 0] : vector<8x16xf32> -> vector<16x8xf32>
    %828 = arith.truncf %827 : vector<16x8xf32> to vector<16x8xbf16>
    %cst_294 = arith.constant dense<0.000000e+00> : vector<8x8xf32>
    %829 = tpu.matmul %826, %828, %cst_294 {dimension_numbers = #tpu.dot_dimension_numbers<[1], [0], [0], [1], [0, 0, 1, 1], [], []>} : vector<8x16xbf16>, vector<16x8xbf16>, vector<8x8xf32> -> vector<8x8xf32>
    %cst_295 = arith.constant dense<0xFF800000> : vector<8xf32>
    %830 = vector.multi_reduction <maximumf>, %829, %cst_295 [1] : vector<8x8xf32> to vector<8xf32>
    %831 = vector.shape_cast %830 : vector<8xf32> to vector<8x1xf32>
    %832 = vector.broadcast %831 : vector<8x1xf32> to vector<8x8xf32>
    %833 = arith.subf %829, %832 : vector<8x8xf32>
    %834 = math.exp %833 : vector<8x8xf32>
    %cst_296 = arith.constant dense<0.000000e+00> : vector<8xf32>
    %835 = vector.multi_reduction <add>, %834, %cst_296 [1] : vector<8x8xf32> to vector<8xf32>
    %836 = vector.shape_cast %835 : vector<8xf32> to vector<8x1xf32>
    %837 = tpu.reciprocal %836 {approx = true} : vector<8x1xf32> -> vector<8x1xf32>
    %838 = vector.broadcast %837 : vector<8x1xf32> to vector<8x8xf32>
    %839 = arith.mulf %834, %838 : vector<8x8xf32>
    %840 = arith.truncf %839 : vector<8x8xf32> to vector<8x8xbf16>
    %841 = arith.truncf %825 : vector<8x16xf32> to vector<8x16xbf16>
    %cst_297 = arith.constant dense<0.000000e+00> : vector<8x16xf32>
    %842 = tpu.matmul %840, %841, %cst_297 {dimension_numbers = #tpu.dot_dimension_numbers<[1], [0], [0], [1], [0, 0, 1, 1], [], []>} : vector<8x8xbf16>, vector<8x16xbf16>, vector<8x16xf32> -> vector<8x16xf32>
    %843 = vector.extract_strided_slice %774 {offsets = [0, 48], sizes = [8, 16], strides = [1, 1]} : vector<8x128xf32> to vector<8x16xf32>
    %844 = vector.extract_strided_slice %782 {offsets = [0, 48], sizes = [8, 16], strides = [1, 1]} : vector<8x256xf32> to vector<8x16xf32>
    %845 = vector.extract_strided_slice %782 {offsets = [0, 176], sizes = [8, 16], strides = [1, 1]} : vector<8x256xf32> to vector<8x16xf32>
    %846 = arith.truncf %843 : vector<8x16xf32> to vector<8x16xbf16>
    %847 = tpu.transpose %844, [1, 0] : vector<8x16xf32> -> vector<16x8xf32>
    %848 = arith.truncf %847 : vector<16x8xf32> to vector<16x8xbf16>
    %cst_298 = arith.constant dense<0.000000e+00> : vector<8x8xf32>
    %849 = tpu.matmul %846, %848, %cst_298 {dimension_numbers = #tpu.dot_dimension_numbers<[1], [0], [0], [1], [0, 0, 1, 1], [], []>} : vector<8x16xbf16>, vector<16x8xbf16>, vector<8x8xf32> -> vector<8x8xf32>
    %cst_299 = arith.constant dense<0xFF800000> : vector<8xf32>
    %850 = vector.multi_reduction <maximumf>, %849, %cst_299 [1] : vector<8x8xf32> to vector<8xf32>
    %851 = vector.shape_cast %850 : vector<8xf32> to vector<8x1xf32>
    %852 = vector.broadcast %851 : vector<8x1xf32> to vector<8x8xf32>
    %853 = arith.subf %849, %852 : vector<8x8xf32>
    %854 = math.exp %853 : vector<8x8xf32>
    %cst_300 = arith.constant dense<0.000000e+00> : vector<8xf32>
    %855 = vector.multi_reduction <add>, %854, %cst_300 [1] : vector<8x8xf32> to vector<8xf32>
    %856 = vector.shape_cast %855 : vector<8xf32> to vector<8x1xf32>
    %857 = tpu.reciprocal %856 {approx = true} : vector<8x1xf32> -> vector<8x1xf32>
    %858 = vector.broadcast %857 : vector<8x1xf32> to vector<8x8xf32>
    %859 = arith.mulf %854, %858 : vector<8x8xf32>
    %860 = arith.truncf %859 : vector<8x8xf32> to vector<8x8xbf16>
    %861 = arith.truncf %845 : vector<8x16xf32> to vector<8x16xbf16>
    %cst_301 = arith.constant dense<0.000000e+00> : vector<8x16xf32>
    %862 = tpu.matmul %860, %861, %cst_301 {dimension_numbers = #tpu.dot_dimension_numbers<[1], [0], [0], [1], [0, 0, 1, 1], [], []>} : vector<8x8xbf16>, vector<8x16xbf16>, vector<8x16xf32> -> vector<8x16xf32>
    %863 = vector.extract_strided_slice %774 {offsets = [0, 64], sizes = [8, 16], strides = [1, 1]} : vector<8x128xf32> to vector<8x16xf32>
    %864 = vector.extract_strided_slice %782 {offsets = [0, 64], sizes = [8, 16], strides = [1, 1]} : vector<8x256xf32> to vector<8x16xf32>
    %865 = vector.extract_strided_slice %782 {offsets = [0, 192], sizes = [8, 16], strides = [1, 1]} : vector<8x256xf32> to vector<8x16xf32>
    %866 = arith.truncf %863 : vector<8x16xf32> to vector<8x16xbf16>
    %867 = tpu.transpose %864, [1, 0] : vector<8x16xf32> -> vector<16x8xf32>
    %868 = arith.truncf %867 : vector<16x8xf32> to vector<16x8xbf16>
    %cst_302 = arith.constant dense<0.000000e+00> : vector<8x8xf32>
    %869 = tpu.matmul %866, %868, %cst_302 {dimension_numbers = #tpu.dot_dimension_numbers<[1], [0], [0], [1], [0, 0, 1, 1], [], []>} : vector<8x16xbf16>, vector<16x8xbf16>, vector<8x8xf32> -> vector<8x8xf32>
    %cst_303 = arith.constant dense<0xFF800000> : vector<8xf32>
    %870 = vector.multi_reduction <maximumf>, %869, %cst_303 [1] : vector<8x8xf32> to vector<8xf32>
    %871 = vector.shape_cast %870 : vector<8xf32> to vector<8x1xf32>
    %872 = vector.broadcast %871 : vector<8x1xf32> to vector<8x8xf32>
    %873 = arith.subf %869, %872 : vector<8x8xf32>
    %874 = math.exp %873 : vector<8x8xf32>
    %cst_304 = arith.constant dense<0.000000e+00> : vector<8xf32>
    %875 = vector.multi_reduction <add>, %874, %cst_304 [1] : vector<8x8xf32> to vector<8xf32>
    %876 = vector.shape_cast %875 : vector<8xf32> to vector<8x1xf32>
    %877 = tpu.reciprocal %876 {approx = true} : vector<8x1xf32> -> vector<8x1xf32>
    %878 = vector.broadcast %877 : vector<8x1xf32> to vector<8x8xf32>
    %879 = arith.mulf %874, %878 : vector<8x8xf32>
    %880 = arith.truncf %879 : vector<8x8xf32> to vector<8x8xbf16>
    %881 = arith.truncf %865 : vector<8x16xf32> to vector<8x16xbf16>
    %cst_305 = arith.constant dense<0.000000e+00> : vector<8x16xf32>
    %882 = tpu.matmul %880, %881, %cst_305 {dimension_numbers = #tpu.dot_dimension_numbers<[1], [0], [0], [1], [0, 0, 1, 1], [], []>} : vector<8x8xbf16>, vector<8x16xbf16>, vector<8x16xf32> -> vector<8x16xf32>
    %883 = vector.extract_strided_slice %774 {offsets = [0, 80], sizes = [8, 16], strides = [1, 1]} : vector<8x128xf32> to vector<8x16xf32>
    %884 = vector.extract_strided_slice %782 {offsets = [0, 80], sizes = [8, 16], strides = [1, 1]} : vector<8x256xf32> to vector<8x16xf32>
    %885 = vector.extract_strided_slice %782 {offsets = [0, 208], sizes = [8, 16], strides = [1, 1]} : vector<8x256xf32> to vector<8x16xf32>
    %886 = arith.truncf %883 : vector<8x16xf32> to vector<8x16xbf16>
    %887 = tpu.transpose %884, [1, 0] : vector<8x16xf32> -> vector<16x8xf32>
    %888 = arith.truncf %887 : vector<16x8xf32> to vector<16x8xbf16>
    %cst_306 = arith.constant dense<0.000000e+00> : vector<8x8xf32>
    %889 = tpu.matmul %886, %888, %cst_306 {dimension_numbers = #tpu.dot_dimension_numbers<[1], [0], [0], [1], [0, 0, 1, 1], [], []>} : vector<8x16xbf16>, vector<16x8xbf16>, vector<8x8xf32> -> vector<8x8xf32>
    %cst_307 = arith.constant dense<0xFF800000> : vector<8xf32>
    %890 = vector.multi_reduction <maximumf>, %889, %cst_307 [1] : vector<8x8xf32> to vector<8xf32>
    %891 = vector.shape_cast %890 : vector<8xf32> to vector<8x1xf32>
    %892 = vector.broadcast %891 : vector<8x1xf32> to vector<8x8xf32>
    %893 = arith.subf %889, %892 : vector<8x8xf32>
    %894 = math.exp %893 : vector<8x8xf32>
    %cst_308 = arith.constant dense<0.000000e+00> : vector<8xf32>
    %895 = vector.multi_reduction <add>, %894, %cst_308 [1] : vector<8x8xf32> to vector<8xf32>
    %896 = vector.shape_cast %895 : vector<8xf32> to vector<8x1xf32>
    %897 = tpu.reciprocal %896 {approx = true} : vector<8x1xf32> -> vector<8x1xf32>
    %898 = vector.broadcast %897 : vector<8x1xf32> to vector<8x8xf32>
    %899 = arith.mulf %894, %898 : vector<8x8xf32>
    %900 = arith.truncf %899 : vector<8x8xf32> to vector<8x8xbf16>
    %901 = arith.truncf %885 : vector<8x16xf32> to vector<8x16xbf16>
    %cst_309 = arith.constant dense<0.000000e+00> : vector<8x16xf32>
    %902 = tpu.matmul %900, %901, %cst_309 {dimension_numbers = #tpu.dot_dimension_numbers<[1], [0], [0], [1], [0, 0, 1, 1], [], []>} : vector<8x8xbf16>, vector<8x16xbf16>, vector<8x16xf32> -> vector<8x16xf32>
    %903 = vector.extract_strided_slice %774 {offsets = [0, 96], sizes = [8, 16], strides = [1, 1]} : vector<8x128xf32> to vector<8x16xf32>
    %904 = vector.extract_strided_slice %782 {offsets = [0, 96], sizes = [8, 16], strides = [1, 1]} : vector<8x256xf32> to vector<8x16xf32>
    %905 = vector.extract_strided_slice %782 {offsets = [0, 224], sizes = [8, 16], strides = [1, 1]} : vector<8x256xf32> to vector<8x16xf32>
    %906 = arith.truncf %903 : vector<8x16xf32> to vector<8x16xbf16>
    %907 = tpu.transpose %904, [1, 0] : vector<8x16xf32> -> vector<16x8xf32>
    %908 = arith.truncf %907 : vector<16x8xf32> to vector<16x8xbf16>
    %cst_310 = arith.constant dense<0.000000e+00> : vector<8x8xf32>
    %909 = tpu.matmul %906, %908, %cst_310 {dimension_numbers = #tpu.dot_dimension_numbers<[1], [0], [0], [1], [0, 0, 1, 1], [], []>} : vector<8x16xbf16>, vector<16x8xbf16>, vector<8x8xf32> -> vector<8x8xf32>
    %cst_311 = arith.constant dense<0xFF800000> : vector<8xf32>
    %910 = vector.multi_reduction <maximumf>, %909, %cst_311 [1] : vector<8x8xf32> to vector<8xf32>
    %911 = vector.shape_cast %910 : vector<8xf32> to vector<8x1xf32>
    %912 = vector.broadcast %911 : vector<8x1xf32> to vector<8x8xf32>
    %913 = arith.subf %909, %912 : vector<8x8xf32>
    %914 = math.exp %913 : vector<8x8xf32>
    %cst_312 = arith.constant dense<0.000000e+00> : vector<8xf32>
    %915 = vector.multi_reduction <add>, %914, %cst_312 [1] : vector<8x8xf32> to vector<8xf32>
    %916 = vector.shape_cast %915 : vector<8xf32> to vector<8x1xf32>
    %917 = tpu.reciprocal %916 {approx = true} : vector<8x1xf32> -> vector<8x1xf32>
    %918 = vector.broadcast %917 : vector<8x1xf32> to vector<8x8xf32>
    %919 = arith.mulf %914, %918 : vector<8x8xf32>
    %920 = arith.truncf %919 : vector<8x8xf32> to vector<8x8xbf16>
    %921 = arith.truncf %905 : vector<8x16xf32> to vector<8x16xbf16>
    %cst_313 = arith.constant dense<0.000000e+00> : vector<8x16xf32>
    %922 = tpu.matmul %920, %921, %cst_313 {dimension_numbers = #tpu.dot_dimension_numbers<[1], [0], [0], [1], [0, 0, 1, 1], [], []>} : vector<8x8xbf16>, vector<8x16xbf16>, vector<8x16xf32> -> vector<8x16xf32>
    %923 = vector.extract_strided_slice %774 {offsets = [0, 112], sizes = [8, 16], strides = [1, 1]} : vector<8x128xf32> to vector<8x16xf32>
    %924 = vector.extract_strided_slice %782 {offsets = [0, 112], sizes = [8, 16], strides = [1, 1]} : vector<8x256xf32> to vector<8x16xf32>
    %925 = vector.extract_strided_slice %782 {offsets = [0, 240], sizes = [8, 16], strides = [1, 1]} : vector<8x256xf32> to vector<8x16xf32>
    %926 = arith.truncf %923 : vector<8x16xf32> to vector<8x16xbf16>
    %927 = tpu.transpose %924, [1, 0] : vector<8x16xf32> -> vector<16x8xf32>
    %928 = arith.truncf %927 : vector<16x8xf32> to vector<16x8xbf16>
    %cst_314 = arith.constant dense<0.000000e+00> : vector<8x8xf32>
    %929 = tpu.matmul %926, %928, %cst_314 {dimension_numbers = #tpu.dot_dimension_numbers<[1], [0], [0], [1], [0, 0, 1, 1], [], []>} : vector<8x16xbf16>, vector<16x8xbf16>, vector<8x8xf32> -> vector<8x8xf32>
    %cst_315 = arith.constant dense<0xFF800000> : vector<8xf32>
    %930 = vector.multi_reduction <maximumf>, %929, %cst_315 [1] : vector<8x8xf32> to vector<8xf32>
    %931 = vector.shape_cast %930 : vector<8xf32> to vector<8x1xf32>
    %932 = vector.broadcast %931 : vector<8x1xf32> to vector<8x8xf32>
    %933 = arith.subf %929, %932 : vector<8x8xf32>
    %934 = math.exp %933 : vector<8x8xf32>
    %cst_316 = arith.constant dense<0.000000e+00> : vector<8xf32>
    %935 = vector.multi_reduction <add>, %934, %cst_316 [1] : vector<8x8xf32> to vector<8xf32>
    %936 = vector.shape_cast %935 : vector<8xf32> to vector<8x1xf32>
    %937 = tpu.reciprocal %936 {approx = true} : vector<8x1xf32> -> vector<8x1xf32>
    %938 = vector.broadcast %937 : vector<8x1xf32> to vector<8x8xf32>
    %939 = arith.mulf %934, %938 : vector<8x8xf32>
    %940 = arith.truncf %939 : vector<8x8xf32> to vector<8x8xbf16>
    %941 = arith.truncf %925 : vector<8x16xf32> to vector<8x16xbf16>
    %cst_317 = arith.constant dense<0.000000e+00> : vector<8x16xf32>
    %942 = tpu.matmul %940, %941, %cst_317 {dimension_numbers = #tpu.dot_dimension_numbers<[1], [0], [0], [1], [0, 0, 1, 1], [], []>} : vector<8x8xbf16>, vector<8x16xbf16>, vector<8x16xf32> -> vector<8x16xf32>
    %943 = tpu.concatenate %802, %822, %842, %862, %882, %902, %922, %942 in 1 : vector<8x16xf32>, vector<8x16xf32>, vector<8x16xf32>, vector<8x16xf32>, vector<8x16xf32>, vector<8x16xf32>, vector<8x16xf32>, vector<8x16xf32> -> vector<8x128xf32>
    %c3_318 = arith.constant 3 : index
    %c0_319 = arith.constant 0 : index
    %c0_320 = arith.constant 0 : index
    %944 = vector.load %arg7[%c3_318, %c0_319, %c0_320] : memref<4x128x128xbf16, #tpu.memory_space<vmem>>, vector<1x128x128xbf16>
    %945 = vector.shape_cast %944 : vector<1x128x128xbf16> to vector<128x128xbf16>
    %946 = arith.truncf %943 : vector<8x128xf32> to vector<8x128xbf16>
    %cst_321 = arith.constant dense<0.000000e+00> : vector<8x128xf32>
    %947 = tpu.matmul %946, %945, %cst_321 {dimension_numbers = #tpu.dot_dimension_numbers<[1], [0], [0], [1], [0, 0, 1, 1], [], []>} : vector<8x128xbf16>, vector<128x128xbf16>, vector<8x128xf32> -> vector<8x128xf32>
    %c3_322 = arith.constant 3 : index
    %c0_323 = arith.constant 0 : index
    %c0_324 = arith.constant 0 : index
    %948 = vector.load %arg8[%c3_322, %c0_323, %c0_324] : memref<4x1x128xf32, #tpu.memory_space<vmem>>, vector<1x1x128xf32>
    %949 = vector.shape_cast %948 : vector<1x1x128xf32> to vector<1x128xf32>
    %950 = vector.broadcast %949 : vector<1x128xf32> to vector<8x128xf32>
    %951 = arith.addf %947, %950 : vector<8x128xf32>
    %952 = arith.addf %951, %766 : vector<8x128xf32>
    %c3_325 = arith.constant 3 : index
    %c0_326 = arith.constant 0 : index
    %c0_327 = arith.constant 0 : index
    %953 = vector.load %arg9[%c3_325, %c0_326, %c0_327] : memref<4x1x128xf32, #tpu.memory_space<vmem>>, vector<1x1x128xf32>
    %954 = vector.shape_cast %953 : vector<1x1x128xf32> to vector<1x128xf32>
    %c3_328 = arith.constant 3 : index
    %c0_329 = arith.constant 0 : index
    %c0_330 = arith.constant 0 : index
    %955 = vector.load %arg10[%c3_328, %c0_329, %c0_330] : memref<4x1x128xf32, #tpu.memory_space<vmem>>, vector<1x1x128xf32>
    %956 = vector.shape_cast %955 : vector<1x1x128xf32> to vector<1x128xf32>
    %cst_331 = arith.constant dense<0.000000e+00> : vector<8xf32>
    %957 = vector.multi_reduction <add>, %952, %cst_331 [1] : vector<8x128xf32> to vector<8xf32>
    %958 = vector.shape_cast %957 : vector<8xf32> to vector<8x1xf32>
    %cst_332 = arith.constant 1.280000e+02 : f32
    %959 = vector.broadcast %cst_332 : f32 to vector<8x1xf32>
    %960 = arith.divf %958, %959 : vector<8x1xf32>
    %961 = vector.broadcast %960 : vector<8x1xf32> to vector<8x128xf32>
    %962 = arith.subf %952, %961 : vector<8x128xf32>
    %963 = arith.mulf %962, %962 : vector<8x128xf32>
    %cst_333 = arith.constant dense<0.000000e+00> : vector<8xf32>
    %964 = vector.multi_reduction <add>, %963, %cst_333 [1] : vector<8x128xf32> to vector<8xf32>
    %965 = vector.shape_cast %964 : vector<8xf32> to vector<8x1xf32>
    %cst_334 = arith.constant 1.280000e+02 : f32
    %966 = vector.broadcast %cst_334 : f32 to vector<8x1xf32>
    %967 = arith.divf %965, %966 : vector<8x1xf32>
    %cst_335 = arith.constant 9.99999974E-6 : f32
    %968 = vector.broadcast %cst_335 : f32 to vector<8x1xf32>
    %969 = arith.addf %967, %968 : vector<8x1xf32>
    %970 = math.rsqrt %969 : vector<8x1xf32>
    %971 = vector.broadcast %970 : vector<8x1xf32> to vector<8x128xf32>
    %972 = arith.mulf %962, %971 : vector<8x128xf32>
    %973 = vector.broadcast %954 : vector<1x128xf32> to vector<8x128xf32>
    %974 = arith.mulf %972, %973 : vector<8x128xf32>
    %975 = vector.broadcast %956 : vector<1x128xf32> to vector<8x128xf32>
    %976 = arith.addf %974, %975 : vector<8x128xf32>
    %c3_336 = arith.constant 3 : index
    %c0_337 = arith.constant 0 : index
    %c0_338 = arith.constant 0 : index
    %977 = vector.load %arg11[%c3_336, %c0_337, %c0_338] : memref<4x128x256xbf16, #tpu.memory_space<vmem>>, vector<1x128x256xbf16>
    %978 = vector.shape_cast %977 : vector<1x128x256xbf16> to vector<128x256xbf16>
    %979 = arith.truncf %976 : vector<8x128xf32> to vector<8x128xbf16>
    %cst_339 = arith.constant dense<0.000000e+00> : vector<8x256xf32>
    %980 = tpu.matmul %979, %978, %cst_339 {dimension_numbers = #tpu.dot_dimension_numbers<[1], [0], [0], [1], [0, 0, 1, 1], [], []>} : vector<8x128xbf16>, vector<128x256xbf16>, vector<8x256xf32> -> vector<8x256xf32>
    %c3_340 = arith.constant 3 : index
    %c0_341 = arith.constant 0 : index
    %c0_342 = arith.constant 0 : index
    %981 = vector.load %arg12[%c3_340, %c0_341, %c0_342] : memref<4x1x256xf32, #tpu.memory_space<vmem>>, vector<1x1x256xf32>
    %982 = vector.shape_cast %981 : vector<1x1x256xf32> to vector<1x256xf32>
    %983 = vector.broadcast %982 : vector<1x256xf32> to vector<8x256xf32>
    %984 = arith.addf %980, %983 : vector<8x256xf32>
    %cst_343 = arith.constant 0.000000e+00 : f32
    %985 = vector.broadcast %cst_343 : f32 to vector<8x256xf32>
    %986 = arith.maximumf %984, %985 : vector<8x256xf32>
    %c3_344 = arith.constant 3 : index
    %c0_345 = arith.constant 0 : index
    %c0_346 = arith.constant 0 : index
    %987 = vector.load %arg13[%c3_344, %c0_345, %c0_346] : memref<4x256x128xbf16, #tpu.memory_space<vmem>>, vector<1x256x128xbf16>
    %988 = vector.shape_cast %987 : vector<1x256x128xbf16> to vector<256x128xbf16>
    %989 = arith.truncf %986 : vector<8x256xf32> to vector<8x256xbf16>
    %cst_347 = arith.constant dense<0.000000e+00> : vector<8x128xf32>
    %990 = tpu.matmul %989, %988, %cst_347 {dimension_numbers = #tpu.dot_dimension_numbers<[1], [0], [0], [1], [0, 0, 1, 1], [], []>} : vector<8x256xbf16>, vector<256x128xbf16>, vector<8x128xf32> -> vector<8x128xf32>
    %c3_348 = arith.constant 3 : index
    %c0_349 = arith.constant 0 : index
    %c0_350 = arith.constant 0 : index
    %991 = vector.load %arg14[%c3_348, %c0_349, %c0_350] : memref<4x1x128xf32, #tpu.memory_space<vmem>>, vector<1x1x128xf32>
    %992 = vector.shape_cast %991 : vector<1x1x128xf32> to vector<1x128xf32>
    %993 = vector.broadcast %992 : vector<1x128xf32> to vector<8x128xf32>
    %994 = arith.addf %990, %993 : vector<8x128xf32>
    %cst_351 = arith.constant 0.000000e+00 : f32
    %995 = vector.broadcast %cst_351 : f32 to vector<8x128xf32>
    %996 = arith.maximumf %994, %995 : vector<8x128xf32>
    %997 = arith.addf %996, %976 : vector<8x128xf32>
    %c3_352 = arith.constant 3 : index
    %c0_353 = arith.constant 0 : index
    %c0_354 = arith.constant 0 : index
    %998 = vector.load %arg15[%c3_352, %c0_353, %c0_354] : memref<4x1x128xf32, #tpu.memory_space<vmem>>, vector<1x1x128xf32>
    %999 = vector.shape_cast %998 : vector<1x1x128xf32> to vector<1x128xf32>
    %c3_355 = arith.constant 3 : index
    %c0_356 = arith.constant 0 : index
    %c0_357 = arith.constant 0 : index
    %1000 = vector.load %arg16[%c3_355, %c0_356, %c0_357] : memref<4x1x128xf32, #tpu.memory_space<vmem>>, vector<1x1x128xf32>
    %1001 = vector.shape_cast %1000 : vector<1x1x128xf32> to vector<1x128xf32>
    %cst_358 = arith.constant dense<0.000000e+00> : vector<8xf32>
    %1002 = vector.multi_reduction <add>, %997, %cst_358 [1] : vector<8x128xf32> to vector<8xf32>
    %1003 = vector.shape_cast %1002 : vector<8xf32> to vector<8x1xf32>
    %cst_359 = arith.constant 1.280000e+02 : f32
    %1004 = vector.broadcast %cst_359 : f32 to vector<8x1xf32>
    %1005 = arith.divf %1003, %1004 : vector<8x1xf32>
    %1006 = vector.broadcast %1005 : vector<8x1xf32> to vector<8x128xf32>
    %1007 = arith.subf %997, %1006 : vector<8x128xf32>
    %1008 = arith.mulf %1007, %1007 : vector<8x128xf32>
    %cst_360 = arith.constant dense<0.000000e+00> : vector<8xf32>
    %1009 = vector.multi_reduction <add>, %1008, %cst_360 [1] : vector<8x128xf32> to vector<8xf32>
    %1010 = vector.shape_cast %1009 : vector<8xf32> to vector<8x1xf32>
    %cst_361 = arith.constant 1.280000e+02 : f32
    %1011 = vector.broadcast %cst_361 : f32 to vector<8x1xf32>
    %1012 = arith.divf %1010, %1011 : vector<8x1xf32>
    %cst_362 = arith.constant 9.99999974E-6 : f32
    %1013 = vector.broadcast %cst_362 : f32 to vector<8x1xf32>
    %1014 = arith.addf %1012, %1013 : vector<8x1xf32>
    %1015 = math.rsqrt %1014 : vector<8x1xf32>
    %1016 = vector.broadcast %1015 : vector<8x1xf32> to vector<8x128xf32>
    %1017 = arith.mulf %1007, %1016 : vector<8x128xf32>
    %1018 = vector.broadcast %999 : vector<1x128xf32> to vector<8x128xf32>
    %1019 = arith.mulf %1017, %1018 : vector<8x128xf32>
    %1020 = vector.broadcast %1001 : vector<1x128xf32> to vector<8x128xf32>
    %1021 = arith.addf %1019, %1020 : vector<8x128xf32>
    %1022 = arith.addf %766, %1021 : vector<8x128xf32>
    %c0_363 = arith.constant 0 : index
    %c0_364 = arith.constant 0 : index
    %1023 = vector.load %arg17[%c0_363, %c0_364] : memref<1x128xf32, #tpu.memory_space<vmem>>, vector<1x128xf32>
    %c0_365 = arith.constant 0 : index
    %c0_366 = arith.constant 0 : index
    %1024 = vector.load %arg18[%c0_365, %c0_366] : memref<1x128xf32, #tpu.memory_space<vmem>>, vector<1x128xf32>
    %cst_367 = arith.constant dense<0.000000e+00> : vector<8xf32>
    %1025 = vector.multi_reduction <add>, %1022, %cst_367 [1] : vector<8x128xf32> to vector<8xf32>
    %1026 = vector.shape_cast %1025 : vector<8xf32> to vector<8x1xf32>
    %cst_368 = arith.constant 1.280000e+02 : f32
    %1027 = vector.broadcast %cst_368 : f32 to vector<8x1xf32>
    %1028 = arith.divf %1026, %1027 : vector<8x1xf32>
    %1029 = vector.broadcast %1028 : vector<8x1xf32> to vector<8x128xf32>
    %1030 = arith.subf %1022, %1029 : vector<8x128xf32>
    %1031 = arith.mulf %1030, %1030 : vector<8x128xf32>
    %cst_369 = arith.constant dense<0.000000e+00> : vector<8xf32>
    %1032 = vector.multi_reduction <add>, %1031, %cst_369 [1] : vector<8x128xf32> to vector<8xf32>
    %1033 = vector.shape_cast %1032 : vector<8xf32> to vector<8x1xf32>
    %cst_370 = arith.constant 1.280000e+02 : f32
    %1034 = vector.broadcast %cst_370 : f32 to vector<8x1xf32>
    %1035 = arith.divf %1033, %1034 : vector<8x1xf32>
    %cst_371 = arith.constant 9.99999974E-6 : f32
    %1036 = vector.broadcast %cst_371 : f32 to vector<8x1xf32>
    %1037 = arith.addf %1035, %1036 : vector<8x1xf32>
    %1038 = math.rsqrt %1037 : vector<8x1xf32>
    %1039 = vector.broadcast %1038 : vector<8x1xf32> to vector<8x128xf32>
    %1040 = arith.mulf %1030, %1039 : vector<8x128xf32>
    %1041 = vector.broadcast %1023 : vector<1x128xf32> to vector<8x128xf32>
    %1042 = arith.mulf %1040, %1041 : vector<8x128xf32>
    %1043 = vector.broadcast %1024 : vector<1x128xf32> to vector<8x128xf32>
    %1044 = arith.addf %1042, %1043 : vector<8x128xf32>
    %cst_372 = arith.constant 0.000000e+00 : f32
    %1045 = vector.broadcast %cst_372 : f32 to vector<8x128xf32>
    %1046 = arith.maximumf %1044, %1045 : vector<8x128xf32>
    %c0_373 = arith.constant 0 : index
    %c0_374 = arith.constant 0 : index
    %1047 = vector.load %arg19[%c0_373, %c0_374] : memref<8x128xf32, #tpu.memory_space<vmem>>, vector<8x128xf32>
    tpu.vector_store %arg19[%c0_373, %c0_374], %1046 {strides = array<i32>} : memref<8x128xf32, #tpu.memory_space<vmem>>, vector<8x128xf32>,
    return
  }
  func.func @transform_0(%arg0: i32) -> (i32, i32) {
    %c0_i32 = arith.constant 0 : i32
    %c0_i32_0 = arith.constant 0 : i32
    return %arg0, %c0_i32 : i32, i32
  }
  func.func @transform_1(%arg0: i32) -> (i32, i32) {
    %c0_i32 = arith.constant 0 : i32
    %c0_i32_0 = arith.constant 0 : i32
    return %arg0, %c0_i32 : i32, i32
  }
  func.func @transform_2(%arg0: i32) -> (i32, i32, i32) {
    %c0_i32 = arith.constant 0 : i32
    %c0_i32_0 = arith.constant 0 : i32
    %c0_i32_1 = arith.constant 0 : i32
    %c0_i32_2 = arith.constant 0 : i32
    return %c0_i32, %c0_i32_0, %c0_i32_1 : i32, i32, i32
  }
  func.func @transform_3(%arg0: i32) -> (i32, i32, i32) {
    %c0_i32 = arith.constant 0 : i32
    %c0_i32_0 = arith.constant 0 : i32
    %c0_i32_1 = arith.constant 0 : i32
    %c0_i32_2 = arith.constant 0 : i32
    return %c0_i32, %c0_i32_0, %c0_i32_1 : i32, i32, i32
  }
  func.func @transform_4(%arg0: i32) -> (i32, i32, i32) {
    %c0_i32 = arith.constant 0 : i32
    %c0_i32_0 = arith.constant 0 : i32
    %c0_i32_1 = arith.constant 0 : i32
    %c0_i32_2 = arith.constant 0 : i32
    return %c0_i32, %c0_i32_0, %c0_i32_1 : i32, i32, i32
  }
  func.func @transform_5(%arg0: i32) -> (i32, i32, i32) {
    %c0_i32 = arith.constant 0 : i32
    %c0_i32_0 = arith.constant 0 : i32
    %c0_i32_1 = arith.constant 0 : i32
    %c0_i32_2 = arith.constant 0 : i32
    return %c0_i32, %c0_i32_0, %c0_i32_1 : i32, i32, i32
  }
  func.func @transform_6(%arg0: i32) -> (i32, i32, i32) {
    %c0_i32 = arith.constant 0 : i32
    %c0_i32_0 = arith.constant 0 : i32
    %c0_i32_1 = arith.constant 0 : i32
    %c0_i32_2 = arith.constant 0 : i32
    return %c0_i32, %c0_i32_0, %c0_i32_1 : i32, i32, i32
  }
  func.func @transform_7(%arg0: i32) -> (i32, i32, i32) {
    %c0_i32 = arith.constant 0 : i32
    %c0_i32_0 = arith.constant 0 : i32
    %c0_i32_1 = arith.constant 0 : i32
    %c0_i32_2 = arith.constant 0 : i32
    return %c0_i32, %c0_i32_0, %c0_i32_1 : i32, i32, i32
  }
  func.func @transform_8(%arg0: i32) -> (i32, i32, i32) {
    %c0_i32 = arith.constant 0 : i32
    %c0_i32_0 = arith.constant 0 : i32
    %c0_i32_1 = arith.constant 0 : i32
    %c0_i32_2 = arith.constant 0 : i32
    return %c0_i32, %c0_i32_0, %c0_i32_1 : i32, i32, i32
  }
  func.func @transform_9(%arg0: i32) -> (i32, i32, i32) {
    %c0_i32 = arith.constant 0 : i32
    %c0_i32_0 = arith.constant 0 : i32
    %c0_i32_1 = arith.constant 0 : i32
    %c0_i32_2 = arith.constant 0 : i32
    return %c0_i32, %c0_i32_0, %c0_i32_1 : i32, i32, i32
  }
  func.func @transform_10(%arg0: i32) -> (i32, i32, i32) {
    %c0_i32 = arith.constant 0 : i32
    %c0_i32_0 = arith.constant 0 : i32
    %c0_i32_1 = arith.constant 0 : i32
    %c0_i32_2 = arith.constant 0 : i32
    return %c0_i32, %c0_i32_0, %c0_i32_1 : i32, i32, i32
  }
  func.func @transform_11(%arg0: i32) -> (i32, i32, i32) {
    %c0_i32 = arith.constant 0 : i32
    %c0_i32_0 = arith.constant 0 : i32
    %c0_i32_1 = arith.constant 0 : i32
    %c0_i32_2 = arith.constant 0 : i32
    return %c0_i32, %c0_i32_0, %c0_i32_1 : i32, i32, i32
  }
  func.func @transform_12(%arg0: i32) -> (i32, i32, i32) {
    %c0_i32 = arith.constant 0 : i32
    %c0_i32_0 = arith.constant 0 : i32
    %c0_i32_1 = arith.constant 0 : i32
    %c0_i32_2 = arith.constant 0 : i32
    return %c0_i32, %c0_i32_0, %c0_i32_1 : i32, i32, i32
  }
  func.func @transform_13(%arg0: i32) -> (i32, i32, i32) {
    %c0_i32 = arith.constant 0 : i32
    %c0_i32_0 = arith.constant 0 : i32
    %c0_i32_1 = arith.constant 0 : i32
    %c0_i32_2 = arith.constant 0 : i32
    return %c0_i32, %c0_i32_0, %c0_i32_1 : i32, i32, i32
  }
  func.func @transform_14(%arg0: i32) -> (i32, i32, i32) {
    %c0_i32 = arith.constant 0 : i32
    %c0_i32_0 = arith.constant 0 : i32
    %c0_i32_1 = arith.constant 0 : i32
    %c0_i32_2 = arith.constant 0 : i32
    return %c0_i32, %c0_i32_0, %c0_i32_1 : i32, i32, i32
  }
  func.func @transform_15(%arg0: i32) -> (i32, i32, i32) {
    %c0_i32 = arith.constant 0 : i32
    %c0_i32_0 = arith.constant 0 : i32
    %c0_i32_1 = arith.constant 0 : i32
    %c0_i32_2 = arith.constant 0 : i32
    return %c0_i32, %c0_i32_0, %c0_i32_1 : i32, i32, i32
  }
  func.func @transform_16(%arg0: i32) -> (i32, i32) {
    %c0_i32 = arith.constant 0 : i32
    %c0_i32_0 = arith.constant 0 : i32
    %c0_i32_1 = arith.constant 0 : i32
    return %c0_i32, %c0_i32_0 : i32, i32
  }
  func.func @transform_17(%arg0: i32) -> (i32, i32) {
    %c0_i32 = arith.constant 0 : i32
    %c0_i32_0 = arith.constant 0 : i32
    %c0_i32_1 = arith.constant 0 : i32
    return %c0_i32, %c0_i32_0 : i32, i32
  }
  func.func @transform_18(%arg0: i32) -> (i32, i32) {
    %c0_i32 = arith.constant 0 : i32
    %c0_i32_0 = arith.constant 0 : i32
    return %arg0, %c0_i32 : i32, i32
  }
}

</mosaic_0001>

<bundles_post_ra>
// kernel: tpu_custom_call.1
= control target key start
LH: loop header
LB: loop body
LE: loop exit
PB: predicated region body
PF: predicated region fallthrough
CT: control target
= control target key end

     0   :  { %s12389_s0 = inlined_call_operand.hbm [shape: f32[16,128], index: 0, kind: input, shape index: {}]   ;;  %s12390_s1 = inlined_call_operand.hbm [shape: f32[16,128], index: 1, kind: input, shape index: {}]   ;;  %s12391_s2 = inlined_call_operand.hbm [shape: bf16[4,128,128], index: 2, kind: input, shape index: {}]   ;;  %s12392_s3 = inlined_call_operand.hbm [shape: f32[4,1,128], index: 3, kind: input, shape index: {}]   ;;  %s12393_s4 = inlined_call_operand.hbm [shape: bf16[4,128,256], index: 4, kind: input, shape index: {}]   ;;  %s12394_s5 = inlined_call_operand.vmem [shape: f32[4,1,256], index: 5, kind: input, shape index: {}]   ;;  %s12395_s6 = inlined_call_operand.hbm [shape: bf16[4,128,128], index: 6, kind: input, shape index: {}]   ;;  %s12396_s7 = inlined_call_operand.vmem [shape: f32[4,1,128], index: 7, kind: input, shape index: {}]   ;;  %s12397_s8 = inlined_call_operand.vmem [shape: f32[4,1,128], index: 8, kind: input, shape index: {}]   ;;  %s12398_s9 = inlined_call_operand.vmem [shape: f32[4,1,128], index: 9, kind: input, shape index: {}]   ;;  %s12399_s10 = inlined_call_operand.hbm [shape: bf16[4,128,256], index: 10, kind: input, shape index: {}]   ;;  %s12400_s11 = inlined_call_operand.vmem [shape: f32[4,1,256], index: 11, kind: input, shape index: {}]   ;;  %s12401_s12 = inlined_call_operand.hbm [shape: bf16[4,256,128], index: 12, kind: input, shape index: {}]   ;;  %s12402_s13 = inlined_call_operand.vmem [shape: f32[4,1,128], index: 13, kind: input, shape index: {}]   ;;  %s12403_s14 = inlined_call_operand.vmem [shape: f32[4,1,128], index: 14, kind: input, shape index: {}]   ;;  %s12404_s15 = inlined_call_operand.vmem [shape: f32[4,1,128], index: 15, kind: input, shape index: {}]   ;;  %s12405_s16 = inlined_call_operand.vmem [shape: f32[1,128], index: 16, kind: input, shape index: {}]   ;;  %s12406_s17 = inlined_call_operand.vmem [shape: f32[1,128], index: 17, kind: input, shape index: {}]   ;;  %s12407_s18 = inlined_call_operand.hbm [shape: f32[16,128], index: 18, kind: output, shape index: {}]  }
   0x1   :  { %12427 = sst [smem:[#allocation25_spill]] %s12389_s0 }
   0x2   :  { %12428 = sst [smem:[#allocation26_spill]] %s12390_s1 }
   0x3   :  { %12429 = sst [smem:[#allocation27_spill]] %s12391_s2 }
   0x4   :  { %12430 = sst [smem:[#allocation28_spill]] %s12392_s3 }
   0x5   :  { %12431 = sst [smem:[#allocation29_spill]] %s12393_s4 }
   0x6   :  { %12432 = sst [smem:[#allocation30_spill]] %s12395_s6 }
   0x7   :  { %12433 = sst [smem:[#allocation31_spill]] %s12398_s9 }
   0x8   :  { %12434 = sst [smem:[#allocation32_spill]] %s12399_s10 }
   0x9   :  { %12435 = sst [smem:[#allocation33_spill]] %s12400_s11 }
   0xa   :  { %12436 = sst [smem:[#allocation34_spill]] %s12401_s12 }
   0xb   :  { %12437 = sst [smem:[#allocation35_spill]] %s12402_s13 }
   0xc   :  { %12438 = sst [smem:[#allocation36_spill]] %s12403_s14 }
   0xd   :  { %12439 = sst [smem:[#allocation37_spill]] %s12404_s15 }
   0xe   :  { %12440 = sst [smem:[#allocation38_spill]] %s12405_s16 }
   0xf   :  { %12441 = sst [smem:[#allocation39_spill]] %s12406_s17 }
  0x10   :  { %12442 = sst [smem:[#allocation40_spill]] %s12407_s18 }
  0x11   :  { %23 = vsyncpa [#allocation3], 0 }
  0x12   :  { %25 = vsyncpa [#allocation3 + $0x1], 0 }
  0x13   :  { %26 = vsyncpa [#allocation6], 0 }
  0x14   :  { %28 = vsyncpa [#allocation6 + $0x1], 0 }
  0x15   :  { %29 = vsyncpa [#allocation9], 0 }
  0x16   :  { %30 = vsyncpa [#allocation12], 0 }
  0x17   :  { %31 = vsyncpa [#allocation15], 0 }
  0x18   :  { %32 = vsyncpa [#allocation4], 0 }
  0x19   :  { %34 = vsyncpa [#allocation4 + $0x1], 0  ;;  %s11053_s27 = smov 0   ;;  %s11055_s28 = smov 0  }
  0x1a   :  { %s11057_s29 = smov 0   ;;  %s11059_s30 = smov 0  }
  0x1b LB: > { %s10933_s0 = smov [#allocation7]   ;;  %s11074_s1 = sadd.s32 4294967295, %s10931_s30   ;;  %s10931_s30 = sphi %s11059_s30, %s12488_s30   ;;  %s10927_s29 = sphi %s11057_s29, %s12487_s29   ;;  %s10923_s28 = sphi %s11055_s28, %s12486_s28   ;;  %s10919_s27 = sphi %s11053_s27, %s12485_s27  }
  0x1c   : > { %s471_s19 = sshll.u32 %s10933_s0, 4  ;;  %p8646_p0 = scmp.ge.s32.totalorder %s10931_s30, 1  ;;  %s11079_s19 = int_to_ptr.vmem [resolvable:$true] %s471_s19 }
  0x1d   : > { %p12419_p1 = scmp.eq.s32.totalorder %s11074_s1, 0  ;;  %p459_p2 = scmp.lt.s32.totalorder %s10931_s30, 3 }
  0x1e   : > { %s10934_s21 = smov [#allocation8]   ;;  %s10935_s23 = smov [#allocation11]  }
  0x1f   : > { %p11081_p3 = pnand %p8646_p0, %p459_p2  ;;  %s484_s22 = sshll.u32 %s10934_s21, 4  ;;  %s11094_s22 = int_to_ptr.vmem [resolvable:$true] %s484_s22 }
  0x20   : > { %s11096_s24 = sshll.u32 %s10935_s23, 4  ;;  %s12445_s0 = sld [smem:[#allocation27_spill]]  ;;  %s514_s24 = int_to_ptr.vmem [resolvable:$true] %s11096_s24 }
  0x21   : > { %s12443_s20 = scalar_select %p11081_p3, 1, 0 }
  0x22   : > { %p9908_p5 = pneg %p11081_p3 }
  0x24   : > { %p11090_p6 = pnand %p9908_p5, %p12419_p1 }
  0x26   : > { %s10617_s18 = scalar_lea.hbm %s12445_s0, 4096  ;;  %p11106_p8 = pneg %p11090_p6 }
  0x27   : > { %p10618_p7 = scmp.ne.s32.totalorder %s12445_s0, %s10617_s18  ;;  %p10624_p11 = scmp.lt.u32.totalorder %s10617_s18, %s12445_s0 }
  0x29   : > { %p10620_p9 = pnand %p11106_p8, %p10618_p7 }
  0x2b   : > { %p10621_p10 = pneg %p10620_p9 }
  0x2d   : > { %p10626_p12 = pnand %p10624_p11, %p10621_p10 }
  0x2f   : > { %10629 = shalt.err (!%p10626_p12)
}
  0x30   : > { %s10630_s16 = scalar_lea.vmem %s11079_s19, 4096  ;;  %p10638_p5 = scmp.lt.s32.totalorder %s11079_s19, %s11079_s19 }
  0x31   : > { %p10631_p13 = scmp.ne.s32.totalorder %s11079_s19, %s10630_s16  ;;  %p10639_p4 = scmp.lt.s32.totalorder %s10630_s16, %s10630_s16 }
  0x33   : > { %p10633_p0 = pnand %p10631_p13, %p11106_p8  ;;  %p10640_p7 = por %p10639_p4, %p10638_p5 }
  0x35   : > { %p10634_p2 = pneg %p10633_p0 }
  0x37   : > { %p10641_p9 = pnand %p10640_p7, %p10634_p2 }
  0x39   : > { %10644 = shalt.err (!%p10641_p9)
}
  0x3a   : > { %s12417_s17 = smov 64   ;;  %s12421_s15 = smov 4  }
  0x3b   : > { %9911 = dma.hbm_to_vmem [thread:$0]  (!%p11090_p6), %s12445_s0, 4096, %s11079_s19, [#allocation6], %s12417_s17, %s12417_s17, %s12421_s15  }
  0x3c   : > { %s12447_s3 = sld [smem:[#allocation28_spill]] }
  0x42   : > { %s10645_s16 = scalar_lea.hbm %s12447_s3, 64 }
  0x43   : > { %p10646_p4 = scmp.ne.s32.totalorder %s12447_s3, %s10645_s16  ;;  %p10652_p12 = scmp.lt.u32.totalorder %s10645_s16, %s12447_s3 }
  0x45   : > { %p10648_p10 = pnand %p10646_p4, %p11106_p8 }
  0x47   : > { %p10649_p11 = pneg %p10648_p10 }
  0x49   : > { %p10654_p13 = pnand %p10652_p12, %p10649_p11 }
  0x4b   : > { %10657 = shalt.err (!%p10654_p13)
}
  0x4c   : > { %s10658_s19 = scalar_lea.vmem %s11094_s22, 64  ;;  %p10666_p7 = scmp.lt.s32.totalorder %s11094_s22, %s11094_s22 }
  0x4d   : > { %p10659_p0 = scmp.ne.s32.totalorder %s11094_s22, %s10658_s19  ;;  %p10667_p9 = scmp.lt.s32.totalorder %s10658_s19, %s10658_s19 }
  0x4f   : > { %p10661_p2 = pnand %p10659_p0, %p11106_p8  ;;  %p10668_p4 = por %p10667_p9, %p10666_p7 }
  0x51   : > { %p10662_p5 = pneg %p10661_p2 }
  0x53   : > { %p10669_p10 = pnand %p10668_p4, %p10662_p5 }
  0x55   : > { %10672 = shalt.err (!%p10669_p10)
}
  0x56   : > { %s10938_s13 = smov 16   ;;  %s10939_s9 = smov 1  }
  0x57   : > { %9914 = dma.hbm_to_vmem [thread:$0]  (!%p11090_p6), %s12447_s3, 64, %s11094_s22, [#allocation9], %s10938_s13, %s10938_s13, %s10939_s9  }
  0x58   : > { %s12448_s6 = sld [smem:[#allocation30_spill]] }
  0x5e   : > { %s10673_s26 = scalar_lea.hbm %s12448_s6, 4096 }
  0x5f   : > { %p10674_p11 = scmp.ne.s32.totalorder %s12448_s6, %s10673_s26  ;;  %p10680_p0 = scmp.lt.u32.totalorder %s10673_s26, %s12448_s6 }
  0x61   : > { %p10676_p12 = pnand %p10674_p11, %p11106_p8 }
  0x63   : > { %p10677_p13 = pneg %p10676_p12 }
  0x65   : > { %p10682_p2 = pnand %p10680_p0, %p10677_p13 }
  0x67   : > { %10685 = shalt.err (!%p10682_p2)
}
  0x68   : > { %s10686_s11 = scalar_lea.vmem %s514_s24, 4096  ;;  %p10694_p4 = scmp.lt.s32.totalorder %s514_s24, %s514_s24 }
  0x69   : > { %p10687_p5 = scmp.ne.s32.totalorder %s514_s24, %s10686_s11  ;;  %p10695_p10 = scmp.lt.s32.totalorder %s10686_s11, %s10686_s11 }
  0x6b   : > { %p10689_p7 = pnand %p10687_p5, %p11106_p8  ;;  %p10696_p1 = por %p10695_p10, %p10694_p4 }
  0x6d   : > { %p10690_p9 = pneg %p10689_p7 }
  0x6f   : > { %p10697_p3 = pnand %p10696_p1, %p10690_p9 }
  0x71   : > { %10700 = shalt.err (!%p10697_p3)
}
  0x72   : > { %s12449_s22 = smov 64   ;;  %s10940_s9 = smov [#allocation10]  }
  0x73   : > { %9920 = dma.hbm_to_vmem [thread:$0]  (!%p11090_p6), %s12448_s6, 4096, %s514_s24, [#allocation12], %s12449_s22, %s12449_s22, %s12421_s15  }
  0x74   : > { %s497_s14 = sshll.u32 %s10940_s9, 4  ;;  %s12450_s4 = sld [smem:[#allocation29_spill]]  ;;  %s498_s14 = int_to_ptr.vmem [resolvable:$true] %s497_s14 }
  0x7a   : > { %s10701_s26 = scalar_lea.hbm %s12450_s4, 8192 }
  0x7b   : > { %p10702_p1 = scmp.ne.s32.totalorder %s12450_s4, %s10701_s26  ;;  %p10708_p12 = scmp.lt.u32.totalorder %s10701_s26, %s12450_s4 }
  0x7d   : > { %p10704_p3 = pnand %p10702_p1, %p11106_p8 }
  0x7f   : > { %p10705_p11 = pneg %p10704_p3 }
  0x81   : > { %p10710_p13 = pnand %p10708_p12, %p10705_p11 }
  0x83   : > { %10713 = shalt.err (!%p10710_p13)
}
  0x84   : > { %s10714_s24 = scalar_lea.vmem %s498_s14, 8192  ;;  %p10722_p7 = scmp.lt.s32.totalorder %s498_s14, %s498_s14 }
  0x85   : > { %p10715_p0 = scmp.ne.s32.totalorder %s498_s14, %s10714_s24  ;;  %p10723_p9 = scmp.lt.s32.totalorder %s10714_s24, %s10714_s24 }
  0x87   : > { %p10717_p2 = pnand %p10715_p0, %p11106_p8  ;;  %p10724_p4 = por %p10723_p9, %p10722_p7 }
  0x89   : > { %p10718_p5 = pneg %p10717_p2 }
  0x8b   : > { %p10725_p10 = pnand %p10724_p4, %p10718_p5 }
  0x8d   : > { %10728 = shalt.err (!%p10725_p10)
}
  0x8e   : > { %s10941_s17 = smov 128   ;;  %s10942_s13 = smov 8  }
  0x8f   : > { %9917 = dma.hbm_to_vmem [thread:$0]  (!%p11090_p6), %s12450_s4, 8192, %s498_s14, [#allocation9], %s10941_s17, %s10941_s17, %s10942_s13  }
  0x90   : > { %s10943_s25 = smov [#allocation13]   ;;  %s10944_s23 = smov [#allocation14]  }
  0x91   : > { %s535_s26 = sshll.u32 %s10943_s25, 4  ;;  %s551_s16 = sshll.u32 %s10944_s23, 4  ;;  %s536_s26 = int_to_ptr.vmem [resolvable:$true] %s535_s26  ;;  %s11193_s16 = int_to_ptr.vmem [resolvable:$true] %s551_s16 }
  0x92   : > { %s12451_s10 = sld [smem:[#allocation32_spill]] }
  0x98   : > { %s10729_s24 = scalar_lea.hbm %s12451_s10, 8192 }
  0x99   : > { %p10730_p1 = scmp.ne.s32.totalorder %s12451_s10, %s10729_s24  ;;  %p10736_p12 = scmp.lt.u32.totalorder %s10729_s24, %s12451_s10 }
  0x9b   : > { %p10732_p3 = pnand %p10730_p1, %p11106_p8 }
  0x9d   : > { %p10733_p11 = pneg %p10732_p3 }
  0x9f   : > { %p10738_p13 = pnand %p10736_p12, %p10733_p11 }
  0xa1   : > { %10741 = shalt.err (!%p10738_p13)
}
  0xa2   : > { %s10742_s18 = scalar_lea.vmem %s536_s26, 8192  ;;  %p10750_p7 = scmp.lt.s32.totalorder %s536_s26, %s536_s26 }
  0xa3   : > { %p10743_p0 = scmp.ne.s32.totalorder %s536_s26, %s10742_s18  ;;  %p10751_p9 = scmp.lt.s32.totalorder %s10742_s18, %s10742_s18 }
  0xa5   : > { %p10745_p2 = pnand %p10743_p0, %p11106_p8  ;;  %p10752_p4 = por %p10751_p9, %p10750_p7 }
  0xa7   : > { %p10746_p5 = pneg %p10745_p2 }
  0xa9   : > { %p10753_p10 = pnand %p10752_p4, %p10746_p5 }
  0xab   : > { %10756 = shalt.err (!%p10753_p10)
}
  0xac   : > { %9923 = dma.hbm_to_vmem [thread:$0]  (!%p11090_p6), %s12451_s10, 8192, %s536_s26, [#allocation12], %s10941_s17, %s10941_s17, %s10942_s13  }
  0xad   : > { %s12452_s12 = sld [smem:[#allocation34_spill]] }
  0xb3   : > { %s10757_s19 = scalar_lea.hbm %s12452_s12, 8192 }
  0xb4   : > { %p10758_p1 = scmp.ne.s32.totalorder %s12452_s12, %s10757_s19  ;;  %p10764_p12 = scmp.lt.u32.totalorder %s10757_s19, %s12452_s12 }
  0xb6   : > { %p10760_p3 = pnand %p10758_p1, %p11106_p8 }
  0xb8   : > { %p10761_p11 = pneg %p10760_p3 }
  0xba   : > { %p10766_p13 = pnand %p10764_p12, %p10761_p11 }
  0xbc   : > { %10769 = shalt.err (!%p10766_p13)
}
  0xbd   : > { %s10770_s17 = scalar_lea.vmem %s11193_s16, 8192  ;;  %p10778_p7 = scmp.lt.s32.totalorder %s11193_s16, %s11193_s16 }
  0xbe   : > { %p10771_p0 = scmp.ne.s32.totalorder %s11193_s16, %s10770_s17  ;;  %p10779_p9 = scmp.lt.s32.totalorder %s10770_s17, %s10770_s17 }
  0xc0   : > { %p10773_p2 = pnand %p10771_p0, %p11106_p8  ;;  %p10780_p4 = por %p10779_p9, %p10778_p7 }
  0xc2   : > { %p10774_p5 = pneg %p10773_p2 }
  0xc4   : > { %p10781_p10 = pnand %p10780_p4, %p10774_p5 }
  0xc6   : > { %10784 = shalt.err (!%p10781_p10)
}
  0xc7   : > { %s12453_s13 = smov 4   ;;  %s8645_s2 = sadd.s32 4294967294, %s10931_s30  }
  0xc8   : > { %9926 = dma.hbm_to_vmem [thread:$0]  (!%p11090_p6), %s12452_s12, 8192, %s11193_s16, [#allocation15], %s12449_s22, %s12449_s22, %s12453_s13  }
  0xc9   : > { %s11241_s21 = sadd.s32 1, %s10931_s30   ;;  %s47_s15 = sadd.s32 1, %s10927_s29 }
  0xca   : > { %s44_s0 = ssub.s32 %s10931_s30, %s11241_s21  ;;  %p54_p1 = scmp.ne.s32.totalorder %s10927_s29, %s10923_s28 }
  0xcb   : > { %p45_p8 = scmp.eq.s32.totalorder %s44_s0, 0  ;;  %p55_p3 = scmp.eq.s32.totalorder %s10931_s30, 0 }
  0xcc   : > { %p60_p11 = scmp.ne.s32.totalorder %s10923_s28, %s10919_s27  ;;  %p12456_p13 = scmp.eq.s32.totalorder %s11074_s1, 0 }
  0xcd   : > { %s11252_s25 = scalar_select %p45_p8, %s10927_s29, %s47_s15  }
  0xce   : > { %p11254_p12 = por %p55_p3, %p54_p1  ;;  %p11260_p6 = por %p12456_p13, %p60_p11 }
  0xcf   : > { %12454 = sst [smem:[#allocation24_spill]] %s11252_s25  ;;  %p446_p0 = scmp.eq.s32.totalorder %s11074_s1, 1 }
  0xd0   : > { %s12457_s22 = scalar_select %p11260_p6, 1, 0 }
  0xd1   : > { %p452_p2 = scmp.eq.s32.totalorder %s8645_s2, 1  ;;  %p9944_p5 = scmp.lt.s32.totalorder %s10931_s30, 2 }
  0xd2   : > { %s580_s16 = sand.u32 1, %s10927_s29   ;;  %p11267_p7 = por %p446_p0, %p54_p1 }
  0xd3   : > { %p11271_p9 = por %p452_p2, %p60_p11  ;;  %s11275_s24 = sshll.u32 %s580_s16, 3 }
  0xd4   : > { %s12458_s19 = scalar_select %p11267_p7, 1, 0 }
  0xd5   : > { %s12459_s11 = scalar_select %p11271_p9, 1, 0 }
  0xd6   : > { %s8655_s9 = sshll.u32 %s10931_s30, 7  ;;  %s12460_s13 = sld [smem:[#allocation25_spill]] }
  0xd7   : > { %s584_s18 = scalar_lea.vmem [#allocation2], %s11275_s24  ;;  %p11288_p4 = pnand %p9944_p5, %p11254_p12 }
  0xd8   : > { %s591_s2 = sshll.u32 %s584_s18, 4  ;;  %s12462_s4 = sld [smem:[#allocation26_spill]]  ;;  %s11284_s2 = int_to_ptr.vmem [resolvable:$true] %s591_s2 }
  0xd9   : > { %s598_s17 = sand.u32 1, %s10931_s30   ;;  %s581_s6 = scalar_lea.sflag [#allocation3], %s580_s16 }
  0xda   : > { %p10787_p8 = pneg %p11288_p4 }
  0xdc   : > { %s11281_s26 = scalar_lea.hbm %s12460_s13, %s8655_s9  ;;  %s10790_s12 = scalar_lea.hbm %s12460_s13, 256 }
  0xdd   : > { %s10785_s10 = scalar_lea.hbm %s11281_s26, 128  ;;  %p10791_p11 = scmp.lt.u32.totalorder %s11281_s26, %s12460_s13 }
  0xde   : > { %s11295_s14 = scalar_lea.hbm %s12462_s4, %s8655_s9  ;;  %p10786_p10 = scmp.ne.s32.totalorder %s11281_s26, %s10785_s10 }
  0xdf   : > { %p10792_p12 = scmp.lt.u32.totalorder %s10790_s12, %s10785_s10  ;;  %p10794_p0 = scmp.lt.u32.totalorder %s10785_s10, %s11281_s26 }
  0xe0   : > { %p10788_p1 = pnand %p10787_p8, %p10786_p10 }
  0xe1   : > { %p10793_p13 = por %p10792_p12, %p10791_p11 }
  0xe2   : > { %p10789_p3 = pneg %p10788_p1 }
  0xe3   : > { %p10795_p2 = por %p10794_p0, %p10793_p13 }
  0xe5   : > { %p10796_p5 = pnand %p10795_p2, %p10789_p3 }
  0xe7   : > { %10799 = shalt.err (!%p10796_p5)
}
  0xe8   : > { %s10800_s16 = scalar_lea.vmem %s11284_s2, 128  ;;  %s10945_s9 = smov [#allocation2]  }
  0xe9   : > { %p10801_p10 = scmp.ne.s32.totalorder %s11284_s2, %s10800_s16  ;;  %s10805_s15 = sshll.u32 %s10945_s9, 4  ;;  %s10806_s15 = int_to_ptr.vmem [resolvable:$false] %s10805_s15 }
  0xea   : > { %s10807_s25 = scalar_lea.vmem %s10806_s15, 256  ;;  %p10808_p7 = scmp.lt.s32.totalorder %s11284_s2, %s10806_s15 }
  0xeb   : > { %p10803_p1 = pnand %p10801_p10, %p10787_p8  ;;  %p10809_p11 = scmp.lt.s32.totalorder %s10807_s25, %s10800_s16 }
  0xed   : > { %p10804_p9 = pneg %p10803_p1  ;;  %p10810_p12 = por %p10809_p11, %p10808_p7 }
  0xef   : > { %p10811_p13 = pnand %p10810_p12, %p10804_p9 }
  0xf1   : > { %10814 = shalt.err (!%p10811_p13)
}
  0xf2   : > { %9930 = dma.hbm_to_vmem [thread:$0]  (!%p11288_p4), %s11281_s26, 128, %s11284_s2, %s581_s6  }
  0xf3   : > { %s602_s10 = scalar_lea.vmem [#allocation5], %s11275_s24  ;;  %s599_s23 = scalar_lea.sflag [#allocation6], %s598_s17 }
  0xf4   : > { %s609_s12 = sshll.u32 %s602_s10, 4  ;;  %s10815_s18 = scalar_lea.hbm %s11295_s14, 128  ;;  %s610_s12 = int_to_ptr.vmem [resolvable:$true] %s609_s12 }
  0xf5   : > { %p10816_p7 = scmp.ne.s32.totalorder %s11295_s14, %s10815_s18  ;;  %s10820_s9 = scalar_lea.hbm %s12462_s4, 256 }
  0xf6   : > { %p10821_p0 = scmp.lt.u32.totalorder %s11295_s14, %s12462_s4  ;;  %p10822_p2 = scmp.lt.u32.totalorder %s10820_s9, %s10815_s18 }
  0xf7   : > { %p10818_p9 = pnand %p10816_p7, %p10787_p8  ;;  %p10824_p10 = scmp.lt.u32.totalorder %s10815_s18, %s11295_s14 }
  0xf8   : > { %p10823_p5 = por %p10822_p2, %p10821_p0 }
  0xf9   : > { %p10819_p3 = pneg %p10818_p9 }
  0xfa   : > { %p10825_p1 = por %p10824_p10, %p10823_p5 }
  0xfc   : > { %p10826_p11 = pnand %p10825_p1, %p10819_p3 }
  0xfe   : > { %10829 = shalt.err (!%p10826_p11)
}
  0xff   : > { %s10830_s6 = scalar_lea.vmem %s610_s12, 128  ;;  %s10946_s24 = smov [#allocation5]  }
 0x100   : > { %p10831_p12 = scmp.ne.s32.totalorder %s610_s12, %s10830_s6  ;;  %s10835_s26 = sshll.u32 %s10946_s24, 4  ;;  %s10836_s26 = int_to_ptr.vmem [resolvable:$false] %s10835_s26 }
 0x101   : > { %s10837_s2 = scalar_lea.vmem %s10836_s26, 256  ;;  %p10838_p9 = scmp.lt.s32.totalorder %s610_s12, %s10836_s26 }
 0x102   : > { %p10833_p13 = pnand %p10831_p12, %p10787_p8  ;;  %p10839_p6 = scmp.lt.s32.totalorder %s10837_s2, %s10830_s6 }
 0x104   : > { %p10834_p7 = pneg %p10833_p13  ;;  %p10840_p0 = por %p10839_p6, %p10838_p9 }
 0x106   : > { %p10841_p2 = pnand %p10840_p0, %p10834_p7 }
 0x108   : > { %10844 = shalt.err (!%p10841_p2)
}
 0x109   : > { %9933 = dma.hbm_to_vmem [thread:$0]  (!%p11288_p4), %s11295_s14, 128, %s610_s12, %s599_s23  }
 0x10a   : > { %p12463_p3 = scmp.ne.s32.totalorder %s12443_s20, 0 }
 0x10b   : > { %s11348_s17 = sand.u32 (!%p12463_p3), 1, %s10923_s28   ;;  %p12464_p6 = scmp.ne.s32.totalorder (!%p12463_p3), %s12457_s22, 0 }
 0x10c   : > { %618 = sbr.rel (%p12463_p3) target bundleno = 12964 (0x32a4), region = 92  ;;  %s11351_s10 = sshll.u32 (!%p12463_p3), %s11348_s17, 3 }
 0x10d   : > { %s621_s18 = scalar_lea.sflag (!%p12463_p3), [#allocation3], %s11348_s17  ;;  %s624_s3 = scalar_lea.vmem (!%p12463_p3), [#allocation2], %s11351_s10 }
 0x113   : > { %10890 = dma.done.wait (%p12464_p6), %s621_s18, 128  }
 0x114   : > { %10892 = vsyncadd (%p12464_p6), %s621_s18, 4294967168  ;;  %s629_s20 = sand.u32 1, %s11074_s1   ;;  %s633_s14 = scalar_lea.vmem [#allocation5], %s11351_s10 }
 0x115   : > { %s630_s0 = scalar_lea.sflag [#allocation6], %s629_s20 }
 0x116   : > { %10894 = dma.done.wait (%p12464_p6), %s630_s0, 128  }
 0x117   : > { %10896 = vsyncadd (%p12464_p6), %s630_s0, 4294967168  ;;  %p12465_p4 = scmp.eq.s32.totalorder %s11074_s1, 0 }
 0x119   : > { %10898 = dma.done.wait (%p12465_p4), [#allocation6], 4096   ;;  %p12466_p8 = pmov %p12465_p4 }
 0x11a   : > { %p12467_p5 = pmov %p12465_p4 }
 0x11b   : > { %10900 = vsyncadd (%p12466_p8), [#allocation6], 4294963200 }
 0x11c   : > { %10902 = dma.done.wait (%p12467_p5), [#allocation9], 8256   ;;  %p12468_p10 = pmov %p12465_p4 }
 0x11d   : > { %p12469_p1 = pmov %p12465_p4 }
 0x11e   : > { %10904 = vsyncadd (%p12468_p10), [#allocation9], 4294959040 }
 0x11f   : > { %10906 = dma.done.wait (%p12469_p1), [#allocation12], 12288   ;;  %p12470_p11 = pmov %p12469_p1 }
 0x120   : > { %p12471_p12 = pmov %p12469_p1 }
 0x121   : > { %10908 = vsyncadd (%p12470_p11), [#allocation12], 4294955008 }
 0x122   : > { %10910 = dma.done.wait (%p12471_p12), [#allocation15], 8192   ;;  %p12472_p13 = pmov %p12469_p1 }
 0x123   : > { %v10947_v0 = vmov 0   ;;  %v10948_v1 = vmov 0.0   ;;  %vm10949_vm0 = vmmov 0   ;;  %v10150_v2 = vld [vmem:[#allocation10 + $0x4] ss:$8 sps:$4 sm:$0xff]   ;;  %v10174_v10 = vld [vmem:[#allocation7] sm:$0xff]   ;;  %v849_v30 = vlaneseq }
 0x124   : > { %10912 = vsyncadd (%p12472_p13), [#allocation15], 4294959104  ;;  %971 = vmatprep.mubr.bf16.mxu1 %v10947_v0  ;;  %9334 = vmatprep.subr.bf16.mxu0 %v10948_v1  ;;  %v10152_v3 = vld [vmem:[#allocation10] ss:$8 sps:$4 sm:$0xff]   ;;  %v10153_v4 = vld [vmem:[#allocation10 + $0x14] ss:$8 sps:$4 sm:$0xff]  }
 0x125   : > { %9350 = vmatprep.mubr.msk.bf16.mxu0 %vm10949_vm0, %v10948_v1  ;;  %939 = vmatprep.subr.bf16.mxu1 %v10150_v2  ;;  %v10155_v5 = vld [vmem:[#allocation10 + $0x10] ss:$8 sps:$4 sm:$0xff]   ;;  %v10156_v6 = vld [vmem:[#allocation10 + $0x24] ss:$8 sps:$4 sm:$0xff]   ;;  %v10158_v7 = vld [vmem:[#allocation10 + $0x20] ss:$8 sps:$4 sm:$0xff]  }
 0x126   : > { %940 = vmatpush1.bf16.msra.mxu1 %v10152_v3  ;;  %v10159_v8 = vld [vmem:[#allocation10 + $0x34] ss:$8 sps:$4 sm:$0xff]   ;;  %v10161_v9 = vld [vmem:[#allocation10 + $0x30] ss:$8 sps:$4 sm:$0xff]   ;;  %v10162_v11 = vld [vmem:[#allocation10 + $0x44] ss:$8 sps:$4 sm:$0xff]   ;;  %9335 = vmatpush3.bf16.msra.mxu0 %v10174_v10 }
 0x127   : > { %941 = vmatprep.subr.bf16.mxu1 %v10153_v4  ;;  %v10175_v12 = vld [vmem:[#allocation7 + $0x8] sm:$0xff]   ;;  %9336 = vmatprep.subr.bf16.mxu0 %v10948_v1  ;;  %v10165_v14 = vld [vmem:[#allocation10 + $0x54] ss:$8 sps:$4 sm:$0xff]   ;;  %v10176_v15 = vld [vmem:[#allocation7 + $0x10] sm:$0xff]   ;;  %v850_v31 = vshrl.u32 %v849_v30, 7  ;;  %s10950_s23 = smov 112  }
 0x128   : > { %v10164_v13 = vld [vmem:[#allocation10 + $0x40] ss:$8 sps:$4 sm:$0xff]   ;;  %v10167_v16 = vld [vmem:[#allocation10 + $0x50] ss:$8 sps:$4 sm:$0xff]   ;;  %v10168_v17 = vld [vmem:[#allocation10 + $0x64] ss:$8 sps:$4 sm:$0xff]  }
 0x129   : > { %v10177_v18 = vld [vmem:[#allocation7 + $0x18] sm:$0xff]   ;;  %v10170_v19 = vld [vmem:[#allocation10 + $0x60] ss:$8 sps:$4 sm:$0xff]   ;;  %v10180_v26 = vld [vmem:[#allocation7 + $0x30] sm:$0xff]   ;;  %v11405_v32 = vsub.s32 0, %v850_v31  ;;  %s10951_s16 = smov 96  }
 0x12a   : > { %942 = vmatpush1.bf16.msra.mxu1 %v10155_v5  ;;  %9337 = vmatpush3.bf16.msra.mxu0 %v10175_v12  ;;  %v10171_v20 = vld [vmem:[#allocation10 + $0x74] ss:$8 sps:$4 sm:$0xff]   ;;  %v10173_v22 = vld [vmem:[#allocation10 + $0x70] ss:$8 sps:$4 sm:$0xff]   ;;  %v10179_v24 = vld [vmem:[#allocation7 + $0x28] sm:$0xff]   ;;  %v11418_v47 = vsub.s32 1, %v850_v31 }
 0x12b   : > { %943 = vmatprep.subr.bf16.mxu1 %v10156_v6  ;;  %9338 = vmatprep.subr.bf16.mxu0 %v10948_v1  ;;  %v10178_v21 = vld [vmem:[#allocation7 + $0x20] sm:$0xff]   ;;  %v10181_v27 = vld [vmem:[#allocation7 + $0x38] sm:$0xff]   ;;  %vm1014_vm1 = vcmask 130048   ;;  %vm1075_vm2 = vcmask 1043456   ;;  %s10952_s9 = smov 64   ;;  %s10953_s15 = smov 48  }
 0x12c   : > { %v716_v23 = vld [vmem:[%s624_s3] sm:$0xff]  ;;  %v717_v28 = vld [vmem:[%s633_s14] sm:$0xff]  ;;  %s10954_s25 = smov 32   ;;  %vm1058_vm3 = vcmask 64512   ;;  %s10955_s6 = smov 80   ;;  %vm2138_vm4 = vcmask 261120  }
 0x12d   : > { %v846_v25 = vpack.c.bf16 %v716_v23, %v716_v23  ;;  %v11399_v29 = vpack.c.bf16 %v717_v28, %v717_v28  ;;  %v847_v33 = vld [vmem:[%s12394_s5] sm:$0x3]  ;;  %s10956_s24 = smov 16   ;;  %vm2140_vm5 = vcmask 392192   ;;  %vm2142_vm6 = vcmask 523264   ;;  %s12474_s26 = sld [smem:[#allocation33_spill]] }
 0x12e   : > { %944 = vmatpush1.bf16.msra.mxu1 %v10158_v7  ;;  %9339 = vmatpush3.bf16.msra.mxu0 %v10176_v15  ;;  %v852_v34 = vrot.slane %v847_v33, %v11405_v32  ;;  %v856_v48 = vrot.slane %v847_v33, %v11418_v47  ;;  %v8668_v49 = vld [vmem:[#allocation8] ss:$0 sm:$0xff]  ;;  %vm2144_vm7 = vcmask 654336   ;;  %vm2146_vm8 = vcmask 785408   ;;  %s12475_s3 = sld [smem:[#allocation35_spill]]  ;;  %s12476_s2 = sld [smem:[#allocation36_spill]] }
 0x12f   : > { %945 = vmatprep.subr.bf16.mxu1 %v10159_v8  ;;  %9340 = vmatprep.subr.bf16.mxu0 %v10948_v1  ;;  %vm2148_vm9 = vcmask 916480   ;;  %s12477_s0 = sld [smem:[#allocation37_spill]]  ;;  %s12479_s12 = sld [smem:[#allocation39_spill]] }
 0x130   : > { %s9043_s18 = sshll.u32 %s11074_s1, 7  ;;  %s714_s20 = scalar_lea.vmem [#allocation16], %s11351_s10 }
 0x131   : > { %p12481_p9 = scmp.ne.s32.totalorder %s12458_s19, 0  ;;  %s10957_s1 = smov [#allocation16]  }
 0x132   : > { %946 = vmatpush1.bf16.msra.mxu1 %v10161_v9  ;;  %9341 = vmatpush3.bf16.msra.mxu0 %v10177_v18  ;;  %s10849_s10 = sshll.u32 %s10957_s1, 4  ;;  %s10850_s10 = int_to_ptr.vmem [resolvable:$false] %s10849_s10 }
 0x133   : > { %947 = vmatprep.subr.bf16.mxu1 %v10162_v11  ;;  %9342 = vmatprep.subr.bf16.mxu0 %v10948_v1 }
 0x136   : > { %948 = vmatpush1.bf16.msra.mxu1 %v10164_v13  ;;  %9343 = vmatpush3.bf16.msra.mxu0 %v10178_v21 }
 0x137   : > { %949 = vmatprep.subr.bf16.mxu1 %v10165_v14  ;;  %9344 = vmatprep.subr.bf16.mxu0 %v10948_v1 }
 0x13a   : > { %950 = vmatpush1.bf16.msra.mxu1 %v10167_v16  ;;  %9345 = vmatpush3.bf16.msra.mxu0 %v10179_v24 }
 0x13b   : > { %951 = vmatprep.subr.bf16.mxu1 %v10168_v17  ;;  %9346 = vmatprep.subr.bf16.mxu0 %v10948_v1 }
 0x13e   : > { %952 = vmatpush1.bf16.msra.mxu1 %v10170_v19  ;;  %9347 = vmatpush3.bf16.msra.mxu0 %v10180_v26 }
 0x13f   : > { %953 = vmatprep.subr.bf16.mxu1 %v10171_v20  ;;  %9348 = vmatprep.subr.bf16.mxu0 %v10948_v1 }
 0x142   : > { %954 = vmatpush1.bf16.msra.mxu1 %v10173_v22  ;;  %9349 = vmatpush3.bf16.msra.mxu0 %v10181_v27 }
 0x143   : > { %9354 = vmatprep.subr.bf16.mxu1 %v10948_v1  ;;  %9378 = vmatprep.subr.bf16.mxu0 %v10948_v1 }
 0x145   : > { %972 = vmatmul.mubr.bf16.vlgmr.msra.gmra.mrb[0].mxu1 %v846_v25  ;;  %9351 = vmatmul.mubr.bf16.vlgmr.msra.gmra.mrb[0].mxu0 %v11399_v29 }
 0x146   : > { %9356 = vmatprep.mubr.msk.bf16.mxu1 %vm10949_vm0, %v10948_v1  ;;  %9380 = vmatprep.mubr.msk.bf16.mxu0 %vm10949_vm0, %v10948_v1 }
 0x218   : > { %v973_v35 = vpop.f32.mrb[0].mxu1  ;;  %v824_v40 = vpop.f32.mrb[0].mxu0 }
 0x219   : > { %v11411_v36 = vadd.f32 %v973_v35, %v852_v34  ;;  %v975_v37 = vpop.f32.mrb[1].mxu1  ;;  %v9352_v41 = vpop.f32.mrb[1].mxu0  ;;  %v825_v52 = vadd.f32 %v8668_v49, %v824_v40 }
 0x21a   : > { %v977_v38 = vpop.f32.mrb[2].mxu1  ;;  %v827_v42 = vpop.f32.mrb[2].mxu0  ;;  %v976_v51 = vadd.f32 %v975_v37, %v856_v48 }
 0x21b   : > { %v978_v39 = vpop.f32.mrb[3].mxu1  ;;  %1120 = vrot.lane.b32.xlu1 %v11411_v36, %s10950_s23  ;;  %981 = vxpose.xlu0.b32.start.end [1/1] (short) (narrow) %v11411_v36, 16  ;;  %v9353_v43 = vpop.f32.mrb[3].mxu0  ;;  %v980_v56 = vpack.c.bf16 %v825_v52, %v825_v52 }
 0x21c   : > { %v11421_v55 = vpack.c.bf16 %v976_v51, %v976_v51 }
 0x21e   : > { %v1077_v57 = vsel %vm1075_vm2, %v11421_v55, 0 }
 0x21f   : > { %1263 = vrot.lane.b32.xlu1 %v11411_v36, %s10951_s16 }
 0x28d   : > { %v1121_v44 = vpop.permute.xlu1 %1120 }
 0x291   : > { %v1264_v45 = vpop.permute.xlu1 %1263 }
 0x292   : > { %v10006_v46 = vpack.i.bf16 %v1264_v45, %v1121_v44 }
 0x294   : > { %10007 = vxpose.xlu1.b32.start.end [1/1] (short) (narrow) %v10006_v46, 16 }
 0x29b   : > { %v997_v50 = vpop.trf.xlu0 }
 0x29f   : > { %v998_v53 = vpop.trf.xlu0 }
 0x2a0   : > { %v1013_v54 = vpack.c.bf16 %v998_v53, %v997_v50 }
 0x2a2   : > { %9355 = vmatpush3.bf16.msra.mxu1 %v1013_v54 }
 0x2a3   : > { %9360 = vmatprep.subr.bf16.mxu1 %v10948_v1 }
 0x2a5   : > { %9357 = vmatmul.mubr.msk.bf16.vlgmr.msra.gmra.mrb[4].mxu1 %vm1014_vm1, %v980_v56 }
 0x2a6   : > { %9361 = vmatpush3.bf16.msra.mxu1 %v1077_v57  ;;  %9362 = vmatprep.mubr.msk.bf16.mxu1 %vm10949_vm0, %v10948_v1 }
 0x2a7   : > { %9366 = vmatprep.subr.bf16.mxu1 %v10948_v1 }
 0x2b6   : > { %1545 = vrot.lane.b32.xlu1 %v11411_v36, %s10952_s9 }
 0x2ba   : > { %1686 = vrot.lane.b32.xlu1 %v11411_v36, %s10953_s15 }
 0x2be   : > { %1827 = vrot.lane.b32.xlu1 %v11411_v36, %s10954_s25 }
 0x314   : > { %v11436_v58 = vpop.trf.xlu1 }
 0x315   : > { %v10012_v3 = vunpack.i.h.bf16 %v11436_v58  ;;  %v10009_v34 = vunpack.i.l.bf16 %v11436_v58 }
 0x318   : > { %v11438_v59 = vpop.trf.xlu1 }
 0x319   : > { %v10017_v4 = vunpack.i.h.bf16 %v11438_v59  ;;  %v10014_v35 = vunpack.i.l.bf16 %v11438_v59 }
 0x31b   : > { %v1298_v5 = vpack.c.bf16 %v10017_v4, %v10012_v3  ;;  %v1155_v38 = vpack.c.bf16 %v10014_v35, %v10009_v34 }
 0x31d   : > { %9379 = vmatpush3.bf16.msra.mxu0 %v1298_v5 }
 0x31e   : > { %9390 = vmatprep.subr.bf16.mxu0 %v10948_v1 }
 0x328   : > { %v1546_v9 = vpop.permute.xlu1 %1545 }
 0x32c   : > { %v1687_v15 = vpop.permute.xlu1 %1686 }
 0x330   : > { %v1828_v16 = vpop.permute.xlu1 %1827 }
 0x331   : > { %v10030_v17 = vpack.i.bf16 %v1828_v16, %v1687_v15 }
 0x378   : > { %v1052_v60 = vpop.f32.mrb[4].mxu1 }
 0x379   : > { %v9358_v61 = vpop.f32.mrb[5].mxu1  ;;  %v1059_v62 = vsel %vm1058_vm3, %v1052_v60, -inf }
 0x37a   : > { %1060 = vmax.xlane.f32.xlu0 %v1059_v62  ;;  %v1055_v63 = vpop.f32.mrb[6].mxu1 }
 0x37b   : > { %v9359_v2 = vpop.f32.mrb[7].mxu1 }
 0x390   : > { %1404 = vrot.lane.b32.xlu0 %v11411_v36, %s10955_s6 }
 0x394   : > { %1299 = vrot.lane.b32.xlu0 %v980_v56, %s10951_s16 }
 0x398   : > { %1440 = vrot.lane.b32.xlu0 %v980_v56, %s10955_s6 }
 0x39c   : > { %1581 = vrot.lane.b32.xlu0 %v980_v56, %s10952_s9 }
 0x407   : > { %v1061_v6 = vpop.xlane.xlu0 %1060 }
 0x408   : > { %v1062_v7 = vsub.f32 %v1052_v60, %v1061_v6 }
 0x40a   : > { %v1063_v8 = vmul.f32 1.442695, %v1062_v7 }
 0x40b   : > { %v1405_v10 = vpop.permute.xlu0 %1404 }
 0x40c   : > { %10470 = vpow2.f32 %v1063_v8  ;;  %v10018_v11 = vpack.i.bf16 %v1546_v9, %v1405_v10 }
 0x40e   : > { %10019 = vxpose.xlu0.b32.start.end [1/1] (short) (narrow) %v10018_v11, 16 }
 0x40f   : > { %v1300_v12 = vpop.permute.xlu0 %1299 }
 0x410   : > { %9381 = vmatmul.mubr.msk.bf16.vlgmr.msra.gmra.mrb[4].mxu0 %vm1014_vm1, %v1300_v12 }
 0x411   : > { %9392 = vmatprep.mubr.msk.bf16.mxu0 %vm10949_vm0, %v10948_v1 }
 0x413   : > { %v1441_v18 = vpop.permute.xlu0 %1440 }
 0x416   : > { %v10471_v13 = vpop.eup %10470 }
 0x417   : > { %v1065_v14 = vsel %vm1058_vm3, %v10471_v13, 0.0  ;;  %v1582_v19 = vpop.permute.xlu0 %1581 }
 0x418   : > { %1066 = vadd.xlane.f32.xlu1 %v1065_v14 }
 0x429   : > { %1157 = vrot.lane.b32.xlu1 %v980_v56, %s10950_s23 }
 0x42d   : > { %1968 = vrot.lane.b32.xlu1 %v11411_v36, %s10956_s24 }
 0x431   : > { %1863 = vrot.lane.b32.xlu1 %v980_v56, %s10954_s25 }
 0x43b   : > { %1722 = vrot.lane.b32.xlu0 %v980_v56, %s10953_s15 }
 0x43f   : > { %2004 = vrot.lane.b32.xlu0 %v980_v56, %s10956_s24 }
 0x45a   : > { %10031 = vxpose.xlu1.b32.start.end [1/1] (short) (narrow) %v10030_v17, 16 }
 0x48e   : > { %v10020_v20 = vpop.trf.xlu0 }
 0x48f   : > { %v10021_v21 = vunpack.i.l.bf16 %v10020_v20  ;;  %v10024_v22 = vunpack.i.h.bf16 %v10020_v20 }
 0x492   : > { %v10025_v23 = vpop.trf.xlu0 }
 0x493   : > { %v10029_v24 = vunpack.i.h.bf16 %v10025_v23  ;;  %v10026_v25 = vunpack.i.l.bf16 %v10025_v23 }
 0x495   : > { %v1439_v26 = vpack.c.bf16 %v10026_v25, %v10021_v21  ;;  %v1580_v27 = vpack.c.bf16 %v10029_v24, %v10024_v22 }
 0x497   : > { %9391 = vmatpush3.bf16.msra.mxu0 %v1439_v26 }
 0x498   : > { %9402 = vmatprep.subr.bf16.mxu0 %v10948_v1 }
 0x49a   : > { %9393 = vmatmul.mubr.msk.bf16.vlgmr.msra.gmra.mrb[8].mxu0 %vm1014_vm1, %v1441_v18 }
 0x49b   : > { %9403 = vmatpush3.bf16.msra.mxu0 %v1580_v27  ;;  %9404 = vmatprep.mubr.msk.bf16.mxu0 %vm10949_vm0, %v10948_v1 }
 0x49c   : > { %9414 = vmatprep.subr.bf16.mxu0 %v10948_v1 }
 0x4a2   : > { %9405 = vmatmul.mubr.msk.bf16.vlgmr.msra.gmra.mrb[12].mxu0 %vm1014_vm1, %v1582_v19 }
 0x4a3   : > { %9416 = vmatprep.mubr.msk.bf16.mxu0 %vm10949_vm0, %v10948_v1 }
 0x4a5   : > { %v1067_v28 = vpop.xlane.xlu1 %1066 }
 0x4a6   : > { %10472 = vrcp.f32 %v1067_v28 }
 0x4a9   : > { %v1158_v30 = vpop.permute.xlu1 %1157 }
 0x4ad   : > { %v1969_v31 = vpop.permute.xlu1 %1968  ;;  %v1723_v52 = vpop.permute.xlu0 %1722 }
 0x4ae   : > { %1971 = vxpose.xlu0.b32.start.end [1/1] (short) (narrow) %v1969_v31, 16 }
 0x4b0   : > { %v10473_v33 = vpop.eup %10472 }
 0x4b1   : > { %v1069_v36 = vmul.f32 %v10473_v33, %v10471_v13  ;;  %v1864_v39 = vpop.permute.xlu1 %1863  ;;  %v2005_v56 = vpop.permute.xlu0 %2004 }
 0x4b3   : > { %v1070_v37 = vpack.c.bf16 %v1069_v36, %v1069_v36 }
 0x4b5   : > { %9363 = vmatmul.mubr.msk.bf16.vlgmr.msra.gmra.mrb[8].mxu1 %vm1058_vm3, %v1070_v37 }
 0x4b6   : > { %9367 = vmatpush3.bf16.msra.mxu1 %v1155_v38  ;;  %9368 = vmatprep.mubr.msk.bf16.mxu1 %vm10949_vm0, %v10948_v1 }
 0x4b7   : > { %9372 = vmatprep.subr.bf16.mxu1 %v10948_v1 }
 0x4bd   : > { %9369 = vmatmul.mubr.msk.bf16.vlgmr.msra.gmra.mrb[12].mxu1 %vm1014_vm1, %v1158_v30 }
 0x4be   : > { %9374 = vmatprep.mubr.msk.bf16.mxu1 %vm10949_vm0, %v10948_v1 }
 0x4da   : > { %v10032_v40 = vpop.trf.xlu1 }
 0x4db   : > { %v10033_v41 = vunpack.i.l.bf16 %v10032_v40  ;;  %v10036_v42 = vunpack.i.h.bf16 %v10032_v40 }
 0x4de   : > { %v10037_v43 = vpop.trf.xlu1 }
 0x4df   : > { %v10041_v44 = vunpack.i.h.bf16 %v10037_v43  ;;  %v10038_v45 = vunpack.i.l.bf16 %v10037_v43 }
 0x4e1   : > { %v1721_v46 = vpack.c.bf16 %v10038_v45, %v10033_v41  ;;  %v1862_v49 = vpack.c.bf16 %v10041_v44, %v10036_v42 }
 0x4e3   : > { %v1338_v48 = vpop.f32.mrb[4].mxu0  ;;  %9415 = vmatpush3.bf16.msra.mxu0 %v1721_v46 }
 0x4e4   : > { %v9382_v50 = vpop.f32.mrb[5].mxu0  ;;  %v1344_v51 = vsel %vm1058_vm3, %v1338_v48, -inf  ;;  %9426 = vmatprep.subr.bf16.mxu0 %v10948_v1 }
 0x4e5   : > { %1345 = vmax.xlane.f32.xlu0 %v1344_v51  ;;  %v1341_v53 = vpop.f32.mrb[6].mxu0 }
 0x4e6   : > { %v9383_v54 = vpop.f32.mrb[7].mxu0  ;;  %9417 = vmatmul.mubr.msk.bf16.vlgmr.msra.gmra.mrb[16].mxu0 %vm1014_vm1, %v1723_v52 }
 0x4e7   : > { %9427 = vmatpush3.bf16.msra.mxu0 %v1862_v49  ;;  %9428 = vmatprep.mubr.msk.bf16.mxu0 %vm10949_vm0, %v10948_v1 }
 0x4e8   : > { %9438 = vmatprep.subr.bf16.mxu0 %v10948_v1 }
 0x4ee   : > { %9429 = vmatmul.mubr.msk.bf16.vlgmr.msra.gmra.mrb[20].mxu0 %vm1014_vm1, %v1864_v39 }
 0x4ef   : > { %9440 = vmatprep.mubr.msk.bf16.mxu0 %vm10949_vm0, %v10948_v1 }
 0x52e   : > { %v1987_v57 = vpop.trf.xlu0 }
 0x532   : > { %v1988_v58 = vpop.trf.xlu0 }
 0x533   : > { %v2003_v59 = vpack.c.bf16 %v1988_v58, %v1987_v57 }
 0x535   : > { %9439 = vmatpush3.bf16.msra.mxu0 %v2003_v59 }
 0x536   : > { %9450 = vmatprep.subr.bf16.mxu0 %v10948_v1 }
 0x538   : > { %9441 = vmatmul.mubr.msk.bf16.vlgmr.msra.gmra.mrb[24].mxu0 %vm1014_vm1, %v2005_v56 }
 0x539   : > { %9466 = vmatprep.mubr.msk.bf16.mxu0 %vm10949_vm0, %v10948_v1 }
 0x56d   : > { %v1479_v60 = vpop.f32.mrb[8].mxu0 }
 0x56e   : > { %v9394_v61 = vpop.f32.mrb[9].mxu0  ;;  %v1485_v15 = vsel %vm1058_vm3, %v1479_v60, -inf }
 0x56f   : > { %v1482_v62 = vpop.f32.mrb[10].mxu0 }
 0x570   : > { %v9395_v63 = vpop.f32.mrb[11].mxu0 }
 0x572   : > { %v1346_v27 = vpop.xlane.xlu0 %1345 }
 0x573   : > { %v1347_v28 = vsub.f32 %v1338_v48, %v1346_v27 }
 0x575   : > { %v1620_v2 = vpop.f32.mrb[12].mxu0  ;;  %v1348_v30 = vmul.f32 1.442695, %v1347_v28 }
 0x576   : > { %v9406_v3 = vpop.f32.mrb[13].mxu0  ;;  %v1626_v16 = vsel %vm1058_vm3, %v1620_v2, -inf }
 0x577   : > { %v1623_v4 = vpop.f32.mrb[14].mxu0  ;;  %10474 = vpow2.f32 %v1348_v30 }
 0x578   : > { %v9407_v5 = vpop.f32.mrb[15].mxu0 }
 0x581   : > { %v11497_v35 = vpop.eup %10474 }
 0x582   : > { %v1350_v38 = vsel %vm1058_vm3, %v11497_v35, 0.0 }
 0x588   : > { %v11489_v6 = vpop.f32.mrb[8].mxu1 }
 0x589   : > { %v9364_v7 = vpop.f32.mrb[9].mxu1 }
 0x58a   : > { %v1116_v8 = vpop.f32.mrb[10].mxu1 }
 0x58b   : > { %v9365_v9 = vpop.f32.mrb[11].mxu1 }
 0x590   : > { %v1196_v10 = vpop.f32.mrb[12].mxu1 }
 0x591   : > { %v9370_v11 = vpop.f32.mrb[13].mxu1  ;;  %v1202_v12 = vsel %vm1058_vm3, %v1196_v10, -inf }
 0x592   : > { %1203 = vmax.xlane.f32.xlu1 %v1202_v12  ;;  %v1199_v13 = vpop.f32.mrb[14].mxu1 }
 0x593   : > { %v9371_v14 = vpop.f32.mrb[15].mxu1 }
 0x596   : > { %1486 = vmax.xlane.f32.xlu1 %v1485_v15 }
 0x59a   : > { %1627 = vmax.xlane.f32.xlu1 %v1626_v16 }
 0x5b9   : > { %v1761_v17 = vpop.f32.mrb[16].mxu0 }
 0x5ba   : > { %v9418_v18 = vpop.f32.mrb[17].mxu0  ;;  %v1767_v19 = vsel %vm1058_vm3, %v1761_v17, -inf }
 0x5bb   : > { %v1764_v20 = vpop.f32.mrb[18].mxu0  ;;  %1768 = vmax.xlane.f32.xlu1 %v1767_v19 }
 0x5bc   : > { %v9419_v21 = vpop.f32.mrb[19].mxu0 }
 0x5c1   : > { %v1902_v22 = vpop.f32.mrb[20].mxu0 }
 0x5c2   : > { %v9430_v23 = vpop.f32.mrb[21].mxu0  ;;  %v1908_v24 = vsel %vm1058_vm3, %v1902_v22, -inf }
 0x5c3   : > { %1909 = vmax.xlane.f32.xlu0 %v1908_v24  ;;  %v1905_v25 = vpop.f32.mrb[22].mxu0 }
 0x5c4   : > { %v9431_v26 = vpop.f32.mrb[23].mxu0 }
 0x60b   : > { %v2043_v31 = vpop.f32.mrb[24].mxu0 }
 0x60c   : > { %v9442_v33 = vpop.f32.mrb[25].mxu0  ;;  %v2049_v34 = vsel %vm1058_vm3, %v2043_v31, -inf }
 0x60d   : > { %v2046_v36 = vpop.f32.mrb[26].mxu0  ;;  %2050 = vmax.xlane.f32.xlu1 %v2049_v34 }
 0x60e   : > { %v9443_v37 = vpop.f32.mrb[27].mxu0 }
 0x611   : > { %1351 = vadd.xlane.f32.xlu1 %v1350_v38 }
 0x61f   : > { %v1204_v39 = vpop.xlane.xlu1 %1203 }
 0x620   : > { %v1205_v40 = vsub.f32 %v1196_v10, %v1204_v39 }
 0x622   : > { %v1206_v43 = vmul.f32 1.442695, %v1205_v40 }
 0x623   : > { %v1487_v41 = vpop.xlane.xlu1 %1486 }
 0x624   : > { %v1488_v42 = vsub.f32 %v1479_v60, %v1487_v41 }
 0x626   : > { %v1489_v44 = vmul.f32 1.442695, %v1488_v42 }
 0x627   : > { %v1628_v45 = vpop.xlane.xlu1 %1627 }
 0x628   : > { %10476 = vpow2.f32 %v1489_v44  ;;  %v1629_v46 = vsub.f32 %v1620_v2, %v1628_v45 }
 0x629   : > { %10478 = vpow2.f32 %v1206_v43 }
 0x62a   : > { %v1630_v48 = vmul.f32 1.442695, %v1629_v46 }
 0x62c   : > { %10480 = vpow2.f32 %v1630_v48 }
 0x632   : > { %v11501_v49 = vpop.eup %10476 }
 0x633   : > { %v1491_v50 = vsel %vm1058_vm3, %v11501_v49, 0.0  ;;  %v10479_v51 = vpop.eup %10478 }
 0x634   : > { %1492 = vadd.xlane.f32.xlu0 %v1491_v50  ;;  %v1208_v53 = vsel %vm1058_vm3, %v10479_v51, 0.0 }
 0x636   : > { %v11505_v52 = vpop.eup %10480 }
 0x637   : > { %v1632_v54 = vsel %vm1058_vm3, %v11505_v52, 0.0 }
 0x638   : > { %1209 = vadd.xlane.f32.xlu0 %v1208_v53  ;;  %1633 = vadd.xlane.f32.xlu1 %v1632_v54 }
 0x648   : > { %v1769_v56 = vpop.xlane.xlu1 %1768 }
 0x649   : > { %v1770_v57 = vsub.f32 %v1761_v17, %v1769_v56 }
 0x64b   : > { %v1771_v58 = vmul.f32 1.442695, %v1770_v57 }
 0x64d   : > { %10482 = vpow2.f32 %v1771_v58 }
 0x64e   : > { %1215 = vrot.lane.b32.xlu0 %v11421_v55, %s10950_s23 }
 0x650   : > { %v1910_v59 = vpop.xlane.xlu0 %1909 }
 0x651   : > { %v1911_v61 = vsub.f32 %v1902_v22, %v1910_v59 }
 0x653   : > { %v1912_v63 = vmul.f32 1.442695, %v1911_v61 }
 0x655   : > { %10484 = vpow2.f32 %v1912_v63 }
 0x657   : > { %v11512_v60 = vpop.eup %10482 }
 0x658   : > { %v1773_v62 = vsel %vm1058_vm3, %v11512_v60, 0.0 }
 0x659   : > { %1774 = vadd.xlane.f32.xlu1 %v1773_v62 }
 0x65f   : > { %v11516_v2 = vpop.eup %10484 }
 0x660   : > { %v1914_v3 = vsel %vm1058_vm3, %v11516_v2, 0.0 }
 0x66a   : > { %1356 = vrot.lane.b32.xlu1 %v11421_v55, %s10951_s16 }
 0x66d   : > { %1915 = vadd.xlane.f32.xlu0 %v1914_v3 }
 0x66e   : > { %1497 = vrot.lane.b32.xlu1 %v11421_v55, %s10955_s6 }
 0x683   : > { %1638 = vrot.lane.b32.xlu0 %v11421_v55, %s10952_s9 }
 0x687   : > { %1920 = vrot.lane.b32.xlu0 %v11421_v55, %s10954_s25 }
 0x68b   : > { %2061 = vrot.lane.b32.xlu0 %v11421_v55, %s10956_s24 }
 0x69a   : > { %v2051_v4 = vpop.xlane.xlu1 %2050 }
 0x69b   : > { %v2052_v5 = vsub.f32 %v2043_v31, %v2051_v4 }
 0x69d   : > { %v2053_v7 = vmul.f32 1.442695, %v2052_v5  ;;  %v10183_v5 = vld [vmem:[#allocation11 + $0x8] sm:$0xff]  }
 0x69e   : > { %v1352_v17 = vpop.xlane.xlu1 %1351 }
 0x69f   : > { %10486 = vpow2.f32 %v2053_v7 }
 0x6a9   : > { %v11530_v8 = vpop.eup %10486 }
 0x6aa   : > { %v2055_v9 = vsel %vm1058_vm3, %v11530_v8, 0.0 }
 0x6ab   : > { %2056 = vadd.xlane.f32.xlu1 %v2055_v9 }
 0x6bc   : > { %1779 = vrot.lane.b32.xlu1 %v11421_v55, %s10953_s15 }
 0x6c1   : > { %v1493_v10 = vpop.xlane.xlu0 %1492 }
 0x6c5   : > { %v1210_v11 = vpop.xlane.xlu0 %1209  ;;  %v1634_v55 = vpop.xlane.xlu1 %1633 }
 0x6c6   : > { %10488 = vrcp.f32 %v1210_v11 }
 0x6c7   : > { %10490 = vrcp.f32 %v1352_v17 }
 0x6c8   : > { %10492 = vrcp.f32 %v1493_v10 }
 0x6c9   : > { %v1216_v12 = vpop.permute.xlu0 %1215  ;;  %10494 = vrcp.f32 %v1634_v55 }
 0x6ca   : > { %v1221_v13 = vsel %vm1075_vm2, %v1216_v12, 0 }
 0x6cb   : > { %9373 = vmatpush3.bf16.msra.mxu1 %v1221_v13  ;;  %v10185_v13 = vld [vmem:[#allocation11 + $0x18] sm:$0xff]  }
 0x6cc   : > { %9384 = vmatprep.subr.bf16.mxu1 %v10948_v1 }
 0x6d0   : > { %v10489_v14 = vpop.eup %10488 }
 0x6d1   : > { %v1212_v15 = vmul.f32 %v10489_v14, %v10479_v51  ;;  %v10491_v18 = vpop.eup %10490  ;;  %v10186_v14 = vld [vmem:[#allocation11 + $0x20] sm:$0xff]  }
 0x6d2   : > { %v1354_v20 = vmul.f32 %v10491_v18, %v11497_v35  ;;  %v10493_v24 = vpop.eup %10492 }
 0x6d3   : > { %v1213_v16 = vpack.c.bf16 %v1212_v15, %v1212_v15  ;;  %v1495_v27 = vmul.f32 %v10493_v24, %v11501_v49  ;;  %v10495_v30 = vpop.eup %10494  ;;  %v10187_v15 = vld [vmem:[#allocation11 + $0x28] sm:$0xff]  }
 0x6d4   : > { %v1355_v23 = vpack.c.bf16 %v1354_v20, %v1354_v20  ;;  %v1636_v33 = vmul.f32 %v10495_v30, %v11505_v52  ;;  %v10189_v20 = vld [vmem:[#allocation11 + $0x38] sm:$0xff]  }
 0x6d5   : > { %9375 = vmatmul.mubr.msk.bf16.vlgmr.msra.gmra.mrb[16].mxu1 %vm1058_vm3, %v1213_v16  ;;  %v1496_v28 = vpack.c.bf16 %v1495_v27, %v1495_v27  ;;  %v10188_v16 = vld [vmem:[#allocation11 + $0x30] sm:$0xff]  }
 0x6d6   : > { %9386 = vmatprep.mubr.msk.bf16.mxu1 %vm10949_vm0, %v10948_v1  ;;  %v1637_v36 = vpack.c.bf16 %v1636_v33, %v1636_v33 }
 0x6e6   : > { %v1775_v19 = vpop.xlane.xlu1 %1774 }
 0x6e7   : > { %10496 = vrcp.f32 %v1775_v19 }
 0x6ea   : > { %v1357_v21 = vpop.permute.xlu1 %1356 }
 0x6eb   : > { %v1362_v22 = vsel %vm1075_vm2, %v1357_v21, 0 }
 0x6ec   : > { %9385 = vmatpush3.bf16.msra.mxu1 %v1362_v22 }
 0x6ed   : > { %9396 = vmatprep.subr.bf16.mxu1 %v10948_v1 }
 0x6ee   : > { %v1498_v25 = vpop.permute.xlu1 %1497 }
 0x6ef   : > { %v1503_v26 = vsel %vm1075_vm2, %v1498_v25, 0  ;;  %9387 = vmatmul.mubr.msk.bf16.vlgmr.msra.gmra.mrb[20].mxu1 %vm1058_vm3, %v1355_v23 }
 0x6f0   : > { %9397 = vmatpush3.bf16.msra.mxu1 %v1503_v26  ;;  %9398 = vmatprep.mubr.msk.bf16.mxu1 %vm10949_vm0, %v10948_v1 }
 0x6f1   : > { %9408 = vmatprep.subr.bf16.mxu1 %v10948_v1  ;;  %v10497_v37 = vpop.eup %10496 }
 0x6f2   : > { %v1777_v39 = vmul.f32 %v10497_v37, %v11512_v60 }
 0x6f4   : > { %v1778_v43 = vpack.c.bf16 %v1777_v39, %v1777_v39 }
 0x6f7   : > { %9399 = vmatmul.mubr.msk.bf16.vlgmr.msra.gmra.mrb[24].mxu1 %vm1058_vm3, %v1496_v28 }
 0x6f8   : > { %9410 = vmatprep.mubr.msk.bf16.mxu1 %vm10949_vm0, %v10948_v1 }
 0x6fa   : > { %v1916_v31 = vpop.xlane.xlu0 %1915 }
 0x6fb   : > { %10498 = vrcp.f32 %v1916_v31 }
 0x6fe   : > { %v1639_v34 = vpop.permute.xlu0 %1638 }
 0x6ff   : > { %v1644_v35 = vsel %vm1075_vm2, %v1639_v34, 0 }
 0x700   : > { %9409 = vmatpush3.bf16.msra.mxu1 %v1644_v35 }
 0x701   : > { %9420 = vmatprep.subr.bf16.mxu1 %v10948_v1 }
 0x702   : > { %v1921_v42 = vpop.permute.xlu0 %1920 }
 0x703   : > { %9411 = vmatmul.mubr.msk.bf16.vlgmr.msra.gmra.mrb[28].mxu1 %vm1058_vm3, %v1637_v36  ;;  %v1926_v45 = vsel %vm1075_vm2, %v1921_v42, 0 }
 0x704   : > { %9422 = vmatprep.mubr.msk.bf16.mxu1 %vm10949_vm0, %v10948_v1 }
 0x705   : > { %v10499_v44 = vpop.eup %10498 }
 0x706   : > { %v1918_v46 = vmul.f32 %v10499_v44, %v11516_v2  ;;  %v2062_v48 = vpop.permute.xlu0 %2061  ;;  %v10182_v2 = vld [vmem:[#allocation11] sm:$0xff]  }
 0x707   : > { %v2067_v51 = vsel %vm1075_vm2, %v2062_v48, 0  ;;  %9451 = vmatpush3.bf16.msra.mxu0 %v10182_v2 }
 0x708   : > { %v1919_v49 = vpack.c.bf16 %v1918_v46, %v1918_v46  ;;  %9452 = vmatprep.subr.bf16.mxu0 %v10948_v1 }
 0x70b   : > { %9453 = vmatpush3.bf16.msra.mxu0 %v10183_v5  ;;  %v10204_v5 = vld [vmem:[#allocation13 + $0x44] ss:$8 sps:$4 sm:$0xff]  }
 0x70c   : > { %9454 = vmatprep.subr.bf16.mxu0 %v10948_v1 }
 0x738   : > { %v2057_v38 = vpop.xlane.xlu1 %2056 }
 0x739   : > { %10500 = vrcp.f32 %v2057_v38 }
 0x73c   : > { %v1780_v40 = vpop.permute.xlu1 %1779 }
 0x73d   : > { %v1785_v41 = vsel %vm1075_vm2, %v1780_v40, 0 }
 0x73e   : > { %9421 = vmatpush3.bf16.msra.mxu1 %v1785_v41 }
 0x73f   : > { %9432 = vmatprep.subr.bf16.mxu1 %v10948_v1 }
 0x741   : > { %9423 = vmatmul.mubr.msk.bf16.vlgmr.msra.gmra.mrb[32].mxu1 %vm1058_vm3, %v1778_v43 }
 0x742   : > { %9433 = vmatpush3.bf16.msra.mxu1 %v1926_v45  ;;  %9434 = vmatprep.mubr.msk.bf16.mxu1 %vm10949_vm0, %v10948_v1  ;;  %v8709_v45 = vld [vmem:[%s12396_s7] ss:$0 sm:$0xff] }
 0x743   : > { %9444 = vmatprep.subr.bf16.mxu1 %v10948_v1  ;;  %v10501_v50 = vpop.eup %10500 }
 0x744   : > { %v2059_v52 = vmul.f32 %v10501_v50, %v11530_v8  ;;  %v10184_v8 = vld [vmem:[#allocation11 + $0x10] sm:$0xff]  }
 0x745   : > { %9455 = vmatpush3.bf16.msra.mxu0 %v10184_v8  ;;  %v10207_v8 = vld [vmem:[#allocation13 + $0x54] ss:$8 sps:$4 sm:$0xff]  }
 0x746   : > { %v2060_v53 = vpack.c.bf16 %v2059_v52, %v2059_v52  ;;  %9456 = vmatprep.subr.bf16.mxu0 %v10948_v1  ;;  %v10616_v52 = vld [vmem:[%s633_s14] sm:$0xff]  ;;  %s12473_s14 = sld [smem:[#allocation31_spill]] }
 0x749   : > { %9435 = vmatmul.mubr.msk.bf16.vlgmr.msra.gmra.mrb[36].mxu1 %vm1058_vm3, %v1919_v49  ;;  %9457 = vmatpush3.bf16.msra.mxu0 %v10185_v13  ;;  %v10211_v13 = vld [vmem:[#allocation13 + $0x70] ss:$8 sps:$4 sm:$0xff]  }
 0x74a   : > { %9445 = vmatpush3.bf16.msra.mxu1 %v2067_v51  ;;  %9446 = vmatprep.mubr.msk.bf16.mxu1 %vm10949_vm0, %v10948_v1 }
 0x74b   : > { %9458 = vmatprep.subr.bf16.mxu0 %v10948_v1 }
 0x74d   : > { %9459 = vmatpush3.bf16.msra.mxu0 %v10186_v14  ;;  %v10214_v14 = vld [vmem:[#allocation14 + $0x40] sm:$0xff]  }
 0x74e   : > { %9460 = vmatprep.subr.bf16.mxu0 %v10948_v1 }
 0x751   : > { %9447 = vmatmul.mubr.msk.bf16.vlgmr.msra.gmra.mrb[40].mxu1 %vm1058_vm3, %v2060_v53  ;;  %9461 = vmatpush3.bf16.msra.mxu0 %v10187_v15  ;;  %v10215_v15 = vld [vmem:[#allocation14] sm:$0xff]  }
 0x752   : > { %2432 = vmatprep.mubr.bf16.mxu1 %v10947_v0  ;;  %9462 = vmatprep.subr.bf16.mxu0 %v10948_v1 }
 0x755   : > { %9463 = vmatpush3.bf16.msra.mxu0 %v10188_v16  ;;  %v10216_v16 = vld [vmem:[#allocation14 + $0x48] sm:$0xff]  }
 0x756   : > { %9464 = vmatprep.subr.bf16.mxu0 %v10948_v1 }
 0x759   : > { %9465 = vmatpush3.bf16.msra.mxu0 %v10189_v20  ;;  %v10221_v20 = vld [vmem:[#allocation14 + $0x18] sm:$0xff]  }
 0x75a   : > { %9096 = vmatprep.subr.bf16.mxu0 %v10214_v14 }
 0x7a8   : > { %v1257_v54 = vpop.f32.mrb[16].mxu1 }
 0x7a9   : > { %2110 = vrot.lane.b32.xlu1 %v1257_v54, %s10956_s24  ;;  %v9376_v56 = vpop.f32.mrb[17].mxu1  ;;  %v10190_v54 = vld [vmem:[#allocation13] ss:$8 sps:$4 sm:$0xff]  }
 0x7aa   : > { %v1260_v57 = vpop.f32.mrb[18].mxu1  ;;  %v10192_v56 = vld [vmem:[#allocation13 + $0x4] ss:$8 sps:$4 sm:$0xff]  }
 0x7ab   : > { %v9377_v58 = vpop.f32.mrb[19].mxu1  ;;  %v10195_v57 = vld [vmem:[#allocation13 + $0x14] ss:$8 sps:$4 sm:$0xff]   ;;  %2400 = vmatprep.subr.bf16.mxu1 %v10192_v56 }
 0x7ac   : > { %2401 = vmatpush1.bf16.msra.mxu1 %v10190_v54  ;;  %v10193_v58 = vld [vmem:[#allocation13 + $0x10] ss:$8 sps:$4 sm:$0xff]   ;;  %v10230_v54 = vld [vmem:[#allocation10 + $0x80] ss:$8 sps:$4 sm:$0xff]  }
 0x7ad   : > { %2402 = vmatprep.subr.bf16.mxu1 %v10195_v57  ;;  %v10235_v57 = vld [vmem:[#allocation10 + $0x94] ss:$8 sps:$4 sm:$0xff]  }
 0x7b0   : > { %2403 = vmatpush1.bf16.msra.mxu1 %v10193_v58  ;;  %v10233_v58 = vld [vmem:[#allocation10 + $0x90] ss:$8 sps:$4 sm:$0xff]  }
 0x7c2   : > { %v1398_v59 = vpop.f32.mrb[20].mxu1 }
 0x7c3   : > { %2114 = vrot.lane.b32.xlu0 %v1398_v59, %s10954_s25  ;;  %v9388_v60 = vpop.f32.mrb[21].mxu1  ;;  %v10198_v59 = vld [vmem:[#allocation13 + $0x24] ss:$8 sps:$4 sm:$0xff]  }
 0x7c4   : > { %v1401_v61 = vpop.f32.mrb[22].mxu1  ;;  %v10196_v60 = vld [vmem:[#allocation13 + $0x20] ss:$8 sps:$4 sm:$0xff]   ;;  %2404 = vmatprep.subr.bf16.mxu1 %v10198_v59  ;;  %v10238_v59 = vld [vmem:[#allocation10 + $0xa4] ss:$8 sps:$4 sm:$0xff]  }
 0x7c5   : > { %v9389_v62 = vpop.f32.mrb[23].mxu1  ;;  %2405 = vmatpush1.bf16.msra.mxu1 %v10196_v60  ;;  %v10236_v60 = vld [vmem:[#allocation10 + $0xa0] ss:$8 sps:$4 sm:$0xff]  }
 0x7ca   : > { %v1539_v63 = vpop.f32.mrb[24].mxu1 }
 0x7cb   : > { %2118 = vrot.lane.b32.xlu1 %v1539_v63, %s10953_s15  ;;  %v9400_v3 = vpop.f32.mrb[25].mxu1 }
 0x7cc   : > { %v1542_v4 = vpop.f32.mrb[26].mxu1  ;;  %v10201_v3 = vld [vmem:[#allocation13 + $0x34] ss:$8 sps:$4 sm:$0xff]  }
 0x7cd   : > { %v9401_v7 = vpop.f32.mrb[27].mxu1  ;;  %v10199_v4 = vld [vmem:[#allocation13 + $0x30] ss:$8 sps:$4 sm:$0xff]   ;;  %2406 = vmatprep.subr.bf16.mxu1 %v10201_v3  ;;  %v10247_v3 = vld [vmem:[#allocation10 + $0xd4] ss:$8 sps:$4 sm:$0xff]  }
 0x7ce   : > { %2407 = vmatpush1.bf16.msra.mxu1 %v10199_v4  ;;  %v10202_v7 = vld [vmem:[#allocation13 + $0x40] ss:$8 sps:$4 sm:$0xff]   ;;  %v10245_v4 = vld [vmem:[#allocation10 + $0xd0] ss:$8 sps:$4 sm:$0xff]  }
 0x7cf   : > { %2408 = vmatprep.subr.bf16.mxu1 %v10204_v5  ;;  %v10250_v5 = vld [vmem:[#allocation10 + $0xe4] ss:$8 sps:$4 sm:$0xff]  }
 0x7d2   : > { %2409 = vmatpush1.bf16.msra.mxu1 %v10202_v7  ;;  %v10248_v7 = vld [vmem:[#allocation10 + $0xe0] ss:$8 sps:$4 sm:$0xff]  }
 0x7d3   : > { %2410 = vmatprep.subr.bf16.mxu1 %v10207_v8  ;;  %v10253_v8 = vld [vmem:[#allocation10 + $0xf4] ss:$8 sps:$4 sm:$0xff]  }
 0x7d6   : > { %v1680_v9 = vpop.f32.mrb[28].mxu1 }
 0x7d7   : > { %2122 = vrot.lane.b32.xlu0 %v1680_v9, %s10952_s9  ;;  %v9412_v10 = vpop.f32.mrb[29].mxu1  ;;  %v10205_v9 = vld [vmem:[#allocation13 + $0x50] ss:$8 sps:$4 sm:$0xff]  }
 0x7d8   : > { %v1683_v11 = vpop.f32.mrb[30].mxu1  ;;  %v10210_v10 = vld [vmem:[#allocation13 + $0x64] ss:$8 sps:$4 sm:$0xff]   ;;  %2411 = vmatpush1.bf16.msra.mxu1 %v10205_v9  ;;  %v10251_v9 = vld [vmem:[#allocation10 + $0xf0] ss:$8 sps:$4 sm:$0xff]  }
 0x7d9   : > { %v9413_v12 = vpop.f32.mrb[31].mxu1  ;;  %v10208_v11 = vld [vmem:[#allocation13 + $0x60] ss:$8 sps:$4 sm:$0xff]   ;;  %2412 = vmatprep.subr.bf16.mxu1 %v10210_v10 }
 0x7da   : > { %v10213_v12 = vld [vmem:[#allocation13 + $0x74] ss:$8 sps:$4 sm:$0xff]  }
 0x7dc   : > { %2413 = vmatpush1.bf16.msra.mxu1 %v10208_v11  ;;  %v8736_v11 = vld [vmem:[%s12475_s3] ss:$0 sm:$0xff] }
 0x7dd   : > { %2414 = vmatprep.subr.bf16.mxu1 %v10213_v12 }
 0x7e0   : > { %2415 = vmatpush1.bf16.msra.mxu1 %v10211_v13 }
 0x7e1   : > { %9470 = vmatprep.subr.bf16.mxu1 %v10948_v1 }
 0x814   : > { %v1821_v17 = vpop.f32.mrb[32].mxu1 }
 0x815   : > { %2126 = vrot.lane.b32.xlu1 %v1821_v17, %s10955_s6  ;;  %v9424_v55 = vpop.f32.mrb[33].mxu1  ;;  %v10217_v17 = vld [vmem:[#allocation14 + $0x8] sm:$0xff]  }
 0x816   : > { %v1824_v18 = vpop.f32.mrb[34].mxu1  ;;  %v10218_v55 = vld [vmem:[#allocation14 + $0x50] sm:$0xff]  }
 0x817   : > { %v9425_v19 = vpop.f32.mrb[35].mxu1  ;;  %v10219_v18 = vld [vmem:[#allocation14 + $0x10] sm:$0xff]  }
 0x818   : > { %v10220_v19 = vld [vmem:[#allocation14 + $0x58] sm:$0xff]  }
 0x81b   : > { %v2111_v30 = vpop.permute.xlu1 %2110 }
 0x81c   : > { %v1962_v21 = vpop.f32.mrb[36].mxu1  ;;  %v2137_v35 = vsel %vm1014_vm1, %v11489_v6, %v2111_v30  ;;  %v8718_v30 = vld [vmem:[%s12397_s8] ss:$0 sm:$0xff] }
 0x81d   : > { %2130 = vrot.lane.b32.xlu0 %v1962_v21, %s10951_s16  ;;  %v9436_v22 = vpop.f32.mrb[37].mxu1  ;;  %v10222_v21 = vld [vmem:[#allocation14 + $0x60] sm:$0xff]  }
 0x81e   : > { %v1965_v23 = vpop.f32.mrb[38].mxu1  ;;  %v10223_v22 = vld [vmem:[#allocation14 + $0x20] sm:$0xff]  }
 0x81f   : > { %v9437_v24 = vpop.f32.mrb[39].mxu1  ;;  %v10224_v23 = vld [vmem:[#allocation14 + $0x68] sm:$0xff]  }
 0x820   : > { %v10225_v24 = vld [vmem:[#allocation14 + $0x28] sm:$0xff]  }
 0x824   : > { %v2103_v25 = vpop.f32.mrb[40].mxu1 }
 0x825   : > { %2134 = vrot.lane.b32.xlu1 %v2103_v25, %s10950_s23  ;;  %v9448_v26 = vpop.f32.mrb[41].mxu1 }
 0x826   : > { %v2106_v27 = vpop.f32.mrb[42].mxu1 }
 0x827   : > { %v9449_v28 = vpop.f32.mrb[43].mxu1 }
 0x835   : > { %v2115_v31 = vpop.permute.xlu0 %2114 }
 0x836   : > { %v2139_v36 = vsel %vm2138_vm4, %v2137_v35, %v2115_v31 }
 0x83d   : > { %v2119_v33 = vpop.permute.xlu1 %2118 }
 0x83e   : > { %v2141_v38 = vsel %vm2140_vm5, %v2139_v36, %v2119_v33  ;;  %v8719_v33 = vld [vmem:[%s12473_s14] ss:$0 sm:$0xff] }
 0x849   : > { %v2123_v34 = vpop.permute.xlu0 %2122 }
 0x84a   : > { %v2143_v40 = vsel %vm2142_vm6, %v2141_v38, %v2123_v34  ;;  %v10227_v38 = vld [vmem:[#allocation14 + $0x30] sm:$0xff]  }
 0x887   : > { %v2127_v37 = vpop.permute.xlu1 %2126 }
 0x888   : > { %v2145_v41 = vsel %vm2144_vm7, %v2143_v40, %v2127_v37  ;;  %v10226_v37 = vld [vmem:[#allocation14 + $0x70] sm:$0xff]   ;;  %v10229_v40 = vld [vmem:[#allocation14 + $0x38] sm:$0xff]  }
 0x88f   : > { %v2131_v39 = vpop.permute.xlu0 %2130 }
 0x890   : > { %v2147_v42 = vsel %vm2146_vm8, %v2145_v41, %v2131_v39  ;;  %v10228_v39 = vld [vmem:[#allocation14 + $0x78] sm:$0xff]   ;;  %v10232_v41 = vld [vmem:[#allocation10 + $0x84] ss:$8 sps:$4 sm:$0xff]  }
 0x897   : > { %v2135_v43 = vpop.permute.xlu1 %2134 }
 0x898   : > { %v2149_v6 = vsel %vm2148_vm9, %v2147_v42, %v2135_v43  ;;  %v2308_v42 = vld [vmem:[%s12474_s26] sm:$0x3] }
 0x899   : > { %v2166_v44 = vpack.c.bf16 %v2149_v6, %v2149_v6  ;;  %v2313_v43 = vrot.slane %v2308_v42, %v11405_v32  ;;  %v2317_v6 = vrot.slane %v2308_v42, %v11418_v47 }
 0x89b   : > { %9467 = vmatmul.mubr.bf16.vlgmr.msra.gmra.mrb[28].mxu0 %v2166_v44 }
 0x89c   : > { %9097 = vmatpush3.bf16.msra.mxu0 %v10215_v15 }
 0x89d   : > { %9098 = vmatprep.subr.bf16.mxu0 %v10216_v16 }
 0x8a0   : > { %9099 = vmatpush3.bf16.msra.mxu0 %v10217_v17 }
 0x8a1   : > { %9100 = vmatprep.subr.bf16.mxu0 %v10218_v55 }
 0x8a4   : > { %9101 = vmatpush3.bf16.msra.mxu0 %v10219_v18 }
 0x8a5   : > { %9102 = vmatprep.subr.bf16.mxu0 %v10220_v19 }
 0x8a8   : > { %9103 = vmatpush3.bf16.msra.mxu0 %v10221_v20 }
 0x8a9   : > { %9104 = vmatprep.subr.bf16.mxu0 %v10222_v21  ;;  %v10254_v21 = vld [vmem:[#allocation7 + $0x40] sm:$0xff]  }
 0x8ac   : > { %9105 = vmatpush3.bf16.msra.mxu0 %v10223_v22  ;;  %v10255_v22 = vld [vmem:[#allocation7 + $0x48] sm:$0xff]  }
 0x8ad   : > { %9106 = vmatprep.subr.bf16.mxu0 %v10224_v23 }
 0x8b0   : > { %9107 = vmatpush3.bf16.msra.mxu0 %v10225_v24 }
 0x8b1   : > { %9108 = vmatprep.subr.bf16.mxu0 %v10226_v37 }
 0x8b4   : > { %9109 = vmatpush3.bf16.msra.mxu0 %v10227_v38 }
 0x8b5   : > { %9110 = vmatprep.subr.bf16.mxu0 %v10228_v39 }
 0x8b8   : > { %9111 = vmatpush3.bf16.msra.mxu0 %v10229_v40 }
 0x8b9   : > { %2873 = vmatprep.subr.bf16.mxu0 %v10232_v41 }
 0x96e   : > { %v2256_v46 = vpop.f32.mrb[28].mxu0 }
 0x96f   : > { %v2257_v48 = vadd.f32 %v8709_v45, %v2256_v46  ;;  %v9468_v49 = vpop.f32.mrb[29].mxu0 }
 0x970   : > { %v2259_v50 = vpop.f32.mrb[30].mxu0 }
 0x971   : > { %v9469_v51 = vpop.f32.mrb[31].mxu0  ;;  %v2262_v53 = vadd.f32 %v10616_v52, %v2257_v48 }
 0x973   : > { %2265 = vadd.xlane.f32.xlu0 %v2262_v53 }
 0xa00   : > { %v2266_v61 = vpop.xlane.xlu0 %2265 }
 0xa01   : > { %v2268_v62 = vmul.f32 0.0078125, %v2266_v61  ;;  %v10241_v61 = vld [vmem:[#allocation10 + $0xb4] ss:$8 sps:$4 sm:$0xff]  }
 0xa03   : > { %v2269_v63 = vsub.f32 %v2262_v53, %v2268_v62  ;;  %v10239_v62 = vld [vmem:[#allocation10 + $0xb0] ss:$8 sps:$4 sm:$0xff]  }
 0xa05   : > { %v2270_v2 = vmul.f32 %v2269_v63, %v2269_v63 }
 0xa07   : > { %2271 = vadd.xlane.f32.xlu1 %v2270_v2  ;;  %v10242_v2 = vld [vmem:[#allocation10 + $0xc0] ss:$8 sps:$4 sm:$0xff]  }
 0xa94   : > { %v2272_v25 = vpop.xlane.xlu1 %2271 }
 0xa95   : > { %v2273_v26 = vmul.f32 0.0078125, %v2272_v25 }
 0xa97   : > { %v2274_v27 = vadd.f32 1e-05, %v2273_v26 }
 0xa99   : > { %10502 = vrsqrt.f32 %v2274_v27  ;;  %v10256_v27 = vld [vmem:[#allocation7 + $0x50] sm:$0xff]  }
 0xaa3   : > { %v10503_v28 = vpop.eup %10502 }
 0xaa4   : > { %v2276_v31 = vmul.f32 %v10503_v28, %v2269_v63  ;;  %v10244_v63 = vld [vmem:[#allocation10 + $0xc4] ss:$8 sps:$4 sm:$0xff]   ;;  %v10257_v28 = vld [vmem:[#allocation7 + $0x58] sm:$0xff]  }
 0xaa6   : > { %v2283_v34 = vmul.f32 %v8718_v30, %v2276_v31  ;;  %v10258_v30 = vld [vmem:[#allocation7 + $0x60] sm:$0xff]   ;;  %v10259_v31 = vld [vmem:[#allocation7 + $0x68] sm:$0xff]  }
 0xaa8   : > { %v11609_v35 = vadd.f32 %v8719_v33, %v2283_v34  ;;  %v10260_v33 = vld [vmem:[#allocation7 + $0x70] sm:$0xff]   ;;  %v10261_v34 = vld [vmem:[#allocation7 + $0x78] sm:$0xff]  }
 0xaaa   : > { %v2307_v36 = vpack.c.bf16 %v11609_v35, %v11609_v35 }
 0xaac   : > { %2433 = vmatmul.mubr.bf16.vlgmr.msra.gmra.mrb[44].mxu1 %v2307_v36 }
 0xaad   : > { %9486 = vmatprep.mubr.msk.bf16.mxu1 %vm10949_vm0, %v10948_v1  ;;  %9471 = vmatpush3.bf16.msra.mxu1 %v10254_v21 }
 0xaae   : > { %9472 = vmatprep.subr.bf16.mxu1 %v10948_v1 }
 0xab1   : > { %9473 = vmatpush3.bf16.msra.mxu1 %v10255_v22 }
 0xab2   : > { %9474 = vmatprep.subr.bf16.mxu1 %v10948_v1 }
 0xab5   : > { %9475 = vmatpush3.bf16.msra.mxu1 %v10256_v27 }
 0xab6   : > { %9476 = vmatprep.subr.bf16.mxu1 %v10948_v1 }
 0xab9   : > { %9477 = vmatpush3.bf16.msra.mxu1 %v10257_v28 }
 0xaba   : > { %9478 = vmatprep.subr.bf16.mxu1 %v10948_v1 }
 0xabd   : > { %9479 = vmatpush3.bf16.msra.mxu1 %v10258_v30 }
 0xabe   : > { %9480 = vmatprep.subr.bf16.mxu1 %v10948_v1 }
 0xac1   : > { %9481 = vmatpush3.bf16.msra.mxu1 %v10259_v31 }
 0xac2   : > { %9482 = vmatprep.subr.bf16.mxu1 %v10948_v1 }
 0xac5   : > { %9483 = vmatpush3.bf16.msra.mxu1 %v10260_v33 }
 0xac6   : > { %9484 = vmatprep.subr.bf16.mxu1 %v10948_v1 }
 0xac9   : > { %9485 = vmatpush3.bf16.msra.mxu1 %v10261_v34 }
 0xaca   : > { %9490 = vmatprep.subr.bf16.mxu1 %v10948_v1 }
 0xb7f   : > { %v2434_v44 = vpop.f32.mrb[44].mxu1 }
 0xb80   : > { %v2435_v45 = vadd.f32 %v2434_v44, %v2313_v43  ;;  %v2436_v46 = vpop.f32.mrb[45].mxu1 }
 0xb81   : > { %v2437_v48 = vadd.f32 %v2436_v46, %v2317_v6  ;;  %v2438_v49 = vpop.f32.mrb[46].mxu1  ;;  %v8753_v46 = vld [vmem:[%s12476_s2] ss:$0 sm:$0xff] }
 0xb82   : > { %v2441_v50 = vmax.f32 %v2435_v45, 0.0  ;;  %v2439_v51 = vpop.f32.mrb[47].mxu1  ;;  %v8754_v49 = vld [vmem:[%s12477_s0] ss:$0 sm:$0xff] }
 0xb83   : > { %v2442_v52 = vmax.f32 %v2437_v48, 0.0 }
 0xb84   : > { %v2475_v56 = vpack.c.bf16 %v2441_v50, %v2441_v50 }
 0xb85   : > { %v2476_v53 = vpack.c.bf16 %v2442_v52, %v2442_v52 }
 0xb87   : > { %2612 = vmatprep.mubr.bf16.mxu0 %v2476_v53 }
 0xb88   : > { %2613 = vmatmul.mubr.bf16.vlgmr.msra.gmra.mrb[32].mxu0 %v2475_v56 }
 0xb89   : > { %2874 = vmatpush1.bf16.msra.mxu0 %v10230_v54  ;;  %2905 = vmatprep.mubr.bf16.mxu0 %v10947_v0 }
 0xb8a   : > { %2875 = vmatprep.subr.bf16.mxu0 %v10235_v57 }
 0xb8d   : > { %2876 = vmatpush1.bf16.msra.mxu0 %v10233_v58 }
 0xb8e   : > { %2877 = vmatprep.subr.bf16.mxu0 %v10238_v59 }
 0xb91   : > { %2878 = vmatpush1.bf16.msra.mxu0 %v10236_v60  ;;  %v8755_v60 = vld [vmem:[#allocation8 + $0x1] ss:$0 sm:$0xff] }
 0xb92   : > { %2879 = vmatprep.subr.bf16.mxu0 %v10241_v61 }
 0xb95   : > { %2880 = vmatpush1.bf16.msra.mxu0 %v10239_v62 }
 0xb96   : > { %2881 = vmatprep.subr.bf16.mxu0 %v10244_v63 }
 0xb99   : > { %2882 = vmatpush1.bf16.msra.mxu0 %v10242_v2 }
 0xb9a   : > { %2883 = vmatprep.subr.bf16.mxu0 %v10247_v3 }
 0xb9d   : > { %2884 = vmatpush1.bf16.msra.mxu0 %v10245_v4 }
 0xb9e   : > { %2885 = vmatprep.subr.bf16.mxu0 %v10250_v5 }
 0xba1   : > { %2886 = vmatpush1.bf16.msra.mxu0 %v10248_v7 }
 0xba2   : > { %2887 = vmatprep.subr.bf16.mxu0 %v10253_v8 }
 0xba5   : > { %2888 = vmatpush1.bf16.msra.mxu0 %v10251_v9 }
 0xba6   : > { %9514 = vmatprep.subr.bf16.mxu0 %v10948_v1 }
 0xba8   : > { %2906 = vmatmul.mubr.bf16.vlgmr.msra.gmra.mrb[36].mxu0 %v11399_v29  ;;  %v11632_v29 = vld [vmem:[%s12394_s5 + $0x2] sm:$0x3] }
 0xba9   : > { %9516 = vmatprep.mubr.msk.bf16.mxu0 %vm10949_vm0, %v10948_v1  ;;  %v2786_v18 = vrot.slane %v11632_v29, %v11405_v32  ;;  %v2790_v58 = vrot.slane %v11632_v29, %v11418_v47 }
 0xc5b   : > { %v9112_v10 = vpop.f32.mrb[32].mxu0 }
 0xc5c   : > { %v9113_v12 = vpop.f32.mrb[33].mxu0 }
 0xc5d   : > { %v9114_v13 = vadd.f32 %v9113_v12, %v9112_v10  ;;  %v9115_v14 = vpop.f32.mrb[34].mxu0 }
 0xc5e   : > { %v9116_v15 = vpop.f32.mrb[35].mxu0 }
 0xc5f   : > { %v2615_v16 = vadd.f32 %v9114_v13, %v8736_v11 }
 0xc61   : > { %v2620_v17 = vmax.f32 %v2615_v16, 0.0 }
 0xc63   : > { %v2621_v55 = vadd.f32 %v2620_v17, %v11609_v35 }
 0xc65   : > { %2624 = vadd.xlane.f32.xlu0 %v2621_v55 }
 0xc7b   : > { %v2907_v19 = vpop.f32.mrb[36].mxu0 }
 0xc7c   : > { %v2908_v20 = vadd.f32 %v2907_v19, %v2786_v18  ;;  %v2909_v35 = vpop.f32.mrb[37].mxu0 }
 0xc7d   : > { %v2911_v36 = vpop.f32.mrb[38].mxu0  ;;  %v2910_v59 = vadd.f32 %v2909_v35, %v2790_v58 }
 0xc7e   : > { %2915 = vxpose.xlu1.b32.start.end [1/1] (short) (narrow) %v2908_v20, 16  ;;  %v2912_v37 = vpop.f32.mrb[39].mxu0 }
 0xc7f   : > { %v11673_v62 = vpack.c.bf16 %v2910_v59, %v2910_v59 }
 0xc81   : > { %v3008_v7 = vsel %vm1075_vm2, %v11673_v62, 0 }
 0xca0   : > { %3194 = vrot.lane.b32.xlu1 %v2908_v20, %s10951_s16 }
 0xca4   : > { %3758 = vrot.lane.b32.xlu1 %v2908_v20, %s10954_s25 }
 0xcf2   : > { %v2625_v23 = vpop.xlane.xlu0 %2624 }
 0xcf3   : > { %v2626_v24 = vmul.f32 0.0078125, %v2625_v23 }
 0xcf5   : > { %v2627_v25 = vsub.f32 %v2621_v55, %v2626_v24 }
 0xcf7   : > { %v2628_v26 = vmul.f32 %v2627_v25, %v2627_v25 }
 0xcf9   : > { %2629 = vadd.xlane.f32.xlu0 %v2628_v26 }
 0xcfe   : > { %v2931_v38 = vpop.trf.xlu1 }
 0xd02   : > { %v2932_v39 = vpop.trf.xlu1 }
 0xd03   : > { %v2947_v52 = vpack.c.bf16 %v2932_v39, %v2931_v38 }
 0xd0f   : > { %3051 = vrot.lane.b32.xlu0 %v2908_v20, %s10950_s23 }
 0xd12   : > { %v3195_v42 = vpop.permute.xlu1 %3194 }
 0xd13   : > { %3335 = vrot.lane.b32.xlu0 %v2908_v20, %s10955_s6 }
 0xd16   : > { %v3759_v54 = vpop.permute.xlu1 %3758 }
 0xd17   : > { %3476 = vrot.lane.b32.xlu0 %v2908_v20, %s10952_s9 }
 0xd1b   : > { %3617 = vrot.lane.b32.xlu0 %v2908_v20, %s10953_s15 }
 0xd86   : > { %v2630_v40 = vpop.xlane.xlu0 %2629 }
 0xd87   : > { %v2631_v41 = vmul.f32 0.0078125, %v2630_v40 }
 0xd89   : > { %v2632_v43 = vadd.f32 1e-05, %v2631_v41 }
 0xd8a   : > { %v3052_v6 = vpop.permute.xlu0 %3051 }
 0xd8b   : > { %10504 = vrsqrt.f32 %v2632_v43  ;;  %v10042_v44 = vpack.i.bf16 %v3195_v42, %v3052_v6 }
 0xd8d   : > { %10043 = vxpose.xlu1.b32.start.end [1/1] (short) (narrow) %v10042_v44, 16 }
 0xd8e   : > { %v3336_v8 = vpop.permute.xlu0 %3335 }
 0xd92   : > { %v3477_v9 = vpop.permute.xlu0 %3476 }
 0xd95   : > { %v10505_v45 = vpop.eup %10504 }
 0xd96   : > { %v2634_v48 = vmul.f32 %v10505_v45, %v2627_v25  ;;  %v3618_v10 = vpop.permute.xlu0 %3617  ;;  %v10054_v25 = vpack.i.bf16 %v3477_v9, %v3336_v8 }
 0xd97   : > { %v10066_v11 = vpack.i.bf16 %v3759_v54, %v3618_v10 }
 0xd98   : > { %v2641_v50 = vmul.f32 %v8753_v46, %v2634_v48 }
 0xd9a   : > { %v11656_v51 = vadd.f32 %v8754_v49, %v2641_v50 }
 0xd9c   : > { %v11660_v53 = vpack.c.bf16 %v11656_v51, %v11656_v51 }
 0xd9e   : > { %9487 = vmatmul.mubr.bf16.vlgmr.msra.gmra.mrb[48].mxu1 %v11660_v53 }
 0xd9f   : > { %9491 = vmatpush3.bf16.msra.mxu1 %v2947_v52  ;;  %9492 = vmatprep.mubr.msk.bf16.mxu1 %vm10949_vm0, %v10948_v1 }
 0xda0   : > { %9496 = vmatprep.subr.bf16.mxu1 %v10948_v1 }
 0xdaf   : > { %3899 = vrot.lane.b32.xlu1 %v2908_v20, %s10956_s24 }
 0xe0d   : > { %v11667_v56 = vpop.trf.xlu1 }
 0xe0e   : > { %v10048_v17 = vunpack.i.h.bf16 %v11667_v56  ;;  %v10045_v36 = vunpack.i.l.bf16 %v11667_v56 }
 0xe11   : > { %v11669_v57 = vpop.trf.xlu1 }
 0xe12   : > { %v10053_v55 = vunpack.i.h.bf16 %v11669_v57  ;;  %v10050_v37 = vunpack.i.l.bf16 %v11669_v57 }
 0xe14   : > { %v3229_v29 = vpack.c.bf16 %v10053_v55, %v10048_v17  ;;  %v3086_v40 = vpack.c.bf16 %v10050_v37, %v10045_v36 }
 0xe16   : > { %9515 = vmatpush3.bf16.msra.mxu0 %v3229_v29 }
 0xe17   : > { %9526 = vmatprep.subr.bf16.mxu0 %v10948_v1 }
 0xe21   : > { %v3900_v26 = vpop.permute.xlu1 %3899 }
 0xe71   : > { %v2757_v61 = vpop.f32.mrb[48].mxu1 }
 0xe72   : > { %v2758_v63 = vadd.f32 %v8755_v60, %v2757_v61  ;;  %v9488_v2 = vpop.f32.mrb[49].mxu1 }
 0xe73   : > { %v2760_v3 = vpop.f32.mrb[50].mxu1 }
 0xe74   : > { %v2914_v4 = vpack.c.bf16 %v2758_v63, %v2758_v63  ;;  %v9489_v5 = vpop.f32.mrb[51].mxu1 }
 0xe76   : > { %9493 = vmatmul.mubr.msk.bf16.vlgmr.msra.gmra.mrb[52].mxu1 %vm1014_vm1, %v2914_v4  ;;  %3794 = vrot.lane.b32.xlu1 %v2914_v4, %s10954_s25 }
 0xe77   : > { %9497 = vmatpush3.bf16.msra.mxu1 %v3008_v7  ;;  %9498 = vmatprep.mubr.msk.bf16.mxu1 %vm10949_vm0, %v10948_v1 }
 0xe78   : > { %9502 = vmatprep.subr.bf16.mxu1 %v10948_v1 }
 0xe9f   : > { %10067 = vxpose.xlu1.b32.start.end [1/1] (short) (narrow) %v10066_v11, 16 }
 0xee8   : > { %v3795_v27 = vpop.permute.xlu1 %3794 }
 0xf1f   : > { %v10068_v28 = vpop.trf.xlu1 }
 0xf20   : > { %v10069_v49 = vunpack.i.l.bf16 %v10068_v28  ;;  %v10072_v54 = vunpack.i.h.bf16 %v10068_v28 }
 0xf23   : > { %v10073_v30 = vpop.trf.xlu1 }
 0xf24   : > { %v10074_v50 = vunpack.i.l.bf16 %v10073_v30  ;;  %v10077_v56 = vunpack.i.h.bf16 %v10073_v30 }
 0xf26   : > { %v3652_v52 = vpack.c.bf16 %v10074_v50, %v10069_v49  ;;  %v3793_v61 = vpack.c.bf16 %v10077_v56, %v10072_v54 }
 0xf49   : > { %v2985_v12 = vpop.f32.mrb[52].mxu1 }
 0xf4a   : > { %v9494_v13 = vpop.f32.mrb[53].mxu1  ;;  %v2991_v14 = vsel %vm1058_vm3, %v2985_v12, -inf }
 0xf4b   : > { %2992 = vmax.xlane.f32.xlu0 %v2991_v14  ;;  %v2988_v15 = vpop.f32.mrb[54].mxu1 }
 0xf4c   : > { %v9495_v16 = vpop.f32.mrb[55].mxu1 }
 0xf61   : > { %3088 = vrot.lane.b32.xlu0 %v2914_v4, %s10950_s23 }
 0xf65   : > { %3230 = vrot.lane.b32.xlu0 %v2914_v4, %s10951_s16 }
 0xf69   : > { %3371 = vrot.lane.b32.xlu0 %v2914_v4, %s10955_s6 }
 0xf6d   : > { %3512 = vrot.lane.b32.xlu0 %v2914_v4, %s10952_s9 }
 0xfd8   : > { %v2993_v18 = vpop.xlane.xlu0 %2992 }
 0xfd9   : > { %v2994_v19 = vsub.f32 %v2985_v12, %v2993_v18 }
 0xfdb   : > { %v2995_v20 = vmul.f32 1.442695, %v2994_v19 }
 0xfdc   : > { %v3089_v21 = vpop.permute.xlu0 %3088 }
 0xfdd   : > { %10506 = vpow2.f32 %v2995_v20 }
 0xfe0   : > { %v3231_v22 = vpop.permute.xlu0 %3230 }
 0xfe1   : > { %9517 = vmatmul.mubr.msk.bf16.vlgmr.msra.gmra.mrb[40].mxu0 %vm1014_vm1, %v3231_v22 }
 0xfe2   : > { %9528 = vmatprep.mubr.msk.bf16.mxu0 %vm10949_vm0, %v10948_v1 }
 0xfe4   : > { %v3372_v31 = vpop.permute.xlu0 %3371 }
 0xfe7   : > { %v10507_v23 = vpop.eup %10506 }
 0xfe8   : > { %v2997_v24 = vsel %vm1058_vm3, %v10507_v23, 0.0  ;;  %v3513_v33 = vpop.permute.xlu0 %3512 }
 0xfe9   : > { %2998 = vadd.xlane.f32.xlu0 %v2997_v24 }
0x1016   : > { %10055 = vxpose.xlu0.b32.start.end [1/1] (short) (narrow) %v10054_v25, 16 }
0x1043   : > { %3653 = vrot.lane.b32.xlu0 %v2914_v4, %s10953_s15 }
0x1047   : > { %3935 = vrot.lane.b32.xlu0 %v2914_v4, %s10956_s24 }
0x1065   : > { %3902 = vxpose.xlu0.b32.start.end [1/1] (short) (narrow) %v3900_v26, 16 }
0x1076   : > { %v2999_v34 = vpop.xlane.xlu0 %2998 }
0x1077   : > { %10508 = vrcp.f32 %v2999_v34 }
0x1081   : > { %v10509_v35 = vpop.eup %10508 }
0x1082   : > { %v3001_v38 = vmul.f32 %v10509_v35, %v10507_v23 }
0x1084   : > { %v3002_v39 = vpack.c.bf16 %v3001_v38, %v3001_v38 }
0x1086   : > { %9499 = vmatmul.mubr.msk.bf16.vlgmr.msra.gmra.mrb[56].mxu1 %vm1058_vm3, %v3002_v39 }
0x1087   : > { %9503 = vmatpush3.bf16.msra.mxu1 %v3086_v40  ;;  %9504 = vmatprep.mubr.msk.bf16.mxu1 %vm10949_vm0, %v10948_v1 }
0x1088   : > { %9508 = vmatprep.subr.bf16.mxu1 %v10948_v1 }
0x108e   : > { %9505 = vmatmul.mubr.msk.bf16.vlgmr.msra.gmra.mrb[60].mxu1 %vm1014_vm1, %v3089_v21 }
0x108f   : > { %9510 = vmatprep.mubr.msk.bf16.mxu1 %vm10949_vm0, %v10948_v1 }
0x1096   : > { %v10056_v41 = vpop.trf.xlu0 }
0x1097   : > { %v10057_v42 = vunpack.i.l.bf16 %v10056_v41  ;;  %v10060_v44 = vunpack.i.h.bf16 %v10056_v41 }
0x109a   : > { %v10061_v43 = vpop.trf.xlu0 }
0x109b   : > { %v10062_v6 = vunpack.i.l.bf16 %v10061_v43  ;;  %v10065_v45 = vunpack.i.h.bf16 %v10061_v43 }
0x109d   : > { %v3370_v46 = vpack.c.bf16 %v10062_v6, %v10057_v42  ;;  %v3511_v48 = vpack.c.bf16 %v10065_v45, %v10060_v44 }
0x109f   : > { %9527 = vmatpush3.bf16.msra.mxu0 %v3370_v46 }
0x10a0   : > { %9538 = vmatprep.subr.bf16.mxu0 %v10948_v1 }
0x10a2   : > { %9529 = vmatmul.mubr.msk.bf16.vlgmr.msra.gmra.mrb[44].mxu0 %vm1014_vm1, %v3372_v31 }
0x10a3   : > { %9539 = vmatpush3.bf16.msra.mxu0 %v3511_v48  ;;  %9540 = vmatprep.mubr.msk.bf16.mxu0 %vm10949_vm0, %v10948_v1 }
0x10a4   : > { %9550 = vmatprep.subr.bf16.mxu0 %v10948_v1 }
0x10aa   : > { %9541 = vmatmul.mubr.msk.bf16.vlgmr.msra.gmra.mrb[48].mxu0 %vm1014_vm1, %v3513_v33 }
0x10ab   : > { %9551 = vmatpush3.bf16.msra.mxu0 %v3652_v52  ;;  %9552 = vmatprep.mubr.msk.bf16.mxu0 %vm10949_vm0, %v10948_v1 }
0x10ac   : > { %9562 = vmatprep.subr.bf16.mxu0 %v10948_v1 }
0x10b4   : > { %v3269_v57 = vpop.f32.mrb[40].mxu0 }
0x10b5   : > { %v9518_v58 = vpop.f32.mrb[41].mxu0  ;;  %v3654_v59 = vpop.permute.xlu0 %3653  ;;  %v3275_v60 = vsel %vm1058_vm3, %v3269_v57, -inf }
0x10b6   : > { %3276 = vmax.xlane.f32.xlu0 %v3275_v60  ;;  %v3272_v63 = vpop.f32.mrb[42].mxu0  ;;  %9553 = vmatmul.mubr.msk.bf16.vlgmr.msra.gmra.mrb[52].mxu0 %vm1014_vm1, %v3654_v59 }
0x10b7   : > { %9563 = vmatpush3.bf16.msra.mxu0 %v3793_v61  ;;  %v9519_v2 = vpop.f32.mrb[43].mxu0  ;;  %9564 = vmatprep.mubr.msk.bf16.mxu0 %vm10949_vm0, %v10948_v1 }
0x10b8   : > { %9574 = vmatprep.subr.bf16.mxu0 %v10948_v1 }
0x10b9   : > { %v3936_v3 = vpop.permute.xlu0 %3935 }
0x10be   : > { %9565 = vmatmul.mubr.msk.bf16.vlgmr.msra.gmra.mrb[56].mxu0 %vm1014_vm1, %v3795_v27 }
0x10bf   : > { %9576 = vmatprep.mubr.msk.bf16.mxu0 %vm10949_vm0, %v10948_v1 }
0x10e5   : > { %v3918_v4 = vpop.trf.xlu0 }
0x10e9   : > { %v3919_v5 = vpop.trf.xlu0 }
0x10ea   : > { %v3934_v7 = vpack.c.bf16 %v3919_v5, %v3918_v4 }
0x10ec   : > { %9575 = vmatpush3.bf16.msra.mxu0 %v3934_v7 }
0x10ed   : > { %9586 = vmatprep.subr.bf16.mxu0 %v10948_v1 }
0x10ef   : > { %9577 = vmatmul.mubr.msk.bf16.vlgmr.msra.gmra.mrb[60].mxu0 %vm1014_vm1, %v3936_v3 }
0x10f0   : > { %9602 = vmatprep.mubr.msk.bf16.mxu0 %vm10949_vm0, %v10948_v1 }
0x1143   : > { %v3277_v37 = vpop.xlane.xlu0 %3276 }
0x1144   : > { %v3278_v38 = vsub.f32 %v3269_v57, %v3277_v37 }
0x1146   : > { %v3279_v39 = vmul.f32 1.442695, %v3278_v38 }
0x1148   : > { %10510 = vpow2.f32 %v3279_v39 }
0x1152   : > { %v11734_v43 = vpop.eup %10510 }
0x1153   : > { %v3281_v45 = vsel %vm1058_vm3, %v11734_v43, 0.0 }
0x1159   : > { %v11726_v8 = vpop.f32.mrb[56].mxu1 }
0x115a   : > { %v9500_v9 = vpop.f32.mrb[57].mxu1 }
0x115b   : > { %v3047_v10 = vpop.f32.mrb[58].mxu1 }
0x115c   : > { %v9501_v11 = vpop.f32.mrb[59].mxu1 }
0x1161   : > { %v3127_v12 = vpop.f32.mrb[60].mxu1 }
0x1162   : > { %v9506_v13 = vpop.f32.mrb[61].mxu1  ;;  %v3133_v14 = vsel %vm1058_vm3, %v3127_v12, -inf }
0x1163   : > { %3134 = vmax.xlane.f32.xlu1 %v3133_v14  ;;  %v3130_v15 = vpop.f32.mrb[62].mxu1 }
0x1164   : > { %v9507_v16 = vpop.f32.mrb[63].mxu1 }
0x1175   : > { %v3410_v17 = vpop.f32.mrb[44].mxu0 }
0x1176   : > { %v9530_v55 = vpop.f32.mrb[45].mxu0  ;;  %v3416_v29 = vsel %vm1058_vm3, %v3410_v17, -inf }
0x1177   : > { %3417 = vmax.xlane.f32.xlu1 %v3416_v29  ;;  %v3413_v18 = vpop.f32.mrb[46].mxu0 }
0x1178   : > { %v9531_v19 = vpop.f32.mrb[47].mxu0 }
0x117d   : > { %v3551_v20 = vpop.f32.mrb[48].mxu0 }
0x117e   : > { %v9542_v21 = vpop.f32.mrb[49].mxu0  ;;  %v3557_v22 = vsel %vm1058_vm3, %v3551_v20, -inf }
0x117f   : > { %3558 = vmax.xlane.f32.xlu1 %v3557_v22  ;;  %v3554_v23 = vpop.f32.mrb[50].mxu0 }
0x1180   : > { %v9543_v24 = vpop.f32.mrb[51].mxu0 }
0x1189   : > { %v3692_v25 = vpop.f32.mrb[52].mxu0 }
0x118a   : > { %v9554_v26 = vpop.f32.mrb[53].mxu0  ;;  %v3698_v27 = vsel %vm1058_vm3, %v3692_v25, -inf }
0x118b   : > { %3699 = vmax.xlane.f32.xlu1 %v3698_v27  ;;  %v3695_v28 = vpop.f32.mrb[54].mxu0 }
0x118c   : > { %v9555_v30 = vpop.f32.mrb[55].mxu0 }
0x1191   : > { %v3833_v31 = vpop.f32.mrb[56].mxu0 }
0x1192   : > { %v9566_v33 = vpop.f32.mrb[57].mxu0  ;;  %v3839_v34 = vsel %vm1058_vm3, %v3833_v31, -inf }
0x1193   : > { %3840 = vmax.xlane.f32.xlu0 %v3839_v34  ;;  %v3836_v35 = vpop.f32.mrb[58].mxu0 }
0x1194   : > { %v9567_v36 = vpop.f32.mrb[59].mxu0 }
0x11c2   : > { %v3974_v40 = vpop.f32.mrb[60].mxu0 }
0x11c3   : > { %v9578_v41 = vpop.f32.mrb[61].mxu0  ;;  %v3980_v42 = vsel %vm1058_vm3, %v3974_v40, -inf }
0x11c4   : > { %3981 = vmax.xlane.f32.xlu1 %v3980_v42  ;;  %v3977_v6 = vpop.f32.mrb[62].mxu0 }
0x11c5   : > { %v9579_v44 = vpop.f32.mrb[63].mxu0 }
0x11c8   : > { %3282 = vadd.xlane.f32.xlu1 %v3281_v45 }
0x11f0   : > { %v3135_v46 = vpop.xlane.xlu1 %3134 }
0x11f1   : > { %v3136_v48 = vsub.f32 %v3127_v12, %v3135_v46 }
0x11f3   : > { %v3137_v52 = vmul.f32 1.442695, %v3136_v48 }
0x1204   : > { %v3418_v49 = vpop.xlane.xlu1 %3417 }
0x1205   : > { %v3419_v50 = vsub.f32 %v3410_v17, %v3418_v49 }
0x1207   : > { %v3420_v54 = vmul.f32 1.442695, %v3419_v50 }
0x1209   : > { %10512 = vpow2.f32 %v3420_v54 }
0x120a   : > { %10514 = vpow2.f32 %v3137_v52 }
0x120c   : > { %v3559_v56 = vpop.xlane.xlu1 %3558 }
0x120d   : > { %v3560_v57 = vsub.f32 %v3551_v20, %v3559_v56 }
0x120f   : > { %v3561_v58 = vmul.f32 1.442695, %v3560_v57 }
0x1211   : > { %10516 = vpow2.f32 %v3561_v58 }
0x1213   : > { %v11738_v59 = vpop.eup %10512 }
0x1214   : > { %v3422_v60 = vsel %vm1058_vm3, %v11738_v59, 0.0  ;;  %v10515_v61 = vpop.eup %10514 }
0x1215   : > { %3423 = vadd.xlane.f32.xlu0 %v3422_v60  ;;  %v3139_v2 = vsel %vm1058_vm3, %v10515_v61, 0.0 }
0x1218   : > { %v3700_v63 = vpop.xlane.xlu1 %3699 }
0x1219   : > { %v3701_v3 = vsub.f32 %v3692_v25, %v3700_v63  ;;  %3140 = vadd.xlane.f32.xlu0 %v3139_v2 }
0x121b   : > { %v11743_v4 = vpop.eup %10516  ;;  %v3702_v5 = vmul.f32 1.442695, %v3701_v3 }
0x121c   : > { %v3563_v7 = vsel %vm1058_vm3, %v11743_v4, 0.0 }
0x121d   : > { %10518 = vpow2.f32 %v3702_v5  ;;  %3564 = vadd.xlane.f32.xlu1 %v3563_v7 }
0x1220   : > { %v3841_v11 = vpop.xlane.xlu0 %3840 }
0x1221   : > { %v3842_v12 = vsub.f32 %v3833_v31, %v3841_v11 }
0x1223   : > { %v3843_v13 = vmul.f32 1.442695, %v3842_v12 }
0x1225   : > { %10520 = vpow2.f32 %v3843_v13 }
0x1227   : > { %v11747_v9 = vpop.eup %10518 }
0x1228   : > { %v3704_v10 = vsel %vm1058_vm3, %v11747_v9, 0.0 }
0x1229   : > { %3705 = vadd.xlane.f32.xlu1 %v3704_v10 }
0x122f   : > { %3146 = vrot.lane.b32.xlu0 %v11673_v62, %s10950_s23  ;;  %v11757_v14 = vpop.eup %10520 }
0x1230   : > { %v3845_v15 = vsel %vm1058_vm3, %v11757_v14, 0.0 }
0x123a   : > { %3287 = vrot.lane.b32.xlu1 %v11673_v62, %s10951_s16 }
0x123e   : > { %3428 = vrot.lane.b32.xlu1 %v11673_v62, %s10955_s6 }
0x124e   : > { %3846 = vadd.xlane.f32.xlu0 %v3845_v15 }
0x1251   : > { %v3982_v16 = vpop.xlane.xlu1 %3981 }
0x1252   : > { %v3983_v17 = vsub.f32 %v3974_v40, %v3982_v16 }
0x1254   : > { %v3984_v55 = vmul.f32 1.442695, %v3983_v17 }
0x1255   : > { %v3283_v21 = vpop.xlane.xlu1 %3282 }
0x1256   : > { %10522 = vpow2.f32 %v3984_v55  ;;  %v10262_v55 = vld [vmem:[#allocation11 + $0x40] sm:$0xff]  }
0x1257   : > { %9587 = vmatpush3.bf16.msra.mxu0 %v10262_v55  ;;  %v10282_v55 = vld [vmem:[#allocation13 + $0xc0] ss:$8 sps:$4 sm:$0xff]  }
0x1258   : > { %9588 = vmatprep.subr.bf16.mxu0 %v10948_v1 }
0x1260   : > { %v11761_v29 = vpop.eup %10522 }
0x1261   : > { %v3986_v18 = vsel %vm1058_vm3, %v11761_v29, 0.0 }
0x1262   : > { %3987 = vadd.xlane.f32.xlu1 %v3986_v18  ;;  %v10264_v18 = vld [vmem:[#allocation11 + $0x50] sm:$0xff]  }
0x1264   : > { %3569 = vrot.lane.b32.xlu0 %v11673_v62, %s10952_s9 }
0x1268   : > { %3851 = vrot.lane.b32.xlu0 %v11673_v62, %s10954_s25 }
0x126c   : > { %3992 = vrot.lane.b32.xlu0 %v11673_v62, %s10956_s24 }
0x1273   : > { %3710 = vrot.lane.b32.xlu1 %v11673_v62, %s10953_s15 }
0x12a2   : > { %v3424_v19 = vpop.xlane.xlu0 %3423 }
0x12a6   : > { %v3141_v20 = vpop.xlane.xlu0 %3140 }
0x12a7   : > { %10524 = vrcp.f32 %v3141_v20 }
0x12a8   : > { %10526 = vrcp.f32 %v3283_v21 }
0x12a9   : > { %10528 = vrcp.f32 %v3424_v19 }
0x12aa   : > { %v3147_v22 = vpop.permute.xlu0 %3146  ;;  %v3565_v25 = vpop.xlane.xlu1 %3564 }
0x12ab   : > { %v3152_v23 = vsel %vm1075_vm2, %v3147_v22, 0  ;;  %10530 = vrcp.f32 %v3565_v25  ;;  %v10267_v25 = vld [vmem:[#allocation11 + $0x68] sm:$0xff]  }
0x12ac   : > { %9509 = vmatpush3.bf16.msra.mxu1 %v3152_v23  ;;  %v10265_v23 = vld [vmem:[#allocation11 + $0x58] sm:$0xff]  }
0x12ad   : > { %9520 = vmatprep.subr.bf16.mxu1 %v10948_v1 }
0x12b1   : > { %v10525_v24 = vpop.eup %10524 }
0x12b2   : > { %v3143_v26 = vmul.f32 %v10525_v24, %v10515_v61  ;;  %v10527_v28 = vpop.eup %10526  ;;  %v10266_v24 = vld [vmem:[#allocation11 + $0x60] sm:$0xff]  }
0x12b3   : > { %v3285_v30 = vmul.f32 %v10527_v28, %v11734_v43  ;;  %v10529_v35 = vpop.eup %10528 }
0x12b4   : > { %v3144_v27 = vpack.c.bf16 %v3143_v26, %v3143_v26  ;;  %v3426_v38 = vmul.f32 %v10529_v35, %v11738_v59  ;;  %v10268_v26 = vld [vmem:[#allocation11 + $0x70] sm:$0xff]  }
0x12b5   : > { %v3286_v34 = vpack.c.bf16 %v3285_v30, %v3285_v30  ;;  %v10531_v40 = vpop.eup %10530 }
0x12b6   : > { %9511 = vmatmul.mubr.msk.bf16.vlgmr.msra.gmra.mrb[64].mxu1 %vm1058_vm3, %v3144_v27  ;;  %v3706_v62 = vpop.xlane.xlu1 %3705  ;;  %v3427_v39 = vpack.c.bf16 %v3426_v38, %v3426_v38  ;;  %v3567_v42 = vmul.f32 %v10531_v40, %v11743_v4 }
0x12b7   : > { %9522 = vmatprep.mubr.msk.bf16.mxu1 %vm10949_vm0, %v10948_v1  ;;  %10532 = vrcp.f32 %v3706_v62 }
0x12b8   : > { %v3568_v44 = vpack.c.bf16 %v3567_v42, %v3567_v42 }
0x12ba   : > { %v3288_v31 = vpop.permute.xlu1 %3287 }
0x12bb   : > { %v3293_v33 = vsel %vm1075_vm2, %v3288_v31, 0  ;;  %v10269_v31 = vld [vmem:[#allocation11 + $0x78] sm:$0xff]  }
0x12bc   : > { %9521 = vmatpush3.bf16.msra.mxu1 %v3293_v33 }
0x12bd   : > { %9532 = vmatprep.subr.bf16.mxu1 %v10948_v1 }
0x12be   : > { %v3429_v36 = vpop.permute.xlu1 %3428 }
0x12bf   : > { %v3434_v37 = vsel %vm1075_vm2, %v3429_v36, 0  ;;  %9523 = vmatmul.mubr.msk.bf16.vlgmr.msra.gmra.mrb[68].mxu1 %vm1058_vm3, %v3286_v34 }
0x12c0   : > { %9533 = vmatpush3.bf16.msra.mxu1 %v3434_v37  ;;  %9534 = vmatprep.mubr.msk.bf16.mxu1 %vm10949_vm0, %v10948_v1 }
0x12c1   : > { %9544 = vmatprep.subr.bf16.mxu1 %v10948_v1  ;;  %v10533_v45 = vpop.eup %10532 }
0x12c2   : > { %v3708_v48 = vmul.f32 %v10533_v45, %v11747_v9 }
0x12c4   : > { %v3709_v54 = vpack.c.bf16 %v3708_v48, %v3708_v48 }
0x12c7   : > { %9535 = vmatmul.mubr.msk.bf16.vlgmr.msra.gmra.mrb[72].mxu1 %vm1058_vm3, %v3427_v39 }
0x12c8   : > { %9546 = vmatprep.mubr.msk.bf16.mxu1 %vm10949_vm0, %v10948_v1 }
0x12db   : > { %v3847_v41 = vpop.xlane.xlu0 %3846 }
0x12dc   : > { %10534 = vrcp.f32 %v3847_v41 }
0x12df   : > { %v3570_v43 = vpop.permute.xlu0 %3569 }
0x12e0   : > { %v3575_v6 = vsel %vm1075_vm2, %v3570_v43, 0 }
0x12e1   : > { %9545 = vmatpush3.bf16.msra.mxu1 %v3575_v6 }
0x12e2   : > { %9556 = vmatprep.subr.bf16.mxu1 %v10948_v1 }
0x12e3   : > { %v3852_v52 = vpop.permute.xlu0 %3851 }
0x12e4   : > { %9547 = vmatmul.mubr.msk.bf16.vlgmr.msra.gmra.mrb[76].mxu1 %vm1058_vm3, %v3568_v44  ;;  %v3857_v57 = vsel %vm1075_vm2, %v3852_v52, 0 }
0x12e5   : > { %9558 = vmatprep.mubr.msk.bf16.mxu1 %vm10949_vm0, %v10948_v1 }
0x12e6   : > { %v10535_v56 = vpop.eup %10534 }
0x12e7   : > { %v3849_v58 = vmul.f32 %v10535_v56, %v11757_v14  ;;  %v3993_v59 = vpop.permute.xlu0 %3992 }
0x12e8   : > { %v3998_v63 = vsel %vm1075_vm2, %v3993_v59, 0 }
0x12e9   : > { %v3850_v60 = vpack.c.bf16 %v3849_v58, %v3849_v58 }
0x12ef   : > { %v3988_v46 = vpop.xlane.xlu1 %3987 }
0x12f0   : > { %10536 = vrcp.f32 %v3988_v46 }
0x12f3   : > { %v3711_v49 = vpop.permute.xlu1 %3710 }
0x12f4   : > { %v3716_v50 = vsel %vm1075_vm2, %v3711_v49, 0 }
0x12f5   : > { %9557 = vmatpush3.bf16.msra.mxu1 %v3716_v50 }
0x12f6   : > { %9568 = vmatprep.subr.bf16.mxu1 %v10948_v1 }
0x12f8   : > { %9559 = vmatmul.mubr.msk.bf16.vlgmr.msra.gmra.mrb[80].mxu1 %vm1058_vm3, %v3709_v54 }
0x12f9   : > { %9569 = vmatpush3.bf16.msra.mxu1 %v3857_v57  ;;  %9570 = vmatprep.mubr.msk.bf16.mxu1 %vm10949_vm0, %v10948_v1 }
0x12fa   : > { %9580 = vmatprep.subr.bf16.mxu1 %v10948_v1  ;;  %v10537_v61 = vpop.eup %10536 }
0x12fb   : > { %v3990_v2 = vmul.f32 %v10537_v61, %v11761_v29  ;;  %v10263_v29 = vld [vmem:[#allocation11 + $0x48] sm:$0xff]  }
0x12fc   : > { %9589 = vmatpush3.bf16.msra.mxu0 %v10263_v29  ;;  %v10287_v29 = vld [vmem:[#allocation13 + $0xd4] ss:$8 sps:$4 sm:$0xff]  }
0x12fd   : > { %v3991_v3 = vpack.c.bf16 %v3990_v2, %v3990_v2  ;;  %9590 = vmatprep.subr.bf16.mxu0 %v10948_v1 }
0x1300   : > { %9571 = vmatmul.mubr.msk.bf16.vlgmr.msra.gmra.mrb[84].mxu1 %vm1058_vm3, %v3850_v60  ;;  %9591 = vmatpush3.bf16.msra.mxu0 %v10264_v18  ;;  %v10285_v18 = vld [vmem:[#allocation13 + $0xd0] ss:$8 sps:$4 sm:$0xff]  }
0x1301   : > { %9581 = vmatpush3.bf16.msra.mxu1 %v3998_v63  ;;  %9582 = vmatprep.mubr.msk.bf16.mxu1 %vm10949_vm0, %v10948_v1 }
0x1302   : > { %9592 = vmatprep.subr.bf16.mxu0 %v10948_v1 }
0x1304   : > { %9593 = vmatpush3.bf16.msra.mxu0 %v10265_v23  ;;  %v10294_v23 = vld [vmem:[#allocation14 + $0xc0] sm:$0xff]  }
0x1305   : > { %9594 = vmatprep.subr.bf16.mxu0 %v10948_v1 }
0x1308   : > { %9583 = vmatmul.mubr.msk.bf16.vlgmr.msra.gmra.mrb[88].mxu1 %vm1058_vm3, %v3991_v3  ;;  %9595 = vmatpush3.bf16.msra.mxu0 %v10266_v24  ;;  %v10295_v24 = vld [vmem:[#allocation14 + $0x80] sm:$0xff]  }
0x1309   : > { %4362 = vmatprep.mubr.bf16.mxu1 %v10947_v0  ;;  %9596 = vmatprep.subr.bf16.mxu0 %v10948_v1 }
0x130c   : > { %9597 = vmatpush3.bf16.msra.mxu0 %v10267_v25  ;;  %v10296_v25 = vld [vmem:[#allocation14 + $0xc8] sm:$0xff]  }
0x130d   : > { %9598 = vmatprep.subr.bf16.mxu0 %v10948_v1 }
0x1310   : > { %9599 = vmatpush3.bf16.msra.mxu0 %v10268_v26  ;;  %v10297_v26 = vld [vmem:[#allocation14 + $0x88] sm:$0xff]  }
0x1311   : > { %9600 = vmatprep.subr.bf16.mxu0 %v10948_v1 }
0x1314   : > { %9601 = vmatpush3.bf16.msra.mxu0 %v10269_v31  ;;  %v10302_v31 = vld [vmem:[#allocation14 + $0xe0] sm:$0xff]  }
0x1315   : > { %9168 = vmatprep.subr.bf16.mxu0 %v10294_v23 }
0x1389   : > { %v3188_v4 = vpop.f32.mrb[64].mxu1 }
0x138a   : > { %v9512_v5 = vpop.f32.mrb[65].mxu1  ;;  %4041 = vrot.lane.b32.xlu1 %v3188_v4, %s10956_s24  ;;  %v10270_v4 = vld [vmem:[#allocation13 + $0x80] ss:$8 sps:$4 sm:$0xff]  }
0x138b   : > { %v3191_v7 = vpop.f32.mrb[66].mxu1  ;;  %v10272_v5 = vld [vmem:[#allocation13 + $0x84] ss:$8 sps:$4 sm:$0xff]  }
0x138c   : > { %v9513_v9 = vpop.f32.mrb[67].mxu1  ;;  %v10275_v7 = vld [vmem:[#allocation13 + $0x94] ss:$8 sps:$4 sm:$0xff]   ;;  %4330 = vmatprep.subr.bf16.mxu1 %v10272_v5 }
0x138d   : > { %4331 = vmatpush1.bf16.msra.mxu1 %v10270_v4  ;;  %v10273_v9 = vld [vmem:[#allocation13 + $0x90] ss:$8 sps:$4 sm:$0xff]   ;;  %v10310_v4 = vld [vmem:[#allocation10 + $0x100] ss:$8 sps:$4 sm:$0xff]  }
0x138e   : > { %4332 = vmatprep.subr.bf16.mxu1 %v10275_v7  ;;  %v10315_v7 = vld [vmem:[#allocation10 + $0x114] ss:$8 sps:$4 sm:$0xff]  }
0x1391   : > { %4333 = vmatpush1.bf16.msra.mxu1 %v10273_v9  ;;  %v10313_v9 = vld [vmem:[#allocation10 + $0x110] ss:$8 sps:$4 sm:$0xff]  }
0x1392   : > { %v3329_v10 = vpop.f32.mrb[68].mxu1 }
0x1393   : > { %4045 = vrot.lane.b32.xlu0 %v3329_v10, %s10954_s25  ;;  %v9524_v11 = vpop.f32.mrb[69].mxu1  ;;  %v10278_v10 = vld [vmem:[#allocation13 + $0xa4] ss:$8 sps:$4 sm:$0xff]  }
0x1394   : > { %v3332_v12 = vpop.f32.mrb[70].mxu1  ;;  %v10276_v11 = vld [vmem:[#allocation13 + $0xa0] ss:$8 sps:$4 sm:$0xff]   ;;  %4334 = vmatprep.subr.bf16.mxu1 %v10278_v10  ;;  %v10318_v10 = vld [vmem:[#allocation10 + $0x124] ss:$8 sps:$4 sm:$0xff]  }
0x1395   : > { %v9525_v13 = vpop.f32.mrb[71].mxu1  ;;  %4335 = vmatpush1.bf16.msra.mxu1 %v10276_v11  ;;  %v10316_v11 = vld [vmem:[#allocation10 + $0x120] ss:$8 sps:$4 sm:$0xff]  }
0x139a   : > { %v3470_v14 = vpop.f32.mrb[72].mxu1 }
0x139b   : > { %4049 = vrot.lane.b32.xlu1 %v3470_v14, %s10953_s15  ;;  %v9536_v15 = vpop.f32.mrb[73].mxu1 }
0x139c   : > { %v3473_v16 = vpop.f32.mrb[74].mxu1 }
0x139d   : > { %v9537_v17 = vpop.f32.mrb[75].mxu1  ;;  %v10279_v16 = vld [vmem:[#allocation13 + $0xb0] ss:$8 sps:$4 sm:$0xff]  }
0x139e   : > { %v10284_v17 = vld [vmem:[#allocation13 + $0xc4] ss:$8 sps:$4 sm:$0xff]  }
0x13b7   : > { %v3611_v19 = vpop.f32.mrb[76].mxu1 }
0x13b8   : > { %4053 = vrot.lane.b32.xlu0 %v3611_v19, %s10952_s9  ;;  %v9548_v20 = vpop.f32.mrb[77].mxu1  ;;  %v10290_v19 = vld [vmem:[#allocation13 + $0xe4] ss:$8 sps:$4 sm:$0xff]  }
0x13b9   : > { %v3614_v21 = vpop.f32.mrb[78].mxu1  ;;  %v10288_v20 = vld [vmem:[#allocation13 + $0xe0] ss:$8 sps:$4 sm:$0xff]  }
0x13ba   : > { %v9549_v22 = vpop.f32.mrb[79].mxu1  ;;  %v10293_v21 = vld [vmem:[#allocation13 + $0xf4] ss:$8 sps:$4 sm:$0xff]  }
0x13bb   : > { %v10291_v22 = vld [vmem:[#allocation13 + $0xf0] ss:$8 sps:$4 sm:$0xff]  }
0x13cb   : > { %v3752_v27 = vpop.f32.mrb[80].mxu1 }
0x13cc   : > { %4057 = vrot.lane.b32.xlu1 %v3752_v27, %s10955_s6  ;;  %v9560_v28 = vpop.f32.mrb[81].mxu1  ;;  %v10298_v27 = vld [vmem:[#allocation14 + $0xd0] sm:$0xff]  }
0x13cd   : > { %v3755_v62 = vpop.f32.mrb[82].mxu1  ;;  %v10299_v28 = vld [vmem:[#allocation14 + $0x90] sm:$0xff]  }
0x13ce   : > { %v9561_v30 = vpop.f32.mrb[83].mxu1  ;;  %v10300_v62 = vld [vmem:[#allocation14 + $0xd8] sm:$0xff]  }
0x13cf   : > { %v10301_v30 = vld [vmem:[#allocation14 + $0x98] sm:$0xff]  }
0x13d3   : > { %v3893_v33 = vpop.f32.mrb[84].mxu1 }
0x13d4   : > { %4061 = vrot.lane.b32.xlu0 %v3893_v33, %s10951_s16  ;;  %v9572_v34 = vpop.f32.mrb[85].mxu1  ;;  %v10303_v33 = vld [vmem:[#allocation14 + $0xa0] sm:$0xff]  }
0x13d5   : > { %v3896_v35 = vpop.f32.mrb[86].mxu1  ;;  %v10304_v34 = vld [vmem:[#allocation14 + $0xe8] sm:$0xff]  }
0x13d6   : > { %v9573_v36 = vpop.f32.mrb[87].mxu1  ;;  %v10305_v35 = vld [vmem:[#allocation14 + $0xa8] sm:$0xff]  }
0x13db   : > { %v4034_v37 = vpop.f32.mrb[88].mxu1 }
0x13dc   : > { %4065 = vrot.lane.b32.xlu1 %v4034_v37, %s10950_s23  ;;  %v9584_v38 = vpop.f32.mrb[89].mxu1 }
0x13dd   : > { %v4037_v39 = vpop.f32.mrb[90].mxu1 }
0x13de   : > { %v9585_v40 = vpop.f32.mrb[91].mxu1 }
0x13df   : > { %v8809_v40 = vld [vmem:[%s12397_s8 + $0x1] ss:$0 sm:$0xff] }
0x13fc   : > { %v4042_v41 = vpop.permute.xlu1 %4041 }
0x13fd   : > { %v4068_v44 = vsel %vm1014_vm1, %v11726_v8, %v4042_v41  ;;  %v8798_v8 = vld [vmem:[%s12396_s7 + $0x1] ss:$0 sm:$0xff] }
0x1405   : > { %v4046_v42 = vpop.permute.xlu0 %4045 }
0x1406   : > { %v4069_v45 = vsel %vm2138_vm4, %v4068_v44, %v4046_v42  ;;  %v8810_v42 = vld [vmem:[%s12473_s14 + $0x1] ss:$0 sm:$0xff] }
0x140d   : > { %v4050_v43 = vpop.permute.xlu1 %4049 }
0x140e   : > { %v4070_v48 = vsel %vm2140_vm5, %v4069_v45, %v4050_v43  ;;  %v10306_v45 = vld [vmem:[#allocation14 + $0xf0] sm:$0xff]  }
0x142a   : > { %v4054_v6 = vpop.permute.xlu0 %4053 }
0x142b   : > { %v4071_v50 = vsel %vm2142_vm6, %v4070_v48, %v4054_v6  ;;  %v10308_v48 = vld [vmem:[#allocation14 + $0xf8] sm:$0xff]  }
0x143e   : > { %v4058_v46 = vpop.permute.xlu1 %4057 }
0x143f   : > { %v4072_v52 = vsel %vm2144_vm7, %v4071_v50, %v4058_v46  ;;  %v10307_v46 = vld [vmem:[#allocation14 + $0xb0] sm:$0xff]   ;;  %v10312_v50 = vld [vmem:[#allocation10 + $0x104] ss:$8 sps:$4 sm:$0xff]  }
0x1446   : > { %v4062_v49 = vpop.permute.xlu0 %4061 }
0x1447   : > { %v4073_v54 = vsel %vm2146_vm8, %v4072_v52, %v4062_v49  ;;  %v10309_v49 = vld [vmem:[#allocation14 + $0xb8] sm:$0xff]  }
0x1448   : > { %v8811_v52 = vld [vmem:[%s12474_s26 + $0x2] sm:$0x3] }
0x144e   : > { %v4066_v56 = vpop.permute.xlu1 %4065 }
0x144f   : > { %v4074_v57 = vsel %vm2148_vm9, %v4073_v54, %v4066_v56  ;;  %v4243_v54 = vrot.slane %v8811_v52, %v11405_v32  ;;  %v4247_v56 = vrot.slane %v8811_v52, %v11418_v47 }
0x1450   : > { %v4092_v58 = vpack.c.bf16 %v4074_v57, %v4074_v57 }
0x1452   : > { %9603 = vmatmul.mubr.bf16.vlgmr.msra.gmra.mrb[64].mxu0 %v4092_v58 }
0x1453   : > { %9169 = vmatpush3.bf16.msra.mxu0 %v10295_v24 }
0x1454   : > { %9170 = vmatprep.subr.bf16.mxu0 %v10296_v25 }
0x1457   : > { %9171 = vmatpush3.bf16.msra.mxu0 %v10297_v26 }
0x1458   : > { %9172 = vmatprep.subr.bf16.mxu0 %v10298_v27 }
0x145b   : > { %9173 = vmatpush3.bf16.msra.mxu0 %v10299_v28 }
0x145c   : > { %9174 = vmatprep.subr.bf16.mxu0 %v10300_v62 }
0x145f   : > { %9175 = vmatpush3.bf16.msra.mxu0 %v10301_v30 }
0x1460   : > { %9176 = vmatprep.subr.bf16.mxu0 %v10302_v31 }
0x1463   : > { %9177 = vmatpush3.bf16.msra.mxu0 %v10303_v33 }
0x1464   : > { %9178 = vmatprep.subr.bf16.mxu0 %v10304_v34 }
0x1467   : > { %9179 = vmatpush3.bf16.msra.mxu0 %v10305_v35 }
0x1468   : > { %9180 = vmatprep.subr.bf16.mxu0 %v10306_v45  ;;  %v10339_v45 = vld [vmem:[#allocation7 + $0xa8] sm:$0xff]  }
0x146b   : > { %9181 = vmatpush3.bf16.msra.mxu0 %v10307_v46  ;;  %v10340_v46 = vld [vmem:[#allocation7 + $0xb0] sm:$0xff]  }
0x146c   : > { %9182 = vmatprep.subr.bf16.mxu0 %v10308_v48  ;;  %v10341_v48 = vld [vmem:[#allocation7 + $0xb8] sm:$0xff]  }
0x146f   : > { %9183 = vmatpush3.bf16.msra.mxu0 %v10309_v49 }
0x1470   : > { %4807 = vmatprep.subr.bf16.mxu0 %v10312_v50 }
0x1525   : > { %v4183_v59 = vpop.f32.mrb[64].mxu0 }
0x1526   : > { %v4184_v60 = vadd.f32 %v8798_v8, %v4183_v59  ;;  %v9604_v61 = vpop.f32.mrb[65].mxu0 }
0x1527   : > { %v4186_v63 = vpop.f32.mrb[66].mxu0 }
0x1528   : > { %v4189_v2 = vadd.f32 %v4184_v60, %v11656_v51  ;;  %v9605_v3 = vpop.f32.mrb[67].mxu0  ;;  %v10281_v51 = vld [vmem:[#allocation13 + $0xb4] ss:$8 sps:$4 sm:$0xff]  }
0x1529   : > { %4336 = vmatprep.subr.bf16.mxu1 %v10281_v51  ;;  %v10327_v51 = vld [vmem:[#allocation10 + $0x154] ss:$8 sps:$4 sm:$0xff]  }
0x152a   : > { %4194 = vadd.xlane.f32.xlu0 %v4189_v2  ;;  %4337 = vmatpush1.bf16.msra.mxu1 %v10279_v16  ;;  %v10325_v16 = vld [vmem:[#allocation10 + $0x150] ss:$8 sps:$4 sm:$0xff]  }
0x152b   : > { %4338 = vmatprep.subr.bf16.mxu1 %v10284_v17  ;;  %v10330_v17 = vld [vmem:[#allocation10 + $0x164] ss:$8 sps:$4 sm:$0xff]  }
0x152e   : > { %4339 = vmatpush1.bf16.msra.mxu1 %v10282_v55  ;;  %v10328_v55 = vld [vmem:[#allocation10 + $0x160] ss:$8 sps:$4 sm:$0xff]  }
0x152f   : > { %4340 = vmatprep.subr.bf16.mxu1 %v10287_v29  ;;  %v10333_v29 = vld [vmem:[#allocation10 + $0x174] ss:$8 sps:$4 sm:$0xff]  }
0x1532   : > { %4341 = vmatpush1.bf16.msra.mxu1 %v10285_v18  ;;  %v10331_v18 = vld [vmem:[#allocation10 + $0x170] ss:$8 sps:$4 sm:$0xff]  }
0x1533   : > { %4342 = vmatprep.subr.bf16.mxu1 %v10290_v19 }
0x1536   : > { %4343 = vmatpush1.bf16.msra.mxu1 %v10288_v20  ;;  %v8829_v20 = vld [vmem:[%s12475_s3 + $0x1] ss:$0 sm:$0xff] }
0x1537   : > { %4344 = vmatprep.subr.bf16.mxu1 %v10293_v21 }
0x153a   : > { %4345 = vmatpush1.bf16.msra.mxu1 %v10291_v22 }
0x153b   : > { %9606 = vmatprep.subr.bf16.mxu1 %v10948_v1 }
0x15b7   : > { %v4195_v12 = vpop.xlane.xlu0 %4194 }
0x15b8   : > { %v4196_v13 = vmul.f32 0.0078125, %v4195_v12  ;;  %v10321_v12 = vld [vmem:[#allocation10 + $0x134] ss:$8 sps:$4 sm:$0xff]  }
0x15ba   : > { %v4197_v14 = vsub.f32 %v4189_v2, %v4196_v13  ;;  %v10319_v13 = vld [vmem:[#allocation10 + $0x130] ss:$8 sps:$4 sm:$0xff]  }
0x15bc   : > { %v4198_v15 = vmul.f32 %v4197_v14, %v4197_v14 }
0x15be   : > { %4199 = vadd.xlane.f32.xlu1 %v4198_v15  ;;  %v10322_v15 = vld [vmem:[#allocation10 + $0x140] ss:$8 sps:$4 sm:$0xff]  }
0x164b   : > { %v4200_v36 = vpop.xlane.xlu1 %4199 }
0x164c   : > { %v4201_v37 = vmul.f32 0.0078125, %v4200_v36 }
0x164e   : > { %v4202_v38 = vadd.f32 1e-05, %v4201_v37  ;;  %v10334_v37 = vld [vmem:[#allocation7 + $0x80] sm:$0xff]  }
0x1650   : > { %10538 = vrsqrt.f32 %v4202_v38  ;;  %v10335_v38 = vld [vmem:[#allocation7 + $0x88] sm:$0xff]  }
0x165a   : > { %v10539_v39 = vpop.eup %10538 }
0x165b   : > { %v4204_v41 = vmul.f32 %v10539_v39, %v4197_v14  ;;  %v10324_v14 = vld [vmem:[#allocation10 + $0x144] ss:$8 sps:$4 sm:$0xff]  }
0x165d   : > { %v4211_v43 = vmul.f32 %v8809_v40, %v4204_v41 }
0x165f   : > { %v11845_v6 = vadd.f32 %v8810_v42, %v4211_v43  ;;  %v10336_v43 = vld [vmem:[#allocation7 + $0x90] sm:$0xff]  }
0x1661   : > { %v4236_v44 = vpack.c.bf16 %v11845_v6, %v11845_v6 }
0x1663   : > { %4363 = vmatmul.mubr.bf16.vlgmr.msra.gmra.mrb[92].mxu1 %v4236_v44  ;;  %v10338_v44 = vld [vmem:[#allocation7 + $0xa0] sm:$0xff]  }
0x1664   : > { %9622 = vmatprep.mubr.msk.bf16.mxu1 %vm10949_vm0, %v10948_v1  ;;  %9607 = vmatpush3.bf16.msra.mxu1 %v10334_v37 }
0x1665   : > { %9608 = vmatprep.subr.bf16.mxu1 %v10948_v1 }
0x1668   : > { %9609 = vmatpush3.bf16.msra.mxu1 %v10335_v38 }
0x1669   : > { %9610 = vmatprep.subr.bf16.mxu1 %v10948_v1 }
0x166c   : > { %9611 = vmatpush3.bf16.msra.mxu1 %v10336_v43 }
0x166d   : > { %9612 = vmatprep.subr.bf16.mxu1 %v10948_v1 }
0x1736   : > { %v4364_v57 = vpop.f32.mrb[92].mxu1 }
0x1737   : > { %v4365_v58 = vadd.f32 %v4364_v57, %v4243_v54  ;;  %v4366_v8 = vpop.f32.mrb[93].mxu1 }
0x1738   : > { %v4367_v59 = vadd.f32 %v4366_v8, %v4247_v56  ;;  %v4368_v60 = vpop.f32.mrb[94].mxu1 }
0x1739   : > { %v4371_v61 = vmax.f32 %v4365_v58, 0.0  ;;  %v4369_v63 = vpop.f32.mrb[95].mxu1  ;;  %v8848_v60 = vld [vmem:[%s12476_s2 + $0x1] ss:$0 sm:$0xff] }
0x173a   : > { %v4372_v2 = vmax.f32 %v4367_v59, 0.0  ;;  %v8849_v63 = vld [vmem:[%s12477_s0 + $0x1] ss:$0 sm:$0xff] }
0x173b   : > { %v4406_v5 = vpack.c.bf16 %v4371_v61, %v4371_v61 }
0x173c   : > { %v4407_v3 = vpack.c.bf16 %v4372_v2, %v4372_v2 }
0x173e   : > { %4544 = vmatprep.mubr.bf16.mxu0 %v4407_v3 }
0x173f   : > { %4545 = vmatmul.mubr.bf16.vlgmr.msra.gmra.mrb[68].mxu0 %v4406_v5 }
0x1740   : > { %4808 = vmatpush1.bf16.msra.mxu0 %v10310_v4  ;;  %4839 = vmatprep.mubr.bf16.mxu0 %v10947_v0 }
0x1741   : > { %4809 = vmatprep.subr.bf16.mxu0 %v10315_v7 }
0x1744   : > { %4810 = vmatpush1.bf16.msra.mxu0 %v10313_v9 }
0x1745   : > { %4811 = vmatprep.subr.bf16.mxu0 %v10318_v10 }
0x1748   : > { %4812 = vmatpush1.bf16.msra.mxu0 %v10316_v11  ;;  %v8850_v11 = vld [vmem:[#allocation8 + $0x2] ss:$0 sm:$0xff] }
0x1749   : > { %4813 = vmatprep.subr.bf16.mxu0 %v10321_v12 }
0x174c   : > { %4814 = vmatpush1.bf16.msra.mxu0 %v10319_v13 }
0x174d   : > { %4815 = vmatprep.subr.bf16.mxu0 %v10324_v14 }
0x1750   : > { %4816 = vmatpush1.bf16.msra.mxu0 %v10322_v15 }
0x1751   : > { %4817 = vmatprep.subr.bf16.mxu0 %v10327_v51 }
0x1754   : > { %4818 = vmatpush1.bf16.msra.mxu0 %v10325_v16 }
0x1755   : > { %4819 = vmatprep.subr.bf16.mxu0 %v10330_v17 }
0x1758   : > { %4820 = vmatpush1.bf16.msra.mxu0 %v10328_v55 }
0x1759   : > { %4821 = vmatprep.subr.bf16.mxu0 %v10333_v29 }
0x175c   : > { %4822 = vmatpush1.bf16.msra.mxu0 %v10331_v18 }
0x175d   : > { %9650 = vmatprep.subr.bf16.mxu0 %v10948_v1 }
0x175f   : > { %4840 = vmatmul.mubr.bf16.vlgmr.msra.gmra.mrb[72].mxu0 %v11660_v53  ;;  %v8859_v53 = vld [vmem:[%s12394_s5 + $0x4] sm:$0x3] }
0x1760   : > { %9652 = vmatprep.mubr.msk.bf16.mxu0 %vm10949_vm0, %v10948_v1  ;;  %v4720_v28 = vrot.slane %v8859_v53, %v11405_v32  ;;  %v4724_v62 = vrot.slane %v8859_v53, %v11418_v47 }
0x1812   : > { %v9184_v19 = vpop.f32.mrb[68].mxu0 }
0x1813   : > { %v9185_v21 = vpop.f32.mrb[69].mxu0 }
0x1814   : > { %v9186_v22 = vadd.f32 %v9185_v21, %v9184_v19  ;;  %v9187_v23 = vpop.f32.mrb[70].mxu0 }
0x1815   : > { %v9188_v24 = vpop.f32.mrb[71].mxu0 }
0x1816   : > { %v4547_v25 = vadd.f32 %v9186_v22, %v8829_v20 }
0x1818   : > { %v4552_v26 = vmax.f32 %v4547_v25, 0.0 }
0x181a   : > { %v4553_v27 = vadd.f32 %v4552_v26, %v11845_v6  ;;  %v10337_v6 = vld [vmem:[#allocation7 + $0x98] sm:$0xff]  }
0x181b   : > { %9613 = vmatpush3.bf16.msra.mxu1 %v10337_v6 }
0x181c   : > { %4558 = vadd.xlane.f32.xlu0 %v4553_v27  ;;  %9614 = vmatprep.subr.bf16.mxu1 %v10948_v1 }
0x181f   : > { %9615 = vmatpush3.bf16.msra.mxu1 %v10338_v44 }
0x1820   : > { %9616 = vmatprep.subr.bf16.mxu1 %v10948_v1 }
0x1823   : > { %9617 = vmatpush3.bf16.msra.mxu1 %v10339_v45 }
0x1824   : > { %9618 = vmatprep.subr.bf16.mxu1 %v10948_v1 }
0x1827   : > { %9619 = vmatpush3.bf16.msra.mxu1 %v10340_v46 }
0x1828   : > { %9620 = vmatprep.subr.bf16.mxu1 %v10948_v1 }
0x182b   : > { %9621 = vmatpush3.bf16.msra.mxu1 %v10341_v48 }
0x182c   : > { %9626 = vmatprep.subr.bf16.mxu1 %v10948_v1 }
0x1832   : > { %v4841_v30 = vpop.f32.mrb[72].mxu0 }
0x1833   : > { %v4842_v31 = vadd.f32 %v4841_v30, %v4720_v28  ;;  %v4843_v33 = vpop.f32.mrb[73].mxu0 }
0x1834   : > { %v11870_v34 = vadd.f32 %v4843_v33, %v4724_v62  ;;  %v4845_v35 = vpop.f32.mrb[74].mxu0 }
0x1835   : > { %v4846_v36 = vpop.f32.mrb[75].mxu0  ;;  %4849 = vxpose.xlu1.b32.start.end [1/1] (short) (narrow) %v4842_v31, 16 }
0x1836   : > { %v11909_v13 = vpack.c.bf16 %v11870_v34, %v11870_v34 }
0x1838   : > { %v4942_v55 = vsel %vm1075_vm2, %v11909_v13, 0 }
0x1857   : > { %5128 = vrot.lane.b32.xlu1 %v4842_v31, %s10951_s16 }
0x185b   : > { %5692 = vrot.lane.b32.xlu1 %v4842_v31, %s10954_s25 }
0x18a9   : > { %v4559_v39 = vpop.xlane.xlu0 %4558 }
0x18aa   : > { %v4560_v40 = vmul.f32 0.0078125, %v4559_v39 }
0x18ac   : > { %v4561_v41 = vsub.f32 %v4553_v27, %v4560_v40 }
0x18ae   : > { %v4562_v42 = vmul.f32 %v4561_v41, %v4561_v41 }
0x18b0   : > { %4563 = vadd.xlane.f32.xlu0 %v4562_v42 }
0x18b5   : > { %v4865_v49 = vpop.trf.xlu1 }
0x18b9   : > { %v4866_v50 = vpop.trf.xlu1 }
0x18ba   : > { %v4881_v4 = vpack.c.bf16 %v4866_v50, %v4865_v49 }
0x18c6   : > { %4985 = vrot.lane.b32.xlu0 %v4842_v31, %s10950_s23 }
0x18c9   : > { %v5129_v57 = vpop.permute.xlu1 %5128 }
0x18ca   : > { %5269 = vrot.lane.b32.xlu0 %v4842_v31, %s10955_s6 }
0x18cd   : > { %v5693_v7 = vpop.permute.xlu1 %5692 }
0x18ce   : > { %5410 = vrot.lane.b32.xlu0 %v4842_v31, %s10952_s9 }
0x18d2   : > { %5551 = vrot.lane.b32.xlu0 %v4842_v31, %s10953_s15 }
0x193d   : > { %v4564_v52 = vpop.xlane.xlu0 %4563 }
0x193e   : > { %v4565_v54 = vmul.f32 0.0078125, %v4564_v52 }
0x1940   : > { %v4566_v56 = vadd.f32 1e-05, %v4565_v54 }
0x1941   : > { %v4986_v58 = vpop.permute.xlu0 %4985 }
0x1942   : > { %10540 = vrsqrt.f32 %v4566_v56  ;;  %v10078_v8 = vpack.i.bf16 %v5129_v57, %v4986_v58 }
0x1944   : > { %10079 = vxpose.xlu1.b32.start.end [1/1] (short) (narrow) %v10078_v8, 16 }
0x1945   : > { %v5270_v29 = vpop.permute.xlu0 %5269 }
0x1949   : > { %v5411_v18 = vpop.permute.xlu0 %5410 }
0x194a   : > { %v10090_v36 = vpack.i.bf16 %v5411_v18, %v5270_v29 }
0x194c   : > { %v10541_v59 = vpop.eup %10540 }
0x194d   : > { %v4568_v61 = vmul.f32 %v10541_v59, %v4561_v41  ;;  %v5552_v19 = vpop.permute.xlu0 %5551 }
0x194e   : > { %v10102_v20 = vpack.i.bf16 %v5693_v7, %v5552_v19 }
0x194f   : > { %v4575_v2 = vmul.f32 %v8848_v60, %v4568_v61 }
0x1951   : > { %v11892_v3 = vadd.f32 %v8849_v63, %v4575_v2 }
0x1953   : > { %v11896_v5 = vpack.c.bf16 %v11892_v3, %v11892_v3 }
0x1955   : > { %9623 = vmatmul.mubr.bf16.vlgmr.msra.gmra.mrb[96].mxu1 %v11896_v5 }
0x1956   : > { %9627 = vmatpush3.bf16.msra.mxu1 %v4881_v4  ;;  %9628 = vmatprep.mubr.msk.bf16.mxu1 %vm10949_vm0, %v10948_v1 }
0x1957   : > { %9632 = vmatprep.subr.bf16.mxu1 %v10948_v1 }
0x1966   : > { %5833 = vrot.lane.b32.xlu1 %v4842_v31, %s10956_s24 }
0x19c4   : > { %v11903_v9 = vpop.trf.xlu1 }
0x19c5   : > { %v10084_v26 = vunpack.i.h.bf16 %v11903_v9  ;;  %v10081_v44 = vunpack.i.l.bf16 %v11903_v9 }
0x19c8   : > { %v11905_v10 = vpop.trf.xlu1 }
0x19c9   : > { %v10089_v27 = vunpack.i.h.bf16 %v11905_v10  ;;  %v10086_v45 = vunpack.i.l.bf16 %v11905_v10 }
0x19cb   : > { %v5163_v53 = vpack.c.bf16 %v10089_v27, %v10084_v26  ;;  %v5020_v49 = vpack.c.bf16 %v10086_v45, %v10081_v44 }
0x19cd   : > { %9651 = vmatpush3.bf16.msra.mxu0 %v5163_v53 }
0x19ce   : > { %9662 = vmatprep.subr.bf16.mxu0 %v10948_v1 }
0x19d8   : > { %v5834_v37 = vpop.permute.xlu1 %5833 }
0x1a28   : > { %v4691_v12 = vpop.f32.mrb[96].mxu1 }
0x1a29   : > { %v4692_v14 = vadd.f32 %v8850_v11, %v4691_v12  ;;  %v9624_v15 = vpop.f32.mrb[97].mxu1 }
0x1a2a   : > { %v4694_v51 = vpop.f32.mrb[98].mxu1 }
0x1a2b   : > { %v4848_v16 = vpack.c.bf16 %v4692_v14, %v4692_v14  ;;  %v9625_v17 = vpop.f32.mrb[99].mxu1 }
0x1a2d   : > { %9629 = vmatmul.mubr.msk.bf16.vlgmr.msra.gmra.mrb[100].mxu1 %vm1014_vm1, %v4848_v16  ;;  %5587 = vrot.lane.b32.xlu1 %v4848_v16, %s10953_s15 }
0x1a2e   : > { %9633 = vmatpush3.bf16.msra.mxu1 %v4942_v55  ;;  %9634 = vmatprep.mubr.msk.bf16.mxu1 %vm10949_vm0, %v10948_v1 }
0x1a2f   : > { %9638 = vmatprep.subr.bf16.mxu1 %v10948_v1 }
0x1a56   : > { %10103 = vxpose.xlu1.b32.start.end [1/1] (short) (narrow) %v10102_v20, 16 }
0x1a9f   : > { %v5588_v38 = vpop.permute.xlu1 %5587 }
0x1ad6   : > { %v10104_v39 = vpop.trf.xlu1 }
0x1ad7   : > { %v10105_v60 = vunpack.i.l.bf16 %v10104_v39  ;;  %v10108_v2 = vunpack.i.h.bf16 %v10104_v39 }
0x1ada   : > { %v10109_v40 = vpop.trf.xlu1 }
0x1adb   : > { %v10110_v61 = vunpack.i.l.bf16 %v10109_v40  ;;  %v10113_v4 = vunpack.i.h.bf16 %v10109_v40 }
0x1add   : > { %v5586_v63 = vpack.c.bf16 %v10110_v61, %v10105_v60  ;;  %v5727_v7 = vpack.c.bf16 %v10113_v4, %v10108_v2 }
0x1b00   : > { %v4919_v21 = vpop.f32.mrb[100].mxu1 }
0x1b01   : > { %v9630_v22 = vpop.f32.mrb[101].mxu1  ;;  %v4925_v23 = vsel %vm1058_vm3, %v4919_v21, -inf }
0x1b02   : > { %4926 = vmax.xlane.f32.xlu0 %v4925_v23  ;;  %v4922_v24 = vpop.f32.mrb[102].mxu1 }
0x1b03   : > { %v9631_v25 = vpop.f32.mrb[103].mxu1 }
0x1b18   : > { %5022 = vrot.lane.b32.xlu0 %v4848_v16, %s10950_s23 }
0x1b1c   : > { %5164 = vrot.lane.b32.xlu0 %v4848_v16, %s10951_s16 }
0x1b20   : > { %5305 = vrot.lane.b32.xlu0 %v4848_v16, %s10955_s6 }
0x1b24   : > { %5446 = vrot.lane.b32.xlu0 %v4848_v16, %s10952_s9 }
0x1b8f   : > { %v4927_v28 = vpop.xlane.xlu0 %4926 }
0x1b90   : > { %v4928_v62 = vsub.f32 %v4919_v21, %v4927_v28 }
0x1b92   : > { %v4929_v30 = vmul.f32 1.442695, %v4928_v62 }
0x1b93   : > { %v5023_v31 = vpop.permute.xlu0 %5022 }
0x1b94   : > { %10542 = vpow2.f32 %v4929_v30 }
0x1b97   : > { %v5165_v33 = vpop.permute.xlu0 %5164 }
0x1b98   : > { %9653 = vmatmul.mubr.msk.bf16.vlgmr.msra.gmra.mrb[76].mxu0 %vm1014_vm1, %v5165_v33 }
0x1b99   : > { %9664 = vmatprep.mubr.msk.bf16.mxu0 %vm10949_vm0, %v10948_v1 }
0x1b9b   : > { %v5306_v41 = vpop.permute.xlu0 %5305 }
0x1b9e   : > { %v10543_v34 = vpop.eup %10542 }
0x1b9f   : > { %v4931_v35 = vsel %vm1058_vm3, %v10543_v34, 0.0  ;;  %v5447_v42 = vpop.permute.xlu0 %5446 }
0x1ba0   : > { %4932 = vadd.xlane.f32.xlu0 %v4931_v35 }
0x1bcd   : > { %10091 = vxpose.xlu0.b32.start.end [1/1] (short) (narrow) %v10090_v36, 16 }
0x1bfa   : > { %5728 = vrot.lane.b32.xlu0 %v4848_v16, %s10954_s25 }
0x1bfe   : > { %5869 = vrot.lane.b32.xlu0 %v4848_v16, %s10956_s24 }
0x1c1c   : > { %5836 = vxpose.xlu0.b32.start.end [1/1] (short) (narrow) %v5834_v37, 16 }
0x1c2d   : > { %v4933_v43 = vpop.xlane.xlu0 %4932 }
0x1c2e   : > { %10544 = vrcp.f32 %v4933_v43 }
0x1c38   : > { %v10545_v6 = vpop.eup %10544 }
0x1c39   : > { %v4935_v46 = vmul.f32 %v10545_v6, %v10543_v34 }
0x1c3b   : > { %v4936_v48 = vpack.c.bf16 %v4935_v46, %v4935_v46 }
0x1c3d   : > { %9635 = vmatmul.mubr.msk.bf16.vlgmr.msra.gmra.mrb[104].mxu1 %vm1058_vm3, %v4936_v48 }
0x1c3e   : > { %9639 = vmatpush3.bf16.msra.mxu1 %v5020_v49  ;;  %9640 = vmatprep.mubr.msk.bf16.mxu1 %vm10949_vm0, %v10948_v1 }
0x1c3f   : > { %9644 = vmatprep.subr.bf16.mxu1 %v10948_v1 }
0x1c45   : > { %9641 = vmatmul.mubr.msk.bf16.vlgmr.msra.gmra.mrb[108].mxu1 %vm1014_vm1, %v5023_v31 }
0x1c46   : > { %9646 = vmatprep.mubr.msk.bf16.mxu1 %vm10949_vm0, %v10948_v1 }
0x1c4d   : > { %v10092_v50 = vpop.trf.xlu0 }
0x1c4e   : > { %v10093_v52 = vunpack.i.l.bf16 %v10092_v50  ;;  %v10096_v57 = vunpack.i.h.bf16 %v10092_v50 }
0x1c51   : > { %v10097_v54 = vpop.trf.xlu0 }
0x1c52   : > { %v10098_v56 = vunpack.i.l.bf16 %v10097_v54  ;;  %v10101_v58 = vunpack.i.h.bf16 %v10097_v54 }
0x1c54   : > { %v5304_v8 = vpack.c.bf16 %v10098_v56, %v10093_v52  ;;  %v5445_v59 = vpack.c.bf16 %v10101_v58, %v10096_v57 }
0x1c56   : > { %9663 = vmatpush3.bf16.msra.mxu0 %v5304_v8 }
0x1c57   : > { %9674 = vmatprep.subr.bf16.mxu0 %v10948_v1 }
0x1c59   : > { %9665 = vmatmul.mubr.msk.bf16.vlgmr.msra.gmra.mrb[80].mxu0 %vm1014_vm1, %v5306_v41 }
0x1c5a   : > { %9675 = vmatpush3.bf16.msra.mxu0 %v5445_v59  ;;  %9676 = vmatprep.mubr.msk.bf16.mxu0 %vm10949_vm0, %v10948_v1 }
0x1c5b   : > { %9686 = vmatprep.subr.bf16.mxu0 %v10948_v1 }
0x1c61   : > { %9677 = vmatmul.mubr.msk.bf16.vlgmr.msra.gmra.mrb[84].mxu0 %vm1014_vm1, %v5447_v42 }
0x1c62   : > { %9687 = vmatpush3.bf16.msra.mxu0 %v5586_v63  ;;  %9688 = vmatprep.mubr.msk.bf16.mxu0 %vm10949_vm0, %v10948_v1 }
0x1c63   : > { %9698 = vmatprep.subr.bf16.mxu0 %v10948_v1 }
0x1c69   : > { %9689 = vmatmul.mubr.msk.bf16.vlgmr.msra.gmra.mrb[88].mxu0 %vm1014_vm1, %v5588_v38 }
0x1c6a   : > { %9699 = vmatpush3.bf16.msra.mxu0 %v5727_v7  ;;  %9700 = vmatprep.mubr.msk.bf16.mxu0 %vm10949_vm0, %v10948_v1 }
0x1c6b   : > { %v5203_v9 = vpop.f32.mrb[76].mxu0  ;;  %9710 = vmatprep.subr.bf16.mxu0 %v10948_v1 }
0x1c6c   : > { %v9654_v10 = vpop.f32.mrb[77].mxu0  ;;  %v5209_v11 = vsel %vm1058_vm3, %v5203_v9, -inf  ;;  %v5729_v15 = vpop.permute.xlu0 %5728 }
0x1c6d   : > { %5210 = vmax.xlane.f32.xlu0 %v5209_v11  ;;  %v5206_v12 = vpop.f32.mrb[78].mxu0 }
0x1c6e   : > { %v9655_v14 = vpop.f32.mrb[79].mxu0 }
0x1c70   : > { %v5870_v51 = vpop.permute.xlu0 %5869 }
0x1c71   : > { %9701 = vmatmul.mubr.msk.bf16.vlgmr.msra.gmra.mrb[92].mxu0 %vm1014_vm1, %v5729_v15 }
0x1c72   : > { %9712 = vmatprep.mubr.msk.bf16.mxu0 %vm10949_vm0, %v10948_v1 }
0x1c9c   : > { %v5852_v16 = vpop.trf.xlu0 }
0x1ca0   : > { %v5853_v17 = vpop.trf.xlu0 }
0x1ca1   : > { %v5868_v55 = vpack.c.bf16 %v5853_v17, %v5852_v16 }
0x1ca3   : > { %9711 = vmatpush3.bf16.msra.mxu0 %v5868_v55 }
0x1ca4   : > { %9722 = vmatprep.subr.bf16.mxu0 %v10948_v1 }
0x1ca6   : > { %9713 = vmatmul.mubr.msk.bf16.vlgmr.msra.gmra.mrb[96].mxu0 %vm1014_vm1, %v5870_v51 }
0x1ca7   : > { %9738 = vmatprep.mubr.msk.bf16.mxu0 %vm10949_vm0, %v10948_v1 }
0x1cfa   : > { %v5211_v45 = vpop.xlane.xlu0 %5210 }
0x1cfb   : > { %v5212_v46 = vsub.f32 %v5203_v9, %v5211_v45 }
0x1cfd   : > { %v5213_v48 = vmul.f32 1.442695, %v5212_v46 }
0x1cff   : > { %10546 = vpow2.f32 %v5213_v48 }
0x1d09   : > { %v11970_v54 = vpop.eup %10546 }
0x1d0a   : > { %v5215_v58 = vsel %vm1058_vm3, %v11970_v54, 0.0 }
0x1d10   : > { %v11962_v29 = vpop.f32.mrb[104].mxu1 }
0x1d11   : > { %v9636_v18 = vpop.f32.mrb[105].mxu1 }
0x1d12   : > { %v4981_v19 = vpop.f32.mrb[106].mxu1 }
0x1d13   : > { %v9637_v20 = vpop.f32.mrb[107].mxu1 }
0x1d18   : > { %v5061_v21 = vpop.f32.mrb[108].mxu1 }
0x1d19   : > { %v9642_v22 = vpop.f32.mrb[109].mxu1  ;;  %v5067_v23 = vsel %vm1058_vm3, %v5061_v21, -inf }
0x1d1a   : > { %5068 = vmax.xlane.f32.xlu1 %v5067_v23  ;;  %v5064_v24 = vpop.f32.mrb[110].mxu1 }
0x1d1b   : > { %v9643_v25 = vpop.f32.mrb[111].mxu1 }
0x1d2c   : > { %v5344_v26 = vpop.f32.mrb[80].mxu0 }
0x1d2d   : > { %v9666_v27 = vpop.f32.mrb[81].mxu0  ;;  %v5350_v53 = vsel %vm1058_vm3, %v5344_v26, -inf }
0x1d2e   : > { %5351 = vmax.xlane.f32.xlu1 %v5350_v53  ;;  %v5347_v28 = vpop.f32.mrb[82].mxu0 }
0x1d2f   : > { %v9667_v62 = vpop.f32.mrb[83].mxu0 }
0x1d34   : > { %v5485_v30 = vpop.f32.mrb[84].mxu0 }
0x1d35   : > { %v9678_v31 = vpop.f32.mrb[85].mxu0  ;;  %v5491_v33 = vsel %vm1058_vm3, %v5485_v30, -inf }
0x1d36   : > { %5492 = vmax.xlane.f32.xlu1 %v5491_v33  ;;  %v5488_v34 = vpop.f32.mrb[86].mxu0 }
0x1d37   : > { %v9679_v35 = vpop.f32.mrb[87].mxu0 }
0x1d3c   : > { %v5626_v36 = vpop.f32.mrb[88].mxu0 }
0x1d3d   : > { %v9690_v37 = vpop.f32.mrb[89].mxu0  ;;  %v5632_v38 = vsel %vm1058_vm3, %v5626_v36, -inf }
0x1d3e   : > { %5633 = vmax.xlane.f32.xlu1 %v5632_v38  ;;  %v5629_v39 = vpop.f32.mrb[90].mxu0 }
0x1d3f   : > { %v9691_v40 = vpop.f32.mrb[91].mxu0 }
0x1d44   : > { %v5767_v41 = vpop.f32.mrb[92].mxu0 }
0x1d45   : > { %v9702_v42 = vpop.f32.mrb[93].mxu0  ;;  %v5773_v43 = vsel %vm1058_vm3, %v5767_v41, -inf }
0x1d46   : > { %5774 = vmax.xlane.f32.xlu0 %v5773_v43  ;;  %v5770_v6 = vpop.f32.mrb[94].mxu0 }
0x1d47   : > { %v9703_v44 = vpop.f32.mrb[95].mxu0 }
0x1d79   : > { %v5908_v49 = vpop.f32.mrb[96].mxu0 }
0x1d7a   : > { %v9714_v50 = vpop.f32.mrb[97].mxu0  ;;  %v5914_v52 = vsel %vm1058_vm3, %v5908_v49, -inf }
0x1d7b   : > { %5915 = vmax.xlane.f32.xlu1 %v5914_v52  ;;  %v5911_v56 = vpop.f32.mrb[98].mxu0 }
0x1d7c   : > { %v9715_v57 = vpop.f32.mrb[99].mxu0 }
0x1d7f   : > { %5216 = vadd.xlane.f32.xlu1 %v5215_v58 }
0x1da7   : > { %v5069_v8 = vpop.xlane.xlu1 %5068 }
0x1da8   : > { %v5070_v59 = vsub.f32 %v5061_v21, %v5069_v8 }
0x1daa   : > { %v5071_v63 = vmul.f32 1.442695, %v5070_v59 }
0x1dbb   : > { %v5352_v60 = vpop.xlane.xlu1 %5351 }
0x1dbc   : > { %v5353_v61 = vsub.f32 %v5344_v26, %v5352_v60 }
0x1dbe   : > { %v5354_v2 = vmul.f32 1.442695, %v5353_v61 }
0x1dc0   : > { %10548 = vpow2.f32 %v5354_v2 }
0x1dc1   : > { %10550 = vpow2.f32 %v5071_v63 }
0x1dc3   : > { %v5493_v4 = vpop.xlane.xlu1 %5492 }
0x1dc4   : > { %v5494_v7 = vsub.f32 %v5485_v30, %v5493_v4 }
0x1dc6   : > { %v5495_v9 = vmul.f32 1.442695, %v5494_v7 }
0x1dc8   : > { %10552 = vpow2.f32 %v5495_v9 }
0x1dca   : > { %v11974_v10 = vpop.eup %10548 }
0x1dcb   : > { %v5634_v11 = vpop.xlane.xlu1 %5633  ;;  %v5356_v12 = vsel %vm1058_vm3, %v11974_v10, 0.0  ;;  %v10551_v14 = vpop.eup %10550 }
0x1dcc   : > { %v5635_v15 = vsub.f32 %v5626_v36, %v5634_v11  ;;  %5357 = vadd.xlane.f32.xlu0 %v5356_v12  ;;  %v5073_v16 = vsel %vm1058_vm3, %v10551_v14, 0.0 }
0x1dce   : > { %v5636_v51 = vmul.f32 1.442695, %v5635_v15 }
0x1dd0   : > { %10554 = vpow2.f32 %v5636_v51  ;;  %5074 = vadd.xlane.f32.xlu0 %v5073_v16 }
0x1dd2   : > { %v11979_v17 = vpop.eup %10552 }
0x1dd3   : > { %v5497_v55 = vsel %vm1058_vm3, %v11979_v17, 0.0  ;;  %v5775_v20 = vpop.xlane.xlu0 %5774 }
0x1dd4   : > { %5498 = vadd.xlane.f32.xlu1 %v5497_v55  ;;  %v5776_v21 = vsub.f32 %v5767_v41, %v5775_v20 }
0x1dd6   : > { %v5777_v22 = vmul.f32 1.442695, %v5776_v21 }
0x1dd8   : > { %10556 = vpow2.f32 %v5777_v22 }
0x1dda   : > { %v11983_v18 = vpop.eup %10554 }
0x1ddb   : > { %v5638_v19 = vsel %vm1058_vm3, %v11983_v18, 0.0 }
0x1ddc   : > { %5639 = vadd.xlane.f32.xlu1 %v5638_v19 }
0x1de2   : > { %v11993_v23 = vpop.eup %10556 }
0x1de3   : > { %v5779_v24 = vsel %vm1058_vm3, %v11993_v23, 0.0 }
0x1de6   : > { %5080 = vrot.lane.b32.xlu0 %v11909_v13, %s10950_s23 }
0x1ded   : > { %5221 = vrot.lane.b32.xlu1 %v11909_v13, %s10951_s16 }
0x1df1   : > { %5362 = vrot.lane.b32.xlu1 %v11909_v13, %s10955_s6 }
0x1e05   : > { %5780 = vadd.xlane.f32.xlu0 %v5779_v24 }
0x1e08   : > { %v5916_v25 = vpop.xlane.xlu1 %5915 }
0x1e09   : > { %v5917_v26 = vsub.f32 %v5908_v49, %v5916_v25 }
0x1e0b   : > { %v5918_v27 = vmul.f32 1.442695, %v5917_v26 }
0x1e0c   : > { %v5217_v31 = vpop.xlane.xlu1 %5216 }
0x1e0d   : > { %10558 = vpow2.f32 %v5918_v27  ;;  %v10342_v27 = vld [vmem:[#allocation11 + $0x80] sm:$0xff]  }
0x1e0e   : > { %9723 = vmatpush3.bf16.msra.mxu0 %v10342_v27  ;;  %v10362_v27 = vld [vmem:[#allocation13 + $0x140] ss:$8 sps:$4 sm:$0xff]  }
0x1e0f   : > { %9724 = vmatprep.subr.bf16.mxu0 %v10948_v1 }
0x1e17   : > { %v11997_v53 = vpop.eup %10558 }
0x1e18   : > { %v5920_v28 = vsel %vm1058_vm3, %v11997_v53, 0.0 }
0x1e19   : > { %5921 = vadd.xlane.f32.xlu1 %v5920_v28  ;;  %v10344_v28 = vld [vmem:[#allocation11 + $0x90] sm:$0xff]  }
0x1e1b   : > { %5503 = vrot.lane.b32.xlu0 %v11909_v13, %s10952_s9 }
0x1e1f   : > { %5785 = vrot.lane.b32.xlu0 %v11909_v13, %s10954_s25 }
0x1e23   : > { %5926 = vrot.lane.b32.xlu0 %v11909_v13, %s10956_s24 }
0x1e2a   : > { %5644 = vrot.lane.b32.xlu1 %v11909_v13, %s10953_s15 }
0x1e59   : > { %v5358_v62 = vpop.xlane.xlu0 %5357 }
0x1e5d   : > { %v5075_v30 = vpop.xlane.xlu0 %5074 }
0x1e5e   : > { %10560 = vrcp.f32 %v5075_v30 }
0x1e5f   : > { %10562 = vrcp.f32 %v5217_v31 }
0x1e60   : > { %10564 = vrcp.f32 %v5358_v62 }
0x1e61   : > { %v5081_v33 = vpop.permute.xlu0 %5080  ;;  %v5499_v35 = vpop.xlane.xlu1 %5498 }
0x1e62   : > { %v5086_v34 = vsel %vm1075_vm2, %v5081_v33, 0  ;;  %10566 = vrcp.f32 %v5499_v35  ;;  %v10346_v35 = vld [vmem:[#allocation11 + $0xa0] sm:$0xff]  }
0x1e63   : > { %9645 = vmatpush3.bf16.msra.mxu1 %v5086_v34  ;;  %v10345_v34 = vld [vmem:[#allocation11 + $0x98] sm:$0xff]  }
0x1e64   : > { %9656 = vmatprep.subr.bf16.mxu1 %v10948_v1 }
0x1e68   : > { %v10561_v36 = vpop.eup %10560 }
0x1e69   : > { %v5077_v37 = vmul.f32 %v10561_v36, %v10551_v14  ;;  %v5640_v38 = vpop.xlane.xlu1 %5639  ;;  %v10563_v40 = vpop.eup %10562  ;;  %v10347_v36 = vld [vmem:[#allocation11 + $0xa8] sm:$0xff]  }
0x1e6a   : > { %v5219_v42 = vmul.f32 %v10563_v40, %v11970_v54  ;;  %v10565_v44 = vpop.eup %10564  ;;  %10568 = vrcp.f32 %v5640_v38 }
0x1e6b   : > { %v5078_v39 = vpack.c.bf16 %v5077_v37, %v5077_v37  ;;  %v5360_v46 = vmul.f32 %v10565_v44, %v11974_v10  ;;  %v10348_v37 = vld [vmem:[#allocation11 + $0xb0] sm:$0xff]  }
0x1e6c   : > { %v5220_v6 = vpack.c.bf16 %v5219_v42, %v5219_v42  ;;  %v10567_v49 = vpop.eup %10566 }
0x1e6d   : > { %9647 = vmatmul.mubr.msk.bf16.vlgmr.msra.gmra.mrb[112].mxu1 %vm1058_vm3, %v5078_v39  ;;  %v5222_v13 = vpop.permute.xlu1 %5221  ;;  %v5361_v48 = vpack.c.bf16 %v5360_v46, %v5360_v46  ;;  %v5501_v52 = vmul.f32 %v10567_v49, %v11979_v17 }
0x1e6e   : > { %v5227_v41 = vsel %vm1075_vm2, %v5222_v13, 0  ;;  %9658 = vmatprep.mubr.msk.bf16.mxu1 %vm10949_vm0, %v10948_v1 }
0x1e6f   : > { %9657 = vmatpush3.bf16.msra.mxu1 %v5227_v41  ;;  %v5502_v57 = vpack.c.bf16 %v5501_v52, %v5501_v52  ;;  %v10349_v41 = vld [vmem:[#allocation11 + $0xb8] sm:$0xff]  }
0x1e70   : > { %9668 = vmatprep.subr.bf16.mxu1 %v10948_v1 }
0x1e71   : > { %v5363_v43 = vpop.permute.xlu1 %5362 }
0x1e72   : > { %v5368_v45 = vsel %vm1075_vm2, %v5363_v43, 0 }
0x1e74   : > { %v10569_v58 = vpop.eup %10568 }
0x1e75   : > { %9659 = vmatmul.mubr.msk.bf16.vlgmr.msra.gmra.mrb[116].mxu1 %vm1058_vm3, %v5220_v6  ;;  %v5642_v59 = vmul.f32 %v10569_v58, %v11983_v18 }
0x1e76   : > { %9669 = vmatpush3.bf16.msra.mxu1 %v5368_v45  ;;  %9670 = vmatprep.mubr.msk.bf16.mxu1 %vm10949_vm0, %v10948_v1 }
0x1e77   : > { %9680 = vmatprep.subr.bf16.mxu1 %v10948_v1  ;;  %v5643_v2 = vpack.c.bf16 %v5642_v59, %v5642_v59 }
0x1e7d   : > { %9671 = vmatmul.mubr.msk.bf16.vlgmr.msra.gmra.mrb[120].mxu1 %vm1058_vm3, %v5361_v48 }
0x1e7e   : > { %9682 = vmatprep.mubr.msk.bf16.mxu1 %vm10949_vm0, %v10948_v1 }
0x1e92   : > { %v5781_v50 = vpop.xlane.xlu0 %5780 }
0x1e93   : > { %10570 = vrcp.f32 %v5781_v50 }
0x1e96   : > { %v5504_v54 = vpop.permute.xlu0 %5503 }
0x1e97   : > { %v5509_v56 = vsel %vm1075_vm2, %v5504_v54, 0 }
0x1e98   : > { %9681 = vmatpush3.bf16.msra.mxu1 %v5509_v56 }
0x1e99   : > { %9692 = vmatprep.subr.bf16.mxu1 %v10948_v1 }
0x1e9a   : > { %v5786_v63 = vpop.permute.xlu0 %5785 }
0x1e9b   : > { %9683 = vmatmul.mubr.msk.bf16.vlgmr.msra.gmra.mrb[124].mxu1 %vm1058_vm3, %v5502_v57  ;;  %v5791_v7 = vsel %vm1075_vm2, %v5786_v63, 0 }
0x1e9c   : > { %9694 = vmatprep.mubr.msk.bf16.mxu1 %vm10949_vm0, %v10948_v1 }
0x1e9d   : > { %v10571_v4 = vpop.eup %10570 }
0x1e9e   : > { %v5783_v9 = vmul.f32 %v10571_v4, %v11993_v23  ;;  %v5927_v10 = vpop.permute.xlu0 %5926 }
0x1e9f   : > { %v5932_v14 = vsel %vm1075_vm2, %v5927_v10, 0 }
0x1ea0   : > { %v5784_v11 = vpack.c.bf16 %v5783_v9, %v5783_v9 }
0x1ea6   : > { %v5922_v8 = vpop.xlane.xlu1 %5921 }
0x1ea7   : > { %10572 = vrcp.f32 %v5922_v8 }
0x1eaa   : > { %v5645_v60 = vpop.permute.xlu1 %5644 }
0x1eab   : > { %v5650_v61 = vsel %vm1075_vm2, %v5645_v60, 0 }
0x1eac   : > { %9693 = vmatpush3.bf16.msra.mxu1 %v5650_v61 }
0x1ead   : > { %9704 = vmatprep.subr.bf16.mxu1 %v10948_v1 }
0x1eaf   : > { %9695 = vmatmul.mubr.msk.bf16.vlgmr.msra.gmra.mrb[128].mxu1 %vm1058_vm3, %v5643_v2 }
0x1eb0   : > { %9705 = vmatpush3.bf16.msra.mxu1 %v5791_v7  ;;  %9706 = vmatprep.mubr.msk.bf16.mxu1 %vm10949_vm0, %v10948_v1 }
0x1eb1   : > { %9716 = vmatprep.subr.bf16.mxu1 %v10948_v1  ;;  %v10573_v12 = vpop.eup %10572 }
0x1eb2   : > { %v5924_v15 = vmul.f32 %v10573_v12, %v11997_v53  ;;  %v10343_v53 = vld [vmem:[#allocation11 + $0x88] sm:$0xff]  }
0x1eb3   : > { %9725 = vmatpush3.bf16.msra.mxu0 %v10343_v53  ;;  %v10367_v53 = vld [vmem:[#allocation13 + $0x154] ss:$8 sps:$4 sm:$0xff]  }
0x1eb4   : > { %v5925_v51 = vpack.c.bf16 %v5924_v15, %v5924_v15  ;;  %9726 = vmatprep.subr.bf16.mxu0 %v10948_v1 }
0x1eb7   : > { %9707 = vmatmul.mubr.msk.bf16.vlgmr.msra.gmra.mrb[132].mxu1 %vm1058_vm3, %v5784_v11  ;;  %9727 = vmatpush3.bf16.msra.mxu0 %v10344_v28  ;;  %v10365_v28 = vld [vmem:[#allocation13 + $0x150] ss:$8 sps:$4 sm:$0xff]  }
0x1eb8   : > { %9717 = vmatpush3.bf16.msra.mxu1 %v5932_v14  ;;  %9718 = vmatprep.mubr.msk.bf16.mxu1 %vm10949_vm0, %v10948_v1 }
0x1eb9   : > { %9728 = vmatprep.subr.bf16.mxu0 %v10948_v1 }
0x1ebb   : > { %9729 = vmatpush3.bf16.msra.mxu0 %v10345_v34  ;;  %v10374_v34 = vld [vmem:[#allocation14 + $0x140] sm:$0xff]  }
0x1ebc   : > { %9730 = vmatprep.subr.bf16.mxu0 %v10948_v1 }
0x1ebf   : > { %9719 = vmatmul.mubr.msk.bf16.vlgmr.msra.gmra.mrb[136].mxu1 %vm1058_vm3, %v5925_v51  ;;  %9731 = vmatpush3.bf16.msra.mxu0 %v10346_v35  ;;  %v10375_v35 = vld [vmem:[#allocation14 + $0x100] sm:$0xff]  }
0x1ec0   : > { %6296 = vmatprep.mubr.bf16.mxu1 %v10947_v0  ;;  %9732 = vmatprep.subr.bf16.mxu0 %v10948_v1 }
0x1ec3   : > { %9733 = vmatpush3.bf16.msra.mxu0 %v10347_v36  ;;  %v10376_v36 = vld [vmem:[#allocation14 + $0x148] sm:$0xff]  }
0x1ec4   : > { %9734 = vmatprep.subr.bf16.mxu0 %v10948_v1 }
0x1ec7   : > { %9735 = vmatpush3.bf16.msra.mxu0 %v10348_v37  ;;  %v10377_v37 = vld [vmem:[#allocation14 + $0x108] sm:$0xff]  }
0x1ec8   : > { %9736 = vmatprep.subr.bf16.mxu0 %v10948_v1 }
0x1ecb   : > { %9737 = vmatpush3.bf16.msra.mxu0 %v10349_v41  ;;  %v10382_v41 = vld [vmem:[#allocation14 + $0x160] sm:$0xff]  }
0x1ecc   : > { %9240 = vmatprep.subr.bf16.mxu0 %v10374_v34 }
0x1f40   : > { %v5122_v16 = vpop.f32.mrb[112].mxu1 }
0x1f41   : > { %v9648_v17 = vpop.f32.mrb[113].mxu1  ;;  %5975 = vrot.lane.b32.xlu1 %v5122_v16, %s10956_s24  ;;  %v10350_v16 = vld [vmem:[#allocation13 + $0x100] ss:$8 sps:$4 sm:$0xff]  }
0x1f42   : > { %v5125_v55 = vpop.f32.mrb[114].mxu1  ;;  %v10352_v17 = vld [vmem:[#allocation13 + $0x104] ss:$8 sps:$4 sm:$0xff]  }
0x1f43   : > { %v9649_v18 = vpop.f32.mrb[115].mxu1  ;;  %v10355_v55 = vld [vmem:[#allocation13 + $0x114] ss:$8 sps:$4 sm:$0xff]   ;;  %6264 = vmatprep.subr.bf16.mxu1 %v10352_v17 }
0x1f44   : > { %6265 = vmatpush1.bf16.msra.mxu1 %v10350_v16  ;;  %v10353_v18 = vld [vmem:[#allocation13 + $0x110] ss:$8 sps:$4 sm:$0xff]   ;;  %v10390_v16 = vld [vmem:[#allocation10 + $0x180] ss:$8 sps:$4 sm:$0xff]  }
0x1f45   : > { %6266 = vmatprep.subr.bf16.mxu1 %v10355_v55  ;;  %v10395_v55 = vld [vmem:[#allocation10 + $0x194] ss:$8 sps:$4 sm:$0xff]  }
0x1f48   : > { %v5263_v19 = vpop.f32.mrb[116].mxu1  ;;  %6267 = vmatpush1.bf16.msra.mxu1 %v10353_v18  ;;  %v10393_v18 = vld [vmem:[#allocation10 + $0x190] ss:$8 sps:$4 sm:$0xff]  }
0x1f49   : > { %5979 = vrot.lane.b32.xlu0 %v5263_v19, %s10954_s25  ;;  %v9660_v20 = vpop.f32.mrb[117].mxu1  ;;  %v10358_v19 = vld [vmem:[#allocation13 + $0x124] ss:$8 sps:$4 sm:$0xff]  }
0x1f4a   : > { %v5266_v21 = vpop.f32.mrb[118].mxu1  ;;  %v10356_v20 = vld [vmem:[#allocation13 + $0x120] ss:$8 sps:$4 sm:$0xff]   ;;  %6268 = vmatprep.subr.bf16.mxu1 %v10358_v19  ;;  %v10398_v19 = vld [vmem:[#allocation10 + $0x1a4] ss:$8 sps:$4 sm:$0xff]  }
0x1f4b   : > { %v9661_v22 = vpop.f32.mrb[119].mxu1 }
0x1f4c   : > { %6269 = vmatpush1.bf16.msra.mxu1 %v10356_v20  ;;  %v10396_v20 = vld [vmem:[#allocation10 + $0x1a0] ss:$8 sps:$4 sm:$0xff]  }
0x1f50   : > { %v5404_v23 = vpop.f32.mrb[120].mxu1 }
0x1f51   : > { %5983 = vrot.lane.b32.xlu1 %v5404_v23, %s10953_s15  ;;  %v9672_v24 = vpop.f32.mrb[121].mxu1 }
0x1f52   : > { %v5407_v25 = vpop.f32.mrb[122].mxu1 }
0x1f53   : > { %v9673_v26 = vpop.f32.mrb[123].mxu1  ;;  %v10359_v25 = vld [vmem:[#allocation13 + $0x130] ss:$8 sps:$4 sm:$0xff]  }
0x1f54   : > { %v10364_v26 = vld [vmem:[#allocation13 + $0x144] ss:$8 sps:$4 sm:$0xff]  }
0x1f6e   : > { %v5545_v62 = vpop.f32.mrb[124].mxu1 }
0x1f6f   : > { %5987 = vrot.lane.b32.xlu0 %v5545_v62, %s10952_s9  ;;  %v9684_v30 = vpop.f32.mrb[125].mxu1  ;;  %v10370_v62 = vld [vmem:[#allocation13 + $0x164] ss:$8 sps:$4 sm:$0xff]  }
0x1f70   : > { %v5548_v31 = vpop.f32.mrb[126].mxu1  ;;  %v10368_v30 = vld [vmem:[#allocation13 + $0x160] ss:$8 sps:$4 sm:$0xff]  }
0x1f71   : > { %v9685_v33 = vpop.f32.mrb[127].mxu1  ;;  %v10373_v31 = vld [vmem:[#allocation13 + $0x174] ss:$8 sps:$4 sm:$0xff]  }
0x1f72   : > { %v10371_v33 = vld [vmem:[#allocation13 + $0x170] ss:$8 sps:$4 sm:$0xff]  }
0x1f82   : > { %v5686_v38 = vpop.f32.mrb[128].mxu1 }
0x1f83   : > { %5991 = vrot.lane.b32.xlu1 %v5686_v38, %s10955_s6  ;;  %v9696_v39 = vpop.f32.mrb[129].mxu1  ;;  %v10378_v38 = vld [vmem:[#allocation14 + $0x150] sm:$0xff]  }
0x1f84   : > { %v5689_v40 = vpop.f32.mrb[130].mxu1  ;;  %v10379_v39 = vld [vmem:[#allocation14 + $0x110] sm:$0xff]  }
0x1f85   : > { %v9697_v13 = vpop.f32.mrb[131].mxu1  ;;  %v10380_v40 = vld [vmem:[#allocation14 + $0x158] sm:$0xff]  }
0x1f86   : > { %v10381_v13 = vld [vmem:[#allocation14 + $0x118] sm:$0xff]  }
0x1f8a   : > { %v5827_v42 = vpop.f32.mrb[132].mxu1 }
0x1f8b   : > { %5995 = vrot.lane.b32.xlu0 %v5827_v42, %s10951_s16  ;;  %v9708_v43 = vpop.f32.mrb[133].mxu1  ;;  %v10383_v42 = vld [vmem:[#allocation14 + $0x120] sm:$0xff]  }
0x1f8c   : > { %v5830_v6 = vpop.f32.mrb[134].mxu1  ;;  %v10384_v43 = vld [vmem:[#allocation14 + $0x168] sm:$0xff]  }
0x1f8d   : > { %v9709_v44 = vpop.f32.mrb[135].mxu1  ;;  %v10385_v6 = vld [vmem:[#allocation14 + $0x128] sm:$0xff]  }
0x1f92   : > { %v5968_v45 = vpop.f32.mrb[136].mxu1 }
0x1f93   : > { %5999 = vrot.lane.b32.xlu1 %v5968_v45, %s10950_s23  ;;  %v9720_v46 = vpop.f32.mrb[137].mxu1 }
0x1f94   : > { %v5971_v48 = vpop.f32.mrb[138].mxu1 }
0x1f95   : > { %v9721_v49 = vpop.f32.mrb[139].mxu1 }
0x1f96   : > { %v8904_v49 = vld [vmem:[%s12397_s8 + $0x2] ss:$0 sm:$0xff] }
0x1fb3   : > { %v5976_v50 = vpop.permute.xlu1 %5975 }
0x1fb4   : > { %v6002_v57 = vsel %vm1014_vm1, %v11962_v29, %v5976_v50  ;;  %v8893_v29 = vld [vmem:[%s12396_s7 + $0x2] ss:$0 sm:$0xff] }
0x1fbb   : > { %v5980_v52 = vpop.permute.xlu0 %5979 }
0x1fbc   : > { %v6003_v58 = vsel %vm2138_vm4, %v6002_v57, %v5980_v52  ;;  %v8905_v52 = vld [vmem:[%s12473_s14 + $0x2] ss:$0 sm:$0xff] }
0x1fc3   : > { %v5984_v54 = vpop.permute.xlu1 %5983 }
0x1fc4   : > { %v6004_v59 = vsel %vm2140_vm5, %v6003_v58, %v5984_v54  ;;  %v10386_v58 = vld [vmem:[#allocation14 + $0x170] sm:$0xff]  }
0x1fe1   : > { %v5988_v56 = vpop.permute.xlu0 %5987 }
0x1fe2   : > { %v6005_v61 = vsel %vm2142_vm6, %v6004_v59, %v5988_v56  ;;  %v10388_v59 = vld [vmem:[#allocation14 + $0x178] sm:$0xff]  }
0x1ff5   : > { %v5992_v8 = vpop.permute.xlu1 %5991 }
0x1ff6   : > { %v6006_v63 = vsel %vm2144_vm7, %v6005_v61, %v5992_v8  ;;  %v10387_v8 = vld [vmem:[#allocation14 + $0x130] sm:$0xff]   ;;  %v10392_v61 = vld [vmem:[#allocation10 + $0x184] ss:$8 sps:$4 sm:$0xff]  }
0x1ffd   : > { %v5996_v60 = vpop.permute.xlu0 %5995 }
0x1ffe   : > { %v6007_v2 = vsel %vm2146_vm8, %v6006_v63, %v5996_v60  ;;  %v10389_v60 = vld [vmem:[#allocation14 + $0x138] sm:$0xff]   ;;  %v8906_v63 = vld [vmem:[%s12474_s26 + $0x4] sm:$0x3] }
0x2005   : > { %v6000_v4 = vpop.permute.xlu1 %5999 }
0x2006   : > { %v6008_v7 = vsel %vm2148_vm9, %v6007_v2, %v6000_v4  ;;  %v6177_v2 = vrot.slane %v8906_v63, %v11405_v32  ;;  %v6181_v4 = vrot.slane %v8906_v63, %v11418_v47 }
0x2007   : > { %v6026_v9 = vpack.c.bf16 %v6008_v7, %v6008_v7 }
0x2009   : > { %9739 = vmatmul.mubr.bf16.vlgmr.msra.gmra.mrb[100].mxu0 %v6026_v9 }
0x200a   : > { %9241 = vmatpush3.bf16.msra.mxu0 %v10375_v35 }
0x200b   : > { %9242 = vmatprep.subr.bf16.mxu0 %v10376_v36 }
0x200e   : > { %9243 = vmatpush3.bf16.msra.mxu0 %v10377_v37 }
0x200f   : > { %9244 = vmatprep.subr.bf16.mxu0 %v10378_v38 }
0x2012   : > { %9245 = vmatpush3.bf16.msra.mxu0 %v10379_v39 }
0x2013   : > { %9246 = vmatprep.subr.bf16.mxu0 %v10380_v40 }
0x2016   : > { %9247 = vmatpush3.bf16.msra.mxu0 %v10381_v13 }
0x2017   : > { %9248 = vmatprep.subr.bf16.mxu0 %v10382_v41 }
0x201a   : > { %9249 = vmatpush3.bf16.msra.mxu0 %v10383_v42 }
0x201b   : > { %9250 = vmatprep.subr.bf16.mxu0 %v10384_v43 }
0x201e   : > { %9251 = vmatpush3.bf16.msra.mxu0 %v10385_v6 }
0x201f   : > { %9252 = vmatprep.subr.bf16.mxu0 %v10386_v58  ;;  %v10419_v58 = vld [vmem:[#allocation7 + $0xe8] sm:$0xff]  }
0x2022   : > { %9253 = vmatpush3.bf16.msra.mxu0 %v10387_v8  ;;  %v10420_v8 = vld [vmem:[#allocation7 + $0xf0] sm:$0xff]  }
0x2023   : > { %9254 = vmatprep.subr.bf16.mxu0 %v10388_v59  ;;  %v10421_v59 = vld [vmem:[#allocation7 + $0xf8] sm:$0xff]  }
0x2026   : > { %9255 = vmatpush3.bf16.msra.mxu0 %v10389_v60 }
0x2027   : > { %6741 = vmatprep.subr.bf16.mxu0 %v10392_v61 }
0x20dc   : > { %v6117_v10 = vpop.f32.mrb[100].mxu0 }
0x20dd   : > { %v6118_v11 = vadd.f32 %v8893_v29, %v6117_v10  ;;  %v9740_v12 = vpop.f32.mrb[101].mxu0 }
0x20de   : > { %v6120_v14 = vpop.f32.mrb[102].mxu0 }
0x20df   : > { %v6123_v15 = vadd.f32 %v6118_v11, %v11892_v3  ;;  %v9741_v51 = vpop.f32.mrb[103].mxu0  ;;  %v10361_v3 = vld [vmem:[#allocation13 + $0x134] ss:$8 sps:$4 sm:$0xff]  }
0x20e0   : > { %6270 = vmatprep.subr.bf16.mxu1 %v10361_v3  ;;  %v10407_v3 = vld [vmem:[#allocation10 + $0x1d4] ss:$8 sps:$4 sm:$0xff]  }
0x20e1   : > { %6128 = vadd.xlane.f32.xlu0 %v6123_v15  ;;  %6271 = vmatpush1.bf16.msra.mxu1 %v10359_v25  ;;  %v10405_v25 = vld [vmem:[#allocation10 + $0x1d0] ss:$8 sps:$4 sm:$0xff]  }
0x20e2   : > { %6272 = vmatprep.subr.bf16.mxu1 %v10364_v26  ;;  %v10410_v26 = vld [vmem:[#allocation10 + $0x1e4] ss:$8 sps:$4 sm:$0xff]  }
0x20e5   : > { %6273 = vmatpush1.bf16.msra.mxu1 %v10362_v27  ;;  %v10408_v27 = vld [vmem:[#allocation10 + $0x1e0] ss:$8 sps:$4 sm:$0xff]  }
0x20e6   : > { %6274 = vmatprep.subr.bf16.mxu1 %v10367_v53  ;;  %v10413_v53 = vld [vmem:[#allocation10 + $0x1f4] ss:$8 sps:$4 sm:$0xff]  }
0x20e9   : > { %6275 = vmatpush1.bf16.msra.mxu1 %v10365_v28  ;;  %v10411_v28 = vld [vmem:[#allocation10 + $0x1f0] ss:$8 sps:$4 sm:$0xff]  }
0x20ea   : > { %6276 = vmatprep.subr.bf16.mxu1 %v10370_v62 }
0x20ed   : > { %6277 = vmatpush1.bf16.msra.mxu1 %v10368_v30  ;;  %v8924_v30 = vld [vmem:[%s12475_s3 + $0x2] ss:$0 sm:$0xff] }
0x20ee   : > { %6278 = vmatprep.subr.bf16.mxu1 %v10373_v31 }
0x20f1   : > { %6279 = vmatpush1.bf16.msra.mxu1 %v10371_v33 }
0x20f2   : > { %9742 = vmatprep.subr.bf16.mxu1 %v10948_v1 }
0x216e   : > { %v6129_v21 = vpop.xlane.xlu0 %6128 }
0x216f   : > { %v6130_v22 = vmul.f32 0.0078125, %v6129_v21  ;;  %v10401_v21 = vld [vmem:[#allocation10 + $0x1b4] ss:$8 sps:$4 sm:$0xff]  }
0x2171   : > { %v6131_v23 = vsub.f32 %v6123_v15, %v6130_v22  ;;  %v10399_v22 = vld [vmem:[#allocation10 + $0x1b0] ss:$8 sps:$4 sm:$0xff]  }
0x2173   : > { %v6132_v24 = vmul.f32 %v6131_v23, %v6131_v23 }
0x2175   : > { %6133 = vadd.xlane.f32.xlu1 %v6132_v24  ;;  %v10402_v24 = vld [vmem:[#allocation10 + $0x1c0] ss:$8 sps:$4 sm:$0xff]  }
0x2202   : > { %v6134_v44 = vpop.xlane.xlu1 %6133 }
0x2203   : > { %v6135_v45 = vmul.f32 0.0078125, %v6134_v44 }
0x2205   : > { %v6136_v46 = vadd.f32 1e-05, %v6135_v45  ;;  %v10414_v45 = vld [vmem:[#allocation7 + $0xc0] sm:$0xff]  }
0x2207   : > { %10574 = vrsqrt.f32 %v6136_v46  ;;  %v10415_v46 = vld [vmem:[#allocation7 + $0xc8] sm:$0xff]  }
0x2211   : > { %v10575_v48 = vpop.eup %10574 }
0x2212   : > { %v6138_v50 = vmul.f32 %v10575_v48, %v6131_v23  ;;  %v10404_v23 = vld [vmem:[#allocation10 + $0x1c4] ss:$8 sps:$4 sm:$0xff]  }
0x2214   : > { %v6145_v54 = vmul.f32 %v8904_v49, %v6138_v50 }
0x2216   : > { %v12081_v56 = vadd.f32 %v8905_v52, %v6145_v54  ;;  %v10416_v54 = vld [vmem:[#allocation7 + $0xd0] sm:$0xff]  }
0x2218   : > { %v6170_v57 = vpack.c.bf16 %v12081_v56, %v12081_v56 }
0x221a   : > { %6297 = vmatmul.mubr.bf16.vlgmr.msra.gmra.mrb[140].mxu1 %v6170_v57  ;;  %v10418_v57 = vld [vmem:[#allocation7 + $0xe0] sm:$0xff]  }
0x221b   : > { %9758 = vmatprep.mubr.msk.bf16.mxu1 %vm10949_vm0, %v10948_v1  ;;  %9743 = vmatpush3.bf16.msra.mxu1 %v10414_v45 }
0x221c   : > { %9744 = vmatprep.subr.bf16.mxu1 %v10948_v1 }
0x221f   : > { %9745 = vmatpush3.bf16.msra.mxu1 %v10415_v46 }
0x2220   : > { %9746 = vmatprep.subr.bf16.mxu1 %v10948_v1 }
0x2223   : > { %9747 = vmatpush3.bf16.msra.mxu1 %v10416_v54 }
0x2224   : > { %9748 = vmatprep.subr.bf16.mxu1 %v10948_v1 }
0x22ed   : > { %v6298_v7 = vpop.f32.mrb[140].mxu1 }
0x22ee   : > { %v6299_v9 = vadd.f32 %v6298_v7, %v6177_v2  ;;  %v6300_v29 = vpop.f32.mrb[141].mxu1  ;;  %v8943_v7 = vld [vmem:[%s12476_s2 + $0x2] ss:$0 sm:$0xff] }
0x22ef   : > { %v6301_v10 = vadd.f32 %v6300_v29, %v6181_v4  ;;  %v6302_v11 = vpop.f32.mrb[142].mxu1  ;;  %v8944_v29 = vld [vmem:[%s12477_s0 + $0x2] ss:$0 sm:$0xff] }
0x22f0   : > { %v6305_v12 = vmax.f32 %v6299_v9, 0.0  ;;  %v6303_v14 = vpop.f32.mrb[143].mxu1 }
0x22f1   : > { %v6306_v15 = vmax.f32 %v6301_v10, 0.0 }
0x22f2   : > { %v6340_v17 = vpack.c.bf16 %v6305_v12, %v6305_v12 }
0x22f3   : > { %v6341_v51 = vpack.c.bf16 %v6306_v15, %v6306_v15 }
0x22f5   : > { %6478 = vmatprep.mubr.bf16.mxu0 %v6341_v51  ;;  %v8945_v51 = vld [vmem:[#allocation8 + $0x3] ss:$0 sm:$0xff] }
0x22f6   : > { %6479 = vmatmul.mubr.bf16.vlgmr.msra.gmra.mrb[104].mxu0 %v6340_v17 }
0x22f7   : > { %6742 = vmatpush1.bf16.msra.mxu0 %v10390_v16  ;;  %6773 = vmatprep.mubr.bf16.mxu0 %v10947_v0 }
0x22f8   : > { %6743 = vmatprep.subr.bf16.mxu0 %v10395_v55 }
0x22fb   : > { %6744 = vmatpush1.bf16.msra.mxu0 %v10393_v18 }
0x22fc   : > { %6745 = vmatprep.subr.bf16.mxu0 %v10398_v19 }
0x22ff   : > { %6746 = vmatpush1.bf16.msra.mxu0 %v10396_v20 }
0x2300   : > { %6747 = vmatprep.subr.bf16.mxu0 %v10401_v21 }
0x2303   : > { %6748 = vmatpush1.bf16.msra.mxu0 %v10399_v22 }
0x2304   : > { %6749 = vmatprep.subr.bf16.mxu0 %v10404_v23 }
0x2307   : > { %6750 = vmatpush1.bf16.msra.mxu0 %v10402_v24 }
0x2308   : > { %6751 = vmatprep.subr.bf16.mxu0 %v10407_v3 }
0x230b   : > { %6752 = vmatpush1.bf16.msra.mxu0 %v10405_v25 }
0x230c   : > { %6753 = vmatprep.subr.bf16.mxu0 %v10410_v26 }
0x230f   : > { %6754 = vmatpush1.bf16.msra.mxu0 %v10408_v27 }
0x2310   : > { %6755 = vmatprep.subr.bf16.mxu0 %v10413_v53 }
0x2313   : > { %6756 = vmatpush1.bf16.msra.mxu0 %v10411_v28 }
0x2314   : > { %9786 = vmatprep.subr.bf16.mxu0 %v10948_v1 }
0x2316   : > { %6774 = vmatmul.mubr.bf16.vlgmr.msra.gmra.mrb[108].mxu0 %v11896_v5  ;;  %v8954_v5 = vld [vmem:[%s12394_s5 + $0x6] sm:$0x3] }
0x2317   : > { %9788 = vmatprep.mubr.msk.bf16.mxu0 %vm10949_vm0, %v10948_v1  ;;  %v6654_v39 = vrot.slane %v8954_v5, %v11405_v32  ;;  %v6658_v40 = vrot.slane %v8954_v5, %v11418_v47 }
0x23c9   : > { %v9256_v62 = vpop.f32.mrb[104].mxu0 }
0x23ca   : > { %v9257_v31 = vpop.f32.mrb[105].mxu0 }
0x23cb   : > { %v9258_v33 = vadd.f32 %v9257_v31, %v9256_v62  ;;  %v9259_v34 = vpop.f32.mrb[106].mxu0 }
0x23cc   : > { %v9260_v35 = vpop.f32.mrb[107].mxu0 }
0x23cd   : > { %v6481_v36 = vadd.f32 %v9258_v33, %v8924_v30 }
0x23cf   : > { %v6486_v37 = vmax.f32 %v6481_v36, 0.0 }
0x23d1   : > { %v6487_v38 = vadd.f32 %v6486_v37, %v12081_v56  ;;  %v10417_v56 = vld [vmem:[#allocation7 + $0xd8] sm:$0xff]  }
0x23d2   : > { %9749 = vmatpush3.bf16.msra.mxu1 %v10417_v56 }
0x23d3   : > { %6492 = vadd.xlane.f32.xlu0 %v6487_v38  ;;  %9750 = vmatprep.subr.bf16.mxu1 %v10948_v1 }
0x23d6   : > { %9751 = vmatpush3.bf16.msra.mxu1 %v10418_v57 }
0x23d7   : > { %9752 = vmatprep.subr.bf16.mxu1 %v10948_v1 }
0x23da   : > { %9753 = vmatpush3.bf16.msra.mxu1 %v10419_v58 }
0x23db   : > { %9754 = vmatprep.subr.bf16.mxu1 %v10948_v1 }
0x23de   : > { %9755 = vmatpush3.bf16.msra.mxu1 %v10420_v8 }
0x23df   : > { %9756 = vmatprep.subr.bf16.mxu1 %v10948_v1 }
0x23e2   : > { %9757 = vmatpush3.bf16.msra.mxu1 %v10421_v59 }
0x23e3   : > { %9762 = vmatprep.subr.bf16.mxu1 %v10948_v1 }
0x23e9   : > { %v6775_v13 = vpop.f32.mrb[108].mxu0 }
0x23ea   : > { %v12106_v41 = vadd.f32 %v6775_v13, %v6654_v39  ;;  %v6777_v42 = vpop.f32.mrb[109].mxu0 }
0x23eb   : > { %v6778_v43 = vadd.f32 %v6777_v42, %v6658_v40  ;;  %v6779_v6 = vpop.f32.mrb[110].mxu0 }
0x23ec   : > { %v6780_v44 = vpop.f32.mrb[111].mxu0  ;;  %6783 = vxpose.xlu1.b32.start.end [1/1] (short) (narrow) %v12106_v41, 16 }
0x23ed   : > { %v12142_v17 = vpack.c.bf16 %v6778_v43, %v6778_v43 }
0x23ef   : > { %v6876_v22 = vsel %vm1075_vm2, %v12142_v17, 0 }
0x240e   : > { %7062 = vrot.lane.b32.xlu1 %v12106_v41, %s10951_s16 }
0x2412   : > { %7485 = vrot.lane.b32.xlu1 %v12106_v41, %s10953_s15 }
0x2460   : > { %v6493_v48 = vpop.xlane.xlu0 %6492 }
0x2461   : > { %v6494_v49 = vmul.f32 0.0078125, %v6493_v48 }
0x2463   : > { %v6495_v50 = vsub.f32 %v6487_v38, %v6494_v49 }
0x2465   : > { %v6496_v52 = vmul.f32 %v6495_v50, %v6495_v50 }
0x2467   : > { %6497 = vadd.xlane.f32.xlu0 %v6496_v52 }
0x246c   : > { %v6799_v2 = vpop.trf.xlu1 }
0x2470   : > { %v6800_v11 = vpop.trf.xlu1 }
0x2471   : > { %v6815_v14 = vpack.c.bf16 %v6800_v11, %v6799_v2 }
0x247d   : > { %6919 = vrot.lane.b32.xlu0 %v12106_v41, %s10950_s23 }
0x2480   : > { %v7063_v26 = vpop.permute.xlu1 %7062 }
0x2481   : > { %7203 = vrot.lane.b32.xlu0 %v12106_v41, %s10955_s6 }
0x2484   : > { %v7486_v27 = vpop.permute.xlu1 %7485 }
0x2485   : > { %7344 = vrot.lane.b32.xlu0 %v12106_v41, %s10952_s9 }
0x2489   : > { %7626 = vrot.lane.b32.xlu0 %v12106_v41, %s10954_s25 }
0x24f4   : > { %v6498_v60 = vpop.xlane.xlu0 %6497 }
0x24f5   : > { %v6499_v61 = vmul.f32 0.0078125, %v6498_v60 }
0x24f7   : > { %v6500_v63 = vadd.f32 1e-05, %v6499_v61 }
0x24f8   : > { %v6920_v23 = vpop.permute.xlu0 %6919 }
0x24f9   : > { %10576 = vrsqrt.f32 %v6500_v63  ;;  %v10114_v42 = vpack.i.bf16 %v7063_v26, %v6920_v23 }
0x24fc   : > { %v7204_v24 = vpop.permute.xlu0 %7203 }
0x2500   : > { %v7345_v3 = vpop.permute.xlu0 %7344 }
0x2501   : > { %v10126_v25 = vpack.i.bf16 %v7345_v3, %v7204_v24 }
0x2503   : > { %v10577_v4 = vpop.eup %10576 }
0x2504   : > { %v6502_v9 = vmul.f32 %v10577_v4, %v6495_v50  ;;  %v7627_v36 = vpop.permute.xlu0 %7626 }
0x2506   : > { %v6509_v10 = vmul.f32 %v8943_v7, %v6502_v9 }
0x2508   : > { %v12135_v12 = vadd.f32 %v8944_v29, %v6509_v10 }
0x250a   : > { %v6534_v15 = vpack.c.bf16 %v12135_v12, %v12135_v12 }
0x250c   : > { %9759 = vmatmul.mubr.bf16.vlgmr.msra.gmra.mrb[144].mxu1 %v6534_v15 }
0x250d   : > { %9763 = vmatpush3.bf16.msra.mxu1 %v6815_v14  ;;  %9764 = vmatprep.mubr.msk.bf16.mxu1 %vm10949_vm0, %v10948_v1 }
0x250e   : > { %9768 = vmatprep.subr.bf16.mxu1 %v10948_v1 }
0x25df   : > { %v6625_v16 = vpop.f32.mrb[144].mxu1 }
0x25e0   : > { %v6626_v55 = vadd.f32 %v8945_v51, %v6625_v16  ;;  %v9760_v18 = vpop.f32.mrb[145].mxu1 }
0x25e1   : > { %v6628_v19 = vpop.f32.mrb[146].mxu1 }
0x25e2   : > { %v6782_v20 = vpack.c.bf16 %v6626_v55, %v6626_v55  ;;  %v9761_v21 = vpop.f32.mrb[147].mxu1 }
0x25e4   : > { %6956 = vrot.lane.b32.xlu1 %v6782_v20, %s10950_s23  ;;  %9765 = vmatmul.mubr.msk.bf16.vlgmr.msra.gmra.mrb[148].mxu1 %vm1014_vm1, %v6782_v20 }
0x25e5   : > { %9769 = vmatpush3.bf16.msra.mxu1 %v6876_v22  ;;  %9770 = vmatprep.mubr.msk.bf16.mxu1 %vm10949_vm0, %v10948_v1 }
0x25e6   : > { %9774 = vmatprep.subr.bf16.mxu1 %v10948_v1 }
0x260d   : > { %10127 = vxpose.xlu1.b32.start.end [1/1] (short) (narrow) %v10126_v25, 16 }
0x262f   : > { %7098 = vrot.lane.b32.xlu1 %v6782_v20, %s10951_s16 }
0x2633   : > { %7239 = vrot.lane.b32.xlu1 %v6782_v20, %s10955_s6 }
0x2637   : > { %7380 = vrot.lane.b32.xlu1 %v6782_v20, %s10952_s9 }
0x263b   : > { %7662 = vrot.lane.b32.xlu1 %v6782_v20, %s10954_s25 }
0x263f   : > { %7803 = vrot.lane.b32.xlu1 %v6782_v20, %s10956_s24 }
0x2656   : > { %v6957_v53 = vpop.permute.xlu1 %6956 }
0x268d   : > { %v10128_v28 = vpop.trf.xlu1 }
0x268e   : > { %v10132_v43 = vunpack.i.h.bf16 %v10128_v28  ;;  %v10129_v6 = vunpack.i.l.bf16 %v10128_v28 }
0x2691   : > { %v10133_v62 = vpop.trf.xlu1 }
0x2692   : > { %v10137_v44 = vunpack.i.h.bf16 %v10133_v62  ;;  %v10134_v45 = vunpack.i.l.bf16 %v10133_v62 }
0x2694   : > { %v7238_v46 = vpack.c.bf16 %v10134_v45, %v10129_v6  ;;  %v7379_v48 = vpack.c.bf16 %v10137_v44, %v10132_v43 }
0x26a1   : > { %v7099_v2 = vpop.permute.xlu1 %7098 }
0x26a5   : > { %v7240_v4 = vpop.permute.xlu1 %7239 }
0x26a9   : > { %v7381_v7 = vpop.permute.xlu1 %7380 }
0x26ad   : > { %v7663_v29 = vpop.permute.xlu1 %7662 }
0x26b1   : > { %v7804_v14 = vpop.permute.xlu1 %7803 }
0x26b7   : > { %v6853_v30 = vpop.f32.mrb[148].mxu1 }
0x26b8   : > { %v9766_v31 = vpop.f32.mrb[149].mxu1  ;;  %v6859_v33 = vsel %vm1058_vm3, %v6853_v30, -inf }
0x26b9   : > { %6860 = vmax.xlane.f32.xlu0 %v6859_v33  ;;  %v6856_v34 = vpop.f32.mrb[150].mxu1 }
0x26ba   : > { %v9767_v35 = vpop.f32.mrb[151].mxu1 }
0x26cf   : > { %7767 = vrot.lane.b32.xlu0 %v12106_v41, %s10956_s24  ;;  %v10138_v41 = vpack.i.bf16 %v7627_v36, %v7486_v27 }
0x2746   : > { %v6861_v37 = vpop.xlane.xlu0 %6860 }
0x2747   : > { %v6862_v38 = vsub.f32 %v6853_v30, %v6861_v37 }
0x2749   : > { %v6863_v5 = vmul.f32 1.442695, %v6862_v38 }
0x274a   : > { %v7768_v39 = vpop.permute.xlu0 %7767 }
0x274b   : > { %10578 = vpow2.f32 %v6863_v5  ;;  %7770 = vxpose.xlu1.b32.start.end [1/1] (short) (narrow) %v7768_v39, 16 }
0x2755   : > { %v10579_v40 = vpop.eup %10578 }
0x2756   : > { %v6865_v13 = vsel %vm1058_vm3, %v10579_v40, 0.0 }
0x2757   : > { %6866 = vadd.xlane.f32.xlu0 %v6865_v13 }
0x2784   : > { %10115 = vxpose.xlu0.b32.start.end [1/1] (short) (narrow) %v10114_v42, 16 }
0x27b1   : > { %7521 = vrot.lane.b32.xlu0 %v6782_v20, %s10953_s15 }
0x27cb   : > { %v7786_v19 = vpop.trf.xlu1 }
0x27cf   : > { %10139 = vxpose.xlu0.b32.start.end [1/1] (short) (narrow) %v10138_v41, 16  ;;  %v7787_v21 = vpop.trf.xlu1 }
0x27d0   : > { %v7802_v22 = vpack.c.bf16 %v7787_v21, %v7786_v19 }
0x27e4   : > { %v6867_v49 = vpop.xlane.xlu0 %6866 }
0x27e5   : > { %10580 = vrcp.f32 %v6867_v49 }
0x27ef   : > { %v10581_v50 = vpop.eup %10580 }
0x27f0   : > { %v6869_v52 = vmul.f32 %v10581_v50, %v10579_v40 }
0x27f2   : > { %v6870_v54 = vpack.c.bf16 %v6869_v52, %v6869_v52 }
0x27f4   : > { %9771 = vmatmul.mubr.msk.bf16.vlgmr.msra.gmra.mrb[152].mxu1 %vm1058_vm3, %v6870_v54 }
0x27f5   : > { %9776 = vmatprep.mubr.msk.bf16.mxu1 %vm10949_vm0, %v10948_v1 }
0x2804   : > { %v10116_v56 = vpop.trf.xlu0 }
0x2805   : > { %v10120_v57 = vunpack.i.h.bf16 %v10116_v56  ;;  %v10117_v58 = vunpack.i.l.bf16 %v10116_v56 }
0x2808   : > { %v10121_v8 = vpop.trf.xlu0 }
0x2809   : > { %v10125_v59 = vunpack.i.h.bf16 %v10121_v8  ;;  %v10122_v60 = vunpack.i.l.bf16 %v10121_v8 }
0x280b   : > { %v6954_v61 = vpack.c.bf16 %v10122_v60, %v10117_v58  ;;  %v7097_v63 = vpack.c.bf16 %v10125_v59, %v10120_v57 }
0x280d   : > { %9775 = vmatpush3.bf16.msra.mxu1 %v6954_v61  ;;  %9787 = vmatpush3.bf16.msra.mxu0 %v7097_v63 }
0x280e   : > { %9798 = vmatprep.subr.bf16.mxu0 %v10948_v1  ;;  %9780 = vmatprep.subr.bf16.mxu1 %v10948_v1 }
0x2810   : > { %9777 = vmatmul.mubr.msk.bf16.vlgmr.msra.gmra.mrb[156].mxu1 %vm1014_vm1, %v6957_v53  ;;  %9789 = vmatmul.mubr.msk.bf16.vlgmr.msra.gmra.mrb[112].mxu0 %vm1014_vm1, %v7099_v2 }
0x2811   : > { %9799 = vmatpush3.bf16.msra.mxu0 %v7238_v46  ;;  %9800 = vmatprep.mubr.msk.bf16.mxu0 %vm10949_vm0, %v10948_v1 }
0x2812   : > { %9810 = vmatprep.subr.bf16.mxu0 %v10948_v1  ;;  %9782 = vmatprep.mubr.msk.bf16.mxu1 %vm10949_vm0, %v10948_v1 }
0x2818   : > { %9801 = vmatmul.mubr.msk.bf16.vlgmr.msra.gmra.mrb[116].mxu0 %vm1014_vm1, %v7240_v4 }
0x2819   : > { %9811 = vmatpush3.bf16.msra.mxu0 %v7379_v48  ;;  %9812 = vmatprep.mubr.msk.bf16.mxu0 %vm10949_vm0, %v10948_v1 }
0x281a   : > { %9822 = vmatprep.subr.bf16.mxu0 %v10948_v1 }
0x2820   : > { %9813 = vmatmul.mubr.msk.bf16.vlgmr.msra.gmra.mrb[120].mxu0 %vm1014_vm1, %v7381_v7 }
0x2821   : > { %9824 = vmatprep.mubr.msk.bf16.mxu0 %vm10949_vm0, %v10948_v1 }
0x2823   : > { %v7522_v9 = vpop.permute.xlu0 %7521 }
0x284f   : > { %v10140_v10 = vpop.trf.xlu0 }
0x2850   : > { %v10141_v11 = vunpack.i.l.bf16 %v10140_v10  ;;  %v10144_v15 = vunpack.i.h.bf16 %v10140_v10 }
0x2853   : > { %v10145_v51 = vpop.trf.xlu0 }
0x2854   : > { %v10149_v16 = vunpack.i.h.bf16 %v10145_v51  ;;  %v10146_v55 = vunpack.i.l.bf16 %v10145_v51 }
0x2856   : > { %v7520_v18 = vpack.c.bf16 %v10146_v55, %v10141_v11  ;;  %v7661_v20 = vpack.c.bf16 %v10149_v16, %v10144_v15 }
0x2858   : > { %9823 = vmatpush3.bf16.msra.mxu0 %v7520_v18 }
0x2859   : > { %9834 = vmatprep.subr.bf16.mxu0 %v10948_v1 }
0x285b   : > { %9825 = vmatmul.mubr.msk.bf16.vlgmr.msra.gmra.mrb[124].mxu0 %vm1014_vm1, %v7522_v9 }
0x285c   : > { %9835 = vmatpush3.bf16.msra.mxu0 %v7661_v20  ;;  %9836 = vmatprep.mubr.msk.bf16.mxu0 %vm10949_vm0, %v10948_v1 }
0x285d   : > { %9846 = vmatprep.subr.bf16.mxu0 %v10948_v1 }
0x2863   : > { %9837 = vmatmul.mubr.msk.bf16.vlgmr.msra.gmra.mrb[128].mxu0 %vm1014_vm1, %v7663_v29 }
0x2864   : > { %9847 = vmatpush3.bf16.msra.mxu0 %v7802_v22  ;;  %9848 = vmatprep.mubr.msk.bf16.mxu0 %vm10949_vm0, %v10948_v1 }
0x2865   : > { %9858 = vmatprep.subr.bf16.mxu0 %v10948_v1 }
0x286b   : > { %9849 = vmatmul.mubr.msk.bf16.vlgmr.msra.gmra.mrb[132].mxu0 %vm1014_vm1, %v7804_v14 }
0x286c   : > { %9874 = vmatprep.mubr.msk.bf16.mxu0 %vm10949_vm0, %v10948_v1 }
0x28c7   : > { %v12192_v23 = vpop.f32.mrb[152].mxu1 }
0x28c8   : > { %v9772_v24 = vpop.f32.mrb[153].mxu1 }
0x28c9   : > { %v6915_v3 = vpop.f32.mrb[154].mxu1 }
0x28ca   : > { %v9773_v25 = vpop.f32.mrb[155].mxu1 }
0x28e3   : > { %v12194_v26 = vpop.f32.mrb[156].mxu1  ;;  %v7137_v27 = vpop.f32.mrb[112].mxu0 }
0x28e4   : > { %v9778_v53 = vpop.f32.mrb[157].mxu1  ;;  %v9790_v28 = vpop.f32.mrb[113].mxu0  ;;  %v7143_v62 = vsel %vm1058_vm3, %v7137_v27, -inf  ;;  %v7001_v16 = vsel %vm1058_vm3, %v12194_v26, -inf }
0x28e5   : > { %7144 = vmax.xlane.f32.xlu1 %v7143_v62  ;;  %v6998_v30 = vpop.f32.mrb[158].mxu1  ;;  %v7140_v31 = vpop.f32.mrb[114].mxu0 }
0x28e6   : > { %v9779_v33 = vpop.f32.mrb[159].mxu1  ;;  %v9791_v34 = vpop.f32.mrb[115].mxu0 }
0x28eb   : > { %v7278_v35 = vpop.f32.mrb[116].mxu0 }
0x28ec   : > { %v9802_v36 = vpop.f32.mrb[117].mxu0  ;;  %v7284_v37 = vsel %vm1058_vm3, %v7278_v35, -inf }
0x28ed   : > { %7285 = vmax.xlane.f32.xlu0 %v7284_v37  ;;  %v7281_v38 = vpop.f32.mrb[118].mxu0 }
0x28ee   : > { %v9803_v5 = vpop.f32.mrb[119].mxu0 }
0x28f3   : > { %v7419_v39 = vpop.f32.mrb[120].mxu0 }
0x28f4   : > { %v9814_v40 = vpop.f32.mrb[121].mxu0  ;;  %v7425_v13 = vsel %vm1058_vm3, %v7419_v39, -inf }
0x28f5   : > { %7426 = vmax.xlane.f32.xlu0 %v7425_v13  ;;  %v7422_v42 = vpop.f32.mrb[122].mxu0 }
0x28f6   : > { %v9815_v43 = vpop.f32.mrb[123].mxu0 }
0x292e   : > { %v7560_v6 = vpop.f32.mrb[124].mxu0 }
0x292f   : > { %v9826_v44 = vpop.f32.mrb[125].mxu0  ;;  %v7566_v45 = vsel %vm1058_vm3, %v7560_v6, -inf }
0x2930   : > { %7567 = vmax.xlane.f32.xlu0 %v7566_v45  ;;  %v7563_v46 = vpop.f32.mrb[126].mxu0 }
0x2931   : > { %v9827_v48 = vpop.f32.mrb[127].mxu0 }
0x2936   : > { %v7701_v41 = vpop.f32.mrb[128].mxu0 }
0x2937   : > { %v9838_v49 = vpop.f32.mrb[129].mxu0  ;;  %v7707_v50 = vsel %vm1058_vm3, %v7701_v41, -inf }
0x2938   : > { %7708 = vmax.xlane.f32.xlu0 %v7707_v50  ;;  %v7704_v52 = vpop.f32.mrb[130].mxu0 }
0x2939   : > { %v9839_v54 = vpop.f32.mrb[131].mxu0 }
0x293e   : > { %v12201_v56 = vpop.f32.mrb[132].mxu0 }
0x293f   : > { %v9850_v57 = vpop.f32.mrb[133].mxu0  ;;  %v7848_v58 = vsel %vm1058_vm3, %v12201_v56, -inf }
0x2940   : > { %7849 = vmax.xlane.f32.xlu0 %v7848_v58  ;;  %v7845_v8 = vpop.f32.mrb[134].mxu0 }
0x2941   : > { %v9851_v59 = vpop.f32.mrb[135].mxu0 }
0x2972   : > { %v7145_v60 = vpop.xlane.xlu1 %7144 }
0x2973   : > { %v7146_v61 = vsub.f32 %v7137_v27, %v7145_v60 }
0x2975   : > { %v7147_v63 = vmul.f32 1.442695, %v7146_v61 }
0x2977   : > { %10582 = vpow2.f32 %v7147_v63 }
0x297a   : > { %v7286_v2 = vpop.xlane.xlu0 %7285 }
0x297b   : > { %v7287_v4 = vsub.f32 %v7278_v35, %v7286_v2 }
0x297d   : > { %v7288_v7 = vmul.f32 1.442695, %v7287_v4 }
0x297f   : > { %10584 = vpow2.f32 %v7288_v7 }
0x2981   : > { %v12205_v9 = vpop.eup %10582 }
0x2982   : > { %v7427_v29 = vpop.xlane.xlu0 %7426  ;;  %v7149_v10 = vsel %vm1058_vm3, %v12205_v9, 0.0 }
0x2983   : > { %v7428_v11 = vsub.f32 %v7419_v39, %v7427_v29  ;;  %7150 = vadd.xlane.f32.xlu1 %v7149_v10 }
0x2985   : > { %v7429_v14 = vmul.f32 1.442695, %v7428_v11 }
0x2987   : > { %10586 = vpow2.f32 %v7429_v14 }
0x2989   : > { %v12209_v15 = vpop.eup %10584 }
0x298a   : > { %v7290_v51 = vsel %vm1058_vm3, %v12209_v15, 0.0 }
0x298b   : > { %7291 = vadd.xlane.f32.xlu0 %v7290_v51 }
0x298f   : > { %7002 = vmax.xlane.f32.xlu0 %v7001_v16 }
0x2991   : > { %v12215_v55 = vpop.eup %10586 }
0x2992   : > { %v7431_v18 = vsel %vm1058_vm3, %v12215_v55, 0.0 }
0x2993   : > { %7432 = vadd.xlane.f32.xlu1 %v7431_v18 }
0x29a5   : > { %7014 = vrot.lane.b32.xlu0 %v12142_v17, %s10950_s23 }
0x29bd   : > { %v7568_v19 = vpop.xlane.xlu0 %7567 }
0x29be   : > { %v7569_v20 = vsub.f32 %v7560_v6, %v7568_v19 }
0x29c0   : > { %v7570_v21 = vmul.f32 1.442695, %v7569_v20 }
0x29c2   : > { %10588 = vpow2.f32 %v7570_v21 }
0x29c5   : > { %v7709_v3 = vpop.xlane.xlu0 %7708 }
0x29c6   : > { %v7710_v25 = vsub.f32 %v7701_v41, %v7709_v3 }
0x29c8   : > { %v7711_v27 = vmul.f32 1.442695, %v7710_v25 }
0x29ca   : > { %10590 = vpow2.f32 %v7711_v27 }
0x29cc   : > { %v12221_v22 = vpop.eup %10588 }
0x29cd   : > { %v7572_v24 = vsel %vm1058_vm3, %v12221_v22, 0.0  ;;  %v7850_v62 = vpop.xlane.xlu0 %7849 }
0x29ce   : > { %7573 = vadd.xlane.f32.xlu1 %v7572_v24  ;;  %v7851_v5 = vsub.f32 %v12201_v56, %v7850_v62 }
0x29d0   : > { %v7852_v39 = vmul.f32 1.442695, %v7851_v5  ;;  %v10426_v5 = vld [vmem:[#allocation11 + $0xe0] sm:$0xff]  }
0x29d4   : > { %v12227_v53 = vpop.eup %10590 }
0x29d5   : > { %v7713_v28 = vsel %vm1058_vm3, %v12227_v53, 0.0 }
0x29df   : > { %7155 = vrot.lane.b32.xlu1 %v12142_v17, %s10951_s16 }
0x2a03   : > { %7714 = vadd.xlane.f32.xlu1 %v7713_v28 }
0x2a10   : > { %v7151_v13 = vpop.xlane.xlu1 %7150 }
0x2a14   : > { %7578 = vrot.lane.b32.xlu1 %v12142_v17, %s10953_s15 }
0x2a18   : > { %7719 = vrot.lane.b32.xlu1 %v12142_v17, %s10954_s25  ;;  %v7292_v30 = vpop.xlane.xlu0 %7291 }
0x2a1c   : > { %7860 = vrot.lane.b32.xlu1 %v12142_v17, %s10956_s24  ;;  %v7003_v31 = vpop.xlane.xlu0 %7002 }
0x2a1d   : > { %v7004_v33 = vsub.f32 %v12194_v26, %v7003_v31 }
0x2a1f   : > { %v7005_v34 = vmul.f32 1.442695, %v7004_v33 }
0x2a20   : > { %v7015_v35 = vpop.permute.xlu0 %7014  ;;  %v7433_v43 = vpop.xlane.xlu1 %7432 }
0x2a21   : > { %10592 = vpow2.f32 %v7005_v34  ;;  %v7020_v36 = vsel %vm1075_vm2, %v7015_v35, 0 }
0x2a22   : > { %9781 = vmatpush3.bf16.msra.mxu1 %v7020_v36  ;;  %10594 = vpow2.f32 %v7852_v39  ;;  %v10423_v36 = vld [vmem:[#allocation11 + $0xc8] sm:$0xff]  }
0x2a23   : > { %9792 = vmatprep.subr.bf16.mxu1 %v10948_v1 }
0x2a2b   : > { %v10593_v37 = vpop.eup %10592 }
0x2a2c   : > { %v7007_v38 = vsel %vm1058_vm3, %v10593_v37, 0.0  ;;  %v12244_v26 = vpop.eup %10594 }
0x2a2d   : > { %7008 = vadd.xlane.f32.xlu0 %v7007_v38  ;;  %v7854_v40 = vsel %vm1058_vm3, %v12244_v26, 0.0  ;;  %v10425_v38 = vld [vmem:[#allocation11 + $0xd8] sm:$0xff]  }
0x2a43   : > { %7296 = vrot.lane.b32.xlu0 %v12142_v17, %s10955_s6 }
0x2a5b   : > { %v7574_v6 = vpop.xlane.xlu1 %7573 }
0x2a5f   : > { %v7156_v46 = vpop.permute.xlu1 %7155 }
0x2a60   : > { %v7161_v49 = vsel %vm1075_vm2, %v7156_v46, 0 }
0x2a62   : > { %7855 = vadd.xlane.f32.xlu0 %v7854_v40 }
0x2a78   : > { %7437 = vrot.lane.b32.xlu0 %v12142_v17, %s10952_s9 }
0x2a90   : > { %v7715_v59 = vpop.xlane.xlu1 %7714 }
0x2a94   : > { %v7579_v4 = vpop.permute.xlu1 %7578 }
0x2a95   : > { %v7584_v29 = vsel %vm1075_vm2, %v7579_v4, 0 }
0x2a98   : > { %v7720_v11 = vpop.permute.xlu1 %7719 }
0x2a99   : > { %v7725_v51 = vsel %vm1075_vm2, %v7720_v11, 0 }
0x2aba   : > { %v7009_v42 = vpop.xlane.xlu0 %7008 }
0x2abb   : > { %10596 = vrcp.f32 %v7009_v42  ;;  %v10427_v42 = vld [vmem:[#allocation11 + $0xe8] sm:$0xff]  }
0x2abc   : > { %10598 = vrcp.f32 %v7151_v13 }
0x2abd   : > { %10600 = vrcp.f32 %v7292_v30 }
0x2abe   : > { %v7297_v50 = vpop.permute.xlu0 %7296  ;;  %10602 = vrcp.f32 %v7433_v43  ;;  %v10428_v43 = vld [vmem:[#allocation11 + $0xf0] sm:$0xff]  }
0x2abf   : > { %v7302_v56 = vsel %vm1075_vm2, %v7297_v50, 0  ;;  %10604 = vrcp.f32 %v7574_v6 }
0x2ac0   : > { %10606 = vrcp.f32 %v7715_v59 }
0x2ac5   : > { %v10597_v44 = vpop.eup %10596 }
0x2ac6   : > { %v7011_v45 = vmul.f32 %v10597_v44, %v10593_v37  ;;  %v10599_v41 = vpop.eup %10598  ;;  %v10424_v37 = vld [vmem:[#allocation11 + $0xd0] sm:$0xff]  }
0x2ac7   : > { %v7153_v17 = vmul.f32 %v10599_v41, %v12205_v9  ;;  %v10601_v54 = vpop.eup %10600 }
0x2ac8   : > { %v7012_v48 = vpack.c.bf16 %v7011_v45, %v7011_v45  ;;  %v7294_v57 = vmul.f32 %v10601_v54, %v12209_v15  ;;  %v10603_v8 = vpop.eup %10602 }
0x2ac9   : > { %v7154_v52 = vpack.c.bf16 %v7153_v17, %v7153_v17  ;;  %v7435_v61 = vmul.f32 %v10603_v8, %v12215_v55  ;;  %v10605_v9 = vpop.eup %10604  ;;  %v7861_v55 = vpop.permute.xlu1 %7860 }
0x2aca   : > { %9783 = vmatmul.mubr.msk.bf16.vlgmr.msra.gmra.mrb[160].mxu1 %vm1058_vm3, %v7012_v48  ;;  %v7295_v58 = vpack.c.bf16 %v7294_v57, %v7294_v57  ;;  %v7576_v10 = vmul.f32 %v10605_v9, %v12221_v22  ;;  %v10607_v15 = vpop.eup %10606  ;;  %v7866_v20 = vsel %vm1075_vm2, %v7861_v55, 0  ;;  %v10429_v48 = vld [vmem:[#allocation11 + $0xf8] sm:$0xff]  }
0x2acb   : > { %9793 = vmatpush3.bf16.msra.mxu1 %v7161_v49  ;;  %9794 = vmatprep.mubr.msk.bf16.mxu1 %vm10949_vm0, %v10948_v1  ;;  %v7436_v7 = vpack.c.bf16 %v7435_v61, %v7435_v61  ;;  %v7717_v16 = vmul.f32 %v10607_v15, %v12227_v53  ;;  %v10422_v53 = vld [vmem:[#allocation11 + $0xc0] sm:$0xff]  }
0x2acc   : > { %9804 = vmatprep.subr.bf16.mxu1 %v10948_v1  ;;  %v7577_v14 = vpack.c.bf16 %v7576_v10, %v7576_v10  ;;  %9859 = vmatpush3.bf16.msra.mxu0 %v10422_v53 }
0x2acd   : > { %v7718_v18 = vpack.c.bf16 %v7717_v16, %v7717_v16  ;;  %9860 = vmatprep.subr.bf16.mxu0 %v10948_v1 }
0x2ad0   : > { %9861 = vmatpush3.bf16.msra.mxu0 %v10423_v36  ;;  %v10450_v36 = vld [vmem:[#allocation13 + $0x1e4] ss:$8 sps:$4 sm:$0xff]  }
0x2ad1   : > { %9862 = vmatprep.subr.bf16.mxu0 %v10948_v1 }
0x2ad2   : > { %9795 = vmatmul.mubr.msk.bf16.vlgmr.msra.gmra.mrb[164].mxu1 %vm1058_vm3, %v7154_v52 }
0x2ad3   : > { %9805 = vmatpush3.bf16.msra.mxu1 %v7302_v56  ;;  %9806 = vmatprep.mubr.msk.bf16.mxu1 %vm10949_vm0, %v10948_v1 }
0x2ad4   : > { %9816 = vmatprep.subr.bf16.mxu1 %v10948_v1  ;;  %9863 = vmatpush3.bf16.msra.mxu0 %v10424_v37  ;;  %v10448_v37 = vld [vmem:[#allocation13 + $0x1e0] ss:$8 sps:$4 sm:$0xff]  }
0x2ad5   : > { %9864 = vmatprep.subr.bf16.mxu0 %v10948_v1 }
0x2ad8   : > { %9865 = vmatpush3.bf16.msra.mxu0 %v10425_v38  ;;  %v10453_v38 = vld [vmem:[#allocation13 + $0x1f4] ss:$8 sps:$4 sm:$0xff]  }
0x2ad9   : > { %9866 = vmatprep.subr.bf16.mxu0 %v10948_v1 }
0x2ada   : > { %9807 = vmatmul.mubr.msk.bf16.vlgmr.msra.gmra.mrb[168].mxu1 %vm1058_vm3, %v7295_v58 }
0x2adb   : > { %9818 = vmatprep.mubr.msk.bf16.mxu1 %vm10949_vm0, %v10948_v1 }
0x2adc   : > { %9867 = vmatpush3.bf16.msra.mxu0 %v10426_v5  ;;  %v10451_v5 = vld [vmem:[#allocation13 + $0x1f0] ss:$8 sps:$4 sm:$0xff]  }
0x2add   : > { %9868 = vmatprep.subr.bf16.mxu0 %v10948_v1 }
0x2ae0   : > { %9869 = vmatpush3.bf16.msra.mxu0 %v10427_v42  ;;  %v10458_v42 = vld [vmem:[#allocation14 + $0x1d0] sm:$0xff]  }
0x2ae1   : > { %9870 = vmatprep.subr.bf16.mxu0 %v10948_v1 }
0x2ae4   : > { %9871 = vmatpush3.bf16.msra.mxu0 %v10428_v43  ;;  %v10459_v43 = vld [vmem:[#allocation14 + $0x190] sm:$0xff]  }
0x2ae5   : > { %9872 = vmatprep.subr.bf16.mxu0 %v10948_v1 }
0x2ae8   : > { %9873 = vmatpush3.bf16.msra.mxu0 %v10429_v48  ;;  %v10464_v48 = vld [vmem:[#allocation14 + $0x1e8] sm:$0xff]  }
0x2aef   : > { %v7856_v60 = vpop.xlane.xlu0 %7855 }
0x2af0   : > { %10608 = vrcp.f32 %v7856_v60 }
0x2af3   : > { %v7438_v63 = vpop.permute.xlu0 %7437 }
0x2af4   : > { %v7443_v2 = vsel %vm1075_vm2, %v7438_v63, 0 }
0x2af5   : > { %9817 = vmatpush3.bf16.msra.mxu1 %v7443_v2 }
0x2af6   : > { %9828 = vmatprep.subr.bf16.mxu1 %v10948_v1 }
0x2af8   : > { %9819 = vmatmul.mubr.msk.bf16.vlgmr.msra.gmra.mrb[172].mxu1 %vm1058_vm3, %v7436_v7 }
0x2af9   : > { %9829 = vmatpush3.bf16.msra.mxu1 %v7584_v29  ;;  %9830 = vmatprep.mubr.msk.bf16.mxu1 %vm10949_vm0, %v10948_v1 }
0x2afa   : > { %9840 = vmatprep.subr.bf16.mxu1 %v10948_v1  ;;  %v10609_v19 = vpop.eup %10608 }
0x2afb   : > { %v7858_v21 = vmul.f32 %v10609_v19, %v12244_v26 }
0x2afd   : > { %v7859_v22 = vpack.c.bf16 %v7858_v21, %v7858_v21  ;;  %v10432_v21 = vld [vmem:[#allocation13 + $0x184] ss:$8 sps:$4 sm:$0xff]  }
0x2b00   : > { %9831 = vmatmul.mubr.msk.bf16.vlgmr.msra.gmra.mrb[176].mxu1 %vm1058_vm3, %v7577_v14 }
0x2b01   : > { %9841 = vmatpush3.bf16.msra.mxu1 %v7725_v51  ;;  %9842 = vmatprep.mubr.msk.bf16.mxu1 %vm10949_vm0, %v10948_v1 }
0x2b02   : > { %9852 = vmatprep.subr.bf16.mxu1 %v10948_v1 }
0x2b08   : > { %9843 = vmatmul.mubr.msk.bf16.vlgmr.msra.gmra.mrb[180].mxu1 %vm1058_vm3, %v7718_v18 }
0x2b09   : > { %9853 = vmatpush3.bf16.msra.mxu1 %v7866_v20  ;;  %9854 = vmatprep.mubr.msk.bf16.mxu1 %vm10949_vm0, %v10948_v1  ;;  %v10430_v20 = vld [vmem:[#allocation13 + $0x180] ss:$8 sps:$4 sm:$0xff]  }
0x2b0a   : > { %8198 = vmatprep.subr.bf16.mxu1 %v10432_v21 }
0x2b10   : > { %9855 = vmatmul.mubr.msk.bf16.vlgmr.msra.gmra.mrb[184].mxu1 %vm1058_vm3, %v7859_v22  ;;  %v10435_v22 = vld [vmem:[#allocation13 + $0x194] ss:$8 sps:$4 sm:$0xff]  }
0x2b11   : > { %8230 = vmatprep.mubr.bf16.mxu1 %v10947_v0  ;;  %8199 = vmatpush1.bf16.msra.mxu1 %v10430_v20 }
0x2b12   : > { %8200 = vmatprep.subr.bf16.mxu1 %v10435_v22 }
0x2b9d   : > { %v7056_v24 = vpop.f32.mrb[160].mxu1 }
0x2b9e   : > { %7909 = vrot.lane.b32.xlu0 %v7056_v24, %s10956_s24  ;;  %v9784_v3 = vpop.f32.mrb[161].mxu1  ;;  %v10433_v24 = vld [vmem:[#allocation13 + $0x190] ss:$8 sps:$4 sm:$0xff]  }
0x2b9f   : > { %v7059_v25 = vpop.f32.mrb[162].mxu1  ;;  %v10438_v3 = vld [vmem:[#allocation13 + $0x1a4] ss:$8 sps:$4 sm:$0xff]   ;;  %8201 = vmatpush1.bf16.msra.mxu1 %v10433_v24 }
0x2ba0   : > { %v9785_v27 = vpop.f32.mrb[163].mxu1  ;;  %v10436_v25 = vld [vmem:[#allocation13 + $0x1a0] ss:$8 sps:$4 sm:$0xff]   ;;  %8202 = vmatprep.subr.bf16.mxu1 %v10438_v3 }
0x2ba3   : > { %8203 = vmatpush1.bf16.msra.mxu1 %v10436_v25 }
0x2ba5   : > { %v7197_v28 = vpop.f32.mrb[164].mxu1 }
0x2ba6   : > { %7913 = vrot.lane.b32.xlu1 %v7197_v28, %s10954_s25  ;;  %v9796_v62 = vpop.f32.mrb[165].mxu1 }
0x2ba7   : > { %v7200_v30 = vpop.f32.mrb[166].mxu1 }
0x2ba8   : > { %v9797_v31 = vpop.f32.mrb[167].mxu1  ;;  %v10441_v30 = vld [vmem:[#allocation13 + $0x1b4] ss:$8 sps:$4 sm:$0xff]  }
0x2ba9   : > { %v10439_v31 = vld [vmem:[#allocation13 + $0x1b0] ss:$8 sps:$4 sm:$0xff]   ;;  %8204 = vmatprep.subr.bf16.mxu1 %v10441_v30 }
0x2baa   : > { %8205 = vmatpush1.bf16.msra.mxu1 %v10439_v31 }
0x2bad   : > { %v7338_v33 = vpop.f32.mrb[168].mxu1 }
0x2bae   : > { %7917 = vrot.lane.b32.xlu0 %v7338_v33, %s10953_s15  ;;  %v9808_v0 = vpop.f32.mrb[169].mxu1  ;;  %v10444_v33 = vld [vmem:[#allocation13 + $0x1c4] ss:$8 sps:$4 sm:$0xff]   ;;  %s8482_s15 = scalar_lea.sflag [#allocation4], %s11348_s17 }
0x2baf   : > { %v7341_v34 = vpop.f32.mrb[170].mxu1  ;;  %v10442_v0 = vld [vmem:[#allocation13 + $0x1c0] ss:$8 sps:$4 sm:$0xff]   ;;  %8206 = vmatprep.subr.bf16.mxu1 %v10444_v33 }
0x2bb0   : > { %v9809_v35 = vpop.f32.mrb[171].mxu1  ;;  %8207 = vmatpush1.bf16.msra.mxu1 %v10442_v0  ;;  %v10447_v34 = vld [vmem:[#allocation13 + $0x1d4] ss:$8 sps:$4 sm:$0xff]  }
0x2bb1   : > { %v10445_v35 = vld [vmem:[#allocation13 + $0x1d0] ss:$8 sps:$4 sm:$0xff]   ;;  %8208 = vmatprep.subr.bf16.mxu1 %v10447_v34  ;;  %v9038_v0 = vld [vmem:[%s12476_s2 + $0x3] ss:$0 sm:$0xff] }
0x2bb4   : > { %8209 = vmatpush1.bf16.msra.mxu1 %v10445_v35  ;;  %v9039_v35 = vld [vmem:[%s12477_s0 + $0x3] ss:$0 sm:$0xff]  ;;  %s12480_s0 = sld [smem:[#allocation40_spill]] }
0x2bb5   : > { %8210 = vmatprep.subr.bf16.mxu1 %v10450_v36 }
0x2bb8   : > { %8211 = vmatpush1.bf16.msra.mxu1 %v10448_v37 }
0x2bb9   : > { %8212 = vmatprep.subr.bf16.mxu1 %v10453_v38 }
0x2bba   : > { %s12345_s2 = scalar_lea.hbm %s12480_s0, %s9043_s18 }
0x2bbc   : > { %8213 = vmatpush1.bf16.msra.mxu1 %v10451_v5 }
0x2bcb   : > { %v7479_v39 = vpop.f32.mrb[172].mxu1 }
0x2bcc   : > { %7921 = vrot.lane.b32.xlu1 %v7479_v39, %s10952_s9  ;;  %v9820_v26 = vpop.f32.mrb[173].mxu1  ;;  %v10454_v39 = vld [vmem:[#allocation14 + $0x1c0] sm:$0xff]  }
0x2bcd   : > { %v7482_v40 = vpop.f32.mrb[174].mxu1  ;;  %v10455_v26 = vld [vmem:[#allocation14 + $0x180] sm:$0xff]   ;;  %9312 = vmatprep.subr.bf16.mxu0 %v10454_v39 }
0x2bce   : > { %v9821_v13 = vpop.f32.mrb[175].mxu1  ;;  %v10456_v40 = vld [vmem:[#allocation14 + $0x1c8] sm:$0xff]  }
0x2bcf   : > { %v10457_v13 = vld [vmem:[#allocation14 + $0x188] sm:$0xff]  }
0x2bd3   : > { %v7620_v6 = vpop.f32.mrb[176].mxu1 }
0x2bd4   : > { %7925 = vrot.lane.b32.xlu0 %v7620_v6, %s10955_s6  ;;  %v9832_v44 = vpop.f32.mrb[177].mxu1  ;;  %v10460_v6 = vld [vmem:[#allocation14 + $0x1d8] sm:$0xff]   ;;  %s12478_s6 = sld [smem:[#allocation38_spill]] }
0x2bd5   : > { %v7623_v45 = vpop.f32.mrb[178].mxu1  ;;  %v10461_v44 = vld [vmem:[#allocation14 + $0x198] sm:$0xff]  }
0x2bd6   : > { %v9833_v46 = vpop.f32.mrb[179].mxu1  ;;  %v10462_v45 = vld [vmem:[#allocation14 + $0x1e0] sm:$0xff]  }
0x2bd7   : > { %v10463_v46 = vld [vmem:[#allocation14 + $0x1a0] sm:$0xff]  }
0x2bdb   : > { %v7761_v41 = vpop.f32.mrb[180].mxu1 }
0x2bdc   : > { %7929 = vrot.lane.b32.xlu1 %v7761_v41, %s10951_s16  ;;  %v9844_v49 = vpop.f32.mrb[181].mxu1  ;;  %v10465_v41 = vld [vmem:[#allocation14 + $0x1a8] sm:$0xff]  }
0x2bdd   : > { %v7764_v17 = vpop.f32.mrb[182].mxu1 }
0x2bde   : > { %v9845_v50 = vpop.f32.mrb[183].mxu1 }
0x2be3   : > { %v7902_v52 = vpop.f32.mrb[184].mxu1 }
0x2be4   : > { %7933 = vrot.lane.b32.xlu0 %v7902_v52, %s10950_s23  ;;  %v9856_v54 = vpop.f32.mrb[185].mxu1  ;;  %s8495_s23 = sshll.u32 %s714_s20, 4  ;;  %s12347_s23 = int_to_ptr.vmem [resolvable:$true] %s8495_s23 }
0x2be5   : > { %v7905_v56 = vpop.f32.mrb[186].mxu1  ;;  %v8999_v54 = vld [vmem:[%s12397_s8 + $0x3] ss:$0 sm:$0xff]  ;;  %s10845_s25 = scalar_lea.vmem %s12347_s23, 128  ;;  %p10852_p3 = scmp.lt.s32.totalorder %s12347_s23, %s10850_s10 }
0x2be6   : > { %v9857_v57 = vpop.f32.mrb[187].mxu1  ;;  %p10846_p7 = scmp.ne.s32.totalorder %s12347_s23, %s10845_s25 }
0x2be7   : > { %v9000_v57 = vld [vmem:[%s12473_s14 + $0x3] ss:$0 sm:$0xff] }
0x2be8   : > { %p10847_p0 = pnand %p10846_p7, %p12481_p9 }
0x2bea   : > { %p10848_p2 = pneg %p10847_p0 }
0x2c10   : > { %v7910_v58 = vpop.permute.xlu0 %7909 }
0x2c11   : > { %v7936_v1 = vsel %vm1014_vm1, %v12192_v23, %v7910_v58  ;;  %v8988_v23 = vld [vmem:[%s12396_s7 + $0x3] ss:$0 sm:$0xff] }
0x2c18   : > { %v7914_v8 = vpop.permute.xlu1 %7913 }
0x2c19   : > { %v7937_v61 = vsel %vm2138_vm4, %v7936_v1, %v7914_v8  ;;  %v10467_v1 = vld [vmem:[#allocation14 + $0x1b0] sm:$0xff]  }
0x2c20   : > { %v7918_v59 = vpop.permute.xlu0 %7917 }
0x2c21   : > { %v7938_v2 = vsel %vm2140_vm5, %v7937_v61, %v7918_v59  ;;  %v10468_v61 = vld [vmem:[#allocation14 + $0x1f8] sm:$0xff]  }
0x2c3e   : > { %v7922_v60 = vpop.permute.xlu1 %7921 }
0x2c3f   : > { %v7939_v7 = vsel %vm2142_vm6, %v7938_v2, %v7922_v60  ;;  %v10466_v60 = vld [vmem:[#allocation14 + $0x1f0] sm:$0xff]   ;;  %v9001_v2 = vld [vmem:[%s12474_s26 + $0x6] sm:$0x3] }
0x2c46   : > { %v7926_v63 = vpop.permute.xlu0 %7925 }
0x2c47   : > { %v7940_v9 = vsel %vm2144_vm7, %v7939_v7, %v7926_v63  ;;  %v10469_v63 = vld [vmem:[#allocation14 + $0x1b8] sm:$0xff]   ;;  %v8115_v7 = vrot.slane %v9001_v2, %v11418_v47 }
0x2c4e   : > { %v7930_v4 = vpop.permute.xlu1 %7929 }
0x2c4f   : > { %v7941_v29 = vsel %vm2146_vm8, %v7940_v9, %v7930_v4  ;;  %v8111_v4 = vrot.slane %v9001_v2, %v11405_v32 }
0x2c56   : > { %v7934_v10 = vpop.permute.xlu0 %7933 }
0x2c57   : > { %v7942_v11 = vsel %vm2148_vm9, %v7941_v29, %v7934_v10 }
0x2c58   : > { %v7960_v14 = vpack.c.bf16 %v7942_v11, %v7942_v11 }
0x2c5a   : > { %9875 = vmatmul.mubr.bf16.vlgmr.msra.gmra.mrb[136].mxu0 %v7960_v14 }
0x2c5b   : > { %9313 = vmatpush3.bf16.msra.mxu0 %v10455_v26 }
0x2c5c   : > { %9314 = vmatprep.subr.bf16.mxu0 %v10456_v40 }
0x2c5f   : > { %9315 = vmatpush3.bf16.msra.mxu0 %v10457_v13 }
0x2c60   : > { %9316 = vmatprep.subr.bf16.mxu0 %v10458_v42 }
0x2c63   : > { %9317 = vmatpush3.bf16.msra.mxu0 %v10459_v43 }
0x2c64   : > { %9318 = vmatprep.subr.bf16.mxu0 %v10460_v6 }
0x2c67   : > { %9319 = vmatpush3.bf16.msra.mxu0 %v10461_v44  ;;  %v9040_v44 = vld [vmem:[%s12478_s6] ss:$0 sm:$0xff]  ;;  %s10851_s6 = scalar_lea.vmem %s10850_s10, 256 }
0x2c68   : > { %9320 = vmatprep.subr.bf16.mxu0 %v10462_v45  ;;  %v9041_v45 = vld [vmem:[%s12479_s12] ss:$0 sm:$0xff]  ;;  %p10853_p6 = scmp.lt.s32.totalorder %s10851_s6, %s10845_s25 }
0x2c6a   : > { %p10854_p4 = por %p10853_p6, %p10852_p3 }
0x2c6b   : > { %9321 = vmatpush3.bf16.msra.mxu0 %v10463_v46 }
0x2c6c   : > { %9322 = vmatprep.subr.bf16.mxu0 %v10464_v48  ;;  %p10855_p8 = pnand %p10854_p4, %p10848_p2 }
0x2c6f   : > { %9323 = vmatpush3.bf16.msra.mxu0 %v10465_v41 }
0x2c70   : > { %9324 = vmatprep.subr.bf16.mxu0 %v10466_v60 }
0x2c73   : > { %9325 = vmatpush3.bf16.msra.mxu0 %v10467_v1 }
0x2c74   : > { %9326 = vmatprep.subr.bf16.mxu0 %v10468_v61 }
0x2c77   : > { %9327 = vmatpush3.bf16.msra.mxu0 %v10469_v63 }
0x2d2d   : > { %v8051_v15 = vpop.f32.mrb[136].mxu0 }
0x2d2e   : > { %v8052_v51 = vadd.f32 %v8988_v23, %v8051_v15  ;;  %v9876_v16 = vpop.f32.mrb[137].mxu0 }
0x2d2f   : > { %v8054_v55 = vpop.f32.mrb[138].mxu0 }
0x2d30   : > { %v8057_v18 = vadd.f32 %v8052_v51, %v12135_v12  ;;  %v9877_v19 = vpop.f32.mrb[139].mxu0 }
0x2d31   : > { %v9019_v19 = vld [vmem:[%s12475_s3 + $0x3] ss:$0 sm:$0xff] }
0x2d32   : > { %8062 = vadd.xlane.f32.xlu1 %v8057_v18 }
0x2dbf   : > { %v8063_v27 = vpop.xlane.xlu1 %8062 }
0x2dc0   : > { %v8064_v53 = vmul.f32 0.0078125, %v8063_v27 }
0x2dc2   : > { %v8065_v28 = vsub.f32 %v8057_v18, %v8064_v53 }
0x2dc4   : > { %v8066_v62 = vmul.f32 %v8065_v28, %v8065_v28 }
0x2dc6   : > { %8067 = vadd.xlane.f32.xlu0 %v8066_v62 }
0x2e53   : > { %v8068_v49 = vpop.xlane.xlu0 %8067 }
0x2e54   : > { %v8069_v17 = vmul.f32 0.0078125, %v8068_v49 }
0x2e56   : > { %v8070_v50 = vadd.f32 1e-05, %v8069_v17 }
0x2e58   : > { %10610 = vrsqrt.f32 %v8070_v50 }
0x2e62   : > { %v10611_v52 = vpop.eup %10610 }
0x2e63   : > { %v8072_v56 = vmul.f32 %v10611_v52, %v8065_v28 }
0x2e65   : > { %v8079_v58 = vmul.f32 %v8999_v54, %v8072_v56 }
0x2e67   : > { %v8086_v8 = vadd.f32 %v9000_v57, %v8079_v58 }
0x2e69   : > { %v8104_v59 = vpack.c.bf16 %v8086_v8, %v8086_v8 }
0x2e6b   : > { %8231 = vmatmul.mubr.bf16.vlgmr.msra.gmra.mrb[188].mxu1 %v8104_v59 }
0x2f3e   : > { %v8232_v9 = vpop.f32.mrb[188].mxu1 }
0x2f3f   : > { %v8233_v29 = vadd.f32 %v8232_v9, %v8111_v4  ;;  %v8234_v10 = vpop.f32.mrb[189].mxu1 }
0x2f40   : > { %v8235_v11 = vadd.f32 %v8234_v10, %v8115_v7  ;;  %v8236_v14 = vpop.f32.mrb[190].mxu1 }
0x2f41   : > { %v8239_v23 = vmax.f32 %v8233_v29, 0.0  ;;  %v8237_v15 = vpop.f32.mrb[191].mxu1 }
0x2f42   : > { %v8240_v51 = vmax.f32 %v8235_v11, 0.0 }
0x2f43   : > { %v8274_v55 = vpack.c.bf16 %v8239_v23, %v8239_v23 }
0x2f44   : > { %v8275_v16 = vpack.c.bf16 %v8240_v51, %v8240_v51 }
0x2f46   : > { %8412 = vmatprep.mubr.bf16.mxu0 %v8275_v16 }
0x2f47   : > { %8413 = vmatmul.mubr.bf16.vlgmr.msra.gmra.mrb[140].mxu0 %v8274_v55 }
0x301a   : > { %v9328_v18 = vpop.f32.mrb[140].mxu0 }
0x301b   : > { %v9329_v32 = vpop.f32.mrb[141].mxu0 }
0x301c   : > { %v9330_v20 = vadd.f32 %v9329_v32, %v9328_v18  ;;  %v9331_v47 = vpop.f32.mrb[142].mxu0 }
0x301d   : > { %v9332_v21 = vpop.f32.mrb[143].mxu0 }
0x301e   : > { %v8415_v22 = vadd.f32 %v9330_v20, %v9019_v19 }
0x3020   : > { %v8420_v24 = vmax.f32 %v8415_v22, 0.0 }
0x3022   : > { %v8421_v3 = vadd.f32 %v8420_v24, %v8086_v8 }
0x3024   : > { %8426 = vadd.xlane.f32.xlu0 %v8421_v3 }
0x30b1   : > { %v8427_v25 = vpop.xlane.xlu0 %8426 }
0x30b2   : > { %v8428_v27 = vmul.f32 0.0078125, %v8427_v25 }
0x30b4   : > { %v8429_v53 = vsub.f32 %v8421_v3, %v8428_v27 }
0x30b6   : > { %v8430_v28 = vmul.f32 %v8429_v53, %v8429_v53 }
0x30b8   : > { %8431 = vadd.xlane.f32.xlu0 %v8430_v28 }
0x3145   : > { %v8432_v62 = vpop.xlane.xlu0 %8431 }
0x3146   : > { %v8433_v30 = vmul.f32 0.0078125, %v8432_v62 }
0x3148   : > { %v8434_v31 = vadd.f32 1e-05, %v8433_v30 }
0x314a   : > { %10612 = vrsqrt.f32 %v8434_v31 }
0x3154   : > { %v10613_v33 = vpop.eup %10612 }
0x3155   : > { %v8436_v34 = vmul.f32 %v10613_v33, %v8429_v53 }
0x3157   : > { %v8443_v36 = vmul.f32 %v9038_v0, %v8436_v34 }
0x3159   : > { %v8450_v37 = vadd.f32 %v9039_v35, %v8443_v36 }
0x315b   : > { %v8451_v38 = vadd.f32 %v8450_v37, %v12135_v12 }
0x315d   : > { %8454 = vadd.xlane.f32.xlu1 %v8451_v38 }
0x31ea   : > { %v8455_v5 = vpop.xlane.xlu1 %8454 }
0x31eb   : > { %v8456_v39 = vmul.f32 0.0078125, %v8455_v5 }
0x31ed   : > { %v8457_v26 = vsub.f32 %v8451_v38, %v8456_v39 }
0x31ef   : > { %v8458_v40 = vmul.f32 %v8457_v26, %v8457_v26 }
0x31f1   : > { %8459 = vadd.xlane.f32.xlu0 %v8458_v40 }
0x327e   : > { %v8460_v13 = vpop.xlane.xlu0 %8459 }
0x327f   : > { %v8461_v42 = vmul.f32 0.0078125, %v8460_v13 }
0x3281   : > { %v8462_v43 = vadd.f32 1e-05, %v8461_v42 }
0x3283   : > { %10614 = vrsqrt.f32 %v8462_v43 }
0x328d   : > { %v10615_v6 = vpop.eup %10614 }
0x328e   : > { %v8464_v12 = vmul.f32 %v10615_v6, %v8457_v26 }
0x3290   : > { %v8471_v46 = vmul.f32 %v9040_v44, %v8464_v12 }
0x3292   : > { %v8478_v48 = vadd.f32 %v9041_v45, %v8471_v46 }
0x3294   : > { %v8479_v41 = vmax.f32 %v8478_v48, 0.0 }
0x3296   : > { %8480 = vst [vmem:[%s714_s20] sm:$0xff] %v8479_v41 }
0x3297   : > { %10858 = shalt.err (!%p10855_p8)
}
0x3298   : > { %s10859_s17 = scalar_lea.hbm %s12345_s2, 128  ;;  %s10863_s12 = scalar_lea.hbm %s12480_s0, 256 }
0x3299   : > { %p10860_p5 = scmp.ne.s32.totalorder %s12345_s2, %s10859_s17  ;;  %p10864_p11 = scmp.lt.u32.totalorder %s12345_s2, %s12480_s0 }
0x329a   : > { %p10865_p12 = scmp.lt.u32.totalorder %s10863_s12, %s10859_s17  ;;  %p10867_p7 = scmp.lt.u32.totalorder %s10859_s17, %s12345_s2 }
0x329b   : > { %p10861_p10 = pnand %p10860_p5, %p12481_p9 }
0x329c   : > { %p10866_p13 = por %p10865_p12, %p10864_p11 }
0x329d   : > { %p10862_p1 = pneg %p10861_p10 }
0x329e   : > { %p10868_p0 = por %p10867_p7, %p10866_p13 }
0x32a0   : > { %p10869_p2 = pnand %p10868_p0, %p10862_p1 }
0x32a2   : > { %10872 = shalt.err (!%p10869_p2)
}
0x32a3   : > { %9906 = dma.vmem_to_hbm [thread:$0]  (%p12481_p9), %s12347_s23, 128, %s12345_s2, %s8482_s15  }
0x32a4 PF: > { %s8507_s16 = sand.u32 1, %s10919_s27   ;;  %p12482_p3 = scmp.ne.s32.totalorder %s12459_s11, 0 }
0x32a5   : > { %p12483_p6 = scmp.ge.s32.totalorder %s10931_s30, 2  ;;  %s8508_s9 = scalar_lea.sflag [#allocation4], %s8507_s16 }
0x32a7   : > { %p9935_p4 = pnand %p12483_p6, %p12482_p3 }
0x32a9   : > { %10914 = dma.done.wait (!%p9935_p4), %s8508_s9, 128  }
0x32aa   : > { %10916 = vsyncadd (!%p9935_p4), %s8508_s9, 4294967168  ;;  %s12484_s25 = sld [smem:[#allocation24_spill]]  ;;  %p37_p8 = scmp.ge.s32.totalorder %s11241_s21, 4  }
0x32ab   : > { %s12485_s27 = smov %s10923_s28  ;;  %s12486_s28 = smov %s10927_s29 }
0x32ac   : > { %s12488_s30 = smov %s11241_s21  ;;  %39 = sbr.rel (!%p37_p8) target bundleno = 27 (0x1b), region = 216 }
0x32b0   : > { %s12487_s29 = smov %s12484_s25 }
0x32b3   :  { %8513 = vsyncpa [#allocation3], 1 }
0x32b4   :  { %8515 = vsyncpa [#allocation3 + $0x1], 1 }
0x32b5   :  { %8516 = vsyncpa [#allocation6], 1 }
0x32b6   :  { %8518 = vsyncpa [#allocation6 + $0x1], 1 }
0x32b7   :  { %8519 = vsyncpa [#allocation9], 1 }
0x32b8   :  { %8520 = vsyncpa [#allocation12], 1 }
0x32b9   :  { %8521 = vsyncpa [#allocation15], 1 }
0x32ba   :  { %8522 = vsyncpa [#allocation4], 1 }
0x32bb   :  { %8524 = vsyncpa [#allocation4 + $0x1], 1 }

</bundles_post_ra>
